<compile_context>
chip_gen: v6e
topology: v6e:2x2x1
jax: 0.10.0
libtpu: 0.0.40
codegen_flags: <defaults>
</compile_context>

<pallas_src>
import jax
import jax.numpy as jnp
from jax.experimental import pallas as pl
from jax.experimental.pallas import tpu as pltpu

SELU_ALPHA = 1.6732632423543772
SELU_SCALE = 1.0507009873554805


def _selu(v):
    # exp only sees the non-positive branch -> no inf in the unselected lane.
    return SELU_SCALE * jnp.where(
        v > 0.0, v, SELU_ALPHA * (jnp.exp(jnp.minimum(v, 0.0)) - 1.0))


def _round_up(n, m):
    return ((n + m - 1) // m) * m


def ann_model_kernel(x_ref,
                     w1_ref, b1_ref,
                     w2_ref, b2_ref,
                     w3_ref, b3_ref,
                     w4_ref, b4_ref,
                     w5_ref, b5_ref,
                     prob_ref, hat_ref,
                     acc_ref):
    k = pl.program_id(0)

    @pl.when(k == 0)
    def _():
        acc_ref[...] = jnp.zeros_like(acc_ref)

    # fc1 partial product over the streamed K tile (bf16 inputs, f32 accumulate).
    acc_ref[...] += jnp.dot(x_ref[...].astype(jnp.bfloat16), w1_ref[...],
                            preferred_element_type=jnp.float32)

    @pl.when(k == pl.num_programs(0) - 1)
    def _():
        h = _selu(acc_ref[...] + b1_ref[...])
        h = _selu(jnp.dot(h.astype(jnp.bfloat16), w2_ref[...],
                          preferred_element_type=jnp.float32) + b2_ref[...])
        h = _selu(jnp.dot(h.astype(jnp.bfloat16), w3_ref[...],
                          preferred_element_type=jnp.float32) + b3_ref[...])
        h = _selu(jnp.dot(h.astype(jnp.bfloat16), w4_ref[...],
                          preferred_element_type=jnp.float32) + b4_ref[...])
        # classifier: Linear(32->1, zero-padded to 128 rows) + Sigmoid
        logits = jnp.dot(h, w5_ref[...],
                         preferred_element_type=jnp.float32) + b5_ref[...]
        prob = 1.0 / (1.0 + jnp.exp(-logits))
        prob_ref[...] = prob
        hat_ref[...] = (prob >= 0.5).astype(jnp.float32)  # torch.ge(prob, 0.5)


def _pad_cast(a, shape, dtype):
    a = a.astype(dtype)
    pads = [(0, s - d) for s, d in zip(shape, a.shape)]
    return jnp.pad(a, pads)


@jax.jit
def ann_model_forward(x, params):
    """x: (B, repr_length).  Returns (out_prob, out_hat, A=None) like PyTorch."""
    x = x.astype(jnp.float32)
    B, K = x.shape
    (w1, b1), (w2, b2), (w3, b3), (w4, b4), (w5, b5) = params

    H1 = _round_up(w1.shape[1], 128)   # 1000 -> 1024
    H2 = _round_up(w2.shape[1], 128)   # 1000 -> 1024
    H3 = _round_up(w3.shape[1], 128)   # 1000 -> 1024
    H4 = _round_up(w4.shape[1], 128)   # 32   -> 128
    Bp = _round_up(B, 8)

    # K tile for the streamed fc1 weight: 2048 columns of bf16 w1 = 4 MiB/block,
    # double-buffered -> 8 MiB, well under the 48 MiB budget on every gen.
    if K <= 2048:
        tk = _round_up(K, 512)
        Kp = tk
    else:
        tk = 2048
        Kp = _round_up(K, tk)
    n_k = Kp // tk

    # Zero-pad + cast once outside the kernel (padding is mathematically inert).
    xp = _pad_cast(x, (Bp, Kp), jnp.float32)
    w1p = _pad_cast(w1, (Kp, H1), jnp.bfloat16)     # streamed over K
    w2p = _pad_cast(w2, (H1, H2), jnp.bfloat16)     # VMEM-resident
    w3p = _pad_cast(w3, (H2, H3), jnp.bfloat16)
    w4p = _pad_cast(w4, (H3, H4), jnp.bfloat16)
    w5p = _pad_cast(w5, (H4, 1), jnp.float32)       # tiny, keep f32
    b1p = _pad_cast(b1.reshape(1, -1), (1, H1), jnp.float32)
    b2p = _pad_cast(b2.reshape(1, -1), (1, H2), jnp.float32)
    b3p = _pad_cast(b3.reshape(1, -1), (1, H3), jnp.float32)
    b4p = _pad_cast(b4.reshape(1, -1), (1, H4), jnp.float32)
    b5p = b5.reshape(1, 1).astype(jnp.float32)

    grid_spec = pltpu.PrefetchScalarGridSpec(
        num_scalar_prefetch=0,
        grid=(n_k,),
        in_specs=[
            pl.BlockSpec((Bp, tk), lambda k: (0, k)),   # x   (streamed over K)
            pl.BlockSpec((tk, H1), lambda k: (k, 0)),   # w1  (streamed over K)
            pl.BlockSpec((1, H1), lambda k: (0, 0)),    # b1
            pl.BlockSpec((H1, H2), lambda k: (0, 0)),   # w2  (resident)
            pl.BlockSpec((1, H2), lambda k: (0, 0)),    # b2
            pl.BlockSpec((H2, H3), lambda k: (0, 0)),   # w3  (resident)
            pl.BlockSpec((1, H3), lambda k: (0, 0)),    # b3
            pl.BlockSpec((H3, H4), lambda k: (0, 0)),   # w4  (resident)
            pl.BlockSpec((1, H4), lambda k: (0, 0)),    # b4
            pl.BlockSpec((H4, 1), lambda k: (0, 0)),    # w5
            pl.BlockSpec((1, 1), lambda k: (0, 0)),     # b5
        ],
        out_specs=(
            pl.BlockSpec((Bp, 1), lambda k: (0, 0)),    # prob (written at k==last)
            pl.BlockSpec((Bp, 1), lambda k: (0, 0)),    # hat
        ),
        scratch_shapes=[pltpu.VMEM((Bp, H1), jnp.float32)],   # fc1 accumulator
    )

    prob, hat = pl.pallas_call(
        ann_model_kernel,
        out_shape=(jax.ShapeDtypeStruct((Bp, 1), jnp.float32),
                   jax.ShapeDtypeStruct((Bp, 1), jnp.float32)),
        grid_spec=grid_spec,
        compiler_params=pltpu.CompilerParams(
            dimension_semantics=("arbitrary",),   # K is a reduction axis
            vmem_limit_bytes=48 << 20),           # legal on v7x (64 MiB VMEM)
    )(xp, w1p, b1p, w2p, b2p, w3p, b3p, w4p, b4p, w5p, b5p)

    return prob[:B, 0], hat[:B, 0], None


def ann_model_reference(x, params):
    """Pure-JAX f32 reference mirroring the PyTorch module."""
    h = x.astype(jnp.float32)
    for i, (w, b) in enumerate(params):
        h = h @ w + b
        if i < len(params) - 1:
            h = jax.nn.selu(h)
    prob = jax.nn.sigmoid(h).reshape(-1)
    hat = (prob >= 0.5).astype(jnp.float32)
    return prob, hat


def init_params(key, repr_length):
    """Deterministic init mimicking nn.Linear default (U[-1/sqrt(fan_in), +])."""
    dims = [(repr_length, 1000), (1000, 1000), (1000, 1000), (1000, 32), (32, 1)]
    params = []
    for fan_in, fan_out in dims:
        key, kw, kb = jax.random.split(key, 3)
        bound = float(fan_in) ** -0.5
        w = jax.random.uniform(kw, (fan_in, fan_out), jnp.float32, -bound, bound)
        b = jax.random.uniform(kb, (fan_out,), jnp.float32, -bound, bound)
        params.append((w, b))
    return params


if __name__ == "__main__":
    # Small shapes consistent with the module's forward: batch=4,
    # repr_length=1024 (the real default is 44782 — a ctor arg; the K-tiled
    # kernel scales to it since w1 is streamed, never fully VMEM-resident).
    B = 4
    REPR_LENGTH = 1024

    key = jax.random.PRNGKey(0)
    k_x, k_p = jax.random.split(key)
    x = jax.random.normal(k_x, (B, REPR_LENGTH), jnp.float32)
    params = init_params(k_p, REPR_LENGTH)

    out_prob, out_hat, A = ann_model_forward(x, params)
    jax.block_until_ready((out_prob, out_hat))

    assert out_prob.shape == (B,) and out_prob.dtype == jnp.float32
    assert out_hat.shape == (B,) and out_hat.dtype == jnp.float32
    assert A is None

    # Numerical sanity vs. pure-JAX reference (loose tol: weights streamed in bf16).
    ref_prob, _ = ann_model_reference(x, params)
    assert bool(jnp.all(jnp.isfinite(out_prob)))
    assert float(jnp.max(jnp.abs(out_prob - ref_prob))) < 5e-2
    assert bool(jnp.array_equal(out_hat, (out_prob >= 0.5).astype(jnp.float32)))

    print("KERNEL_OK")
</pallas_src>

<mosaic_0001>
module attributes {stable_mosaic.version = 11 : i64} {
  func.func @ann_model_kernel(%arg0: i32, %arg1: memref<8x1024xf32, #tpu.memory_space<vmem>>, %arg2: memref<1024x1024xbf16, #tpu.memory_space<vmem>>, %arg3: memref<1x1024xf32, #tpu.memory_space<vmem>>, %arg4: memref<1024x1024xbf16, #tpu.memory_space<vmem>>, %arg5: memref<1x1024xf32, #tpu.memory_space<vmem>>, %arg6: memref<1024x1024xbf16, #tpu.memory_space<vmem>>, %arg7: memref<1x1024xf32, #tpu.memory_space<vmem>>, %arg8: memref<1024x128xbf16, #tpu.memory_space<vmem>>, %arg9: memref<1x128xf32, #tpu.memory_space<vmem>>, %arg10: memref<128x1xf32, #tpu.memory_space<vmem>>, %arg11: memref<1x1xf32, #tpu.memory_space<vmem>>, %arg12: memref<8x1xf32, #tpu.memory_space<vmem>>, %arg13: memref<8x1xf32, #tpu.memory_space<vmem>>, %arg14: memref<8x1024xf32, #tpu.memory_space<vmem>>) attributes {dimension_semantics = [#tpu.dimension_semantics<arbitrary>], iteration_bounds = array<i64: 1>, scalar_prefetch = 0 : i64, scratch_operands = 1 : i64, tpu.core_type = #tpu.core_type<tc>, window_params = [{transform_indices = @transform_0, window_bounds = array<i64: 8, 1024>}, {transform_indices = @transform_1, window_bounds = array<i64: 1024, 1024>}, {pipeline_mode = #tpu.pipeline_mode<synchronous>, transform_indices = @transform_2, window_bounds = array<i64: 1, 1024>}, {pipeline_mode = #tpu.pipeline_mode<synchronous>, transform_indices = @transform_3, window_bounds = array<i64: 1024, 1024>}, {pipeline_mode = #tpu.pipeline_mode<synchronous>, transform_indices = @transform_4, window_bounds = array<i64: 1, 1024>}, {pipeline_mode = #tpu.pipeline_mode<synchronous>, transform_indices = @transform_5, window_bounds = array<i64: 1024, 1024>}, {pipeline_mode = #tpu.pipeline_mode<synchronous>, transform_indices = @transform_6, window_bounds = array<i64: 1, 1024>}, {pipeline_mode = #tpu.pipeline_mode<synchronous>, transform_indices = @transform_7, window_bounds = array<i64: 1024, 128>}, {pipeline_mode = #tpu.pipeline_mode<synchronous>, transform_indices = @transform_8, window_bounds = array<i64: 1, 128>}, {pipeline_mode = #tpu.pipeline_mode<synchronous>, transform_indices = @transform_9, window_bounds = array<i64: 128, 1>}, {pipeline_mode = #tpu.pipeline_mode<synchronous>, transform_indices = @transform_10, window_bounds = array<i64: 1, 1>}, {pipeline_mode = #tpu.pipeline_mode<synchronous>, transform_indices = @transform_11, window_bounds = array<i64: 8, 1>}, {pipeline_mode = #tpu.pipeline_mode<synchronous>, transform_indices = @transform_12, window_bounds = array<i64: 8, 1>}]} {
    %c0_i32 = arith.constant 0 : i32
    %0 = arith.cmpi eq, %arg0, %c0_i32 : i32
    %1 = arith.extui %0 : i1 to i32
    %c0_i32_0 = arith.constant 0 : i32
    %2 = arith.cmpi ne, %1, %c0_i32_0 : i32
    scf.if %2 {
      %cst_10 = arith.constant 0.000000e+00 : f32
      %13 = vector.broadcast %cst_10 : f32 to vector<8x1024xf32>
      %c0_11 = arith.constant 0 : index
      %c0_12 = arith.constant 0 : index
      %14 = vector.load %arg14[%c0_11, %c0_12] : memref<8x1024xf32, #tpu.memory_space<vmem>>, vector<8x1024xf32>
      tpu.vector_store %arg14[%c0_11, %c0_12], %13 {strides = array<i32>} : memref<8x1024xf32, #tpu.memory_space<vmem>>, vector<8x1024xf32>,
    } else {
    }
    %c0 = arith.constant 0 : index
    %c0_1 = arith.constant 0 : index
    %3 = vector.load %arg14[%c0, %c0_1] : memref<8x1024xf32, #tpu.memory_space<vmem>>, vector<8x1024xf32>
    %c0_2 = arith.constant 0 : index
    %c0_3 = arith.constant 0 : index
    %4 = vector.load %arg1[%c0_2, %c0_3] : memref<8x1024xf32, #tpu.memory_space<vmem>>, vector<8x1024xf32>
    %5 = arith.truncf %4 : vector<8x1024xf32> to vector<8x1024xbf16>
    %c0_4 = arith.constant 0 : index
    %c0_5 = arith.constant 0 : index
    %6 = vector.load %arg2[%c0_4, %c0_5] : memref<1024x1024xbf16, #tpu.memory_space<vmem>>, vector<1024x1024xbf16>
    %cst = arith.constant dense<0.000000e+00> : vector<8x1024xf32>
    %7 = tpu.matmul %5, %6, %cst {dimension_numbers = #tpu.dot_dimension_numbers<[1], [0], [0], [1], [0, 0, 1, 1], [], []>} : vector<8x1024xbf16>, vector<1024x1024xbf16>, vector<8x1024xf32> -> vector<8x1024xf32>
    %8 = arith.addf %3, %7 : vector<8x1024xf32>
    %c0_6 = arith.constant 0 : index
    %c0_7 = arith.constant 0 : index
    %9 = vector.load %arg14[%c0_6, %c0_7] : memref<8x1024xf32, #tpu.memory_space<vmem>>, vector<8x1024xf32>
    tpu.vector_store %arg14[%c0_6, %c0_7], %8 {strides = array<i32>} : memref<8x1024xf32, #tpu.memory_space<vmem>>, vector<8x1024xf32>,
    %c0_i32_8 = arith.constant 0 : i32
    %10 = arith.cmpi eq, %arg0, %c0_i32_8 : i32
    %11 = arith.extui %10 : i1 to i32
    %c0_i32_9 = arith.constant 0 : i32
    %12 = arith.cmpi ne, %11, %c0_i32_9 : i32
    scf.if %12 {
      %c0_10 = arith.constant 0 : index
      %c0_11 = arith.constant 0 : index
      %13 = vector.load %arg14[%c0_10, %c0_11] : memref<8x1024xf32, #tpu.memory_space<vmem>>, vector<8x1024xf32>
      %c0_12 = arith.constant 0 : index
      %c0_13 = arith.constant 0 : index
      %14 = vector.load %arg3[%c0_12, %c0_13] : memref<1x1024xf32, #tpu.memory_space<vmem>>, vector<1x1024xf32>
      %15 = vector.broadcast %14 : vector<1x1024xf32> to vector<8x1024xf32>
      %16 = arith.addf %13, %15 : vector<8x1024xf32>
      %cst_14 = arith.constant 0.000000e+00 : f32
      %17 = vector.broadcast %cst_14 : f32 to vector<8x1024xf32>
      %18 = arith.cmpf ogt, %16, %17 : vector<8x1024xf32>
      %cst_15 = arith.constant 0.000000e+00 : f32
      %19 = vector.broadcast %cst_15 : f32 to vector<8x1024xf32>
      %20 = arith.minimumf %16, %19 : vector<8x1024xf32>
      %21 = math.exp %20 : vector<8x1024xf32>
      %cst_16 = arith.constant 1.000000e+00 : f32
      %22 = vector.broadcast %cst_16 : f32 to vector<8x1024xf32>
      %23 = arith.subf %21, %22 : vector<8x1024xf32>
      %cst_17 = arith.constant 1.67326319 : f32
      %24 = vector.broadcast %cst_17 : f32 to vector<8x1024xf32>
      %25 = arith.mulf %24, %23 : vector<8x1024xf32>
      %26 = arith.select %18, %16, %25 : vector<8x1024xi1>, vector<8x1024xf32>
      %cst_18 = arith.constant 1.05070102 : f32
      %27 = vector.broadcast %cst_18 : f32 to vector<8x1024xf32>
      %28 = arith.mulf %27, %26 : vector<8x1024xf32>
      %29 = arith.truncf %28 : vector<8x1024xf32> to vector<8x1024xbf16>
      %c0_19 = arith.constant 0 : index
      %c0_20 = arith.constant 0 : index
      %30 = vector.load %arg4[%c0_19, %c0_20] : memref<1024x1024xbf16, #tpu.memory_space<vmem>>, vector<1024x1024xbf16>
      %cst_21 = arith.constant dense<0.000000e+00> : vector<8x1024xf32>
      %31 = tpu.matmul %29, %30, %cst_21 {dimension_numbers = #tpu.dot_dimension_numbers<[1], [0], [0], [1], [0, 0, 1, 1], [], []>} : vector<8x1024xbf16>, vector<1024x1024xbf16>, vector<8x1024xf32> -> vector<8x1024xf32>
      %c0_22 = arith.constant 0 : index
      %c0_23 = arith.constant 0 : index
      %32 = vector.load %arg5[%c0_22, %c0_23] : memref<1x1024xf32, #tpu.memory_space<vmem>>, vector<1x1024xf32>
      %33 = vector.broadcast %32 : vector<1x1024xf32> to vector<8x1024xf32>
      %34 = arith.addf %31, %33 : vector<8x1024xf32>
      %cst_24 = arith.constant 0.000000e+00 : f32
      %35 = vector.broadcast %cst_24 : f32 to vector<8x1024xf32>
      %36 = arith.cmpf ogt, %34, %35 : vector<8x1024xf32>
      %cst_25 = arith.constant 0.000000e+00 : f32
      %37 = vector.broadcast %cst_25 : f32 to vector<8x1024xf32>
      %38 = arith.minimumf %34, %37 : vector<8x1024xf32>
      %39 = math.exp %38 : vector<8x1024xf32>
      %cst_26 = arith.constant 1.000000e+00 : f32
      %40 = vector.broadcast %cst_26 : f32 to vector<8x1024xf32>
      %41 = arith.subf %39, %40 : vector<8x1024xf32>
      %cst_27 = arith.constant 1.67326319 : f32
      %42 = vector.broadcast %cst_27 : f32 to vector<8x1024xf32>
      %43 = arith.mulf %42, %41 : vector<8x1024xf32>
      %44 = arith.select %36, %34, %43 : vector<8x1024xi1>, vector<8x1024xf32>
      %cst_28 = arith.constant 1.05070102 : f32
      %45 = vector.broadcast %cst_28 : f32 to vector<8x1024xf32>
      %46 = arith.mulf %45, %44 : vector<8x1024xf32>
      %47 = arith.truncf %46 : vector<8x1024xf32> to vector<8x1024xbf16>
      %c0_29 = arith.constant 0 : index
      %c0_30 = arith.constant 0 : index
      %48 = vector.load %arg6[%c0_29, %c0_30] : memref<1024x1024xbf16, #tpu.memory_space<vmem>>, vector<1024x1024xbf16>
      %cst_31 = arith.constant dense<0.000000e+00> : vector<8x1024xf32>
      %49 = tpu.matmul %47, %48, %cst_31 {dimension_numbers = #tpu.dot_dimension_numbers<[1], [0], [0], [1], [0, 0, 1, 1], [], []>} : vector<8x1024xbf16>, vector<1024x1024xbf16>, vector<8x1024xf32> -> vector<8x1024xf32>
      %c0_32 = arith.constant 0 : index
      %c0_33 = arith.constant 0 : index
      %50 = vector.load %arg7[%c0_32, %c0_33] : memref<1x1024xf32, #tpu.memory_space<vmem>>, vector<1x1024xf32>
      %51 = vector.broadcast %50 : vector<1x1024xf32> to vector<8x1024xf32>
      %52 = arith.addf %49, %51 : vector<8x1024xf32>
      %cst_34 = arith.constant 0.000000e+00 : f32
      %53 = vector.broadcast %cst_34 : f32 to vector<8x1024xf32>
      %54 = arith.cmpf ogt, %52, %53 : vector<8x1024xf32>
      %cst_35 = arith.constant 0.000000e+00 : f32
      %55 = vector.broadcast %cst_35 : f32 to vector<8x1024xf32>
      %56 = arith.minimumf %52, %55 : vector<8x1024xf32>
      %57 = math.exp %56 : vector<8x1024xf32>
      %cst_36 = arith.constant 1.000000e+00 : f32
      %58 = vector.broadcast %cst_36 : f32 to vector<8x1024xf32>
      %59 = arith.subf %57, %58 : vector<8x1024xf32>
      %cst_37 = arith.constant 1.67326319 : f32
      %60 = vector.broadcast %cst_37 : f32 to vector<8x1024xf32>
      %61 = arith.mulf %60, %59 : vector<8x1024xf32>
      %62 = arith.select %54, %52, %61 : vector<8x1024xi1>, vector<8x1024xf32>
      %cst_38 = arith.constant 1.05070102 : f32
      %63 = vector.broadcast %cst_38 : f32 to vector<8x1024xf32>
      %64 = arith.mulf %63, %62 : vector<8x1024xf32>
      %65 = arith.truncf %64 : vector<8x1024xf32> to vector<8x1024xbf16>
      %c0_39 = arith.constant 0 : index
      %c0_40 = arith.constant 0 : index
      %66 = vector.load %arg8[%c0_39, %c0_40] : memref<1024x128xbf16, #tpu.memory_space<vmem>>, vector<1024x128xbf16>
      %cst_41 = arith.constant dense<0.000000e+00> : vector<8x128xf32>
      %67 = tpu.matmul %65, %66, %cst_41 {dimension_numbers = #tpu.dot_dimension_numbers<[1], [0], [0], [1], [0, 0, 1, 1], [], []>} : vector<8x1024xbf16>, vector<1024x128xbf16>, vector<8x128xf32> -> vector<8x128xf32>
      %c0_42 = arith.constant 0 : index
      %c0_43 = arith.constant 0 : index
      %68 = vector.load %arg9[%c0_42, %c0_43] : memref<1x128xf32, #tpu.memory_space<vmem>>, vector<1x128xf32>
      %69 = vector.broadcast %68 : vector<1x128xf32> to vector<8x128xf32>
      %70 = arith.addf %67, %69 : vector<8x128xf32>
      %cst_44 = arith.constant 0.000000e+00 : f32
      %71 = vector.broadcast %cst_44 : f32 to vector<8x128xf32>
      %72 = arith.cmpf ogt, %70, %71 : vector<8x128xf32>
      %cst_45 = arith.constant 0.000000e+00 : f32
      %73 = vector.broadcast %cst_45 : f32 to vector<8x128xf32>
      %74 = arith.minimumf %70, %73 : vector<8x128xf32>
      %75 = math.exp %74 : vector<8x128xf32>
      %cst_46 = arith.constant 1.000000e+00 : f32
      %76 = vector.broadcast %cst_46 : f32 to vector<8x128xf32>
      %77 = arith.subf %75, %76 : vector<8x128xf32>
      %cst_47 = arith.constant 1.67326319 : f32
      %78 = vector.broadcast %cst_47 : f32 to vector<8x128xf32>
      %79 = arith.mulf %78, %77 : vector<8x128xf32>
      %80 = arith.select %72, %70, %79 : vector<8x128xi1>, vector<8x128xf32>
      %cst_48 = arith.constant 1.05070102 : f32
      %81 = vector.broadcast %cst_48 : f32 to vector<8x128xf32>
      %82 = arith.mulf %81, %80 : vector<8x128xf32>
      %c0_49 = arith.constant 0 : index
      %c0_50 = arith.constant 0 : index
      %83 = vector.load %arg10[%c0_49, %c0_50] : memref<128x1xf32, #tpu.memory_space<vmem>>, vector<128x1xf32>
      %cst_51 = arith.constant dense<0.000000e+00> : vector<8x1xf32>
      %84 = tpu.matmul %82, %83, %cst_51 {dimension_numbers = #tpu.dot_dimension_numbers<[1], [0], [0], [1], [0, 0, 1, 1], [], []>} : vector<8x128xf32>, vector<128x1xf32>, vector<8x1xf32> -> vector<8x1xf32>
      %c0_52 = arith.constant 0 : index
      %c0_53 = arith.constant 0 : index
      %85 = vector.load %arg11[%c0_52, %c0_53] : memref<1x1xf32, #tpu.memory_space<vmem>>, vector<1x1xf32>
      %86 = vector.broadcast %85 : vector<1x1xf32> to vector<8x1xf32>
      %87 = arith.addf %84, %86 : vector<8x1xf32>
      %cst_54 = arith.constant 0.000000e+00 : f32
      %88 = vector.broadcast %cst_54 : f32 to vector<8x1xf32>
      %89 = arith.subf %88, %87 : vector<8x1xf32>
      %90 = math.exp %89 : vector<8x1xf32>
      %cst_55 = arith.constant 1.000000e+00 : f32
      %91 = vector.broadcast %cst_55 : f32 to vector<8x1xf32>
      %92 = arith.addf %91, %90 : vector<8x1xf32>
      %cst_56 = arith.constant 1.000000e+00 : f32
      %93 = vector.broadcast %cst_56 : f32 to vector<8x1xf32>
      %94 = arith.divf %93, %92 : vector<8x1xf32>
      %c0_57 = arith.constant 0 : index
      %c0_58 = arith.constant 0 : index
      %95 = vector.load %arg12[%c0_57, %c0_58] : memref<8x1xf32, #tpu.memory_space<vmem>>, vector<8x1xf32>
      tpu.vector_store %arg12[%c0_57, %c0_58], %94 {strides = array<i32>} : memref<8x1xf32, #tpu.memory_space<vmem>>, vector<8x1xf32>,
      %cst_59 = arith.constant 5.000000e-01 : f32
      %96 = vector.broadcast %cst_59 : f32 to vector<8x1xf32>
      %97 = arith.cmpf oge, %94, %96 : vector<8x1xf32>
      %98 = arith.extui %97 : vector<8x1xi1> to vector<8x1xi32>
      %99 = arith.sitofp %98 : vector<8x1xi32> to vector<8x1xf32>
      %c0_60 = arith.constant 0 : index
      %c0_61 = arith.constant 0 : index
      %100 = vector.load %arg13[%c0_60, %c0_61] : memref<8x1xf32, #tpu.memory_space<vmem>>, vector<8x1xf32>
      tpu.vector_store %arg13[%c0_60, %c0_61], %99 {strides = array<i32>} : memref<8x1xf32, #tpu.memory_space<vmem>>, vector<8x1xf32>,
    } else {
    }
    return
  }
  func.func @transform_0(%arg0: i32) -> (i32, i32) {
    %c0_i32 = arith.constant 0 : i32
    %c0_i32_0 = arith.constant 0 : i32
    return %c0_i32, %arg0 : i32, i32
  }
  func.func @transform_1(%arg0: i32) -> (i32, i32) {
    %c0_i32 = arith.constant 0 : i32
    %c0_i32_0 = arith.constant 0 : i32
    return %arg0, %c0_i32 : i32, i32
  }
  func.func @transform_2(%arg0: i32) -> (i32, i32) {
    %c0_i32 = arith.constant 0 : i32
    %c0_i32_0 = arith.constant 0 : i32
    %c0_i32_1 = arith.constant 0 : i32
    return %c0_i32, %c0_i32_0 : i32, i32
  }
  func.func @transform_3(%arg0: i32) -> (i32, i32) {
    %c0_i32 = arith.constant 0 : i32
    %c0_i32_0 = arith.constant 0 : i32
    %c0_i32_1 = arith.constant 0 : i32
    return %c0_i32, %c0_i32_0 : i32, i32
  }
  func.func @transform_4(%arg0: i32) -> (i32, i32) {
    %c0_i32 = arith.constant 0 : i32
    %c0_i32_0 = arith.constant 0 : i32
    %c0_i32_1 = arith.constant 0 : i32
    return %c0_i32, %c0_i32_0 : i32, i32
  }
  func.func @transform_5(%arg0: i32) -> (i32, i32) {
    %c0_i32 = arith.constant 0 : i32
    %c0_i32_0 = arith.constant 0 : i32
    %c0_i32_1 = arith.constant 0 : i32
    return %c0_i32, %c0_i32_0 : i32, i32
  }
  func.func @transform_6(%arg0: i32) -> (i32, i32) {
    %c0_i32 = arith.constant 0 : i32
    %c0_i32_0 = arith.constant 0 : i32
    %c0_i32_1 = arith.constant 0 : i32
    return %c0_i32, %c0_i32_0 : i32, i32
  }
  func.func @transform_7(%arg0: i32) -> (i32, i32) {
    %c0_i32 = arith.constant 0 : i32
    %c0_i32_0 = arith.constant 0 : i32
    %c0_i32_1 = arith.constant 0 : i32
    return %c0_i32, %c0_i32_0 : i32, i32
  }
  func.func @transform_8(%arg0: i32) -> (i32, i32) {
    %c0_i32 = arith.constant 0 : i32
    %c0_i32_0 = arith.constant 0 : i32
    %c0_i32_1 = arith.constant 0 : i32
    return %c0_i32, %c0_i32_0 : i32, i32
  }
  func.func @transform_9(%arg0: i32) -> (i32, i32) {
    %c0_i32 = arith.constant 0 : i32
    %c0_i32_0 = arith.constant 0 : i32
    %c0_i32_1 = arith.constant 0 : i32
    return %c0_i32, %c0_i32_0 : i32, i32
  }
  func.func @transform_10(%arg0: i32) -> (i32, i32) {
    %c0_i32 = arith.constant 0 : i32
    %c0_i32_0 = arith.constant 0 : i32
    %c0_i32_1 = arith.constant 0 : i32
    return %c0_i32, %c0_i32_0 : i32, i32
  }
  func.func @transform_11(%arg0: i32) -> (i32, i32) {
    %c0_i32 = arith.constant 0 : i32
    %c0_i32_0 = arith.constant 0 : i32
    %c0_i32_1 = arith.constant 0 : i32
    return %c0_i32, %c0_i32_0 : i32, i32
  }
  func.func @transform_12(%arg0: i32) -> (i32, i32) {
    %c0_i32 = arith.constant 0 : i32
    %c0_i32_0 = arith.constant 0 : i32
    %c0_i32_1 = arith.constant 0 : i32
    return %c0_i32, %c0_i32_0 : i32, i32
  }
}

</mosaic_0001>

<bundles_post_ra>
// kernel: ann_model_forward.1
= control target key start
LH: loop header
LB: loop body
LE: loop exit
PB: predicated region body
PF: predicated region fallthrough
CT: control target
= control target key end

     0   :  { %s19815_s1 = inlined_call_operand.vmem [shape: bf16[1024,1024], index: 1, kind: input, shape index: {}]   ;;  %s19816_s0 = inlined_call_operand.vmem [shape: f32[8,1024], index: 0, kind: input, shape index: {}]   ;;  %s19817_s2 = inlined_call_operand.vmem [shape: f32[1,1024], index: 2, kind: input, shape index: {}]   ;;  %s19818_s3 = inlined_call_operand.vmem [shape: bf16[1024,1024], index: 3, kind: input, shape index: {}]   ;;  %s19819_s4 = inlined_call_operand.vmem [shape: f32[1,1024], index: 4, kind: input, shape index: {}]   ;;  %s19820_s5 = inlined_call_operand.vmem [shape: bf16[1024,1024], index: 5, kind: input, shape index: {}]   ;;  %s19821_s6 = inlined_call_operand.vmem [shape: f32[1,1024], index: 6, kind: input, shape index: {}]   ;;  %s19822_s7 = inlined_call_operand.vmem [shape: bf16[1024,128], index: 7, kind: input, shape index: {}]   ;;  %s19823_s8 = inlined_call_operand.vmem [shape: f32[1,128], index: 8, kind: input, shape index: {}]   ;;  %s19824_s9 = inlined_call_operand.vmem [shape: f32[128,1], index: 9, kind: input, shape index: {}]   ;;  %s19825_s10 = inlined_call_operand.<no memory space> [shape: f32[1,1], index: 10, kind: input, shape index: {}]   ;;  %s19826_s11 = inlined_call_operand.vmem [shape: f32[8,1], index: 11, kind: output, shape index: {0}]   ;;  %s19827_s12 = inlined_call_operand.vmem [shape: f32[8,1], index: 12, kind: output, shape index: {1}]  }
   0x1   :  { %v135_v0 = vld [vmem:[%s19815_s1 + $0x1c0] sm:$0xff]  ;;  %v64_v53 = vld [vmem:[%s19816_s0 + $0x8] sm:$0xff]  ;;  %v66_v54 = vld [vmem:[%s19816_s0 + $0x18] sm:$0xff] }
   0x2   :  { %v139_v1 = vld [vmem:[%s19815_s1 + $0x1e0] sm:$0xff]  ;;  %v14495_v58 = vpack.c.bf16 %v64_v53, %v64_v53  ;;  %v14497_v59 = vpack.c.bf16 %v66_v54, %v66_v54 }
   0x3   :  { %v263_v2 = vld [vmem:[%s19815_s1 + $0x5c0] sm:$0xff]  ;;  %v12497_v3 = vcombine.high %v135_v0, %v139_v1  ;;  %v12496_v5 = vcombine.low %v135_v0, %v139_v1 }
   0x4   :  { %v267_v4 = vld [vmem:[%s19815_s1 + $0x5e0] sm:$0xff]  ;;  %3183 = vmatprep.mubr.bf16.mxu0 %v14495_v58  ;;  %3224 = vmatprep.mubr.bf16.mxu1 %v14497_v59 }
   0x5   :  { %v127_v6 = vld [vmem:[%s19815_s1 + $0x180] sm:$0xff]  ;;  %v12625_v8 = vcombine.high %v263_v2, %v267_v4  ;;  %v12624_v9 = vcombine.low %v263_v2, %v267_v4  ;;  %3151 = vmatprep.subr.bf16.mxu0 %v12497_v3 }
   0x6   :  { %v131_v7 = vld [vmem:[%s19815_s1 + $0x1a0] sm:$0xff]  ;;  %3152 = vmatpush1.bf16.msra.mxu0 %v12496_v5 }
   0x7   :  { %v12489_v10 = vcombine.high %v127_v6, %v131_v7  ;;  %v255_v11 = vld [vmem:[%s19815_s1 + $0x580] sm:$0xff]  ;;  %3192 = vmatprep.subr.bf16.mxu1 %v12625_v8  ;;  %v12488_v18 = vcombine.low %v127_v6, %v131_v7 }
   0x8   :  { %v259_v12 = vld [vmem:[%s19815_s1 + $0x5a0] sm:$0xff]  ;;  %3193 = vmatpush1.bf16.msra.mxu1 %v12624_v9 }
   0x9   :  { %v119_v13 = vld [vmem:[%s19815_s1 + $0x140] sm:$0xff]  ;;  %v12617_v14 = vcombine.high %v255_v11, %v259_v12  ;;  %3153 = vmatprep.subr.bf16.mxu0 %v12489_v10  ;;  %v12616_v19 = vcombine.low %v255_v11, %v259_v12 }
   0xa   :  { %v123_v15 = vld [vmem:[%s19815_s1 + $0x160] sm:$0xff]  ;;  %3154 = vmatpush1.bf16.msra.mxu0 %v12488_v18 }
   0xb   :  { %v247_v16 = vld [vmem:[%s19815_s1 + $0x540] sm:$0xff]  ;;  %v12481_v20 = vcombine.high %v119_v13, %v123_v15  ;;  %3194 = vmatprep.subr.bf16.mxu1 %v12617_v14  ;;  %v12480_v26 = vcombine.low %v119_v13, %v123_v15 }
   0xc   :  { %v251_v17 = vld [vmem:[%s19815_s1 + $0x560] sm:$0xff]  ;;  %3195 = vmatpush1.bf16.msra.mxu1 %v12616_v19 }
   0xd   :  { %v12609_v21 = vcombine.high %v247_v16, %v251_v17  ;;  %v111_v22 = vld [vmem:[%s19815_s1 + $0x100] sm:$0xff]  ;;  %3155 = vmatprep.subr.bf16.mxu0 %v12481_v20  ;;  %v12608_v27 = vcombine.low %v247_v16, %v251_v17 }
   0xe   :  { %v115_v23 = vld [vmem:[%s19815_s1 + $0x120] sm:$0xff]  ;;  %3156 = vmatpush1.bf16.msra.mxu0 %v12480_v26 }
   0xf   :  { %v239_v24 = vld [vmem:[%s19815_s1 + $0x500] sm:$0xff]  ;;  %v12473_v28 = vcombine.high %v111_v22, %v115_v23  ;;  %3196 = vmatprep.subr.bf16.mxu1 %v12609_v21  ;;  %v12472_v34 = vcombine.low %v111_v22, %v115_v23 }
  0x10   :  { %v243_v25 = vld [vmem:[%s19815_s1 + $0x520] sm:$0xff]  ;;  %3197 = vmatpush1.bf16.msra.mxu1 %v12608_v27 }
  0x11   :  { %v12601_v29 = vcombine.high %v239_v24, %v243_v25  ;;  %v103_v30 = vld [vmem:[%s19815_s1 + $0xc0] sm:$0xff]  ;;  %3157 = vmatprep.subr.bf16.mxu0 %v12473_v28  ;;  %v12600_v35 = vcombine.low %v239_v24, %v243_v25 }
  0x12   :  { %v107_v31 = vld [vmem:[%s19815_s1 + $0xe0] sm:$0xff]  ;;  %3158 = vmatpush1.bf16.msra.mxu0 %v12472_v34 }
  0x13   :  { %v231_v32 = vld [vmem:[%s19815_s1 + $0x4c0] sm:$0xff]  ;;  %v12465_v36 = vcombine.high %v103_v30, %v107_v31  ;;  %3198 = vmatprep.subr.bf16.mxu1 %v12601_v29  ;;  %v12464_v42 = vcombine.low %v103_v30, %v107_v31 }
  0x14   :  { %v235_v33 = vld [vmem:[%s19815_s1 + $0x4e0] sm:$0xff]  ;;  %3199 = vmatpush1.bf16.msra.mxu1 %v12600_v35 }
  0x15   :  { %v12593_v37 = vcombine.high %v231_v32, %v235_v33  ;;  %v95_v38 = vld [vmem:[%s19815_s1 + $0x80] sm:$0xff]  ;;  %3159 = vmatprep.subr.bf16.mxu0 %v12465_v36  ;;  %v12592_v43 = vcombine.low %v231_v32, %v235_v33 }
  0x16   :  { %v99_v39 = vld [vmem:[%s19815_s1 + $0xa0] sm:$0xff]  ;;  %3160 = vmatpush1.bf16.msra.mxu0 %v12464_v42 }
  0x17   :  { %v223_v40 = vld [vmem:[%s19815_s1 + $0x480] sm:$0xff]  ;;  %v12457_v44 = vcombine.high %v95_v38, %v99_v39  ;;  %3200 = vmatprep.subr.bf16.mxu1 %v12593_v37  ;;  %v12456_v50 = vcombine.low %v95_v38, %v99_v39 }
  0x18   :  { %v227_v41 = vld [vmem:[%s19815_s1 + $0x4a0] sm:$0xff]  ;;  %3201 = vmatpush1.bf16.msra.mxu1 %v12592_v43 }
  0x19   :  { %v12585_v45 = vcombine.high %v223_v40, %v227_v41  ;;  %v87_v46 = vld [vmem:[%s19815_s1 + $0x40] sm:$0xff]  ;;  %3161 = vmatprep.subr.bf16.mxu0 %v12457_v44  ;;  %v12584_v51 = vcombine.low %v223_v40, %v227_v41 }
  0x1a   :  { %v91_v47 = vld [vmem:[%s19815_s1 + $0x60] sm:$0xff]  ;;  %3162 = vmatpush1.bf16.msra.mxu0 %v12456_v50 }
  0x1b   :  { %v215_v48 = vld [vmem:[%s19815_s1 + $0x440] sm:$0xff]  ;;  %v12449_v52 = vcombine.high %v87_v46, %v91_v47  ;;  %3202 = vmatprep.subr.bf16.mxu1 %v12585_v45  ;;  %v12448_v62 = vcombine.low %v87_v46, %v91_v47 }
  0x1c   :  { %v219_v49 = vld [vmem:[%s19815_s1 + $0x460] sm:$0xff]  ;;  %3203 = vmatpush1.bf16.msra.mxu1 %v12584_v51 }
  0x1d   :  { %v12577_v55 = vcombine.high %v215_v48, %v219_v49  ;;  %v79_v56 = vld [vmem:[%s19815_s1] sm:$0xff]  ;;  %3163 = vmatprep.subr.bf16.mxu0 %v12449_v52  ;;  %v12576_v63 = vcombine.low %v215_v48, %v219_v49 }
  0x1e   :  { %v83_v57 = vld [vmem:[%s19815_s1 + $0x20] sm:$0xff]  ;;  %3164 = vmatpush1.bf16.msra.mxu0 %v12448_v62 }
  0x1f   :  { %v207_v60 = vld [vmem:[%s19815_s1 + $0x400] sm:$0xff]  ;;  %v12441_v0 = vcombine.high %v79_v56, %v83_v57  ;;  %3204 = vmatprep.subr.bf16.mxu1 %v12577_v55  ;;  %v12440_v6 = vcombine.low %v79_v56, %v83_v57 }
  0x20   :  { %v211_v61 = vld [vmem:[%s19815_s1 + $0x420] sm:$0xff]  ;;  %3205 = vmatpush1.bf16.msra.mxu1 %v12576_v63 }
  0x21   :  { %v12569_v1 = vcombine.high %v207_v60, %v211_v61  ;;  %v199_v2 = vld [vmem:[%s19815_s1 + $0x3c0] sm:$0xff]  ;;  %3165 = vmatprep.subr.bf16.mxu0 %v12441_v0  ;;  %v12568_v7 = vcombine.low %v207_v60, %v211_v61 }
  0x22   :  { %v203_v3 = vld [vmem:[%s19815_s1 + $0x3e0] sm:$0xff]  ;;  %3166 = vmatpush1.bf16.msra.mxu0 %v12440_v6 }
  0x23   :  { %v327_v4 = vld [vmem:[%s19815_s1 + $0x7c0] sm:$0xff]  ;;  %v12561_v8 = vcombine.high %v199_v2, %v203_v3  ;;  %3206 = vmatprep.subr.bf16.mxu1 %v12569_v1  ;;  %v12560_v14 = vcombine.low %v199_v2, %v203_v3 }
  0x24   :  { %v331_v5 = vld [vmem:[%s19815_s1 + $0x7e0] sm:$0xff]  ;;  %3207 = vmatpush1.bf16.msra.mxu1 %v12568_v7 }
  0x25   :  { %v12689_v9 = vcombine.high %v327_v4, %v331_v5  ;;  %v191_v10 = vld [vmem:[%s19815_s1 + $0x380] sm:$0xff]  ;;  %3167 = vmatprep.subr.bf16.mxu0 %v12561_v8  ;;  %v12688_v15 = vcombine.low %v327_v4, %v331_v5 }
  0x26   :  { %v195_v11 = vld [vmem:[%s19815_s1 + $0x3a0] sm:$0xff]  ;;  %3168 = vmatpush2.bf16.msra.mxu0 %v12560_v14 }
  0x27   :  { %v319_v12 = vld [vmem:[%s19815_s1 + $0x780] sm:$0xff]  ;;  %v12553_v16 = vcombine.high %v191_v10, %v195_v11  ;;  %3208 = vmatprep.subr.bf16.mxu1 %v12689_v9  ;;  %v12552_v22 = vcombine.low %v191_v10, %v195_v11  ;;  %v65_v11 = vld [vmem:[%s19816_s0 + $0x10] sm:$0xff] }
  0x28   :  { %v323_v13 = vld [vmem:[%s19815_s1 + $0x7a0] sm:$0xff]  ;;  %3209 = vmatpush2.bf16.msra.mxu1 %v12688_v15 }
  0x29   :  { %v12681_v17 = vcombine.high %v319_v12, %v323_v13  ;;  %v183_v18 = vld [vmem:[%s19815_s1 + $0x340] sm:$0xff]  ;;  %3169 = vmatprep.subr.bf16.mxu0 %v12553_v16  ;;  %v12680_v23 = vcombine.low %v319_v12, %v323_v13 }
  0x2a   :  { %v187_v19 = vld [vmem:[%s19815_s1 + $0x360] sm:$0xff]  ;;  %3170 = vmatpush2.bf16.msra.mxu0 %v12552_v22  ;;  %v70_v22 = vld [vmem:[%s19816_s0 + $0x38] sm:$0xff] }
  0x2b   :  { %v311_v20 = vld [vmem:[%s19815_s1 + $0x740] sm:$0xff]  ;;  %v12545_v24 = vcombine.high %v183_v18, %v187_v19  ;;  %3210 = vmatprep.subr.bf16.mxu1 %v12681_v17  ;;  %v12544_v30 = vcombine.low %v183_v18, %v187_v19  ;;  %v68_v19 = vld [vmem:[%s19816_s0 + $0x28] sm:$0xff] }
  0x2c   :  { %v315_v21 = vld [vmem:[%s19815_s1 + $0x760] sm:$0xff]  ;;  %3211 = vmatpush2.bf16.msra.mxu1 %v12680_v23 }
  0x2d   :  { %v12673_v25 = vcombine.high %v311_v20, %v315_v21  ;;  %v175_v26 = vld [vmem:[%s19815_s1 + $0x300] sm:$0xff]  ;;  %3171 = vmatprep.subr.bf16.mxu0 %v12545_v24  ;;  %v12672_v31 = vcombine.low %v311_v20, %v315_v21  ;;  %v14638_v20 = vpack.c.bf16 %v65_v11, %v65_v11 }
  0x2e   :  { %v179_v27 = vld [vmem:[%s19815_s1 + $0x320] sm:$0xff]  ;;  %3172 = vmatpush2.bf16.msra.mxu0 %v12544_v30 }
  0x2f   :  { %v303_v28 = vld [vmem:[%s19815_s1 + $0x700] sm:$0xff]  ;;  %v12537_v32 = vcombine.high %v175_v26, %v179_v27  ;;  %3212 = vmatprep.subr.bf16.mxu1 %v12673_v25  ;;  %v12536_v38 = vcombine.low %v175_v26, %v179_v27 }
  0x30   :  { %v307_v29 = vld [vmem:[%s19815_s1 + $0x720] sm:$0xff]  ;;  %3213 = vmatpush2.bf16.msra.mxu1 %v12672_v31  ;;  %v14658_v31 = vpack.c.bf16 %v70_v22, %v70_v22 }
  0x31   :  { %v12665_v33 = vcombine.high %v303_v28, %v307_v29  ;;  %v167_v34 = vld [vmem:[%s19815_s1 + $0x2c0] sm:$0xff]  ;;  %3173 = vmatprep.subr.bf16.mxu0 %v12537_v32  ;;  %v12664_v39 = vcombine.low %v303_v28, %v307_v29  ;;  %v14649_v28 = vpack.c.bf16 %v68_v19, %v68_v19 }
  0x32   :  { %v171_v35 = vld [vmem:[%s19815_s1 + $0x2e0] sm:$0xff]  ;;  %3174 = vmatpush2.bf16.msra.mxu0 %v12536_v38 }
  0x33   :  { %v295_v36 = vld [vmem:[%s19815_s1 + $0x6c0] sm:$0xff]  ;;  %v12529_v40 = vcombine.high %v167_v34, %v171_v35  ;;  %3214 = vmatprep.subr.bf16.mxu1 %v12665_v33  ;;  %v12528_v46 = vcombine.low %v167_v34, %v171_v35 }
  0x34   :  { %v299_v37 = vld [vmem:[%s19815_s1 + $0x6e0] sm:$0xff]  ;;  %3215 = vmatpush2.bf16.msra.mxu1 %v12664_v39 }
  0x35   :  { %v12657_v41 = vcombine.high %v295_v36, %v299_v37  ;;  %v159_v42 = vld [vmem:[%s19815_s1 + $0x280] sm:$0xff]  ;;  %3175 = vmatprep.subr.bf16.mxu0 %v12529_v40  ;;  %v12656_v47 = vcombine.low %v295_v36, %v299_v37 }
  0x36   :  { %v163_v43 = vld [vmem:[%s19815_s1 + $0x2a0] sm:$0xff]  ;;  %3176 = vmatpush2.bf16.msra.mxu0 %v12528_v46 }
  0x37   :  { %v287_v44 = vld [vmem:[%s19815_s1 + $0x680] sm:$0xff]  ;;  %v12521_v48 = vcombine.high %v159_v42, %v163_v43  ;;  %3216 = vmatprep.subr.bf16.mxu1 %v12657_v41  ;;  %v12520_v54 = vcombine.low %v159_v42, %v163_v43 }
  0x38   :  { %v291_v45 = vld [vmem:[%s19815_s1 + $0x6a0] sm:$0xff]  ;;  %3217 = vmatpush2.bf16.msra.mxu1 %v12656_v47 }
  0x39   :  { %v12649_v49 = vcombine.high %v287_v44, %v291_v45  ;;  %v151_v50 = vld [vmem:[%s19815_s1 + $0x240] sm:$0xff]  ;;  %3177 = vmatprep.subr.bf16.mxu0 %v12521_v48  ;;  %v12648_v55 = vcombine.low %v287_v44, %v291_v45 }
  0x3a   :  { %v155_v51 = vld [vmem:[%s19815_s1 + $0x260] sm:$0xff]  ;;  %3178 = vmatpush2.bf16.msra.mxu0 %v12520_v54 }
  0x3b   :  { %v279_v52 = vld [vmem:[%s19815_s1 + $0x640] sm:$0xff]  ;;  %v12513_v56 = vcombine.high %v151_v50, %v155_v51  ;;  %3218 = vmatprep.subr.bf16.mxu1 %v12649_v49  ;;  %v12512_v0 = vcombine.low %v151_v50, %v155_v51 }
  0x3c   :  { %v283_v53 = vld [vmem:[%s19815_s1 + $0x660] sm:$0xff]  ;;  %3219 = vmatpush2.bf16.msra.mxu1 %v12648_v55 }
  0x3d   :  { %v12641_v57 = vcombine.high %v279_v52, %v283_v53  ;;  %v143_v60 = vld [vmem:[%s19815_s1 + $0x200] sm:$0xff]  ;;  %3179 = vmatprep.subr.bf16.mxu0 %v12513_v56  ;;  %v12640_v1 = vcombine.low %v279_v52, %v283_v53 }
  0x3e   :  { %v147_v61 = vld [vmem:[%s19815_s1 + $0x220] sm:$0xff]  ;;  %3180 = vmatpush2.bf16.msra.mxu0 %v12512_v0 }
  0x3f   :  { %v271_v62 = vld [vmem:[%s19815_s1 + $0x600] sm:$0xff]  ;;  %v12505_v2 = vcombine.high %v143_v60, %v147_v61  ;;  %3220 = vmatprep.subr.bf16.mxu1 %v12641_v57  ;;  %v12504_v8 = vcombine.low %v143_v60, %v147_v61 }
  0x40   :  { %v275_v63 = vld [vmem:[%s19815_s1 + $0x620] sm:$0xff]  ;;  %3221 = vmatpush2.bf16.msra.mxu1 %v12640_v1 }
  0x41   :  { %v12633_v3 = vcombine.high %v271_v62, %v275_v63  ;;  %v391_v4 = vld [vmem:[%s19815_s1 + $0x9c0] sm:$0xff]  ;;  %3181 = vmatprep.subr.bf16.mxu0 %v12505_v2  ;;  %v12632_v10 = vcombine.low %v271_v62, %v275_v63 }
  0x42   :  { %v395_v5 = vld [vmem:[%s19815_s1 + $0x9e0] sm:$0xff]  ;;  %3182 = vmatpush2.bf16.msra.mxu0 %v12504_v8 }
  0x43   :  { %v519_v6 = vld [vmem:[%s19815_s1 + $0xdc0] sm:$0xff]  ;;  %v12753_v12 = vcombine.high %v391_v4, %v395_v5  ;;  %3222 = vmatprep.subr.bf16.mxu1 %v12633_v3  ;;  %v12752_v21 = vcombine.low %v391_v4, %v395_v5 }
  0x44   :  { %v523_v7 = vld [vmem:[%s19815_s1 + $0xde0] sm:$0xff]  ;;  %3223 = vmatpush2.bf16.msra.mxu1 %v12632_v10 }
  0x45   :  { %v63_v9 = vld [vmem:[%s19816_s0] sm:$0xff]  ;;  %v12881_v13 = vcombine.high %v519_v6, %v523_v7  ;;  %3233 = vmatprep.subr.bf16.mxu0 %v12753_v12  ;;  %v12880_v23 = vcombine.low %v519_v6, %v523_v7 }
  0x46   :  { %v383_v14 = vld [vmem:[%s19815_s1 + $0x980] sm:$0xff]  ;;  %v14627_v16 = vpack.c.bf16 %v63_v9, %v63_v9 }
  0x47   :  { %v387_v15 = vld [vmem:[%s19815_s1 + $0x9a0] sm:$0xff]  ;;  %3274 = vmatprep.subr.bf16.mxu1 %v12881_v13  ;;  %3225 = vmatmul.mubr.bf16.vlgmr.msra.gmra.mxu1 %v14638_v20 }
  0x48   :  { %v511_v17 = vld [vmem:[%s19815_s1 + $0xd80] sm:$0xff]  ;;  %v12745_v24 = vcombine.high %v383_v14, %v387_v15  ;;  %3184 = vmatmul.mubr.bf16.vlgmr.msra.gmra.mxu0 %v14627_v16  ;;  %v12744_v32 = vcombine.low %v383_v14, %v387_v15  ;;  %3275 = vmatpush1.bf16.msra.mxu1 %v12880_v23 }
  0x49   :  { %v515_v18 = vld [vmem:[%s19815_s1 + $0xda0] sm:$0xff]  ;;  %3234 = vmatpush1.bf16.msra.mxu0 %v12752_v21  ;;  %3265 = vmatprep.mubr.bf16.mxu0 %v14649_v28 }
  0x4a   :  { %v12873_v25 = vcombine.high %v511_v17, %v515_v18  ;;  %v375_v26 = vld [vmem:[%s19815_s1 + $0x940] sm:$0xff]  ;;  %3235 = vmatprep.subr.bf16.mxu0 %v12745_v24  ;;  %v12872_v33 = vcombine.low %v511_v17, %v515_v18  ;;  %3306 = vmatprep.mubr.bf16.mxu1 %v14658_v31 }
  0x4b   :  { %v379_v27 = vld [vmem:[%s19815_s1 + $0x960] sm:$0xff] }
  0x4c   :  { %v503_v29 = vld [vmem:[%s19815_s1 + $0xd40] sm:$0xff]  ;;  %v12737_v34 = vcombine.high %v375_v26, %v379_v27  ;;  %3276 = vmatprep.subr.bf16.mxu1 %v12873_v25  ;;  %v12736_v40 = vcombine.low %v375_v26, %v379_v27 }
  0x4d   :  { %v507_v30 = vld [vmem:[%s19815_s1 + $0xd60] sm:$0xff]  ;;  %3236 = vmatpush1.bf16.msra.mxu0 %v12744_v32  ;;  %3277 = vmatpush1.bf16.msra.mxu1 %v12872_v33 }
  0x4e   :  { %v12865_v35 = vcombine.high %v503_v29, %v507_v30  ;;  %v367_v36 = vld [vmem:[%s19815_s1 + $0x900] sm:$0xff]  ;;  %3237 = vmatprep.subr.bf16.mxu0 %v12737_v34  ;;  %v12864_v41 = vcombine.low %v503_v29, %v507_v30 }
  0x4f   :  { %v371_v37 = vld [vmem:[%s19815_s1 + $0x920] sm:$0xff] }
  0x50   :  { %v495_v38 = vld [vmem:[%s19815_s1 + $0xd00] sm:$0xff]  ;;  %v12729_v42 = vcombine.high %v367_v36, %v371_v37  ;;  %3278 = vmatprep.subr.bf16.mxu1 %v12865_v35  ;;  %v12728_v48 = vcombine.low %v367_v36, %v371_v37 }
  0x51   :  { %v499_v39 = vld [vmem:[%s19815_s1 + $0xd20] sm:$0xff]  ;;  %3238 = vmatpush1.bf16.msra.mxu0 %v12736_v40  ;;  %3279 = vmatpush1.bf16.msra.mxu1 %v12864_v41 }
  0x52   :  { %v12857_v43 = vcombine.high %v495_v38, %v499_v39  ;;  %v359_v44 = vld [vmem:[%s19815_s1 + $0x8c0] sm:$0xff]  ;;  %3239 = vmatprep.subr.bf16.mxu0 %v12729_v42  ;;  %v12856_v49 = vcombine.low %v495_v38, %v499_v39 }
  0x53   :  { %v363_v45 = vld [vmem:[%s19815_s1 + $0x8e0] sm:$0xff] }
  0x54   :  { %v487_v46 = vld [vmem:[%s19815_s1 + $0xcc0] sm:$0xff]  ;;  %v12721_v50 = vcombine.high %v359_v44, %v363_v45  ;;  %3280 = vmatprep.subr.bf16.mxu1 %v12857_v43  ;;  %v12720_v56 = vcombine.low %v359_v44, %v363_v45 }
  0x55   :  { %v491_v47 = vld [vmem:[%s19815_s1 + $0xce0] sm:$0xff]  ;;  %3240 = vmatpush1.bf16.msra.mxu0 %v12728_v48  ;;  %3281 = vmatpush1.bf16.msra.mxu1 %v12856_v49 }
  0x56   :  { %v12849_v51 = vcombine.high %v487_v46, %v491_v47  ;;  %v351_v52 = vld [vmem:[%s19815_s1 + $0x880] sm:$0xff]  ;;  %3241 = vmatprep.subr.bf16.mxu0 %v12721_v50  ;;  %v12848_v57 = vcombine.low %v487_v46, %v491_v47 }
  0x57   :  { %v355_v53 = vld [vmem:[%s19815_s1 + $0x8a0] sm:$0xff] }
  0x58   :  { %v479_v54 = vld [vmem:[%s19815_s1 + $0xc80] sm:$0xff]  ;;  %v12713_v60 = vcombine.high %v351_v52, %v355_v53  ;;  %3282 = vmatprep.subr.bf16.mxu1 %v12849_v51  ;;  %v12712_v2 = vcombine.low %v351_v52, %v355_v53 }
  0x59   :  { %v483_v55 = vld [vmem:[%s19815_s1 + $0xca0] sm:$0xff]  ;;  %3242 = vmatpush1.bf16.msra.mxu0 %v12720_v56  ;;  %3283 = vmatpush1.bf16.msra.mxu1 %v12848_v57 }
  0x5a   :  { %v12841_v61 = vcombine.high %v479_v54, %v483_v55  ;;  %v343_v62 = vld [vmem:[%s19815_s1 + $0x840] sm:$0xff]  ;;  %3243 = vmatprep.subr.bf16.mxu0 %v12713_v60  ;;  %v12840_v3 = vcombine.low %v479_v54, %v483_v55 }
  0x5b   :  { %v347_v63 = vld [vmem:[%s19815_s1 + $0x860] sm:$0xff] }
  0x5c   :  { %v471_v0 = vld [vmem:[%s19815_s1 + $0xc40] sm:$0xff]  ;;  %v12705_v4 = vcombine.high %v343_v62, %v347_v63  ;;  %3284 = vmatprep.subr.bf16.mxu1 %v12841_v61  ;;  %v12704_v10 = vcombine.low %v343_v62, %v347_v63 }
  0x5d   :  { %v475_v1 = vld [vmem:[%s19815_s1 + $0xc60] sm:$0xff]  ;;  %3244 = vmatpush1.bf16.msra.mxu0 %v12712_v2  ;;  %3285 = vmatpush1.bf16.msra.mxu1 %v12840_v3 }
  0x5e   :  { %v12833_v5 = vcombine.high %v471_v0, %v475_v1  ;;  %v335_v6 = vld [vmem:[%s19815_s1 + $0x800] sm:$0xff]  ;;  %3245 = vmatprep.subr.bf16.mxu0 %v12705_v4  ;;  %v12832_v11 = vcombine.low %v471_v0, %v475_v1 }
  0x5f   :  { %v339_v7 = vld [vmem:[%s19815_s1 + $0x820] sm:$0xff] }
  0x60   :  { %v463_v8 = vld [vmem:[%s19815_s1 + $0xc00] sm:$0xff]  ;;  %v12697_v12 = vcombine.high %v335_v6, %v339_v7  ;;  %3286 = vmatprep.subr.bf16.mxu1 %v12833_v5  ;;  %v12696_v19 = vcombine.low %v335_v6, %v339_v7 }
  0x61   :  { %v467_v9 = vld [vmem:[%s19815_s1 + $0xc20] sm:$0xff]  ;;  %3246 = vmatpush1.bf16.msra.mxu0 %v12704_v10  ;;  %3287 = vmatpush1.bf16.msra.mxu1 %v12832_v11 }
  0x62   :  { %v12825_v13 = vcombine.high %v463_v8, %v467_v9  ;;  %v455_v14 = vld [vmem:[%s19815_s1 + $0xbc0] sm:$0xff]  ;;  %3247 = vmatprep.subr.bf16.mxu0 %v12697_v12  ;;  %v12824_v21 = vcombine.low %v463_v8, %v467_v9 }
  0x63   :  { %v459_v15 = vld [vmem:[%s19815_s1 + $0xbe0] sm:$0xff] }
  0x64   :  { %v583_v17 = vld [vmem:[%s19815_s1 + $0xfc0] sm:$0xff]  ;;  %v12817_v22 = vcombine.high %v455_v14, %v459_v15  ;;  %3288 = vmatprep.subr.bf16.mxu1 %v12825_v13  ;;  %v12816_v29 = vcombine.low %v455_v14, %v459_v15 }
  0x65   :  { %v587_v18 = vld [vmem:[%s19815_s1 + $0xfe0] sm:$0xff]  ;;  %3248 = vmatpush1.bf16.msra.mxu0 %v12696_v19  ;;  %3289 = vmatpush1.bf16.msra.mxu1 %v12824_v21 }
  0x66   :  { %v12945_v23 = vcombine.high %v583_v17, %v587_v18  ;;  %v447_v24 = vld [vmem:[%s19815_s1 + $0xb80] sm:$0xff]  ;;  %3249 = vmatprep.subr.bf16.mxu0 %v12817_v22  ;;  %v12944_v30 = vcombine.low %v583_v17, %v587_v18  ;;  %v136_v22 = vld [vmem:[%s19815_s1 + $0x1c8] sm:$0xff] }
  0x67   :  { %v451_v25 = vld [vmem:[%s19815_s1 + $0xba0] sm:$0xff] }
  0x68   :  { %v575_v26 = vld [vmem:[%s19815_s1 + $0xf80] sm:$0xff]  ;;  %v12809_v32 = vcombine.high %v447_v24, %v451_v25  ;;  %3290 = vmatprep.subr.bf16.mxu1 %v12945_v23  ;;  %v12808_v38 = vcombine.low %v447_v24, %v451_v25  ;;  %v140_v23 = vld [vmem:[%s19815_s1 + $0x1e8] sm:$0xff] }
  0x69   :  { %v579_v27 = vld [vmem:[%s19815_s1 + $0xfa0] sm:$0xff]  ;;  %3250 = vmatpush2.bf16.msra.mxu0 %v12816_v29  ;;  %3291 = vmatpush2.bf16.msra.mxu1 %v12944_v30  ;;  %v264_v24 = vld [vmem:[%s19815_s1 + $0x5c8] sm:$0xff]  ;;  %v69_v30 = vld [vmem:[%s19816_s0 + $0x30] sm:$0xff] }
  0x6a   :  { %v12937_v33 = vcombine.high %v575_v26, %v579_v27  ;;  %v439_v34 = vld [vmem:[%s19815_s1 + $0xb40] sm:$0xff]  ;;  %3251 = vmatprep.subr.bf16.mxu0 %v12809_v32  ;;  %v12936_v39 = vcombine.low %v575_v26, %v579_v27  ;;  %v268_v25 = vld [vmem:[%s19815_s1 + $0x5e8] sm:$0xff]  ;;  %v12499_v32 = vcombine.high %v136_v22, %v140_v23 }
  0x6b   :  { %v443_v35 = vld [vmem:[%s19815_s1 + $0xb60] sm:$0xff] }
  0x6c   :  { %v567_v36 = vld [vmem:[%s19815_s1 + $0xf40] sm:$0xff]  ;;  %v12801_v40 = vcombine.high %v439_v34, %v443_v35  ;;  %3292 = vmatprep.subr.bf16.mxu1 %v12937_v33  ;;  %v12800_v46 = vcombine.low %v439_v34, %v443_v35  ;;  %v12627_v33 = vcombine.high %v264_v24, %v268_v25  ;;  %v128_v34 = vld [vmem:[%s19815_s1 + $0x188] sm:$0xff] }
  0x6d   :  { %v571_v37 = vld [vmem:[%s19815_s1 + $0xf60] sm:$0xff]  ;;  %3252 = vmatpush2.bf16.msra.mxu0 %v12808_v38  ;;  %3293 = vmatpush2.bf16.msra.mxu1 %v12936_v39  ;;  %v132_v35 = vld [vmem:[%s19815_s1 + $0x1a8] sm:$0xff]  ;;  %v14851_v39 = vpack.c.bf16 %v69_v30, %v69_v30 }
  0x6e   :  { %v12929_v41 = vcombine.high %v567_v36, %v571_v37  ;;  %v431_v42 = vld [vmem:[%s19815_s1 + $0xb00] sm:$0xff]  ;;  %3253 = vmatprep.subr.bf16.mxu0 %v12801_v40  ;;  %v12928_v47 = vcombine.low %v567_v36, %v571_v37  ;;  %v256_v37 = vld [vmem:[%s19815_s1 + $0x588] sm:$0xff]  ;;  %v12498_v40 = vcombine.low %v136_v22, %v140_v23 }
  0x6f   :  { %v435_v43 = vld [vmem:[%s19815_s1 + $0xb20] sm:$0xff]  ;;  %v260_v38 = vld [vmem:[%s19815_s1 + $0x5a8] sm:$0xff] }
  0x70   :  { %v559_v44 = vld [vmem:[%s19815_s1 + $0xf00] sm:$0xff]  ;;  %v12793_v48 = vcombine.high %v431_v42, %v435_v43  ;;  %3294 = vmatprep.subr.bf16.mxu1 %v12929_v41  ;;  %v12792_v54 = vcombine.low %v431_v42, %v435_v43  ;;  %v12626_v41 = vcombine.low %v264_v24, %v268_v25  ;;  %v12491_v42 = vcombine.high %v128_v34, %v132_v35  ;;  %v80_v24 = vld [vmem:[%s19815_s1 + $0x8] sm:$0xff] }
  0x71   :  { %v563_v45 = vld [vmem:[%s19815_s1 + $0xf20] sm:$0xff]  ;;  %3254 = vmatpush2.bf16.msra.mxu0 %v12800_v46  ;;  %3295 = vmatpush2.bf16.msra.mxu1 %v12928_v47  ;;  %v12619_v43 = vcombine.high %v256_v37, %v260_v38  ;;  %v248_v46 = vld [vmem:[%s19815_s1 + $0x548] sm:$0xff] }
  0x72   :  { %v12921_v49 = vcombine.high %v559_v44, %v563_v45  ;;  %v423_v50 = vld [vmem:[%s19815_s1 + $0xac0] sm:$0xff]  ;;  %3255 = vmatprep.subr.bf16.mxu0 %v12793_v48  ;;  %v12920_v55 = vcombine.low %v559_v44, %v563_v45  ;;  %v120_v44 = vld [vmem:[%s19815_s1 + $0x148] sm:$0xff]  ;;  %v12490_v48 = vcombine.low %v128_v34, %v132_v35 }
  0x73   :  { %v427_v51 = vld [vmem:[%s19815_s1 + $0xae0] sm:$0xff]  ;;  %v124_v45 = vld [vmem:[%s19815_s1 + $0x168] sm:$0xff] }
  0x74   :  { %v551_v52 = vld [vmem:[%s19815_s1 + $0xec0] sm:$0xff]  ;;  %v12785_v56 = vcombine.high %v423_v50, %v427_v51  ;;  %3296 = vmatprep.subr.bf16.mxu1 %v12921_v49  ;;  %v12784_v0 = vcombine.low %v423_v50, %v427_v51  ;;  %v252_v47 = vld [vmem:[%s19815_s1 + $0x568] sm:$0xff]  ;;  %v12618_v49 = vcombine.low %v256_v37, %v260_v38  ;;  %v12483_v50 = vcombine.high %v120_v44, %v124_v45 }
  0x75   :  { %v555_v53 = vld [vmem:[%s19815_s1 + $0xee0] sm:$0xff]  ;;  %3256 = vmatpush2.bf16.msra.mxu0 %v12792_v54  ;;  %3297 = vmatpush2.bf16.msra.mxu1 %v12920_v55  ;;  %v12611_v51 = vcombine.high %v248_v46, %v252_v47  ;;  %v240_v54 = vld [vmem:[%s19815_s1 + $0x508] sm:$0xff] }
  0x76   :  { %v12913_v57 = vcombine.high %v551_v52, %v555_v53  ;;  %v415_v60 = vld [vmem:[%s19815_s1 + $0xa80] sm:$0xff]  ;;  %3257 = vmatprep.subr.bf16.mxu0 %v12785_v56  ;;  %v12912_v1 = vcombine.low %v551_v52, %v555_v53  ;;  %v112_v52 = vld [vmem:[%s19815_s1 + $0x108] sm:$0xff]  ;;  %v12482_v56 = vcombine.low %v120_v44, %v124_v45 }
  0x77   :  { %v419_v61 = vld [vmem:[%s19815_s1 + $0xaa0] sm:$0xff]  ;;  %v116_v53 = vld [vmem:[%s19815_s1 + $0x128] sm:$0xff] }
  0x78   :  { %v543_v62 = vld [vmem:[%s19815_s1 + $0xe80] sm:$0xff]  ;;  %v12777_v2 = vcombine.high %v415_v60, %v419_v61  ;;  %3298 = vmatprep.subr.bf16.mxu1 %v12913_v57  ;;  %v12776_v8 = vcombine.low %v415_v60, %v419_v61  ;;  %v244_v55 = vld [vmem:[%s19815_s1 + $0x528] sm:$0xff]  ;;  %v12610_v57 = vcombine.low %v248_v46, %v252_v47  ;;  %v12475_v60 = vcombine.high %v112_v52, %v116_v53 }
  0x79   :  { %v547_v63 = vld [vmem:[%s19815_s1 + $0xea0] sm:$0xff]  ;;  %3258 = vmatpush2.bf16.msra.mxu0 %v12784_v0  ;;  %3299 = vmatpush2.bf16.msra.mxu1 %v12912_v1  ;;  %v12603_v61 = vcombine.high %v240_v54, %v244_v55  ;;  %v232_v0 = vld [vmem:[%s19815_s1 + $0x4c8] sm:$0xff] }
  0x7a   :  { %v12905_v3 = vcombine.high %v543_v62, %v547_v63  ;;  %v407_v4 = vld [vmem:[%s19815_s1 + $0xa40] sm:$0xff]  ;;  %3259 = vmatprep.subr.bf16.mxu0 %v12777_v2  ;;  %v12904_v9 = vcombine.low %v543_v62, %v547_v63  ;;  %v104_v62 = vld [vmem:[%s19815_s1 + $0xc8] sm:$0xff]  ;;  %v12474_v2 = vcombine.low %v112_v52, %v116_v53 }
  0x7b   :  { %v411_v5 = vld [vmem:[%s19815_s1 + $0xa60] sm:$0xff]  ;;  %v108_v63 = vld [vmem:[%s19815_s1 + $0xe8] sm:$0xff] }
  0x7c   :  { %v535_v6 = vld [vmem:[%s19815_s1 + $0xe40] sm:$0xff]  ;;  %v12769_v10 = vcombine.high %v407_v4, %v411_v5  ;;  %3300 = vmatprep.subr.bf16.mxu1 %v12905_v3  ;;  %v12768_v17 = vcombine.low %v407_v4, %v411_v5  ;;  %v236_v1 = vld [vmem:[%s19815_s1 + $0x4e8] sm:$0xff]  ;;  %v12602_v3 = vcombine.low %v240_v54, %v244_v55  ;;  %v12467_v4 = vcombine.high %v104_v62, %v108_v63 }
  0x7d   :  { %v539_v7 = vld [vmem:[%s19815_s1 + $0xe60] sm:$0xff]  ;;  %3260 = vmatpush2.bf16.msra.mxu0 %v12776_v8  ;;  %3301 = vmatpush2.bf16.msra.mxu1 %v12904_v9  ;;  %v12595_v5 = vcombine.high %v232_v0, %v236_v1  ;;  %v224_v8 = vld [vmem:[%s19815_s1 + $0x488] sm:$0xff] }
  0x7e   :  { %v12897_v11 = vcombine.high %v535_v6, %v539_v7  ;;  %v399_v12 = vld [vmem:[%s19815_s1 + $0xa00] sm:$0xff]  ;;  %3261 = vmatprep.subr.bf16.mxu0 %v12769_v10  ;;  %v12896_v18 = vcombine.low %v535_v6, %v539_v7  ;;  %v96_v6 = vld [vmem:[%s19815_s1 + $0x88] sm:$0xff]  ;;  %v12466_v10 = vcombine.low %v104_v62, %v108_v63 }
  0x7f   :  { %v403_v13 = vld [vmem:[%s19815_s1 + $0xa20] sm:$0xff]  ;;  %v100_v7 = vld [vmem:[%s19815_s1 + $0xa8] sm:$0xff] }
  0x80   :  { %v527_v14 = vld [vmem:[%s19815_s1 + $0xe00] sm:$0xff]  ;;  %v12761_v19 = vcombine.high %v399_v12, %v403_v13  ;;  %3302 = vmatprep.subr.bf16.mxu1 %v12897_v11  ;;  %v12760_v26 = vcombine.low %v399_v12, %v403_v13  ;;  %v228_v9 = vld [vmem:[%s19815_s1 + $0x4a8] sm:$0xff]  ;;  %v12594_v11 = vcombine.low %v232_v0, %v236_v1  ;;  %v12459_v12 = vcombine.high %v96_v6, %v100_v7 }
  0x81   :  { %v531_v15 = vld [vmem:[%s19815_s1 + $0xe20] sm:$0xff]  ;;  %3262 = vmatpush2.bf16.msra.mxu0 %v12768_v17  ;;  %3303 = vmatpush2.bf16.msra.mxu1 %v12896_v18  ;;  %v12587_v13 = vcombine.high %v224_v8, %v228_v9  ;;  %v216_v17 = vld [vmem:[%s19815_s1 + $0x448] sm:$0xff] }
  0x82   :  { %v12889_v21 = vcombine.high %v527_v14, %v531_v15  ;;  %v67_v27 = vld [vmem:[%s19816_s0 + $0x20] sm:$0xff]  ;;  %3263 = vmatprep.subr.bf16.mxu0 %v12761_v19  ;;  %v12888_v29 = vcombine.low %v527_v14, %v531_v15  ;;  %v88_v14 = vld [vmem:[%s19815_s1 + $0x48] sm:$0xff]  ;;  %v12458_v19 = vcombine.low %v96_v6, %v100_v7 }
  0x83   :  { %v14843_v36 = vpack.c.bf16 %v67_v27, %v67_v27  ;;  %v92_v15 = vld [vmem:[%s19815_s1 + $0x68] sm:$0xff] }
  0x84   :  { %3304 = vmatprep.subr.bf16.mxu1 %v12889_v21  ;;  %v220_v18 = vld [vmem:[%s19815_s1 + $0x468] sm:$0xff]  ;;  %v12586_v21 = vcombine.low %v224_v8, %v228_v9  ;;  %v12451_v22 = vcombine.high %v88_v14, %v92_v15 }
  0x85   :  { %3264 = vmatpush2.bf16.msra.mxu0 %v12760_v26  ;;  %3305 = vmatpush2.bf16.msra.mxu1 %v12888_v29  ;;  %v12579_v23 = vcombine.high %v216_v17, %v220_v18  ;;  %v84_v25 = vld [vmem:[%s19815_s1 + $0x28] sm:$0xff]  ;;  %v12450_v29 = vcombine.low %v88_v14, %v92_v15  ;;  %v12578_v30 = vcombine.low %v216_v17, %v220_v18 }
  0x86   :  { %3315 = vmatprep.subr.bf16.mxu0 %v12499_v32  ;;  %3356 = vmatprep.subr.bf16.mxu1 %v12627_v33  ;;  %v208_v26 = vld [vmem:[%s19815_s1 + $0x408] sm:$0xff]  ;;  %v12443_v32 = vcombine.high %v80_v24, %v84_v25 }
  0x87   :  { %v212_v27 = vld [vmem:[%s19815_s1 + $0x428] sm:$0xff] }
  0x88   :  { %3266 = vmatmul.mubr.bf16.vlgmr.msra.gmra.mxu0 %v14843_v36  ;;  %3307 = vmatmul.mubr.bf16.vlgmr.msra.gmra.mxu1 %v14851_v39  ;;  %v12571_v33 = vcombine.high %v208_v26, %v212_v27  ;;  %v200_v34 = vld [vmem:[%s19815_s1 + $0x3c8] sm:$0xff] }
  0x89   :  { %3316 = vmatpush1.bf16.msra.mxu0 %v12498_v40  ;;  %3357 = vmatpush1.bf16.msra.mxu1 %v12626_v41  ;;  %v204_v35 = vld [vmem:[%s19815_s1 + $0x3e8] sm:$0xff]  ;;  %v12442_v40 = vcombine.low %v80_v24, %v84_v25  ;;  %v12570_v41 = vcombine.low %v208_v26, %v212_v27 }
  0x8a   :  { %3317 = vmatprep.subr.bf16.mxu0 %v12491_v42  ;;  %3358 = vmatprep.subr.bf16.mxu1 %v12619_v43  ;;  %v328_v37 = vld [vmem:[%s19815_s1 + $0x7c8] sm:$0xff]  ;;  %v12563_v42 = vcombine.high %v200_v34, %v204_v35 }
  0x8b   :  { %3347 = vmatprep.mubr.bf16.mxu0 %v14495_v58  ;;  %3388 = vmatprep.mubr.bf16.mxu1 %v14497_v59  ;;  %v332_v38 = vld [vmem:[%s19815_s1 + $0x7e8] sm:$0xff] }
  0x8c   :  { %v12691_v43 = vcombine.high %v328_v37, %v332_v38  ;;  %v192_v44 = vld [vmem:[%s19815_s1 + $0x388] sm:$0xff] }
  0x8d   :  { %3318 = vmatpush1.bf16.msra.mxu0 %v12490_v48  ;;  %3359 = vmatpush1.bf16.msra.mxu1 %v12618_v49  ;;  %v196_v45 = vld [vmem:[%s19815_s1 + $0x3a8] sm:$0xff]  ;;  %v12562_v48 = vcombine.low %v200_v34, %v204_v35  ;;  %v12690_v49 = vcombine.low %v328_v37, %v332_v38 }
  0x8e   :  { %3319 = vmatprep.subr.bf16.mxu0 %v12483_v50  ;;  %3360 = vmatprep.subr.bf16.mxu1 %v12611_v51  ;;  %v320_v46 = vld [vmem:[%s19815_s1 + $0x788] sm:$0xff]  ;;  %v12555_v50 = vcombine.high %v192_v44, %v196_v45 }
  0x8f   :  { %v324_v47 = vld [vmem:[%s19815_s1 + $0x7a8] sm:$0xff] }
  0x90   :  { %v12683_v51 = vcombine.high %v320_v46, %v324_v47  ;;  %v184_v52 = vld [vmem:[%s19815_s1 + $0x348] sm:$0xff] }
  0x91   :  { %3320 = vmatpush1.bf16.msra.mxu0 %v12482_v56  ;;  %3361 = vmatpush1.bf16.msra.mxu1 %v12610_v57  ;;  %v188_v53 = vld [vmem:[%s19815_s1 + $0x368] sm:$0xff]  ;;  %v12554_v56 = vcombine.low %v192_v44, %v196_v45  ;;  %v12682_v57 = vcombine.low %v320_v46, %v324_v47 }
  0x92   :  { %3321 = vmatprep.subr.bf16.mxu0 %v12475_v60  ;;  %3362 = vmatprep.subr.bf16.mxu1 %v12603_v61  ;;  %v312_v54 = vld [vmem:[%s19815_s1 + $0x748] sm:$0xff]  ;;  %v12547_v60 = vcombine.high %v184_v52, %v188_v53 }
  0x93   :  { %v316_v55 = vld [vmem:[%s19815_s1 + $0x768] sm:$0xff] }
  0x94   :  { %v12675_v61 = vcombine.high %v312_v54, %v316_v55  ;;  %v176_v62 = vld [vmem:[%s19815_s1 + $0x308] sm:$0xff] }
  0x95   :  { %3322 = vmatpush1.bf16.msra.mxu0 %v12474_v2  ;;  %3363 = vmatpush1.bf16.msra.mxu1 %v12602_v3  ;;  %v180_v63 = vld [vmem:[%s19815_s1 + $0x328] sm:$0xff]  ;;  %v12546_v2 = vcombine.low %v184_v52, %v188_v53  ;;  %v12674_v3 = vcombine.low %v312_v54, %v316_v55 }
  0x96   :  { %3323 = vmatprep.subr.bf16.mxu0 %v12467_v4  ;;  %3364 = vmatprep.subr.bf16.mxu1 %v12595_v5  ;;  %v304_v0 = vld [vmem:[%s19815_s1 + $0x708] sm:$0xff]  ;;  %v12539_v4 = vcombine.high %v176_v62, %v180_v63 }
  0x97   :  { %v308_v1 = vld [vmem:[%s19815_s1 + $0x728] sm:$0xff] }
  0x98   :  { %v12667_v5 = vcombine.high %v304_v0, %v308_v1  ;;  %v168_v6 = vld [vmem:[%s19815_s1 + $0x2c8] sm:$0xff] }
  0x99   :  { %3324 = vmatpush1.bf16.msra.mxu0 %v12466_v10  ;;  %3365 = vmatpush1.bf16.msra.mxu1 %v12594_v11  ;;  %v172_v7 = vld [vmem:[%s19815_s1 + $0x2e8] sm:$0xff]  ;;  %v12538_v10 = vcombine.low %v176_v62, %v180_v63  ;;  %v12666_v11 = vcombine.low %v304_v0, %v308_v1 }
  0x9a   :  { %3325 = vmatprep.subr.bf16.mxu0 %v12459_v12  ;;  %3366 = vmatprep.subr.bf16.mxu1 %v12587_v13  ;;  %v296_v8 = vld [vmem:[%s19815_s1 + $0x6c8] sm:$0xff]  ;;  %v12531_v12 = vcombine.high %v168_v6, %v172_v7 }
  0x9b   :  { %v300_v9 = vld [vmem:[%s19815_s1 + $0x6e8] sm:$0xff] }
  0x9c   :  { %v12659_v13 = vcombine.high %v296_v8, %v300_v9  ;;  %v160_v14 = vld [vmem:[%s19815_s1 + $0x288] sm:$0xff] }
  0x9d   :  { %3326 = vmatpush1.bf16.msra.mxu0 %v12458_v19  ;;  %3367 = vmatpush1.bf16.msra.mxu1 %v12586_v21  ;;  %v164_v15 = vld [vmem:[%s19815_s1 + $0x2a8] sm:$0xff]  ;;  %v12530_v19 = vcombine.low %v168_v6, %v172_v7  ;;  %v12658_v21 = vcombine.low %v296_v8, %v300_v9 }
  0x9e   :  { %3327 = vmatprep.subr.bf16.mxu0 %v12451_v22  ;;  %3368 = vmatprep.subr.bf16.mxu1 %v12579_v23  ;;  %v288_v17 = vld [vmem:[%s19815_s1 + $0x688] sm:$0xff]  ;;  %v12523_v22 = vcombine.high %v160_v14, %v164_v15 }
  0x9f   :  { %v292_v18 = vld [vmem:[%s19815_s1 + $0x6a8] sm:$0xff] }
  0xa0   :  { %v12651_v23 = vcombine.high %v288_v17, %v292_v18  ;;  %v152_v24 = vld [vmem:[%s19815_s1 + $0x248] sm:$0xff] }
  0xa1   :  { %3328 = vmatpush1.bf16.msra.mxu0 %v12450_v29  ;;  %3369 = vmatpush1.bf16.msra.mxu1 %v12578_v30  ;;  %v156_v25 = vld [vmem:[%s19815_s1 + $0x268] sm:$0xff]  ;;  %v12522_v29 = vcombine.low %v160_v14, %v164_v15  ;;  %v12650_v30 = vcombine.low %v288_v17, %v292_v18 }
  0xa2   :  { %3329 = vmatprep.subr.bf16.mxu0 %v12443_v32  ;;  %3370 = vmatprep.subr.bf16.mxu1 %v12571_v33  ;;  %v280_v26 = vld [vmem:[%s19815_s1 + $0x648] sm:$0xff]  ;;  %v12515_v32 = vcombine.high %v152_v24, %v156_v25 }
  0xa3   :  { %v284_v27 = vld [vmem:[%s19815_s1 + $0x668] sm:$0xff] }
  0xa4   :  { %v12643_v33 = vcombine.high %v280_v26, %v284_v27  ;;  %v144_v34 = vld [vmem:[%s19815_s1 + $0x208] sm:$0xff] }
  0xa5   :  { %3330 = vmatpush1.bf16.msra.mxu0 %v12442_v40  ;;  %3371 = vmatpush1.bf16.msra.mxu1 %v12570_v41  ;;  %v148_v35 = vld [vmem:[%s19815_s1 + $0x228] sm:$0xff]  ;;  %v12514_v40 = vcombine.low %v152_v24, %v156_v25  ;;  %v12642_v41 = vcombine.low %v280_v26, %v284_v27 }
  0xa6   :  { %3331 = vmatprep.subr.bf16.mxu0 %v12563_v42  ;;  %3372 = vmatprep.subr.bf16.mxu1 %v12691_v43  ;;  %v272_v37 = vld [vmem:[%s19815_s1 + $0x608] sm:$0xff]  ;;  %v12507_v42 = vcombine.high %v144_v34, %v148_v35 }
  0xa7   :  { %v276_v38 = vld [vmem:[%s19815_s1 + $0x628] sm:$0xff] }
  0xa8   :  { %v12635_v43 = vcombine.high %v272_v37, %v276_v38  ;;  %v392_v44 = vld [vmem:[%s19815_s1 + $0x9c8] sm:$0xff] }
  0xa9   :  { %3332 = vmatpush2.bf16.msra.mxu0 %v12562_v48  ;;  %3373 = vmatpush2.bf16.msra.mxu1 %v12690_v49  ;;  %v396_v45 = vld [vmem:[%s19815_s1 + $0x9e8] sm:$0xff]  ;;  %v12506_v48 = vcombine.low %v144_v34, %v148_v35  ;;  %v12634_v49 = vcombine.low %v272_v37, %v276_v38 }
  0xaa   :  { %3333 = vmatprep.subr.bf16.mxu0 %v12555_v50  ;;  %3374 = vmatprep.subr.bf16.mxu1 %v12683_v51  ;;  %v520_v46 = vld [vmem:[%s19815_s1 + $0xdc8] sm:$0xff]  ;;  %v12755_v50 = vcombine.high %v392_v44, %v396_v45 }
  0xab   :  { %v524_v47 = vld [vmem:[%s19815_s1 + $0xde8] sm:$0xff] }
  0xac   :  { %v12883_v51 = vcombine.high %v520_v46, %v524_v47  ;;  %v384_v52 = vld [vmem:[%s19815_s1 + $0x988] sm:$0xff] }
  0xad   :  { %3334 = vmatpush2.bf16.msra.mxu0 %v12554_v56  ;;  %3375 = vmatpush2.bf16.msra.mxu1 %v12682_v57  ;;  %v388_v53 = vld [vmem:[%s19815_s1 + $0x9a8] sm:$0xff]  ;;  %v12754_v56 = vcombine.low %v392_v44, %v396_v45  ;;  %v12882_v57 = vcombine.low %v520_v46, %v524_v47 }
  0xae   :  { %3335 = vmatprep.subr.bf16.mxu0 %v12547_v60  ;;  %3376 = vmatprep.subr.bf16.mxu1 %v12675_v61  ;;  %v512_v54 = vld [vmem:[%s19815_s1 + $0xd88] sm:$0xff]  ;;  %v12747_v60 = vcombine.high %v384_v52, %v388_v53 }
  0xaf   :  { %v516_v55 = vld [vmem:[%s19815_s1 + $0xda8] sm:$0xff] }
  0xb0   :  { %v12875_v61 = vcombine.high %v512_v54, %v516_v55  ;;  %v376_v62 = vld [vmem:[%s19815_s1 + $0x948] sm:$0xff] }
  0xb1   :  { %3336 = vmatpush2.bf16.msra.mxu0 %v12546_v2  ;;  %3377 = vmatpush2.bf16.msra.mxu1 %v12674_v3  ;;  %v380_v63 = vld [vmem:[%s19815_s1 + $0x968] sm:$0xff]  ;;  %v12746_v2 = vcombine.low %v384_v52, %v388_v53  ;;  %v12874_v3 = vcombine.low %v512_v54, %v516_v55 }
  0xb2   :  { %3337 = vmatprep.subr.bf16.mxu0 %v12539_v4  ;;  %3378 = vmatprep.subr.bf16.mxu1 %v12667_v5  ;;  %v504_v0 = vld [vmem:[%s19815_s1 + $0xd48] sm:$0xff]  ;;  %v12739_v4 = vcombine.high %v376_v62, %v380_v63 }
  0xb3   :  { %v508_v1 = vld [vmem:[%s19815_s1 + $0xd68] sm:$0xff] }
  0xb4   :  { %v12867_v5 = vcombine.high %v504_v0, %v508_v1  ;;  %v368_v6 = vld [vmem:[%s19815_s1 + $0x908] sm:$0xff] }
  0xb5   :  { %3338 = vmatpush2.bf16.msra.mxu0 %v12538_v10  ;;  %3379 = vmatpush2.bf16.msra.mxu1 %v12666_v11  ;;  %v372_v7 = vld [vmem:[%s19815_s1 + $0x928] sm:$0xff]  ;;  %v12738_v10 = vcombine.low %v376_v62, %v380_v63  ;;  %v12866_v11 = vcombine.low %v504_v0, %v508_v1 }
  0xb6   :  { %3339 = vmatprep.subr.bf16.mxu0 %v12531_v12  ;;  %3380 = vmatprep.subr.bf16.mxu1 %v12659_v13  ;;  %v496_v8 = vld [vmem:[%s19815_s1 + $0xd08] sm:$0xff]  ;;  %v12731_v12 = vcombine.high %v368_v6, %v372_v7 }
  0xb7   :  { %v500_v9 = vld [vmem:[%s19815_s1 + $0xd28] sm:$0xff] }
  0xb8   :  { %v12859_v13 = vcombine.high %v496_v8, %v500_v9  ;;  %v360_v14 = vld [vmem:[%s19815_s1 + $0x8c8] sm:$0xff] }
  0xb9   :  { %3340 = vmatpush2.bf16.msra.mxu0 %v12530_v19  ;;  %3381 = vmatpush2.bf16.msra.mxu1 %v12658_v21  ;;  %v364_v15 = vld [vmem:[%s19815_s1 + $0x8e8] sm:$0xff]  ;;  %v12730_v19 = vcombine.low %v368_v6, %v372_v7  ;;  %v12858_v21 = vcombine.low %v496_v8, %v500_v9 }
  0xba   :  { %3341 = vmatprep.subr.bf16.mxu0 %v12523_v22  ;;  %3382 = vmatprep.subr.bf16.mxu1 %v12651_v23  ;;  %v488_v17 = vld [vmem:[%s19815_s1 + $0xcc8] sm:$0xff]  ;;  %v12723_v22 = vcombine.high %v360_v14, %v364_v15 }
  0xbb   :  { %v492_v18 = vld [vmem:[%s19815_s1 + $0xce8] sm:$0xff] }
  0xbc   :  { %v12851_v23 = vcombine.high %v488_v17, %v492_v18  ;;  %v352_v24 = vld [vmem:[%s19815_s1 + $0x888] sm:$0xff] }
  0xbd   :  { %3342 = vmatpush2.bf16.msra.mxu0 %v12522_v29  ;;  %3383 = vmatpush2.bf16.msra.mxu1 %v12650_v30  ;;  %v356_v25 = vld [vmem:[%s19815_s1 + $0x8a8] sm:$0xff]  ;;  %v12722_v29 = vcombine.low %v360_v14, %v364_v15  ;;  %v12850_v30 = vcombine.low %v488_v17, %v492_v18 }
  0xbe   :  { %3343 = vmatprep.subr.bf16.mxu0 %v12515_v32  ;;  %3384 = vmatprep.subr.bf16.mxu1 %v12643_v33  ;;  %v480_v26 = vld [vmem:[%s19815_s1 + $0xc88] sm:$0xff]  ;;  %v12715_v32 = vcombine.high %v352_v24, %v356_v25 }
  0xbf   :  { %v484_v27 = vld [vmem:[%s19815_s1 + $0xca8] sm:$0xff] }
  0xc0   :  { %v12843_v33 = vcombine.high %v480_v26, %v484_v27  ;;  %v344_v34 = vld [vmem:[%s19815_s1 + $0x848] sm:$0xff] }
  0xc1   :  { %3344 = vmatpush2.bf16.msra.mxu0 %v12514_v40  ;;  %3385 = vmatpush2.bf16.msra.mxu1 %v12642_v41  ;;  %v348_v35 = vld [vmem:[%s19815_s1 + $0x868] sm:$0xff]  ;;  %v12714_v40 = vcombine.low %v352_v24, %v356_v25  ;;  %v12842_v41 = vcombine.low %v480_v26, %v484_v27 }
  0xc2   :  { %3345 = vmatprep.subr.bf16.mxu0 %v12507_v42  ;;  %3386 = vmatprep.subr.bf16.mxu1 %v12635_v43  ;;  %v472_v37 = vld [vmem:[%s19815_s1 + $0xc48] sm:$0xff]  ;;  %v12707_v42 = vcombine.high %v344_v34, %v348_v35 }
  0xc3   :  { %v476_v38 = vld [vmem:[%s19815_s1 + $0xc68] sm:$0xff] }
  0xc4   :  { %v12835_v43 = vcombine.high %v472_v37, %v476_v38  ;;  %v336_v44 = vld [vmem:[%s19815_s1 + $0x808] sm:$0xff] }
  0xc5   :  { %3346 = vmatpush2.bf16.msra.mxu0 %v12506_v48  ;;  %3387 = vmatpush2.bf16.msra.mxu1 %v12634_v49  ;;  %v340_v45 = vld [vmem:[%s19815_s1 + $0x828] sm:$0xff]  ;;  %v12706_v48 = vcombine.low %v344_v34, %v348_v35  ;;  %v12834_v49 = vcombine.low %v472_v37, %v476_v38 }
  0xc6   :  { %3397 = vmatprep.subr.bf16.mxu0 %v12755_v50  ;;  %3438 = vmatprep.subr.bf16.mxu1 %v12883_v51  ;;  %v464_v46 = vld [vmem:[%s19815_s1 + $0xc08] sm:$0xff]  ;;  %v12699_v50 = vcombine.high %v336_v44, %v340_v45 }
  0xc7   :  { %v468_v47 = vld [vmem:[%s19815_s1 + $0xc28] sm:$0xff] }
  0xc8   :  { %3348 = vmatmul.mubr.bf16.vlgmr.msra.gmra.mxu0 %v14627_v16  ;;  %3389 = vmatmul.mubr.bf16.vlgmr.msra.gmra.mxu1 %v14638_v20  ;;  %v12827_v51 = vcombine.high %v464_v46, %v468_v47  ;;  %v456_v52 = vld [vmem:[%s19815_s1 + $0xbc8] sm:$0xff] }
  0xc9   :  { %3398 = vmatpush1.bf16.msra.mxu0 %v12754_v56  ;;  %3439 = vmatpush1.bf16.msra.mxu1 %v12882_v57  ;;  %v460_v53 = vld [vmem:[%s19815_s1 + $0xbe8] sm:$0xff]  ;;  %v12698_v56 = vcombine.low %v336_v44, %v340_v45  ;;  %v12826_v57 = vcombine.low %v464_v46, %v468_v47 }
  0xca   :  { %3399 = vmatprep.subr.bf16.mxu0 %v12747_v60  ;;  %3440 = vmatprep.subr.bf16.mxu1 %v12875_v61  ;;  %v584_v54 = vld [vmem:[%s19815_s1 + $0xfc8] sm:$0xff]  ;;  %v12819_v60 = vcombine.high %v456_v52, %v460_v53 }
  0xcb   :  { %3429 = vmatprep.mubr.bf16.mxu0 %v14649_v28  ;;  %3470 = vmatprep.mubr.bf16.mxu1 %v14658_v31  ;;  %v588_v55 = vld [vmem:[%s19815_s1 + $0xfe8] sm:$0xff] }
  0xcc   :  { %v12947_v61 = vcombine.high %v584_v54, %v588_v55  ;;  %v448_v62 = vld [vmem:[%s19815_s1 + $0xb88] sm:$0xff] }
  0xcd   :  { %3400 = vmatpush1.bf16.msra.mxu0 %v12746_v2  ;;  %3441 = vmatpush1.bf16.msra.mxu1 %v12874_v3  ;;  %v452_v63 = vld [vmem:[%s19815_s1 + $0xba8] sm:$0xff]  ;;  %v12818_v2 = vcombine.low %v456_v52, %v460_v53  ;;  %v12946_v3 = vcombine.low %v584_v54, %v588_v55 }
  0xce   :  { %3401 = vmatprep.subr.bf16.mxu0 %v12739_v4  ;;  %3442 = vmatprep.subr.bf16.mxu1 %v12867_v5  ;;  %v576_v0 = vld [vmem:[%s19815_s1 + $0xf88] sm:$0xff]  ;;  %v12811_v4 = vcombine.high %v448_v62, %v452_v63 }
  0xcf   :  { %v580_v1 = vld [vmem:[%s19815_s1 + $0xfa8] sm:$0xff] }
  0xd0   :  { %v12939_v5 = vcombine.high %v576_v0, %v580_v1  ;;  %v440_v6 = vld [vmem:[%s19815_s1 + $0xb48] sm:$0xff] }
  0xd1   :  { %3402 = vmatpush1.bf16.msra.mxu0 %v12738_v10  ;;  %3443 = vmatpush1.bf16.msra.mxu1 %v12866_v11  ;;  %v444_v7 = vld [vmem:[%s19815_s1 + $0xb68] sm:$0xff]  ;;  %v12810_v10 = vcombine.low %v448_v62, %v452_v63  ;;  %v12938_v11 = vcombine.low %v576_v0, %v580_v1  ;;  %v137_v62 = vld [vmem:[%s19815_s1 + $0x1d0] sm:$0xff] }
  0xd2   :  { %3403 = vmatprep.subr.bf16.mxu0 %v12731_v12  ;;  %3444 = vmatprep.subr.bf16.mxu1 %v12859_v13  ;;  %v568_v8 = vld [vmem:[%s19815_s1 + $0xf48] sm:$0xff]  ;;  %v12803_v12 = vcombine.high %v440_v6, %v444_v7  ;;  %v141_v63 = vld [vmem:[%s19815_s1 + $0x1f0] sm:$0xff] }
  0xd3   :  { %v572_v9 = vld [vmem:[%s19815_s1 + $0xf68] sm:$0xff]  ;;  %v265_v0 = vld [vmem:[%s19815_s1 + $0x5d0] sm:$0xff] }
  0xd4   :  { %v12931_v13 = vcombine.high %v568_v8, %v572_v9  ;;  %v432_v14 = vld [vmem:[%s19815_s1 + $0xb08] sm:$0xff]  ;;  %v269_v1 = vld [vmem:[%s19815_s1 + $0x5f0] sm:$0xff] }
  0xd5   :  { %3404 = vmatpush1.bf16.msra.mxu0 %v12730_v19  ;;  %3445 = vmatpush1.bf16.msra.mxu1 %v12858_v21  ;;  %v436_v15 = vld [vmem:[%s19815_s1 + $0xb28] sm:$0xff]  ;;  %v12802_v19 = vcombine.low %v440_v6, %v444_v7  ;;  %v12930_v21 = vcombine.low %v568_v8, %v572_v9  ;;  %v129_v6 = vld [vmem:[%s19815_s1 + $0x190] sm:$0xff] }
  0xd6   :  { %3405 = vmatprep.subr.bf16.mxu0 %v12723_v22  ;;  %3446 = vmatprep.subr.bf16.mxu1 %v12851_v23  ;;  %v560_v17 = vld [vmem:[%s19815_s1 + $0xf08] sm:$0xff]  ;;  %v12795_v22 = vcombine.high %v432_v14, %v436_v15  ;;  %v133_v7 = vld [vmem:[%s19815_s1 + $0x1b0] sm:$0xff] }
  0xd7   :  { %v564_v18 = vld [vmem:[%s19815_s1 + $0xf28] sm:$0xff]  ;;  %v257_v8 = vld [vmem:[%s19815_s1 + $0x590] sm:$0xff] }
  0xd8   :  { %v12923_v23 = vcombine.high %v560_v17, %v564_v18  ;;  %v424_v24 = vld [vmem:[%s19815_s1 + $0xac8] sm:$0xff]  ;;  %v261_v9 = vld [vmem:[%s19815_s1 + $0x5b0] sm:$0xff] }
  0xd9   :  { %3406 = vmatpush1.bf16.msra.mxu0 %v12722_v29  ;;  %3447 = vmatpush1.bf16.msra.mxu1 %v12850_v30  ;;  %v428_v25 = vld [vmem:[%s19815_s1 + $0xae8] sm:$0xff]  ;;  %v12794_v29 = vcombine.low %v432_v14, %v436_v15  ;;  %v12922_v30 = vcombine.low %v560_v17, %v564_v18  ;;  %v121_v14 = vld [vmem:[%s19815_s1 + $0x150] sm:$0xff] }
  0xda   :  { %3407 = vmatprep.subr.bf16.mxu0 %v12715_v32  ;;  %3448 = vmatprep.subr.bf16.mxu1 %v12843_v33  ;;  %v552_v26 = vld [vmem:[%s19815_s1 + $0xec8] sm:$0xff]  ;;  %v12787_v32 = vcombine.high %v424_v24, %v428_v25  ;;  %v125_v15 = vld [vmem:[%s19815_s1 + $0x170] sm:$0xff] }
  0xdb   :  { %v556_v27 = vld [vmem:[%s19815_s1 + $0xee8] sm:$0xff]  ;;  %v249_v18 = vld [vmem:[%s19815_s1 + $0x550] sm:$0xff] }
  0xdc   :  { %v12915_v33 = vcombine.high %v552_v26, %v556_v27  ;;  %v416_v34 = vld [vmem:[%s19815_s1 + $0xa88] sm:$0xff] }
  0xdd   :  { %3408 = vmatpush1.bf16.msra.mxu0 %v12714_v40  ;;  %3449 = vmatpush1.bf16.msra.mxu1 %v12842_v41  ;;  %v420_v35 = vld [vmem:[%s19815_s1 + $0xaa8] sm:$0xff]  ;;  %v12786_v40 = vcombine.low %v424_v24, %v428_v25  ;;  %v12914_v41 = vcombine.low %v552_v26, %v556_v27  ;;  %v12620_v25 = vcombine.low %v257_v8, %v261_v9 }
  0xde   :  { %3409 = vmatprep.subr.bf16.mxu0 %v12707_v42  ;;  %3450 = vmatprep.subr.bf16.mxu1 %v12835_v43  ;;  %v544_v37 = vld [vmem:[%s19815_s1 + $0xe88] sm:$0xff]  ;;  %v12779_v42 = vcombine.high %v416_v34, %v420_v35  ;;  %v12485_v26 = vcombine.high %v121_v14, %v125_v15 }
  0xdf   :  { %v548_v38 = vld [vmem:[%s19815_s1 + $0xea8] sm:$0xff] }
  0xe0   :  { %v12907_v43 = vcombine.high %v544_v37, %v548_v38  ;;  %v408_v44 = vld [vmem:[%s19815_s1 + $0xa48] sm:$0xff] }
  0xe1   :  { %3410 = vmatpush1.bf16.msra.mxu0 %v12706_v48  ;;  %3451 = vmatpush1.bf16.msra.mxu1 %v12834_v49  ;;  %v412_v45 = vld [vmem:[%s19815_s1 + $0xa68] sm:$0xff]  ;;  %v12778_v48 = vcombine.low %v416_v34, %v420_v35  ;;  %v12906_v49 = vcombine.low %v544_v37, %v548_v38  ;;  %v241_v35 = vld [vmem:[%s19815_s1 + $0x510] sm:$0xff] }
  0xe2   :  { %3411 = vmatprep.subr.bf16.mxu0 %v12699_v50  ;;  %3452 = vmatprep.subr.bf16.mxu1 %v12827_v51  ;;  %v536_v46 = vld [vmem:[%s19815_s1 + $0xe48] sm:$0xff]  ;;  %v12771_v50 = vcombine.high %v408_v44, %v412_v45  ;;  %v245_v37 = vld [vmem:[%s19815_s1 + $0x530] sm:$0xff] }
  0xe3   :  { %v540_v47 = vld [vmem:[%s19815_s1 + $0xe68] sm:$0xff] }
  0xe4   :  { %v12899_v51 = vcombine.high %v536_v46, %v540_v47  ;;  %v400_v52 = vld [vmem:[%s19815_s1 + $0xa08] sm:$0xff] }
  0xe5   :  { %3412 = vmatpush1.bf16.msra.mxu0 %v12698_v56  ;;  %3453 = vmatpush1.bf16.msra.mxu1 %v12826_v57  ;;  %v404_v53 = vld [vmem:[%s19815_s1 + $0xa28] sm:$0xff]  ;;  %v12770_v56 = vcombine.low %v408_v44, %v412_v45  ;;  %v12898_v57 = vcombine.low %v536_v46, %v540_v47  ;;  %v12605_v45 = vcombine.high %v241_v35, %v245_v37  ;;  %v105_v46 = vld [vmem:[%s19815_s1 + $0xd0] sm:$0xff] }
  0xe6   :  { %3413 = vmatprep.subr.bf16.mxu0 %v12819_v60  ;;  %3454 = vmatprep.subr.bf16.mxu1 %v12947_v61  ;;  %v528_v54 = vld [vmem:[%s19815_s1 + $0xe08] sm:$0xff]  ;;  %v12763_v60 = vcombine.high %v400_v52, %v404_v53  ;;  %v109_v47 = vld [vmem:[%s19815_s1 + $0xf0] sm:$0xff] }
  0xe7   :  { %v532_v55 = vld [vmem:[%s19815_s1 + $0xe28] sm:$0xff] }
  0xe8   :  { %v12891_v61 = vcombine.high %v528_v54, %v532_v55 }
  0xe9   :  { %3414 = vmatpush2.bf16.msra.mxu0 %v12818_v2  ;;  %3455 = vmatpush2.bf16.msra.mxu1 %v12946_v3  ;;  %v12762_v2 = vcombine.low %v400_v52, %v404_v53  ;;  %v12890_v3 = vcombine.low %v528_v54, %v532_v55  ;;  %v12469_v52 = vcombine.high %v105_v46, %v109_v47  ;;  %v97_v54 = vld [vmem:[%s19815_s1 + $0x90] sm:$0xff] }
  0xea   :  { %3415 = vmatprep.subr.bf16.mxu0 %v12811_v4  ;;  %3456 = vmatprep.subr.bf16.mxu1 %v12939_v5  ;;  %v12501_v4 = vcombine.high %v137_v62, %v141_v63  ;;  %v12629_v5 = vcombine.high %v265_v0, %v269_v1  ;;  %v101_v55 = vld [vmem:[%s19815_s1 + $0xb0] sm:$0xff] }
  0xed   :  { %3416 = vmatpush2.bf16.msra.mxu0 %v12810_v10  ;;  %3457 = vmatpush2.bf16.msra.mxu1 %v12938_v11  ;;  %v12500_v10 = vcombine.low %v137_v62, %v141_v63  ;;  %v12628_v11 = vcombine.low %v265_v0, %v269_v1  ;;  %v12461_v62 = vcombine.high %v97_v54, %v101_v55  ;;  %v89_v0 = vld [vmem:[%s19815_s1 + $0x50] sm:$0xff] }
  0xee   :  { %3417 = vmatprep.subr.bf16.mxu0 %v12803_v12  ;;  %3458 = vmatprep.subr.bf16.mxu1 %v12931_v13  ;;  %v12493_v12 = vcombine.high %v129_v6, %v133_v7  ;;  %v12621_v13 = vcombine.high %v257_v8, %v261_v9  ;;  %v93_v1 = vld [vmem:[%s19815_s1 + $0x70] sm:$0xff] }
  0xef   :  { %v81_v8 = vld [vmem:[%s19815_s1 + $0x10] sm:$0xff] }
  0xf0   :  { %v85_v9 = vld [vmem:[%s19815_s1 + $0x30] sm:$0xff] }
  0xf1   :  { %3418 = vmatpush2.bf16.msra.mxu0 %v12802_v19  ;;  %3459 = vmatpush2.bf16.msra.mxu1 %v12930_v21  ;;  %v253_v19 = vld [vmem:[%s19815_s1 + $0x570] sm:$0xff] }
  0xf2   :  { %3419 = vmatprep.subr.bf16.mxu0 %v12795_v22  ;;  %3460 = vmatprep.subr.bf16.mxu1 %v12923_v23  ;;  %v12492_v22 = vcombine.low %v129_v6, %v133_v7  ;;  %v12453_v6 = vcombine.high %v89_v0, %v93_v1 }
  0xf5   :  { %3420 = vmatpush2.bf16.msra.mxu0 %v12794_v29  ;;  %3461 = vmatpush2.bf16.msra.mxu1 %v12922_v30  ;;  %v12613_v29 = vcombine.high %v249_v18, %v253_v19  ;;  %v113_v30 = vld [vmem:[%s19815_s1 + $0x110] sm:$0xff] }
  0xf6   :  { %3421 = vmatprep.subr.bf16.mxu0 %v12787_v32  ;;  %3462 = vmatprep.subr.bf16.mxu1 %v12915_v33  ;;  %v117_v32 = vld [vmem:[%s19815_s1 + $0x130] sm:$0xff] }
  0xf9   :  { %3422 = vmatpush2.bf16.msra.mxu0 %v12786_v40  ;;  %3463 = vmatpush2.bf16.msra.mxu1 %v12914_v41  ;;  %v12484_v40 = vcombine.low %v121_v14, %v125_v15  ;;  %v12445_v14 = vcombine.high %v81_v8, %v85_v9 }
  0xfa   :  { %3423 = vmatprep.subr.bf16.mxu0 %v12779_v42  ;;  %3464 = vmatprep.subr.bf16.mxu1 %v12907_v43  ;;  %v12612_v42 = vcombine.low %v249_v18, %v253_v19  ;;  %v12477_v43 = vcombine.high %v113_v30, %v117_v32  ;;  %v205_v18 = vld [vmem:[%s19815_s1 + $0x3f0] sm:$0xff] }
  0xfb   :  { %v329_v19 = vld [vmem:[%s19815_s1 + $0x7d0] sm:$0xff] }
  0xfd   :  { %3424 = vmatpush2.bf16.msra.mxu0 %v12778_v48  ;;  %3465 = vmatpush2.bf16.msra.mxu1 %v12906_v49  ;;  %v233_v48 = vld [vmem:[%s19815_s1 + $0x4d0] sm:$0xff] }
  0xfe   :  { %3425 = vmatprep.subr.bf16.mxu0 %v12771_v50  ;;  %3466 = vmatprep.subr.bf16.mxu1 %v12899_v51  ;;  %v237_v49 = vld [vmem:[%s19815_s1 + $0x4f0] sm:$0xff]  ;;  %v12476_v50 = vcombine.low %v113_v30, %v117_v32  ;;  %v12604_v51 = vcombine.low %v241_v35, %v245_v37 }
  0xff   :  { %v12597_v53 = vcombine.high %v233_v48, %v237_v49  ;;  %v321_v30 = vld [vmem:[%s19815_s1 + $0x790] sm:$0xff] }
 0x100   :  { %v325_v32 = vld [vmem:[%s19815_s1 + $0x7b0] sm:$0xff] }
 0x101   :  { %3426 = vmatpush2.bf16.msra.mxu0 %v12770_v56  ;;  %3467 = vmatpush2.bf16.msra.mxu1 %v12898_v57  ;;  %v225_v56 = vld [vmem:[%s19815_s1 + $0x490] sm:$0xff] }
 0x102   :  { %3427 = vmatprep.subr.bf16.mxu0 %v12763_v60  ;;  %3468 = vmatprep.subr.bf16.mxu1 %v12891_v61  ;;  %v229_v57 = vld [vmem:[%s19815_s1 + $0x4b0] sm:$0xff]  ;;  %v12468_v60 = vcombine.low %v105_v46, %v109_v47  ;;  %v12596_v61 = vcombine.low %v233_v48, %v237_v49 }
 0x103   :  { %v12589_v63 = vcombine.high %v225_v56, %v229_v57  ;;  %v177_v48 = vld [vmem:[%s19815_s1 + $0x310] sm:$0xff] }
 0x104   :  { %v181_v49 = vld [vmem:[%s19815_s1 + $0x330] sm:$0xff] }
 0x105   :  { %3428 = vmatpush2.bf16.msra.mxu0 %v12762_v2  ;;  %3469 = vmatpush2.bf16.msra.mxu1 %v12890_v3  ;;  %v217_v2 = vld [vmem:[%s19815_s1 + $0x450] sm:$0xff] }
 0x106   :  { %3479 = vmatprep.subr.bf16.mxu0 %v12501_v4  ;;  %3520 = vmatprep.subr.bf16.mxu1 %v12629_v5  ;;  %v221_v3 = vld [vmem:[%s19815_s1 + $0x470] sm:$0xff]  ;;  %v12460_v4 = vcombine.low %v97_v54, %v101_v55  ;;  %v12588_v5 = vcombine.low %v225_v56, %v229_v57  ;;  %v12541_v54 = vcombine.high %v177_v48, %v181_v49 }
 0x107   :  { %v3226_v21 = vpop.f32.mrf.mxu1  ;;  %v12581_v7 = vcombine.high %v217_v2, %v221_v3  ;;  %v169_v56 = vld [vmem:[%s19815_s1 + $0x2d0] sm:$0xff] }
 0x108   :  { %v3185_v17 = vpop.f32.mrf.mxu0  ;;  %3430 = vmatmul.mubr.bf16.vlgmr.msra.gmra.mxu0 %v14843_v36  ;;  %3471 = vmatmul.mubr.bf16.vlgmr.msra.gmra.mxu1 %v14851_v39  ;;  %v173_v57 = vld [vmem:[%s19815_s1 + $0x2f0] sm:$0xff] }
 0x109   :  { %3480 = vmatpush1.bf16.msra.mxu0 %v12500_v10  ;;  %v15259_v23 = vadd.f32 %v3226_v21, %v3185_v17  ;;  %3521 = vmatpush1.bf16.msra.mxu1 %v12628_v11  ;;  %v3228_v27 = vpop.f32.mrf.mxu1  ;;  %v209_v10 = vld [vmem:[%s19815_s1 + $0x410] sm:$0xff] }
 0x10a   :  { %v3187_v24 = vpop.f32.mrf.mxu0  ;;  %3481 = vmatprep.subr.bf16.mxu0 %v12493_v12  ;;  %3522 = vmatprep.subr.bf16.mxu1 %v12621_v13  ;;  %v213_v11 = vld [vmem:[%s19815_s1 + $0x430] sm:$0xff]  ;;  %v12452_v12 = vcombine.low %v89_v0, %v93_v1  ;;  %v12580_v13 = vcombine.low %v217_v2, %v221_v3  ;;  %v12533_v0 = vcombine.high %v169_v56, %v173_v57 }
 0x10b   :  { %3511 = vmatprep.mubr.bf16.mxu0 %v14495_v58  ;;  %v15268_v33 = vadd.f32 %v3228_v27, %v3187_v24  ;;  %3552 = vmatprep.mubr.bf16.mxu1 %v14497_v59  ;;  %v3230_v38 = vpop.f32.mrf.mxu1  ;;  %v12573_v15 = vcombine.high %v209_v10, %v213_v11  ;;  %v201_v17 = vld [vmem:[%s19815_s1 + $0x3d0] sm:$0xff]  ;;  %v12572_v24 = vcombine.low %v209_v10, %v213_v11 }
 0x10c   :  { %v3189_v34 = vpop.f32.mrf.mxu0  ;;  %v333_v21 = vld [vmem:[%s19815_s1 + $0x7f0] sm:$0xff]  ;;  %v12685_v38 = vcombine.high %v321_v30, %v325_v32 }
 0x10d   :  { %3482 = vmatpush1.bf16.msra.mxu0 %v12492_v22  ;;  %3523 = vmatpush1.bf16.msra.mxu1 %v12620_v25  ;;  %v3231_v44 = vpop.f32.mrf.mxu1  ;;  %v12444_v22 = vcombine.low %v81_v8, %v85_v9  ;;  %v12565_v25 = vcombine.high %v201_v17, %v205_v18  ;;  %v193_v27 = vld [vmem:[%s19815_s1 + $0x390] sm:$0xff]  ;;  %v12564_v34 = vcombine.low %v201_v17, %v205_v18 }
 0x10e   :  { %v3190_v41 = vpop.f32.mrf.mxu0  ;;  %3483 = vmatprep.subr.bf16.mxu0 %v12485_v26  ;;  %3524 = vmatprep.subr.bf16.mxu1 %v12613_v29  ;;  %v12693_v26 = vcombine.high %v329_v19, %v333_v21  ;;  %v197_v29 = vld [vmem:[%s19815_s1 + $0x3b0] sm:$0xff]  ;;  %v12692_v35 = vcombine.low %v329_v19, %v333_v21 }
 0x10f   :  { %v12557_v37 = vcombine.high %v193_v27, %v197_v29  ;;  %v189_v41 = vld [vmem:[%s19815_s1 + $0x370] sm:$0xff]  ;;  %v12556_v44 = vcombine.low %v193_v27, %v197_v29 }
 0x110   :  { %v161_v2 = vld [vmem:[%s19815_s1 + $0x290] sm:$0xff] }
 0x111   :  { %3484 = vmatpush1.bf16.msra.mxu0 %v12484_v40  ;;  %3525 = vmatpush1.bf16.msra.mxu1 %v12612_v42  ;;  %v185_v40 = vld [vmem:[%s19815_s1 + $0x350] sm:$0xff] }
 0x112   :  { %3485 = vmatprep.subr.bf16.mxu0 %v12477_v43  ;;  %3526 = vmatprep.subr.bf16.mxu1 %v12605_v45  ;;  %v313_v42 = vld [vmem:[%s19815_s1 + $0x750] sm:$0xff]  ;;  %v12684_v45 = vcombine.low %v321_v30, %v325_v32  ;;  %v12549_v46 = vcombine.high %v185_v40, %v189_v41 }
 0x113   :  { %v317_v43 = vld [vmem:[%s19815_s1 + $0x770] sm:$0xff] }
 0x114   :  { %v12677_v47 = vcombine.high %v313_v42, %v317_v43  ;;  %v165_v3 = vld [vmem:[%s19815_s1 + $0x2b0] sm:$0xff] }
 0x115   :  { %3486 = vmatpush1.bf16.msra.mxu0 %v12476_v50  ;;  %3527 = vmatpush1.bf16.msra.mxu1 %v12604_v51  ;;  %v305_v50 = vld [vmem:[%s19815_s1 + $0x710] sm:$0xff]  ;;  %v12525_v8 = vcombine.high %v161_v2, %v165_v3 }
 0x116   :  { %3487 = vmatprep.subr.bf16.mxu0 %v12469_v52  ;;  %3528 = vmatprep.subr.bf16.mxu1 %v12597_v53  ;;  %v309_v51 = vld [vmem:[%s19815_s1 + $0x730] sm:$0xff]  ;;  %v12548_v52 = vcombine.low %v185_v40, %v189_v41  ;;  %v12676_v53 = vcombine.low %v313_v42, %v317_v43 }
 0x117   :  { %v12669_v55 = vcombine.high %v305_v50, %v309_v51  ;;  %v153_v10 = vld [vmem:[%s19815_s1 + $0x250] sm:$0xff] }
 0x118   :  { %v157_v11 = vld [vmem:[%s19815_s1 + $0x270] sm:$0xff] }
 0x119   :  { %3488 = vmatpush1.bf16.msra.mxu0 %v12468_v60  ;;  %3529 = vmatpush1.bf16.msra.mxu1 %v12596_v61  ;;  %v297_v60 = vld [vmem:[%s19815_s1 + $0x6d0] sm:$0xff]  ;;  %v12517_v17 = vcombine.high %v153_v10, %v157_v11 }
 0x11a   :  { %3489 = vmatprep.subr.bf16.mxu0 %v12461_v62  ;;  %3530 = vmatprep.subr.bf16.mxu1 %v12589_v63  ;;  %v301_v61 = vld [vmem:[%s19815_s1 + $0x6f0] sm:$0xff]  ;;  %v12540_v62 = vcombine.low %v177_v48, %v181_v49  ;;  %v12668_v63 = vcombine.low %v305_v50, %v309_v51 }
 0x11b   :  { %v12661_v1 = vcombine.high %v297_v60, %v301_v61  ;;  %v145_v19 = vld [vmem:[%s19815_s1 + $0x210] sm:$0xff] }
 0x11c   :  { %v149_v21 = vld [vmem:[%s19815_s1 + $0x230] sm:$0xff] }
 0x11d   :  { %3490 = vmatpush1.bf16.msra.mxu0 %v12460_v4  ;;  %3531 = vmatpush1.bf16.msra.mxu1 %v12588_v5  ;;  %v289_v4 = vld [vmem:[%s19815_s1 + $0x690] sm:$0xff]  ;;  %v12509_v27 = vcombine.high %v145_v19, %v149_v21 }
 0x11e   :  { %3491 = vmatprep.subr.bf16.mxu0 %v12453_v6  ;;  %3532 = vmatprep.subr.bf16.mxu1 %v12581_v7  ;;  %v293_v5 = vld [vmem:[%s19815_s1 + $0x6b0] sm:$0xff]  ;;  %v12532_v6 = vcombine.low %v169_v56, %v173_v57  ;;  %v12660_v7 = vcombine.low %v297_v60, %v301_v61 }
 0x11f   :  { %v12653_v9 = vcombine.high %v289_v4, %v293_v5  ;;  %v393_v30 = vld [vmem:[%s19815_s1 + $0x9d0] sm:$0xff] }
 0x120   :  { %v397_v32 = vld [vmem:[%s19815_s1 + $0x9f0] sm:$0xff] }
 0x121   :  { %3492 = vmatpush1.bf16.msra.mxu0 %v12452_v12  ;;  %3533 = vmatpush1.bf16.msra.mxu1 %v12580_v13  ;;  %v281_v12 = vld [vmem:[%s19815_s1 + $0x650] sm:$0xff]  ;;  %v12757_v40 = vcombine.high %v393_v30, %v397_v32 }
 0x122   :  { %3493 = vmatprep.subr.bf16.mxu0 %v12445_v14  ;;  %3534 = vmatprep.subr.bf16.mxu1 %v12573_v15  ;;  %v285_v13 = vld [vmem:[%s19815_s1 + $0x670] sm:$0xff]  ;;  %v12524_v14 = vcombine.low %v161_v2, %v165_v3  ;;  %v12652_v15 = vcombine.low %v289_v4, %v293_v5 }
 0x123   :  { %v12645_v18 = vcombine.high %v281_v12, %v285_v13  ;;  %v385_v42 = vld [vmem:[%s19815_s1 + $0x990] sm:$0xff] }
 0x124   :  { %v389_v43 = vld [vmem:[%s19815_s1 + $0x9b0] sm:$0xff] }
 0x125   :  { %3494 = vmatpush1.bf16.msra.mxu0 %v12444_v22  ;;  %3535 = vmatpush1.bf16.msra.mxu1 %v12572_v24  ;;  %v273_v22 = vld [vmem:[%s19815_s1 + $0x610] sm:$0xff]  ;;  %v12749_v48 = vcombine.high %v385_v42, %v389_v43  ;;  %v12748_v57 = vcombine.low %v385_v42, %v389_v43 }
 0x126   :  { %3495 = vmatprep.subr.bf16.mxu0 %v12565_v25  ;;  %3536 = vmatprep.subr.bf16.mxu1 %v12693_v26  ;;  %v277_v24 = vld [vmem:[%s19815_s1 + $0x630] sm:$0xff]  ;;  %v12516_v25 = vcombine.low %v153_v10, %v157_v11  ;;  %v12644_v26 = vcombine.low %v281_v12, %v285_v13 }
 0x127   :  { %v12637_v29 = vcombine.high %v273_v22, %v277_v24  ;;  %v377_v50 = vld [vmem:[%s19815_s1 + $0x950] sm:$0xff] }
 0x128   :  { %v381_v51 = vld [vmem:[%s19815_s1 + $0x970] sm:$0xff] }
 0x129   :  { %3496 = vmatpush2.bf16.msra.mxu0 %v12564_v34  ;;  %3537 = vmatpush2.bf16.msra.mxu1 %v12692_v35  ;;  %v521_v34 = vld [vmem:[%s19815_s1 + $0xdd0] sm:$0xff] }
 0x12a   :  { %3497 = vmatprep.subr.bf16.mxu0 %v12557_v37  ;;  %3538 = vmatprep.subr.bf16.mxu1 %v12685_v38  ;;  %v525_v35 = vld [vmem:[%s19815_s1 + $0xdf0] sm:$0xff]  ;;  %v12508_v37 = vcombine.low %v145_v19, %v149_v21  ;;  %v12636_v38 = vcombine.low %v273_v22, %v277_v24 }
 0x12b   :  { %v12885_v41 = vcombine.high %v521_v34, %v525_v35  ;;  %v373_v3 = vld [vmem:[%s19815_s1 + $0x930] sm:$0xff] }
 0x12c   :  { %v497_v5 = vld [vmem:[%s19815_s1 + $0xd10] sm:$0xff] }
 0x12d   :  { %3498 = vmatpush2.bf16.msra.mxu0 %v12556_v44  ;;  %3539 = vmatpush2.bf16.msra.mxu1 %v12684_v45  ;;  %v513_v44 = vld [vmem:[%s19815_s1 + $0xd90] sm:$0xff] }
 0x12e   :  { %3499 = vmatprep.subr.bf16.mxu0 %v12549_v46  ;;  %3540 = vmatprep.subr.bf16.mxu1 %v12677_v47  ;;  %v517_v45 = vld [vmem:[%s19815_s1 + $0xdb0] sm:$0xff]  ;;  %v12756_v46 = vcombine.low %v393_v30, %v397_v32  ;;  %v12884_v47 = vcombine.low %v521_v34, %v525_v35 }
 0x12f   :  { %v12877_v49 = vcombine.high %v513_v44, %v517_v45  ;;  %v12876_v61 = vcombine.low %v513_v44, %v517_v45 }
 0x131   :  { %3500 = vmatpush2.bf16.msra.mxu0 %v12548_v52  ;;  %3541 = vmatpush2.bf16.msra.mxu1 %v12676_v53  ;;  %v505_v53 = vld [vmem:[%s19815_s1 + $0xd50] sm:$0xff] }
 0x132   :  { %3501 = vmatprep.subr.bf16.mxu0 %v12541_v54  ;;  %3542 = vmatprep.subr.bf16.mxu1 %v12669_v55  ;;  %v509_v54 = vld [vmem:[%s19815_s1 + $0xd70] sm:$0xff] }
 0x133   :  { %v12869_v2 = vcombine.high %v505_v53, %v509_v54  ;;  %v12868_v10 = vcombine.low %v505_v53, %v509_v54  ;;  %v457_v54 = vld [vmem:[%s19815_s1 + $0xbd0] sm:$0xff] }
 0x135   :  { %3502 = vmatpush2.bf16.msra.mxu0 %v12540_v62  ;;  %3543 = vmatpush2.bf16.msra.mxu1 %v12668_v63  ;;  %v12741_v62 = vcombine.high %v377_v50, %v381_v51 }
 0x136   :  { %3503 = vmatprep.subr.bf16.mxu0 %v12533_v0  ;;  %3544 = vmatprep.subr.bf16.mxu1 %v12661_v1 }
 0x139   :  { %3504 = vmatpush2.bf16.msra.mxu0 %v12532_v6  ;;  %3545 = vmatpush2.bf16.msra.mxu1 %v12660_v7 }
 0x13a   :  { %3505 = vmatprep.subr.bf16.mxu0 %v12525_v8  ;;  %3546 = vmatprep.subr.bf16.mxu1 %v12653_v9  ;;  %v12740_v8 = vcombine.low %v377_v50, %v381_v51 }
 0x13d   :  { %3506 = vmatpush2.bf16.msra.mxu0 %v12524_v14  ;;  %3547 = vmatpush2.bf16.msra.mxu1 %v12652_v15  ;;  %v361_v14 = vld [vmem:[%s19815_s1 + $0x8d0] sm:$0xff] }
 0x13e   :  { %3507 = vmatprep.subr.bf16.mxu0 %v12517_v17  ;;  %3548 = vmatprep.subr.bf16.mxu1 %v12645_v18  ;;  %v365_v15 = vld [vmem:[%s19815_s1 + $0x8f0] sm:$0xff] }
 0x13f   :  { %v489_v17 = vld [vmem:[%s19815_s1 + $0xcd0] sm:$0xff]  ;;  %v12725_v22 = vcombine.high %v361_v14, %v365_v15  ;;  %v12724_v30 = vcombine.low %v361_v14, %v365_v15 }
 0x140   :  { %v493_v18 = vld [vmem:[%s19815_s1 + $0xcf0] sm:$0xff] }
 0x141   :  { %3508 = vmatpush2.bf16.msra.mxu0 %v12516_v25  ;;  %3549 = vmatpush2.bf16.msra.mxu1 %v12644_v26  ;;  %v12853_v24 = vcombine.high %v489_v17, %v493_v18  ;;  %v353_v25 = vld [vmem:[%s19815_s1 + $0x890] sm:$0xff]  ;;  %v12852_v32 = vcombine.low %v489_v17, %v493_v18 }
 0x142   :  { %3509 = vmatprep.subr.bf16.mxu0 %v12509_v27  ;;  %3550 = vmatprep.subr.bf16.mxu1 %v12637_v29  ;;  %v357_v26 = vld [vmem:[%s19815_s1 + $0x8b0] sm:$0xff] }
 0x143   :  { %v481_v27 = vld [vmem:[%s19815_s1 + $0xc90] sm:$0xff]  ;;  %v12717_v34 = vcombine.high %v353_v25, %v357_v26  ;;  %v12716_v42 = vcombine.low %v353_v25, %v357_v26 }
 0x144   :  { %v485_v29 = vld [vmem:[%s19815_s1 + $0xcb0] sm:$0xff] }
 0x145   :  { %3510 = vmatpush2.bf16.msra.mxu0 %v12508_v37  ;;  %3551 = vmatpush2.bf16.msra.mxu1 %v12636_v38  ;;  %v12845_v35 = vcombine.high %v481_v27, %v485_v29  ;;  %v345_v37 = vld [vmem:[%s19815_s1 + $0x850] sm:$0xff]  ;;  %v12844_v43 = vcombine.low %v481_v27, %v485_v29 }
 0x146   :  { %3561 = vmatprep.subr.bf16.mxu0 %v12757_v40  ;;  %3602 = vmatprep.subr.bf16.mxu1 %v12885_v41  ;;  %v349_v38 = vld [vmem:[%s19815_s1 + $0x870] sm:$0xff] }
 0x147   :  { %v473_v40 = vld [vmem:[%s19815_s1 + $0xc50] sm:$0xff]  ;;  %v12709_v44 = vcombine.high %v345_v37, %v349_v38  ;;  %v12708_v50 = vcombine.low %v345_v37, %v349_v38 }
 0x148   :  { %v3267_v52 = vpop.f32.mrf.mxu0  ;;  %3512 = vmatmul.mubr.bf16.vlgmr.msra.gmra.mxu0 %v14627_v16  ;;  %v3308_v56 = vpop.f32.mrf.mxu1  ;;  %3553 = vmatmul.mubr.bf16.vlgmr.msra.gmra.mxu1 %v14638_v20  ;;  %v477_v41 = vld [vmem:[%s19815_s1 + $0xc70] sm:$0xff] }
 0x149   :  { %v3268_v55 = vadd.f32 %v3267_v52, %v15259_v23  ;;  %3562 = vmatpush1.bf16.msra.mxu0 %v12756_v46  ;;  %3603 = vmatpush1.bf16.msra.mxu1 %v12884_v47  ;;  %v369_v23 = vld [vmem:[%s19815_s1 + $0x910] sm:$0xff]  ;;  %v12837_v45 = vcombine.high %v473_v40, %v477_v41  ;;  %v12836_v51 = vcombine.low %v473_v40, %v477_v41 }
 0x14a   :  { %v3269_v60 = vpop.f32.mrf.mxu0  ;;  %3563 = vmatprep.subr.bf16.mxu0 %v12749_v48  ;;  %v3310_v1 = vpop.f32.mrf.mxu1  ;;  %3604 = vmatprep.subr.bf16.mxu1 %v12877_v49  ;;  %v12733_v11 = vcombine.high %v369_v23, %v373_v3  ;;  %v12732_v19 = vcombine.low %v369_v23, %v373_v3  ;;  %v337_v46 = vld [vmem:[%s19815_s1 + $0x810] sm:$0xff] }
 0x14b   :  { %v15460_v63 = vadd.f32 %v3308_v56, %v3268_v55  ;;  %v3270_v0 = vadd.f32 %v3269_v60, %v15268_v33  ;;  %3593 = vmatprep.mubr.bf16.mxu0 %v14649_v28  ;;  %v501_v33 = vld [vmem:[%s19815_s1 + $0xd30] sm:$0xff]  ;;  %3634 = vmatprep.mubr.bf16.mxu1 %v14658_v31 }
 0x14c   :  { %v3271_v4 = vpop.f32.mrf.mxu0  ;;  %v3312_v7 = vpop.f32.mrf.mxu1  ;;  %v12861_v13 = vcombine.high %v497_v5, %v501_v33  ;;  %v12860_v21 = vcombine.low %v497_v5, %v501_v33  ;;  %v341_v47 = vld [vmem:[%s19815_s1 + $0x830] sm:$0xff] }
 0x14d   :  { %v15477_v6 = vadd.f32 %v3310_v1, %v3270_v0  ;;  %3564 = vmatpush1.bf16.msra.mxu0 %v12748_v57  ;;  %3605 = vmatpush1.bf16.msra.mxu1 %v12876_v61  ;;  %v465_v48 = vld [vmem:[%s19815_s1 + $0xc10] sm:$0xff]  ;;  %v12701_v52 = vcombine.high %v337_v46, %v341_v47  ;;  %v12700_v60 = vcombine.low %v337_v46, %v341_v47 }
 0x14e   :  { %v3272_v9 = vpop.f32.mrf.mxu0  ;;  %3565 = vmatprep.subr.bf16.mxu0 %v12741_v62  ;;  %v3313_v12 = vpop.f32.mrf.mxu1  ;;  %3606 = vmatprep.subr.bf16.mxu1 %v12869_v2  ;;  %v469_v49 = vld [vmem:[%s19815_s1 + $0xc30] sm:$0xff] }
 0x14f   :  { %v12829_v53 = vcombine.high %v465_v48, %v469_v49  ;;  %v461_v55 = vld [vmem:[%s19815_s1 + $0xbf0] sm:$0xff]  ;;  %v12828_v61 = vcombine.low %v465_v48, %v469_v49 }
 0x150   :  { %v585_v56 = vld [vmem:[%s19815_s1 + $0xfd0] sm:$0xff]  ;;  %v12821_v62 = vcombine.high %v457_v54, %v461_v55  ;;  %v12820_v4 = vcombine.low %v457_v54, %v461_v55 }
 0x151   :  { %3566 = vmatpush1.bf16.msra.mxu0 %v12740_v8  ;;  %3607 = vmatpush1.bf16.msra.mxu1 %v12868_v10  ;;  %v589_v57 = vld [vmem:[%s19815_s1 + $0xff0] sm:$0xff] }
 0x152   :  { %3567 = vmatprep.subr.bf16.mxu0 %v12733_v11  ;;  %3608 = vmatprep.subr.bf16.mxu1 %v12861_v13  ;;  %v12949_v0 = vcombine.high %v585_v56, %v589_v57  ;;  %v449_v1 = vld [vmem:[%s19815_s1 + $0xb90] sm:$0xff]  ;;  %v12948_v5 = vcombine.low %v585_v56, %v589_v57 }
 0x153   :  { %v453_v2 = vld [vmem:[%s19815_s1 + $0xbb0] sm:$0xff] }
 0x154   :  { %v577_v23 = vld [vmem:[%s19815_s1 + $0xf90] sm:$0xff]  ;;  %v12813_v33 = vcombine.high %v449_v1, %v453_v2  ;;  %v12812_v12 = vcombine.low %v449_v1, %v453_v2 }
 0x155   :  { %3568 = vmatpush1.bf16.msra.mxu0 %v12732_v19  ;;  %3609 = vmatpush1.bf16.msra.mxu1 %v12860_v21  ;;  %v581_v3 = vld [vmem:[%s19815_s1 + $0xfb0] sm:$0xff] }
 0x156   :  { %3569 = vmatprep.subr.bf16.mxu0 %v12725_v22  ;;  %3610 = vmatprep.subr.bf16.mxu1 %v12853_v24  ;;  %v12941_v7 = vcombine.high %v577_v23, %v581_v3  ;;  %v441_v8 = vld [vmem:[%s19815_s1 + $0xb50] sm:$0xff]  ;;  %v12940_v13 = vcombine.low %v577_v23, %v581_v3  ;;  %v138_v23 = vld [vmem:[%s19815_s1 + $0x1d8] sm:$0xff] }
 0x157   :  { %v445_v9 = vld [vmem:[%s19815_s1 + $0xb70] sm:$0xff]  ;;  %v142_v3 = vld [vmem:[%s19815_s1 + $0x1f8] sm:$0xff] }
 0x158   :  { %v569_v10 = vld [vmem:[%s19815_s1 + $0xf50] sm:$0xff]  ;;  %v12805_v14 = vcombine.high %v441_v8, %v445_v9  ;;  %v12804_v22 = vcombine.low %v441_v8, %v445_v9  ;;  %v12503_v8 = vcombine.high %v138_v23, %v142_v3 }
 0x159   :  { %3570 = vmatpush1.bf16.msra.mxu0 %v12724_v30  ;;  %3611 = vmatpush1.bf16.msra.mxu1 %v12852_v32  ;;  %v573_v11 = vld [vmem:[%s19815_s1 + $0xf70] sm:$0xff] }
 0x15a   :  { %3571 = vmatprep.subr.bf16.mxu0 %v12717_v34  ;;  %3612 = vmatprep.subr.bf16.mxu1 %v12845_v35  ;;  %v12933_v15 = vcombine.high %v569_v10, %v573_v11  ;;  %v433_v17 = vld [vmem:[%s19815_s1 + $0xb10] sm:$0xff]  ;;  %v12932_v24 = vcombine.low %v569_v10, %v573_v11  ;;  %v130_v10 = vld [vmem:[%s19815_s1 + $0x198] sm:$0xff] }
 0x15b   :  { %v437_v18 = vld [vmem:[%s19815_s1 + $0xb30] sm:$0xff]  ;;  %v134_v11 = vld [vmem:[%s19815_s1 + $0x1b8] sm:$0xff] }
 0x15c   :  { %v561_v19 = vld [vmem:[%s19815_s1 + $0xf10] sm:$0xff]  ;;  %v12797_v25 = vcombine.high %v433_v17, %v437_v18  ;;  %v12796_v34 = vcombine.low %v433_v17, %v437_v18  ;;  %v12495_v17 = vcombine.high %v130_v10, %v134_v11 }
 0x15d   :  { %3572 = vmatpush1.bf16.msra.mxu0 %v12716_v42  ;;  %3613 = vmatpush1.bf16.msra.mxu1 %v12844_v43  ;;  %v565_v21 = vld [vmem:[%s19815_s1 + $0xf30] sm:$0xff] }
 0x15e   :  { %3573 = vmatprep.subr.bf16.mxu0 %v12709_v44  ;;  %3614 = vmatprep.subr.bf16.mxu1 %v12837_v45  ;;  %v12925_v26 = vcombine.high %v561_v19, %v565_v21  ;;  %v425_v27 = vld [vmem:[%s19815_s1 + $0xad0] sm:$0xff]  ;;  %v12924_v35 = vcombine.low %v561_v19, %v565_v21  ;;  %v122_v19 = vld [vmem:[%s19815_s1 + $0x158] sm:$0xff] }
 0x15f   :  { %v429_v29 = vld [vmem:[%s19815_s1 + $0xaf0] sm:$0xff]  ;;  %v126_v21 = vld [vmem:[%s19815_s1 + $0x178] sm:$0xff] }
 0x160   :  { %v553_v30 = vld [vmem:[%s19815_s1 + $0xed0] sm:$0xff]  ;;  %v12789_v37 = vcombine.high %v425_v27, %v429_v29  ;;  %v12788_v44 = vcombine.low %v425_v27, %v429_v29  ;;  %v12494_v27 = vcombine.low %v130_v10, %v134_v11 }
 0x161   :  { %3574 = vmatpush1.bf16.msra.mxu0 %v12708_v50  ;;  %3615 = vmatpush1.bf16.msra.mxu1 %v12836_v51  ;;  %v557_v32 = vld [vmem:[%s19815_s1 + $0xef0] sm:$0xff] }
 0x162   :  { %3575 = vmatprep.subr.bf16.mxu0 %v12701_v52  ;;  %3616 = vmatprep.subr.bf16.mxu1 %v12829_v53  ;;  %v12917_v38 = vcombine.high %v553_v30, %v557_v32  ;;  %v417_v40 = vld [vmem:[%s19815_s1 + $0xa90] sm:$0xff]  ;;  %v12916_v45 = vcombine.low %v553_v30, %v557_v32 }
 0x163   :  { %v421_v41 = vld [vmem:[%s19815_s1 + $0xab0] sm:$0xff] }
 0x164   :  { %v545_v42 = vld [vmem:[%s19815_s1 + $0xe90] sm:$0xff]  ;;  %v12781_v46 = vcombine.high %v417_v40, %v421_v41  ;;  %v12780_v52 = vcombine.low %v417_v40, %v421_v41  ;;  %v118_v40 = vld [vmem:[%s19815_s1 + $0x138] sm:$0xff] }
 0x165   :  { %3576 = vmatpush1.bf16.msra.mxu0 %v12700_v60  ;;  %3617 = vmatpush1.bf16.msra.mxu1 %v12828_v61  ;;  %v549_v43 = vld [vmem:[%s19815_s1 + $0xeb0] sm:$0xff] }
 0x166   :  { %3577 = vmatprep.subr.bf16.mxu0 %v12821_v62  ;;  %3618 = vmatprep.subr.bf16.mxu1 %v12949_v0  ;;  %v12909_v47 = vcombine.high %v545_v42, %v549_v43  ;;  %v409_v48 = vld [vmem:[%s19815_s1 + $0xa50] sm:$0xff]  ;;  %v12908_v53 = vcombine.low %v545_v42, %v549_v43  ;;  %v242_v43 = vld [vmem:[%s19815_s1 + $0x518] sm:$0xff] }
 0x167   :  { %v413_v49 = vld [vmem:[%s19815_s1 + $0xa70] sm:$0xff] }
 0x168   :  { %v537_v50 = vld [vmem:[%s19815_s1 + $0xe50] sm:$0xff]  ;;  %v12773_v54 = vcombine.high %v409_v48, %v413_v49  ;;  %v12772_v62 = vcombine.low %v409_v48, %v413_v49 }
 0x169   :  { %3578 = vmatpush2.bf16.msra.mxu0 %v12820_v4  ;;  %3619 = vmatpush2.bf16.msra.mxu1 %v12948_v5  ;;  %v541_v51 = vld [vmem:[%s19815_s1 + $0xe70] sm:$0xff]  ;;  %v266_v4 = vld [vmem:[%s19815_s1 + $0x5d8] sm:$0xff] }
 0x16a   :  { %3579 = vmatprep.subr.bf16.mxu0 %v12813_v33  ;;  %3620 = vmatprep.subr.bf16.mxu1 %v12941_v7  ;;  %v12901_v55 = vcombine.high %v537_v50, %v541_v51  ;;  %v401_v56 = vld [vmem:[%s19815_s1 + $0xa10] sm:$0xff]  ;;  %v12900_v0 = vcombine.low %v537_v50, %v541_v51  ;;  %v270_v5 = vld [vmem:[%s19815_s1 + $0x5f8] sm:$0xff] }
 0x16b   :  { %v405_v57 = vld [vmem:[%s19815_s1 + $0xa30] sm:$0xff]  ;;  %v12631_v9 = vcombine.high %v266_v4, %v270_v5  ;;  %v106_v51 = vld [vmem:[%s19815_s1 + $0xd8] sm:$0xff] }
 0x16c   :  { %v529_v60 = vld [vmem:[%s19815_s1 + $0xe10] sm:$0xff]  ;;  %v12765_v1 = vcombine.high %v401_v56, %v405_v57  ;;  %v12764_v33 = vcombine.low %v401_v56, %v405_v57 }
 0x16d   :  { %3580 = vmatpush2.bf16.msra.mxu0 %v12812_v12  ;;  %3621 = vmatpush2.bf16.msra.mxu1 %v12940_v13  ;;  %v533_v61 = vld [vmem:[%s19815_s1 + $0xe30] sm:$0xff]  ;;  %v258_v12 = vld [vmem:[%s19815_s1 + $0x598] sm:$0xff] }
 0x16e   :  { %3581 = vmatprep.subr.bf16.mxu0 %v12805_v14  ;;  %3622 = vmatprep.subr.bf16.mxu1 %v12933_v15  ;;  %v12893_v2 = vcombine.high %v529_v60, %v533_v61  ;;  %v12892_v7 = vcombine.low %v529_v60, %v533_v61  ;;  %v262_v13 = vld [vmem:[%s19815_s1 + $0x5b8] sm:$0xff]  ;;  %v12502_v14 = vcombine.low %v138_v23, %v142_v3 }
 0x16f   :  { %v12630_v15 = vcombine.low %v266_v4, %v270_v5  ;;  %v12623_v18 = vcombine.high %v258_v12, %v262_v13  ;;  %v12622_v32 = vcombine.low %v258_v12, %v262_v13  ;;  %v98_v60 = vld [vmem:[%s19815_s1 + $0x98] sm:$0xff] }
 0x170   :  { %v102_v61 = vld [vmem:[%s19815_s1 + $0xb8] sm:$0xff] }
 0x171   :  { %3582 = vmatpush2.bf16.msra.mxu0 %v12804_v22  ;;  %3623 = vmatpush2.bf16.msra.mxu1 %v12932_v24  ;;  %v250_v24 = vld [vmem:[%s19815_s1 + $0x558] sm:$0xff]  ;;  %v12463_v23 = vcombine.high %v98_v60, %v102_v61 }
 0x172   :  { %3583 = vmatprep.subr.bf16.mxu0 %v12797_v25  ;;  %3624 = vmatprep.subr.bf16.mxu1 %v12925_v26  ;;  %v254_v25 = vld [vmem:[%s19815_s1 + $0x578] sm:$0xff] }
 0x173   :  { %v90_v4 = vld [vmem:[%s19815_s1 + $0x58] sm:$0xff] }
 0x174   :  { %v94_v5 = vld [vmem:[%s19815_s1 + $0x78] sm:$0xff] }
 0x175   :  { %3584 = vmatpush2.bf16.msra.mxu0 %v12796_v34  ;;  %3625 = vmatpush2.bf16.msra.mxu1 %v12924_v35  ;;  %v12487_v34 = vcombine.high %v122_v19, %v126_v21  ;;  %v12455_v10 = vcombine.high %v90_v4, %v94_v5  ;;  %v82_v12 = vld [vmem:[%s19815_s1 + $0x18] sm:$0xff] }
 0x176   :  { %3585 = vmatprep.subr.bf16.mxu0 %v12789_v37  ;;  %3626 = vmatprep.subr.bf16.mxu1 %v12917_v38  ;;  %v12615_v37 = vcombine.high %v250_v24, %v254_v25  ;;  %v114_v38 = vld [vmem:[%s19815_s1 + $0x118] sm:$0xff] }
 0x177   :  { %v12479_v48 = vcombine.high %v114_v38, %v118_v40  ;;  %v86_v13 = vld [vmem:[%s19815_s1 + $0x38] sm:$0xff] }
 0x179   :  { %3586 = vmatpush2.bf16.msra.mxu0 %v12788_v44  ;;  %3627 = vmatpush2.bf16.msra.mxu1 %v12916_v45  ;;  %v246_v44 = vld [vmem:[%s19815_s1 + $0x538] sm:$0xff] }
 0x17a   :  { %3587 = vmatprep.subr.bf16.mxu0 %v12781_v46  ;;  %3628 = vmatprep.subr.bf16.mxu1 %v12909_v47  ;;  %v12486_v46 = vcombine.low %v122_v19, %v126_v21  ;;  %v12607_v50 = vcombine.high %v242_v43, %v246_v44  ;;  %v12447_v19 = vcombine.high %v82_v12, %v86_v13 }
 0x17d   :  { %3588 = vmatpush2.bf16.msra.mxu0 %v12780_v52  ;;  %3629 = vmatpush2.bf16.msra.mxu1 %v12908_v53  ;;  %v110_v52 = vld [vmem:[%s19815_s1 + $0xf8] sm:$0xff] }
 0x17e   :  { %3589 = vmatprep.subr.bf16.mxu0 %v12773_v54  ;;  %3630 = vmatprep.subr.bf16.mxu1 %v12901_v55  ;;  %v238_v53 = vld [vmem:[%s19815_s1 + $0x4f8] sm:$0xff]  ;;  %v12478_v54 = vcombine.low %v114_v38, %v118_v40  ;;  %v12606_v55 = vcombine.low %v242_v43, %v246_v44  ;;  %v12471_v56 = vcombine.high %v106_v51, %v110_v52 }
 0x17f   :  { %v322_v38 = vld [vmem:[%s19815_s1 + $0x798] sm:$0xff] }
 0x180   :  { %v326_v40 = vld [vmem:[%s19815_s1 + $0x7b8] sm:$0xff] }
 0x181   :  { %3590 = vmatpush2.bf16.msra.mxu0 %v12772_v62  ;;  %3631 = vmatpush2.bf16.msra.mxu1 %v12900_v0  ;;  %v226_v62 = vld [vmem:[%s19815_s1 + $0x498] sm:$0xff] }
 0x182   :  { %3591 = vmatprep.subr.bf16.mxu0 %v12765_v1  ;;  %3632 = vmatprep.subr.bf16.mxu1 %v12893_v2  ;;  %v230_v0 = vld [vmem:[%s19815_s1 + $0x4b8] sm:$0xff]  ;;  %v12470_v1 = vcombine.low %v106_v51, %v110_v52 }
 0x183   :  { %v12591_v3 = vcombine.high %v226_v62, %v230_v0 }
 0x185   :  { %3592 = vmatpush2.bf16.msra.mxu0 %v12764_v33  ;;  %3633 = vmatpush2.bf16.msra.mxu1 %v12892_v7  ;;  %v218_v33 = vld [vmem:[%s19815_s1 + $0x458] sm:$0xff] }
 0x186   :  { %3643 = vmatprep.subr.bf16.mxu0 %v12503_v8  ;;  %3684 = vmatprep.subr.bf16.mxu1 %v12631_v9  ;;  %v222_v7 = vld [vmem:[%s19815_s1 + $0x478] sm:$0xff]  ;;  %v12462_v8 = vcombine.low %v98_v60, %v102_v61  ;;  %v12590_v9 = vcombine.low %v226_v62, %v230_v0 }
 0x187   :  { %v12583_v11 = vcombine.high %v218_v33, %v222_v7  ;;  %v170_v62 = vld [vmem:[%s19815_s1 + $0x2d8] sm:$0xff] }
 0x188   :  { %v3349_v22 = vpop.f32.mrf.mxu0  ;;  %3594 = vmatmul.mubr.bf16.vlgmr.msra.gmra.mxu0 %v14843_v36  ;;  %v3390_v26 = vpop.f32.mrf.mxu1  ;;  %3635 = vmatmul.mubr.bf16.vlgmr.msra.gmra.mxu1 %v14851_v39  ;;  %v174_v0 = vld [vmem:[%s19815_s1 + $0x2f8] sm:$0xff] }
 0x189   :  { %3644 = vmatpush1.bf16.msra.mxu0 %v12502_v14  ;;  %v15661_v29 = vadd.f32 %v3390_v26, %v3349_v22  ;;  %3685 = vmatpush1.bf16.msra.mxu1 %v12630_v15  ;;  %v210_v14 = vld [vmem:[%s19815_s1 + $0x418] sm:$0xff] }
 0x18a   :  { %v3351_v30 = vpop.f32.mrf.mxu0  ;;  %3645 = vmatprep.subr.bf16.mxu0 %v12495_v17  ;;  %v3392_v35 = vpop.f32.mrf.mxu1  ;;  %3686 = vmatprep.subr.bf16.mxu1 %v12623_v18  ;;  %v214_v15 = vld [vmem:[%s19815_s1 + $0x438] sm:$0xff]  ;;  %v12454_v17 = vcombine.low %v90_v4, %v94_v5  ;;  %v12582_v18 = vcombine.low %v218_v33, %v222_v7  ;;  %v12535_v4 = vcombine.high %v170_v62, %v174_v0 }
 0x18b   :  { %3675 = vmatprep.mubr.bf16.mxu0 %v14495_v58  ;;  %v15670_v41 = vadd.f32 %v3392_v35, %v3351_v30  ;;  %3716 = vmatprep.mubr.bf16.mxu1 %v14497_v59  ;;  %v12614_v58 = vcombine.low %v250_v24, %v254_v25  ;;  %v234_v59 = vld [vmem:[%s19815_s1 + $0x4d8] sm:$0xff]  ;;  %v12575_v21 = vcombine.high %v210_v14, %v214_v15 }
 0x18c   :  { %v3353_v42 = vpop.f32.mrf.mxu0  ;;  %v3394_v45 = vpop.f32.mrf.mxu1  ;;  %v12599_v57 = vcombine.high %v234_v59, %v238_v53  ;;  %v12598_v2 = vcombine.low %v234_v59, %v238_v53  ;;  %v202_v22 = vld [vmem:[%s19815_s1 + $0x3d8] sm:$0xff]  ;;  %v12574_v30 = vcombine.low %v210_v14, %v214_v15 }
 0x18d   :  { %3646 = vmatpush1.bf16.msra.mxu0 %v12494_v27  ;;  %3687 = vmatpush1.bf16.msra.mxu1 %v12622_v32  ;;  %v206_v24 = vld [vmem:[%s19815_s1 + $0x3f8] sm:$0xff]  ;;  %v12446_v27 = vcombine.low %v82_v12, %v86_v13  ;;  %v12687_v45 = vcombine.high %v322_v38, %v326_v40 }
 0x18e   :  { %v3354_v47 = vpop.f32.mrf.mxu0  ;;  %3647 = vmatprep.subr.bf16.mxu0 %v12487_v34  ;;  %v3395_v49 = vpop.f32.mrf.mxu1  ;;  %3688 = vmatprep.subr.bf16.mxu1 %v12615_v37  ;;  %v330_v25 = vld [vmem:[%s19815_s1 + $0x7d8] sm:$0xff]  ;;  %v12567_v32 = vcombine.high %v202_v22, %v206_v24  ;;  %v12566_v42 = vcombine.low %v202_v22, %v206_v24 }
 0x18f   :  { %v334_v26 = vld [vmem:[%s19815_s1 + $0x7f8] sm:$0xff] }
 0x190   :  { %v12695_v34 = vcombine.high %v330_v25, %v334_v26  ;;  %v194_v35 = vld [vmem:[%s19815_s1 + $0x398] sm:$0xff]  ;;  %v12694_v43 = vcombine.low %v330_v25, %v334_v26 }
 0x191   :  { %3648 = vmatpush1.bf16.msra.mxu0 %v12486_v46  ;;  %3689 = vmatpush1.bf16.msra.mxu1 %v12614_v58  ;;  %v198_v37 = vld [vmem:[%s19815_s1 + $0x3b8] sm:$0xff] }
 0x192   :  { %3649 = vmatprep.subr.bf16.mxu0 %v12479_v48  ;;  %3690 = vmatprep.subr.bf16.mxu1 %v12607_v50  ;;  %v12559_v44 = vcombine.high %v194_v35, %v198_v37  ;;  %v186_v46 = vld [vmem:[%s19815_s1 + $0x358] sm:$0xff]  ;;  %v12558_v49 = vcombine.low %v194_v35, %v198_v37  ;;  %v12686_v50 = vcombine.low %v322_v38, %v326_v40 }
 0x193   :  { %v190_v47 = vld [vmem:[%s19815_s1 + $0x378] sm:$0xff] }
 0x194   :  { %v314_v58 = vld [vmem:[%s19815_s1 + $0x758] sm:$0xff]  ;;  %v12551_v51 = vcombine.high %v186_v46, %v190_v47 }
 0x195   :  { %3650 = vmatpush1.bf16.msra.mxu0 %v12478_v54  ;;  %3691 = vmatpush1.bf16.msra.mxu1 %v12606_v55  ;;  %v318_v48 = vld [vmem:[%s19815_s1 + $0x778] sm:$0xff] }
 0x196   :  { %3651 = vmatprep.subr.bf16.mxu0 %v12471_v56  ;;  %3692 = vmatprep.subr.bf16.mxu1 %v12599_v57  ;;  %v12679_v52 = vcombine.high %v314_v58, %v318_v48  ;;  %v178_v59 = vld [vmem:[%s19815_s1 + $0x318] sm:$0xff]  ;;  %v12550_v56 = vcombine.low %v186_v46, %v190_v47  ;;  %v12678_v57 = vcombine.low %v314_v58, %v318_v48 }
 0x197   :  { %v182_v53 = vld [vmem:[%s19815_s1 + $0x338] sm:$0xff] }
 0x198   :  { %v306_v54 = vld [vmem:[%s19815_s1 + $0x718] sm:$0xff]  ;;  %v12543_v60 = vcombine.high %v178_v59, %v182_v53 }
 0x199   :  { %3652 = vmatpush1.bf16.msra.mxu0 %v12470_v1  ;;  %3693 = vmatpush1.bf16.msra.mxu1 %v12598_v2  ;;  %v310_v55 = vld [vmem:[%s19815_s1 + $0x738] sm:$0xff] }
 0x19a   :  { %3653 = vmatprep.subr.bf16.mxu0 %v12463_v23  ;;  %3694 = vmatprep.subr.bf16.mxu1 %v12591_v3  ;;  %v12671_v61 = vcombine.high %v306_v54, %v310_v55  ;;  %v298_v1 = vld [vmem:[%s19815_s1 + $0x6d8] sm:$0xff]  ;;  %v12542_v23 = vcombine.low %v178_v59, %v182_v53  ;;  %v12670_v3 = vcombine.low %v306_v54, %v310_v55 }
 0x19b   :  { %v302_v2 = vld [vmem:[%s19815_s1 + $0x6f8] sm:$0xff] }
 0x19c   :  { %v12663_v5 = vcombine.high %v298_v1, %v302_v2  ;;  %v162_v33 = vld [vmem:[%s19815_s1 + $0x298] sm:$0xff] }
 0x19d   :  { %3654 = vmatpush1.bf16.msra.mxu0 %v12462_v8  ;;  %3695 = vmatpush1.bf16.msra.mxu1 %v12590_v9  ;;  %v166_v7 = vld [vmem:[%s19815_s1 + $0x2b8] sm:$0xff] }
 0x19e   :  { %3655 = vmatprep.subr.bf16.mxu0 %v12455_v10  ;;  %3696 = vmatprep.subr.bf16.mxu1 %v12583_v11  ;;  %v290_v8 = vld [vmem:[%s19815_s1 + $0x698] sm:$0xff]  ;;  %v12534_v10 = vcombine.low %v170_v62, %v174_v0  ;;  %v12662_v11 = vcombine.low %v298_v1, %v302_v2  ;;  %v12527_v12 = vcombine.high %v162_v33, %v166_v7 }
 0x19f   :  { %v294_v9 = vld [vmem:[%s19815_s1 + $0x6b8] sm:$0xff] }
 0x1a0   :  { %v12655_v13 = vcombine.high %v290_v8, %v294_v9  ;;  %v154_v14 = vld [vmem:[%s19815_s1 + $0x258] sm:$0xff] }
 0x1a1   :  { %3656 = vmatpush1.bf16.msra.mxu0 %v12454_v17  ;;  %3697 = vmatpush1.bf16.msra.mxu1 %v12582_v18  ;;  %v158_v15 = vld [vmem:[%s19815_s1 + $0x278] sm:$0xff] }
 0x1a2   :  { %3657 = vmatprep.subr.bf16.mxu0 %v12447_v19  ;;  %3698 = vmatprep.subr.bf16.mxu1 %v12575_v21  ;;  %v282_v17 = vld [vmem:[%s19815_s1 + $0x658] sm:$0xff]  ;;  %v12526_v19 = vcombine.low %v162_v33, %v166_v7  ;;  %v12654_v21 = vcombine.low %v290_v8, %v294_v9  ;;  %v12519_v22 = vcombine.high %v154_v14, %v158_v15 }
 0x1a3   :  { %v286_v18 = vld [vmem:[%s19815_s1 + $0x678] sm:$0xff] }
 0x1a4   :  { %v12647_v24 = vcombine.high %v282_v17, %v286_v18  ;;  %v146_v25 = vld [vmem:[%s19815_s1 + $0x218] sm:$0xff] }
 0x1a5   :  { %3658 = vmatpush1.bf16.msra.mxu0 %v12446_v27  ;;  %3699 = vmatpush1.bf16.msra.mxu1 %v12574_v30  ;;  %v150_v26 = vld [vmem:[%s19815_s1 + $0x238] sm:$0xff] }
 0x1a6   :  { %3659 = vmatprep.subr.bf16.mxu0 %v12567_v32  ;;  %3700 = vmatprep.subr.bf16.mxu1 %v12695_v34  ;;  %v274_v27 = vld [vmem:[%s19815_s1 + $0x618] sm:$0xff]  ;;  %v12518_v32 = vcombine.low %v154_v14, %v158_v15  ;;  %v12646_v34 = vcombine.low %v282_v17, %v286_v18  ;;  %v12511_v35 = vcombine.high %v146_v25, %v150_v26 }
 0x1a7   :  { %v278_v30 = vld [vmem:[%s19815_s1 + $0x638] sm:$0xff] }
 0x1a8   :  { %v12639_v37 = vcombine.high %v274_v27, %v278_v30  ;;  %v394_v38 = vld [vmem:[%s19815_s1 + $0x9d8] sm:$0xff] }
 0x1a9   :  { %3660 = vmatpush2.bf16.msra.mxu0 %v12566_v42  ;;  %3701 = vmatpush2.bf16.msra.mxu1 %v12694_v43  ;;  %v398_v40 = vld [vmem:[%s19815_s1 + $0x9f8] sm:$0xff] }
 0x1aa   :  { %3661 = vmatprep.subr.bf16.mxu0 %v12559_v44  ;;  %3702 = vmatprep.subr.bf16.mxu1 %v12687_v45  ;;  %v522_v42 = vld [vmem:[%s19815_s1 + $0xdd8] sm:$0xff]  ;;  %v12510_v44 = vcombine.low %v146_v25, %v150_v26  ;;  %v12638_v45 = vcombine.low %v274_v27, %v278_v30  ;;  %v12759_v46 = vcombine.high %v394_v38, %v398_v40 }
 0x1ab   :  { %v526_v43 = vld [vmem:[%s19815_s1 + $0xdf8] sm:$0xff] }
 0x1ac   :  { %v12887_v47 = vcombine.high %v522_v42, %v526_v43  ;;  %v386_v58 = vld [vmem:[%s19815_s1 + $0x998] sm:$0xff] }
 0x1ad   :  { %3662 = vmatpush2.bf16.msra.mxu0 %v12558_v49  ;;  %3703 = vmatpush2.bf16.msra.mxu1 %v12686_v50  ;;  %v390_v48 = vld [vmem:[%s19815_s1 + $0x9b8] sm:$0xff] }
 0x1ae   :  { %3663 = vmatprep.subr.bf16.mxu0 %v12551_v51  ;;  %3704 = vmatprep.subr.bf16.mxu1 %v12679_v52  ;;  %v514_v49 = vld [vmem:[%s19815_s1 + $0xd98] sm:$0xff]  ;;  %v12758_v51 = vcombine.low %v394_v38, %v398_v40  ;;  %v12886_v52 = vcombine.low %v522_v42, %v526_v43  ;;  %v12751_v59 = vcombine.high %v386_v58, %v390_v48 }
 0x1af   :  { %v518_v50 = vld [vmem:[%s19815_s1 + $0xdb8] sm:$0xff]  ;;  %v12750_v0 = vcombine.low %v386_v58, %v390_v48 }
 0x1b0   :  { %v12879_v53 = vcombine.high %v514_v49, %v518_v50  ;;  %v378_v54 = vld [vmem:[%s19815_s1 + $0x958] sm:$0xff]  ;;  %v12878_v2 = vcombine.low %v514_v49, %v518_v50 }
 0x1b1   :  { %3664 = vmatpush2.bf16.msra.mxu0 %v12550_v56  ;;  %3705 = vmatpush2.bf16.msra.mxu1 %v12678_v57  ;;  %v382_v55 = vld [vmem:[%s19815_s1 + $0x978] sm:$0xff] }
 0x1b2   :  { %3665 = vmatprep.subr.bf16.mxu0 %v12543_v60  ;;  %3706 = vmatprep.subr.bf16.mxu1 %v12671_v61  ;;  %v506_v57 = vld [vmem:[%s19815_s1 + $0xd58] sm:$0xff]  ;;  %v12742_v9 = vcombine.low %v378_v54, %v382_v55 }
 0x1b3   :  { %v510_v60 = vld [vmem:[%s19815_s1 + $0xd78] sm:$0xff] }
 0x1b4   :  { %v498_v33 = vld [vmem:[%s19815_s1 + $0xd18] sm:$0xff] }
 0x1b5   :  { %3666 = vmatpush2.bf16.msra.mxu0 %v12542_v23  ;;  %3707 = vmatpush2.bf16.msra.mxu1 %v12670_v3  ;;  %v502_v7 = vld [vmem:[%s19815_s1 + $0xd38] sm:$0xff] }
 0x1b6   :  { %3667 = vmatprep.subr.bf16.mxu0 %v12535_v4  ;;  %3708 = vmatprep.subr.bf16.mxu1 %v12663_v5  ;;  %v12871_v4 = vcombine.high %v506_v57, %v510_v60  ;;  %v370_v5 = vld [vmem:[%s19815_s1 + $0x918] sm:$0xff]  ;;  %v12863_v14 = vcombine.high %v498_v33, %v502_v7 }
 0x1b7   :  { %v362_v15 = vld [vmem:[%s19815_s1 + $0x8d8] sm:$0xff] }
 0x1b8   :  { %v490_v17 = vld [vmem:[%s19815_s1 + $0xcd8] sm:$0xff] }
 0x1b9   :  { %3668 = vmatpush2.bf16.msra.mxu0 %v12534_v10  ;;  %3709 = vmatpush2.bf16.msra.mxu1 %v12662_v11  ;;  %v12870_v11 = vcombine.low %v506_v57, %v510_v60  ;;  %v494_v18 = vld [vmem:[%s19815_s1 + $0xcf8] sm:$0xff] }
 0x1ba   :  { %3669 = vmatprep.subr.bf16.mxu0 %v12527_v12  ;;  %3710 = vmatprep.subr.bf16.mxu1 %v12655_v13  ;;  %v12855_v25 = vcombine.high %v490_v17, %v494_v18  ;;  %v354_v26 = vld [vmem:[%s19815_s1 + $0x898] sm:$0xff]  ;;  %v12854_v40 = vcombine.low %v490_v17, %v494_v18 }
 0x1bb   :  { %v358_v27 = vld [vmem:[%s19815_s1 + $0x8b8] sm:$0xff] }
 0x1bc   :  { %v482_v30 = vld [vmem:[%s19815_s1 + $0xc98] sm:$0xff]  ;;  %v12719_v42 = vcombine.high %v354_v26, %v358_v27  ;;  %v12718_v49 = vcombine.low %v354_v26, %v358_v27 }
 0x1bd   :  { %3670 = vmatpush2.bf16.msra.mxu0 %v12526_v19  ;;  %3711 = vmatpush2.bf16.msra.mxu1 %v12654_v21  ;;  %v12862_v21 = vcombine.low %v498_v33, %v502_v7  ;;  %v442_v17 = vld [vmem:[%s19815_s1 + $0xb58] sm:$0xff] }
 0x1be   :  { %3671 = vmatprep.subr.bf16.mxu0 %v12519_v22  ;;  %3712 = vmatprep.subr.bf16.mxu1 %v12647_v24  ;;  %v446_v18 = vld [vmem:[%s19815_s1 + $0xb78] sm:$0xff] }
 0x1bf   :  { %v12807_v26 = vcombine.high %v442_v17, %v446_v18 }
 0x1c1   :  { %3672 = vmatpush2.bf16.msra.mxu0 %v12518_v32  ;;  %3713 = vmatpush2.bf16.msra.mxu1 %v12646_v34  ;;  %v486_v32 = vld [vmem:[%s19815_s1 + $0xcb8] sm:$0xff] }
 0x1c2   :  { %3673 = vmatprep.subr.bf16.mxu0 %v12511_v35  ;;  %3714 = vmatprep.subr.bf16.mxu1 %v12639_v37  ;;  %v12847_v43 = vcombine.high %v482_v30, %v486_v32 }
 0x1c5   :  { %3674 = vmatpush2.bf16.msra.mxu0 %v12510_v44  ;;  %3715 = vmatpush2.bf16.msra.mxu1 %v12638_v45  ;;  %v346_v44 = vld [vmem:[%s19815_s1 + $0x858] sm:$0xff] }
 0x1c6   :  { %3725 = vmatprep.subr.bf16.mxu0 %v12759_v46  ;;  %3766 = vmatprep.subr.bf16.mxu1 %v12887_v47  ;;  %v350_v45 = vld [vmem:[%s19815_s1 + $0x878] sm:$0xff]  ;;  %v15920_v46 = vld [vmem:[%s19817_s2] sm:$0xff] }
 0x1c7   :  { %v478_v47 = vld [vmem:[%s19815_s1 + $0xc78] sm:$0xff]  ;;  %v12710_v60 = vcombine.low %v346_v44, %v350_v45 }
 0x1c8   :  { %v3431_v56 = vpop.f32.mrf.mxu0  ;;  %3676 = vmatmul.mubr.bf16.vlgmr.msra.gmra.mxu0 %v14627_v16  ;;  %v3472_v62 = vpop.f32.mrf.mxu1  ;;  %3717 = vmatmul.mubr.bf16.vlgmr.msra.gmra.mxu1 %v14638_v20  ;;  %v12743_v16 = vcombine.high %v378_v54, %v382_v55  ;;  %v374_v20 = vld [vmem:[%s19815_s1 + $0x938] sm:$0xff] }
 0x1c9   :  { %v3432_v61 = vadd.f32 %v3431_v56, %v15661_v29  ;;  %3726 = vmatpush1.bf16.msra.mxu0 %v12758_v51  ;;  %3767 = vmatpush1.bf16.msra.mxu1 %v12886_v52  ;;  %v12735_v12 = vcombine.high %v370_v5, %v374_v20  ;;  %v12734_v19 = vcombine.low %v370_v5, %v374_v20  ;;  %v342_v54 = vld [vmem:[%s19815_s1 + $0x838] sm:$0xff] }
 0x1ca   :  { %v3433_v1 = vpop.f32.mrf.mxu0  ;;  %3727 = vmatprep.subr.bf16.mxu0 %v12751_v59  ;;  %v3474_v3 = vpop.f32.mrf.mxu1  ;;  %3768 = vmatprep.subr.bf16.mxu1 %v12879_v53  ;;  %v12846_v51 = vcombine.low %v482_v30, %v486_v32  ;;  %v12711_v52 = vcombine.high %v346_v44, %v350_v45  ;;  %v338_v53 = vld [vmem:[%s19815_s1 + $0x818] sm:$0xff] }
 0x1cb   :  { %v15862_v23 = vadd.f32 %v3472_v62, %v3432_v61  ;;  %3757 = vmatprep.mubr.bf16.mxu0 %v14649_v28  ;;  %3798 = vmatprep.mubr.bf16.mxu1 %v14658_v31  ;;  %v3836_v28 = vlaneseq  ;;  %v366_v31 = vld [vmem:[%s19815_s1 + $0x8f8] sm:$0xff]  ;;  %v3434_v38 = vadd.f32 %v3433_v1, %v15670_v41  ;;  %v12702_v5 = vcombine.low %v338_v53, %v342_v54 }
 0x1cc   :  { %v3435_v29 = vpop.f32.mrf.mxu0  ;;  %v3476_v8 = vpop.f32.mrf.mxu1  ;;  %v12727_v22 = vcombine.high %v362_v15, %v366_v31  ;;  %v12726_v37 = vcombine.low %v362_v15, %v366_v31  ;;  %v474_v41 = vld [vmem:[%s19815_s1 + $0xc58] sm:$0xff] }
 0x1cd   :  { %3728 = vmatpush1.bf16.msra.mxu0 %v12750_v0  ;;  %3769 = vmatpush1.bf16.msra.mxu1 %v12878_v2  ;;  %v15890_v24 = vshrl.u32 %v3836_v28, 7  ;;  %v3475_v50 = vadd.f32 %v3474_v3, %v3434_v38  ;;  %v12839_v59 = vcombine.high %v474_v41, %v478_v47  ;;  %v466_v55 = vld [vmem:[%s19815_s1 + $0xc18] sm:$0xff]  ;;  %v12838_v62 = vcombine.low %v474_v41, %v478_v47 }
 0x1ce   :  { %v3436_v10 = vpop.f32.mrf.mxu0  ;;  %3729 = vmatprep.subr.bf16.mxu0 %v12743_v16  ;;  %v3477_v13 = vpop.f32.mrf.mxu1  ;;  %3770 = vmatprep.subr.bf16.mxu1 %v12871_v4  ;;  %v470_v56 = vld [vmem:[%s19815_s1 + $0xc38] sm:$0xff]  ;;  %v12703_v0 = vcombine.high %v338_v53, %v342_v54 }
 0x1cf   :  { %v15905_v34 = vsub.s32 1, %v15890_v24  ;;  %v15908_v35 = vsub.s32 3, %v15890_v24  ;;  %v12831_v1 = vcombine.high %v466_v55, %v470_v56  ;;  %v458_v2 = vld [vmem:[%s19815_s1 + $0xbd8] sm:$0xff]  ;;  %v12830_v29 = vcombine.low %v466_v55, %v470_v56 }
 0x1d0   :  { %v462_v16 = vld [vmem:[%s19815_s1 + $0xbf8] sm:$0xff] }
 0x1d1   :  { %3730 = vmatpush1.bf16.msra.mxu0 %v12742_v9  ;;  %3771 = vmatpush1.bf16.msra.mxu1 %v12870_v11  ;;  %v3843_v58 = vrot.slane %v15920_v46, %v15905_v34  ;;  %v3851_v48 = vrot.slane %v15920_v46, %v15908_v35  ;;  %v590_v3 = vld [vmem:[%s19815_s1 + $0xff8] sm:$0xff]  ;;  %v12823_v33 = vcombine.high %v458_v2, %v462_v16 }
 0x1d2   :  { %3731 = vmatprep.subr.bf16.mxu0 %v12735_v12  ;;  %3772 = vmatprep.subr.bf16.mxu1 %v12863_v14  ;;  %v450_v8 = vld [vmem:[%s19815_s1 + $0xb98] sm:$0xff]  ;;  %v12822_v28 = vcombine.low %v458_v2, %v462_v16 }
 0x1d3   :  { %v15945_v57 = vadd.f32 %v3843_v58, %v15477_v6  ;;  %v15947_v61 = vadd.f32 %v3851_v48, %v3475_v50  ;;  %v586_v6 = vld [vmem:[%s19815_s1 + $0xfd8] sm:$0xff] }
 0x1d4   :  { %v12951_v7 = vcombine.high %v586_v6, %v590_v3  ;;  %v454_v9 = vld [vmem:[%s19815_s1 + $0xbb8] sm:$0xff]  ;;  %v12950_v14 = vcombine.low %v586_v6, %v590_v3 }
 0x1d5   :  { %3732 = vmatpush1.bf16.msra.mxu0 %v12734_v19  ;;  %3773 = vmatpush1.bf16.msra.mxu1 %v12862_v21  ;;  %v3893_v4 = vmin.f32 %v15945_v57, 0.0  ;;  %v3895_v20 = vmin.f32 %v15947_v61, 0.0  ;;  %v578_v10 = vld [vmem:[%s19815_s1 + $0xf98] sm:$0xff]  ;;  %v12815_v15 = vcombine.high %v450_v8, %v454_v9  ;;  %vm3885_vm0 = vcmp.gt.f32.partialorder %v15945_v57, 0.0 }
 0x1d6   :  { %3733 = vmatprep.subr.bf16.mxu0 %v12727_v22  ;;  %3774 = vmatprep.subr.bf16.mxu1 %v12855_v25  ;;  %v582_v11 = vld [vmem:[%s19815_s1 + $0xfb8] sm:$0xff]  ;;  %v12814_v22 = vcombine.low %v450_v8, %v454_v9  ;;  %vm3887_vm1 = vcmp.gt.f32.partialorder %v15947_v61, 0.0 }
 0x1d7   :  { %v3902_v12 = vmul.f32 1.442695, %v3893_v4  ;;  %v3906_v13 = vmul.f32 1.442695, %v3895_v20  ;;  %v12943_v31 = vcombine.high %v578_v10, %v582_v11  ;;  %v570_v19 = vld [vmem:[%s19815_s1 + $0xf58] sm:$0xff]  ;;  %v12942_v25 = vcombine.low %v578_v10, %v582_v11 }
 0x1d8   :  { %v574_v21 = vld [vmem:[%s19815_s1 + $0xf78] sm:$0xff] }
 0x1d9   :  { %3734 = vmatpush1.bf16.msra.mxu0 %v12726_v37  ;;  %3775 = vmatpush1.bf16.msra.mxu1 %v12854_v40  ;;  %14274 = vpow2.f32 %v3902_v12  ;;  %v12935_v27 = vcombine.high %v570_v19, %v574_v21  ;;  %v434_v30 = vld [vmem:[%s19815_s1 + $0xb18] sm:$0xff]  ;;  %v12806_v40 = vcombine.low %v442_v17, %v446_v18  ;;  %v4012_v17 = vld [vmem:[%s19818_s3 + $0x1c0] sm:$0xff] }
 0x1da   :  { %3735 = vmatprep.subr.bf16.mxu0 %v12719_v42  ;;  %3776 = vmatprep.subr.bf16.mxu1 %v12847_v43  ;;  %14276 = vpow2.f32 %v3906_v13  ;;  %v438_v32 = vld [vmem:[%s19815_s1 + $0xb38] sm:$0xff]  ;;  %v12934_v42 = vcombine.low %v570_v19, %v574_v21  ;;  %v4016_v18 = vld [vmem:[%s19818_s3 + $0x1e0] sm:$0xff] }
 0x1db   :  { %v562_v37 = vld [vmem:[%s19815_s1 + $0xf18] sm:$0xff]  ;;  %v12799_v43 = vcombine.high %v434_v30, %v438_v32  ;;  %v12798_v48 = vcombine.low %v434_v30, %v438_v32  ;;  %v4140_v19 = vld [vmem:[%s19818_s3 + $0x5c0] sm:$0xff]  ;;  %v13017_v30 = vcombine.high %v4012_v17, %v4016_v18 }
 0x1dc   :  { %v566_v38 = vld [vmem:[%s19815_s1 + $0xf38] sm:$0xff]  ;;  %v4144_v21 = vld [vmem:[%s19818_s3 + $0x5e0] sm:$0xff] }
 0x1dd   :  { %3736 = vmatpush1.bf16.msra.mxu0 %v12718_v49  ;;  %3777 = vmatpush1.bf16.msra.mxu1 %v12846_v51  ;;  %v12927_v44 = vcombine.high %v562_v37, %v566_v38  ;;  %v426_v45 = vld [vmem:[%s19815_s1 + $0xad8] sm:$0xff]  ;;  %v12926_v49 = vcombine.low %v562_v37, %v566_v38  ;;  %v13145_v32 = vcombine.high %v4140_v19, %v4144_v21  ;;  %v4004_v38 = vld [vmem:[%s19818_s3 + $0x180] sm:$0xff] }
 0x1de   :  { %3737 = vmatprep.subr.bf16.mxu0 %v12711_v52  ;;  %3778 = vmatprep.subr.bf16.mxu1 %v12839_v59  ;;  %v430_v41 = vld [vmem:[%s19815_s1 + $0xaf8] sm:$0xff] }
 0x1df   :  { %v554_v47 = vld [vmem:[%s19815_s1 + $0xed8] sm:$0xff]  ;;  %v12791_v50 = vcombine.high %v426_v45, %v430_v41  ;;  %v12790_v55 = vcombine.low %v426_v45, %v430_v41  ;;  %v3996_v41 = vld [vmem:[%s19818_s3 + $0x140] sm:$0xff] }
 0x1e0   :  { %v558_v58 = vld [vmem:[%s19815_s1 + $0xef8] sm:$0xff] }
 0x1e1   :  { %3738 = vmatpush1.bf16.msra.mxu0 %v12710_v60  ;;  %3779 = vmatpush1.bf16.msra.mxu1 %v12838_v62  ;;  %v12919_v51 = vcombine.high %v554_v47, %v558_v58  ;;  %v418_v52 = vld [vmem:[%s19815_s1 + $0xa98] sm:$0xff]  ;;  %v12918_v60 = vcombine.low %v554_v47, %v558_v58  ;;  %v4000_v47 = vld [vmem:[%s19818_s3 + $0x160] sm:$0xff] }
 0x1e2   :  { %3739 = vmatprep.subr.bf16.mxu0 %v12703_v0  ;;  %3780 = vmatprep.subr.bf16.mxu1 %v12831_v1  ;;  %v422_v59 = vld [vmem:[%s19815_s1 + $0xab8] sm:$0xff] }
 0x1e3   :  { %v546_v53 = vld [vmem:[%s19815_s1 + $0xe98] sm:$0xff]  ;;  %v12783_v62 = vcombine.high %v418_v52, %v422_v59 }
 0x1e4   :  { %v550_v54 = vld [vmem:[%s19815_s1 + $0xeb8] sm:$0xff] }
 0x1e5   :  { %3740 = vmatpush1.bf16.msra.mxu0 %v12702_v5  ;;  %3781 = vmatpush1.bf16.msra.mxu1 %v12830_v29  ;;  %v12911_v1 = vcombine.high %v546_v53, %v550_v54  ;;  %v410_v2 = vld [vmem:[%s19815_s1 + $0xa58] sm:$0xff]  ;;  %v12782_v5 = vcombine.low %v418_v52, %v422_v59  ;;  %v12910_v29 = vcombine.low %v546_v53, %v550_v54 }
 0x1e6   :  { %3741 = vmatprep.subr.bf16.mxu0 %v12823_v33  ;;  %3782 = vmatprep.subr.bf16.mxu1 %v12951_v7  ;;  %v14275_v56 = vpop.eup %14274  ;;  %v414_v16 = vld [vmem:[%s19815_s1 + $0xa78] sm:$0xff] }
 0x1e7   :  { %v14277_v0 = vpop.eup %14276  ;;  %v538_v6 = vld [vmem:[%s19815_s1 + $0xe58] sm:$0xff]  ;;  %v12953_v4 = vadd.f32 -1.0, %v14275_v56  ;;  %v12775_v33 = vcombine.high %v410_v2, %v414_v16  ;;  %v13001_v56 = vcombine.high %v3996_v41, %v4000_v47 }
 0x1e8   :  { %v542_v3 = vld [vmem:[%s19815_s1 + $0xe78] sm:$0xff]  ;;  %v12955_v20 = vadd.f32 -1.0, %v14277_v0  ;;  %v3992_v0 = vld [vmem:[%s19818_s3 + $0x120] sm:$0xff] }
 0x1e9   :  { %3742 = vmatpush2.bf16.msra.mxu0 %v12822_v28  ;;  %3783 = vmatpush2.bf16.msra.mxu1 %v12950_v14  ;;  %v12903_v7 = vcombine.high %v538_v6, %v542_v3  ;;  %v402_v8 = vld [vmem:[%s19815_s1 + $0xa18] sm:$0xff]  ;;  %v3925_v12 = vmul.f32 1.6732632, %v12953_v4  ;;  %v12774_v28 = vcombine.low %v410_v2, %v414_v16  ;;  %v12902_v14 = vcombine.low %v538_v6, %v542_v3  ;;  %v4116_v2 = vld [vmem:[%s19818_s3 + $0x500] sm:$0xff] }
 0x1ea   :  { %3743 = vmatprep.subr.bf16.mxu0 %v12815_v15  ;;  %3784 = vmatprep.subr.bf16.mxu1 %v12943_v31  ;;  %v406_v9 = vld [vmem:[%s19815_s1 + $0xa38] sm:$0xff]  ;;  %v3927_v13 = vmul.f32 1.6732632, %v12955_v20  ;;  %v4120_v16 = vld [vmem:[%s19818_s3 + $0x520] sm:$0xff]  ;;  %v13000_v3 = vcombine.low %v3996_v41, %v4000_v47 }
 0x1eb   :  { %v530_v10 = vld [vmem:[%s19815_s1 + $0xe18] sm:$0xff]  ;;  %v12767_v15 = vcombine.high %v402_v8, %v406_v9  ;;  %v3960_v41 = vld [vmem:[%s19818_s3 + $0x20] sm:$0xff] }
 0x1ec   :  { %v534_v11 = vld [vmem:[%s19815_s1 + $0xe38] sm:$0xff] }
 0x1ed   :  { %3744 = vmatpush2.bf16.msra.mxu0 %v12814_v22  ;;  %3785 = vmatpush2.bf16.msra.mxu1 %v12942_v25  ;;  %v12895_v31 = vcombine.high %v530_v10, %v534_v11  ;;  %v3933_v22 = vsel %vm3885_vm0, %v15945_v57, %v3925_v12  ;;  %v12766_v25 = vcombine.low %v402_v8, %v406_v9  ;;  %v4008_v57 = vld [vmem:[%s19818_s3 + $0x1a0] sm:$0xff] }
 0x1ee   :  { %3745 = vmatprep.subr.bf16.mxu0 %v12807_v26  ;;  %3786 = vmatprep.subr.bf16.mxu1 %v12935_v27  ;;  %v3935_v26 = vsel %vm3887_vm1, %v15947_v61, %v3927_v13  ;;  %v12894_v27 = vcombine.low %v530_v10, %v534_v11  ;;  %v3941_v37 = vmul.f32 1.050701, %v3933_v22  ;;  %v4132_v61 = vld [vmem:[%s19818_s3 + $0x580] sm:$0xff]  ;;  %v13009_v45 = vcombine.high %v4004_v38, %v4008_v57 }
 0x1ef   :  { %v13008_v53 = vcombine.low %v4004_v38, %v4008_v57  ;;  %v3984_v8 = vld [vmem:[%s19818_s3 + $0xe0] sm:$0xff]  ;;  %v13120_v12 = vcombine.low %v4116_v2, %v4120_v16  ;;  %v16126_v13 = vsub.s32 0, %v15890_v24 }
 0x1f0   :  { %v4108_v9 = vld [vmem:[%s19818_s3 + $0x4c0] sm:$0xff] }
 0x1f1   :  { %3746 = vmatpush2.bf16.msra.mxu0 %v12806_v40  ;;  %3787 = vmatpush2.bf16.msra.mxu1 %v12934_v42  ;;  %v3943_v40 = vmul.f32 1.050701, %v3935_v26  ;;  %v13016_v42 = vcombine.low %v4012_v17, %v4016_v18  ;;  %v4112_v10 = vld [vmem:[%s19818_s3 + $0x4e0] sm:$0xff]  ;;  %v16135_v17 = vsub.s32 2, %v15890_v24  ;;  %v3839_v26 = vrot.slane %v15920_v46, %v16126_v13 }
 0x1f2   :  { %3747 = vmatprep.subr.bf16.mxu0 %v12799_v43  ;;  %3788 = vmatprep.subr.bf16.mxu1 %v12927_v44  ;;  %v4136_v43 = vld [vmem:[%s19818_s3 + $0x5a0] sm:$0xff]  ;;  %v13144_v44 = vcombine.low %v4140_v19, %v4144_v21  ;;  %v13112_v22 = vcombine.low %v4108_v9, %v4112_v10 }
 0x1f3   :  { %v16091_v59 = vpack.c.bf16 %v3943_v40, %v3943_v40  ;;  %v4100_v18 = vld [vmem:[%s19818_s3 + $0x480] sm:$0xff] }
 0x1f4   :  { %v4104_v19 = vld [vmem:[%s19818_s3 + $0x4a0] sm:$0xff] }
 0x1f5   :  { %3748 = vmatpush2.bf16.msra.mxu0 %v12798_v48  ;;  %3789 = vmatpush2.bf16.msra.mxu1 %v12926_v49  ;;  %v16082_v48 = vpack.c.bf16 %v3941_v37, %v3941_v37  ;;  %v13137_v49 = vcombine.high %v4132_v61, %v4136_v43  ;;  %v3847_v37 = vrot.slane %v15920_v46, %v16135_v17  ;;  %v4092_v38 = vld [vmem:[%s19818_s3 + $0x440] sm:$0xff] }
 0x1f6   :  { %3749 = vmatprep.subr.bf16.mxu0 %v12791_v50  ;;  %3790 = vmatprep.subr.bf16.mxu1 %v12919_v51  ;;  %v4124_v50 = vld [vmem:[%s19818_s3 + $0x540] sm:$0xff] }
 0x1f7   :  { %v4128_v51 = vld [vmem:[%s19818_s3 + $0x560] sm:$0xff]  ;;  %v16169_v47 = vadd.f32 %v3847_v37, %v15862_v23 }
 0x1f8   :  { %v4096_v57 = vld [vmem:[%s19818_s3 + $0x460] sm:$0xff] }
 0x1f9   :  { %3750 = vmatpush2.bf16.msra.mxu0 %v12790_v55  ;;  %3791 = vmatpush2.bf16.msra.mxu1 %v12918_v60  ;;  %v13136_v55 = vcombine.low %v4132_v61, %v4136_v43  ;;  %v16160_v43 = vadd.f32 %v3839_v26, %v15460_v63  ;;  %v4088_v63 = vld [vmem:[%s19818_s3 + $0x420] sm:$0xff]  ;;  %vm3886_vm3 = vcmp.gt.f32.partialorder %v16169_v47, 0.0 }
 0x1fa   :  { %3751 = vmatprep.subr.bf16.mxu0 %v12783_v62  ;;  %3792 = vmatprep.subr.bf16.mxu1 %v12911_v1  ;;  %v13129_v62 = vcombine.high %v4124_v50, %v4128_v51  ;;  %v4076_v23 = vld [vmem:[%s19818_s3 + $0x3c0] sm:$0xff] }
 0x1fb   :  { %v4044_v37 = vld [vmem:[%s19818_s3 + $0x2c0] sm:$0xff]  ;;  %vm3884_vm2 = vcmp.gt.f32.partialorder %v16160_v43, 0.0 }
 0x1fd   :  { %3752 = vmatpush2.bf16.msra.mxu0 %v12782_v5  ;;  %3793 = vmatpush2.bf16.msra.mxu1 %v12910_v29  ;;  %v13128_v5 = vcombine.low %v4124_v50, %v4128_v51  ;;  %v13096_v50 = vcombine.low %v4092_v38, %v4096_v57 }
 0x1fe   :  { %3753 = vmatprep.subr.bf16.mxu0 %v12775_v33  ;;  %3794 = vmatprep.subr.bf16.mxu1 %v12903_v7  ;;  %v13121_v33 = vcombine.high %v4116_v2, %v4120_v16  ;;  %v3980_v7 = vld [vmem:[%s19818_s3 + $0xc0] sm:$0xff] }
 0x1ff   :  { %v12984_v21 = vcombine.low %v3980_v7, %v3984_v8 }
 0x201   :  { %3754 = vmatpush2.bf16.msra.mxu0 %v12774_v28  ;;  %3795 = vmatpush2.bf16.msra.mxu1 %v12902_v14  ;;  %v12985_v28 = vcombine.high %v3980_v7, %v3984_v8  ;;  %v13113_v14 = vcombine.high %v4108_v9, %v4112_v10  ;;  %v4060_v10 = vld [vmem:[%s19818_s3 + $0x340] sm:$0xff] }
 0x202   :  { %3755 = vmatprep.subr.bf16.mxu0 %v12767_v15  ;;  %3796 = vmatprep.subr.bf16.mxu1 %v12895_v31  ;;  %v3972_v15 = vld [vmem:[%s19818_s3 + $0x80] sm:$0xff] }
 0x203   :  { %v3976_v31 = vld [vmem:[%s19818_s3 + $0xa0] sm:$0xff] }
 0x204   :  { %v12976_v40 = vcombine.low %v3972_v15, %v3976_v31 }
 0x205   :  { %3756 = vmatpush2.bf16.msra.mxu0 %v12766_v25  ;;  %3797 = vmatpush2.bf16.msra.mxu1 %v12894_v27  ;;  %v12977_v25 = vcombine.high %v3972_v15, %v3976_v31  ;;  %v13105_v27 = vcombine.high %v4100_v18, %v4104_v19 }
 0x206   :  { %7070 = vmatprep.subr.bf16.mxu0 %v13017_v30  ;;  %7111 = vmatprep.subr.bf16.mxu1 %v13145_v32  ;;  %v3964_v30 = vld [vmem:[%s19818_s3 + $0x40] sm:$0xff] }
 0x207   :  { %v3968_v32 = vld [vmem:[%s19818_s3 + $0x60] sm:$0xff] }
 0x208   :  { %v3513_v58 = vpop.f32.mrf.mxu0  ;;  %3758 = vmatmul.mubr.bf16.vlgmr.msra.gmra.mxu0 %v14843_v36  ;;  %v3554_v52 = vpop.f32.mrf.mxu1  ;;  %3799 = vmatmul.mubr.bf16.vlgmr.msra.gmra.mxu1 %v14851_v39  ;;  %v3988_v39 = vld [vmem:[%s19818_s3 + $0x100] sm:$0xff]  ;;  %v12969_v61 = vcombine.high %v3964_v30, %v3968_v32 }
 0x209   :  { %7071 = vmatpush1.bf16.msra.mxu0 %v13016_v42  ;;  %v16093_v54 = vadd.f32 %v3554_v52, %v3513_v58  ;;  %7102 = vmatprep.mubr.bf16.mxu0 %v16082_v48  ;;  %v12993_v20 = vcombine.high %v3988_v39, %v3992_v0  ;;  %v12992_v11 = vcombine.low %v3988_v39, %v3992_v0  ;;  %v4084_v58 = vld [vmem:[%s19818_s3 + $0x400] sm:$0xff]  ;;  %v3892_v52 = vmin.f32 %v16160_v43, 0.0 }
 0x20a   :  { %7112 = vmatpush1.bf16.msra.mxu1 %v13144_v44  ;;  %v16096_v36 = vpop.f32.mrf.mxu0  ;;  %7143 = vmatprep.mubr.bf16.mxu1 %v16091_v59  ;;  %v16099_v60 = vpop.f32.mrf.mxu1  ;;  %v13104_v42 = vcombine.low %v4100_v18, %v4104_v19  ;;  %v13097_v44 = vcombine.high %v4092_v38, %v4096_v57  ;;  %v4208_v39 = vld [vmem:[%s19818_s3 + $0x7e0] sm:$0xff] }
 0x20b   :  { %7072 = vmatprep.subr.bf16.mxu0 %v13009_v45  ;;  %7113 = vmatprep.subr.bf16.mxu1 %v13137_v49  ;;  %v3956_v45 = vld [vmem:[%s19818_s3] sm:$0xff]  ;;  %v12968_v49 = vcombine.low %v3964_v30, %v3968_v32  ;;  %v3900_v16 = vmul.f32 1.442695, %v3892_v52 }
 0x20c   :  { %v3517_v1 = vpop.f32.mrf.mxu0  ;;  %v3558_v6 = vpop.f32.mrf.mxu1  ;;  %v12961_v51 = vcombine.high %v3956_v45, %v3960_v41  ;;  %v12960_v0 = vcombine.low %v3956_v45, %v3960_v41  ;;  %v4052_v19 = vld [vmem:[%s19818_s3 + $0x300] sm:$0xff] }
 0x20d   :  { %7073 = vmatpush1.bf16.msra.mxu0 %v13008_v53  ;;  %v13089_v53 = vcombine.high %v4084_v58, %v4088_v63  ;;  %v13088_v1 = vcombine.low %v4084_v58, %v4088_v63  ;;  %14278 = vpow2.f32 %v3900_v16  ;;  %v4048_v38 = vld [vmem:[%s19818_s3 + $0x2e0] sm:$0xff] }
 0x20e   :  { %7114 = vmatpush1.bf16.msra.mxu1 %v13136_v55  ;;  %v3518_v4 = vpop.f32.mrf.mxu0  ;;  %7074 = vmatprep.subr.bf16.mxu0 %v13001_v56  ;;  %v3559_v29 = vpop.f32.mrf.mxu1  ;;  %v4080_v55 = vld [vmem:[%s19818_s3 + $0x3e0] sm:$0xff]  ;;  %v3894_v56 = vmin.f32 %v16169_v47, 0.0  ;;  %v13048_v52 = vcombine.low %v4044_v37, %v4048_v38 }
 0x20f   :  { %7115 = vmatprep.subr.bf16.mxu1 %v13129_v62  ;;  %v4204_v62 = vld [vmem:[%s19818_s3 + $0x7c0] sm:$0xff]  ;;  %v13081_v2 = vcombine.high %v4076_v23, %v4080_v55 }
 0x210   :  { %v13209_v6 = vcombine.high %v4204_v62, %v4208_v39  ;;  %v4072_v4 = vld [vmem:[%s19818_s3 + $0x3a0] sm:$0xff]  ;;  %v13208_v7 = vcombine.low %v4204_v62, %v4208_v39 }
 0x211   :  { %7075 = vmatpush1.bf16.msra.mxu0 %v13000_v3  ;;  %v4068_v3 = vld [vmem:[%s19818_s3 + $0x380] sm:$0xff] }
 0x212   :  { %7116 = vmatpush1.bf16.msra.mxu1 %v13128_v5  ;;  %7076 = vmatprep.subr.bf16.mxu0 %v12993_v20  ;;  %v3904_v5 = vmul.f32 1.442695, %v3894_v56  ;;  %v4196_v20 = vld [vmem:[%s19818_s3 + $0x780] sm:$0xff]  ;;  %v13073_v8 = vcombine.high %v4068_v3, %v4072_v4 }
 0x213   :  { %7117 = vmatprep.subr.bf16.mxu1 %v13121_v33  ;;  %v4200_v29 = vld [vmem:[%s19818_s3 + $0x7a0] sm:$0xff]  ;;  %v13080_v33 = vcombine.low %v4076_v23, %v4080_v55 }
 0x214   :  { %v13201_v9 = vcombine.high %v4196_v20, %v4200_v29  ;;  %14280 = vpow2.f32 %v3904_v5  ;;  %v13200_v15 = vcombine.low %v4196_v20, %v4200_v29  ;;  %v4172_v57 = vld [vmem:[%s19818_s3 + $0x6c0] sm:$0xff] }
 0x215   :  { %7077 = vmatpush1.bf16.msra.mxu0 %v12992_v11  ;;  %v4064_v11 = vld [vmem:[%s19818_s3 + $0x360] sm:$0xff] }
 0x216   :  { %7118 = vmatpush1.bf16.msra.mxu1 %v13120_v12  ;;  %7078 = vmatprep.subr.bf16.mxu0 %v12985_v28  ;;  %v4188_v12 = vld [vmem:[%s19818_s3 + $0x740] sm:$0xff]  ;;  %v13065_v31 = vcombine.high %v4060_v10, %v4064_v11  ;;  %v13064_v26 = vcombine.low %v4060_v10, %v4064_v11 }
 0x217   :  { %7119 = vmatprep.subr.bf16.mxu1 %v13113_v14  ;;  %v4192_v28 = vld [vmem:[%s19818_s3 + $0x760] sm:$0xff]  ;;  %v13072_v14 = vcombine.low %v4068_v3, %v4072_v4 }
 0x218   :  { %v13193_v18 = vcombine.high %v4188_v12, %v4192_v28  ;;  %v4036_v41 = vld [vmem:[%s19818_s3 + $0x280] sm:$0xff] }
 0x219   :  { %7079 = vmatpush1.bf16.msra.mxu0 %v12984_v21  ;;  %v4056_v21 = vld [vmem:[%s19818_s3 + $0x320] sm:$0xff] }
 0x21a   :  { %7120 = vmatpush1.bf16.msra.mxu1 %v13112_v22  ;;  %7080 = vmatprep.subr.bf16.mxu0 %v12977_v25  ;;  %v4180_v22 = vld [vmem:[%s19818_s3 + $0x700] sm:$0xff]  ;;  %v13057_v30 = vcombine.high %v4052_v19, %v4056_v21  ;;  %v14279_v63 = vpop.eup %14278 }
 0x21b   :  { %7121 = vmatprep.subr.bf16.mxu1 %v13105_v27  ;;  %v4184_v25 = vld [vmem:[%s19818_s3 + $0x720] sm:$0xff]  ;;  %v13192_v27 = vcombine.low %v4188_v12, %v4192_v28  ;;  %v12952_v55 = vadd.f32 -1.0, %v14279_v63 }
 0x21c   :  { %v13185_v32 = vcombine.high %v4180_v22, %v4184_v25  ;;  %v4040_v58 = vld [vmem:[%s19818_s3 + $0x2a0] sm:$0xff] }
 0x21d   :  { %7081 = vmatpush1.bf16.msra.mxu0 %v12976_v40  ;;  %v4176_v40 = vld [vmem:[%s19818_s3 + $0x6e0] sm:$0xff]  ;;  %v13041_v23 = vcombine.high %v4036_v41, %v4040_v58  ;;  %v13040_v16 = vcombine.low %v4036_v41, %v4040_v58  ;;  %v3924_v4 = vmul.f32 1.6732632, %v12952_v55 }
 0x21e   :  { %7122 = vmatpush1.bf16.msra.mxu1 %v13104_v42  ;;  %7082 = vmatprep.subr.bf16.mxu0 %v12969_v61  ;;  %v13056_v42 = vcombine.low %v4052_v19, %v4056_v21  ;;  %v13184_v61 = vcombine.low %v4180_v22, %v4184_v25  ;;  %v13177_v45 = vcombine.high %v4172_v57, %v4176_v40  ;;  %v4028_v62 = vld [vmem:[%s19818_s3 + $0x240] sm:$0xff] }
 0x21f   :  { %7123 = vmatprep.subr.bf16.mxu1 %v13097_v44  ;;  %v13049_v44 = vcombine.high %v4044_v37, %v4048_v38  ;;  %v4032_v39 = vld [vmem:[%s19818_s3 + $0x260] sm:$0xff]  ;;  %v3932_v12 = vsel %vm3884_vm2, %v16160_v43, %v3924_v4 }
 0x220   :  { %v13033_v3 = vcombine.high %v4028_v62, %v4032_v39  ;;  %v4020_v20 = vld [vmem:[%s19818_s3 + $0x200] sm:$0xff]  ;;  %v3940_v21 = vmul.f32 1.050701, %v3932_v12 }
 0x221   :  { %7083 = vmatpush1.bf16.msra.mxu0 %v12968_v49  ;;  %v4164_v49 = vld [vmem:[%s19818_s3 + $0x680] sm:$0xff] }
 0x222   :  { %7124 = vmatpush1.bf16.msra.mxu1 %v13096_v50  ;;  %7084 = vmatprep.subr.bf16.mxu0 %v12961_v51  ;;  %v4168_v50 = vld [vmem:[%s19818_s3 + $0x6a0] sm:$0xff]  ;;  %v14281_v51 = vpop.eup %14280 }
 0x223   :  { %7125 = vmatprep.subr.bf16.mxu1 %v13089_v53  ;;  %v13176_v53 = vcombine.low %v4172_v57, %v4176_v40  ;;  %v13169_v56 = vcombine.high %v4164_v49, %v4168_v50  ;;  %v4024_v29 = vld [vmem:[%s19818_s3 + $0x220] sm:$0xff]  ;;  %v16303_v57 = vpack.c.bf16 %v3940_v21, %v3940_v21 }
 0x224   :  { %v13025_v11 = vcombine.high %v4020_v20, %v4024_v29  ;;  %v4400_v43 = vld [vmem:[%s19818_s3 + $0xde0] sm:$0xff]  ;;  %v13024_v19 = vcombine.low %v4020_v20, %v4024_v29 }
 0x225   :  { %7085 = vmatpush1.bf16.msra.mxu0 %v12960_v0  ;;  %v12954_v0 = vadd.f32 -1.0, %v14281_v51  ;;  %v4392_v37 = vld [vmem:[%s19818_s3 + $0xda0] sm:$0xff]  ;;  %v3557_v51 = vadd.f32 %v16099_v60, %v16096_v36 }
 0x226   :  { %7126 = vmatpush1.bf16.msra.mxu1 %v13088_v1  ;;  %7086 = vmatprep.subr.bf16.mxu0 %v13081_v2  ;;  %v4156_v1 = vld [vmem:[%s19818_s3 + $0x640] sm:$0xff] }
 0x227   :  { %7127 = vmatprep.subr.bf16.mxu1 %v13209_v6  ;;  %v4160_v2 = vld [vmem:[%s19818_s3 + $0x660] sm:$0xff]  ;;  %v13168_v6 = vcombine.low %v4164_v49, %v4168_v50 }
 0x228   :  { %v13161_v5 = vcombine.high %v4156_v1, %v4160_v2  ;;  %v13160_v10 = vcombine.low %v4156_v1, %v4160_v2  ;;  %v4256_v41 = vld [vmem:[%s19818_s3 + $0x960] sm:$0xff] }
 0x229   :  { %7087 = vmatpush2.bf16.msra.mxu0 %v13080_v33  ;;  %v3926_v33 = vmul.f32 1.6732632, %v12954_v0  ;;  %v4380_v49 = vld [vmem:[%s19818_s3 + $0xd40] sm:$0xff] }
 0x22a   :  { %7128 = vmatpush2.bf16.msra.mxu1 %v13208_v7  ;;  %7088 = vmatprep.subr.bf16.mxu0 %v13073_v8  ;;  %v4148_v7 = vld [vmem:[%s19818_s3 + $0x600] sm:$0xff] }
 0x22b   :  { %7129 = vmatprep.subr.bf16.mxu1 %v13201_v9  ;;  %v4152_v8 = vld [vmem:[%s19818_s3 + $0x620] sm:$0xff]  ;;  %v13032_v9 = vcombine.low %v4028_v62, %v4032_v39 }
 0x22c   :  { %v13153_v28 = vcombine.high %v4148_v7, %v4152_v8  ;;  %v13152_v22 = vcombine.low %v4148_v7, %v4152_v8  ;;  %v4384_v50 = vld [vmem:[%s19818_s3 + $0xd60] sm:$0xff] }
 0x22d   :  { %7089 = vmatpush2.bf16.msra.mxu0 %v13072_v14  ;;  %v4268_v14 = vld [vmem:[%s19818_s3 + $0x9c0] sm:$0xff]  ;;  %v13385_v60 = vcombine.high %v4380_v49, %v4384_v50 }
 0x22e   :  { %7130 = vmatpush2.bf16.msra.mxu1 %v13200_v15  ;;  %7090 = vmatprep.subr.bf16.mxu0 %v13065_v31  ;;  %v4272_v15 = vld [vmem:[%s19818_s3 + $0x9e0] sm:$0xff]  ;;  %v3934_v31 = vsel %vm3886_vm3, %v16169_v47, %v3926_v33  ;;  %v13384_v33 = vcombine.low %v4380_v49, %v4384_v50 }
 0x22f   :  { %7131 = vmatprep.subr.bf16.mxu1 %v13193_v18  ;;  %v4396_v18 = vld [vmem:[%s19818_s3 + $0xdc0] sm:$0xff]  ;;  %v13273_v25 = vcombine.high %v4268_v14, %v4272_v15  ;;  %v13272_v38 = vcombine.low %v4268_v14, %v4272_v15 }
 0x230   :  { %v4260_v47 = vld [vmem:[%s19818_s3 + $0x980] sm:$0xff] }
 0x231   :  { %7091 = vmatpush2.bf16.msra.mxu0 %v13064_v26  ;;  %v3942_v26 = vmul.f32 1.050701, %v3934_v31  ;;  %v4244_v1 = vld [vmem:[%s19818_s3 + $0x900] sm:$0xff] }
 0x232   :  { %7132 = vmatpush2.bf16.msra.mxu1 %v13192_v27  ;;  %7092 = vmatprep.subr.bf16.mxu0 %v13057_v30  ;;  %v4264_v27 = vld [vmem:[%s19818_s3 + $0x9a0] sm:$0xff]  ;;  %v13401_v30 = vcombine.high %v4396_v18, %v4400_v43 }
 0x233   :  { %7133 = vmatprep.subr.bf16.mxu1 %v13185_v32  ;;  %v4388_v32 = vld [vmem:[%s19818_s3 + $0xd80] sm:$0xff]  ;;  %v13265_v40 = vcombine.high %v4260_v47, %v4264_v27 }
 0x234   :  { %v13393_v58 = vcombine.high %v4388_v32, %v4392_v37  ;;  %v4248_v36 = vld [vmem:[%s19818_s3 + $0x920] sm:$0xff] }
 0x235   :  { %7093 = vmatpush2.bf16.msra.mxu0 %v13056_v42  ;;  %v13400_v42 = vcombine.low %v4396_v18, %v4400_v43  ;;  %v13249_v29 = vcombine.high %v4244_v1, %v4248_v36  ;;  %v4364_v12 = vld [vmem:[%s19818_s3 + $0xcc0] sm:$0xff]  ;;  %v13248_v15 = vcombine.low %v4244_v1, %v4248_v36 }
 0x236   :  { %7134 = vmatpush2.bf16.msra.mxu1 %v13184_v61  ;;  %7094 = vmatprep.subr.bf16.mxu0 %v13049_v44  ;;  %v16305_v61 = vpack.c.bf16 %v3942_v26, %v3942_v26  ;;  %v16308_v44 = vsub.s32 5, %v15890_v24  ;;  %v4332_v1 = vld [vmem:[%s19818_s3 + $0xbc0] sm:$0xff] }
 0x237   :  { %7135 = vmatprep.subr.bf16.mxu1 %v13177_v45  ;;  %v4252_v45 = vld [vmem:[%s19818_s3 + $0x940] sm:$0xff] }
 0x238   :  { %v13257_v55 = vcombine.high %v4252_v45, %v4256_v41  ;;  %v3859_v0 = vrot.slane %v15920_v46, %v16308_v44  ;;  %v4336_v36 = vld [vmem:[%s19818_s3 + $0xbe0] sm:$0xff] }
 0x239   :  { %7095 = vmatpush2.bf16.msra.mxu0 %v13048_v52 }
 0x23a   :  { %7136 = vmatpush2.bf16.msra.mxu1 %v13176_v53  ;;  %7096 = vmatprep.subr.bf16.mxu0 %v13041_v23  ;;  %v13264_v53 = vcombine.low %v4260_v47, %v4264_v27  ;;  %v4356_v47 = vld [vmem:[%s19818_s3 + $0xc80] sm:$0xff] }
 0x23b   :  { %7137 = vmatprep.subr.bf16.mxu1 %v13169_v56  ;;  %v13392_v56 = vcombine.low %v4388_v32, %v4392_v37 }
 0x23d   :  { %7097 = vmatpush2.bf16.msra.mxu0 %v13040_v16  ;;  %v4372_v16 = vld [vmem:[%s19818_s3 + $0xd00] sm:$0xff] }
 0x23e   :  { %7138 = vmatpush2.bf16.msra.mxu1 %v13168_v6  ;;  %7098 = vmatprep.subr.bf16.mxu0 %v13033_v3  ;;  %v4376_v6 = vld [vmem:[%s19818_s3 + $0xd20] sm:$0xff] }
 0x23f   :  { %7139 = vmatprep.subr.bf16.mxu1 %v13161_v5  ;;  %v13256_v5 = vcombine.low %v4252_v45, %v4256_v41  ;;  %v13376_v18 = vcombine.low %v4372_v16, %v4376_v6  ;;  %v4348_v41 = vld [vmem:[%s19818_s3 + $0xc40] sm:$0xff] }
 0x241   :  { %7099 = vmatpush2.bf16.msra.mxu0 %v13032_v9  ;;  %v4236_v9 = vld [vmem:[%s19818_s3 + $0x8c0] sm:$0xff] }
 0x242   :  { %7140 = vmatpush2.bf16.msra.mxu1 %v13160_v10  ;;  %7100 = vmatprep.subr.bf16.mxu0 %v13025_v11  ;;  %v4240_v10 = vld [vmem:[%s19818_s3 + $0x8e0] sm:$0xff]  ;;  %v13377_v11 = vcombine.high %v4372_v16, %v4376_v6 }
 0x243   :  { %7141 = vmatprep.subr.bf16.mxu1 %v13153_v28  ;;  %v4368_v28 = vld [vmem:[%s19818_s3 + $0xce0] sm:$0xff]  ;;  %v13241_v31 = vcombine.high %v4236_v9, %v4240_v10  ;;  %v13240_v27 = vcombine.low %v4236_v9, %v4240_v10 }
 0x244   :  { %v13369_v26 = vcombine.high %v4364_v12, %v4368_v28  ;;  %v13368_v32 = vcombine.low %v4364_v12, %v4368_v28  ;;  %v4464_v16 = vld [vmem:[%s19818_s3 + $0xfe0] sm:$0xff]  ;;  %v13336_v28 = vcombine.low %v4332_v1, %v4336_v36 }
 0x245   :  { %7101 = vmatpush2.bf16.msra.mxu0 %v13024_v19  ;;  %v16357_v19 = vsub.s32 4, %v15890_v24  ;;  %v4452_v10 = vld [vmem:[%s19818_s3 + $0xf80] sm:$0xff] }
 0x246   :  { %7142 = vmatpush2.bf16.msra.mxu1 %v13152_v22  ;;  %7152 = vmatprep.subr.bf16.mxu0 %v13273_v25  ;;  %v4228_v22 = vld [vmem:[%s19818_s3 + $0x880] sm:$0xff] }
 0x247   :  { %7193 = vmatprep.subr.bf16.mxu1 %v13401_v30  ;;  %v4232_v25 = vld [vmem:[%s19818_s3 + $0x8a0] sm:$0xff] }
 0x248   :  { %v3595_v63 = vpop.f32.mrf.mxu0  ;;  %7103 = vmatmul.mubr.bf16.vlgmr.msra.gmra.mxu0 %v16303_v57  ;;  %v3636_v52 = vpop.f32.mrf.mxu1  ;;  %v13233_v30 = vcombine.high %v4228_v22, %v4232_v25 }
 0x249   :  { %7144 = vmatmul.mubr.bf16.vlgmr.msra.gmra.mxu1 %v16305_v61  ;;  %7153 = vmatpush1.bf16.msra.mxu0 %v13272_v38  ;;  %v3596_v43 = vadd.f32 %v3595_v63, %v16093_v54  ;;  %v4360_v54 = vld [vmem:[%s19818_s3 + $0xca0] sm:$0xff]  ;;  %v3855_v38 = vrot.slane %v15920_v46, %v16357_v19  ;;  %v13232_v46 = vcombine.low %v4228_v22, %v4232_v25 }
 0x24a   :  { %v3597_v23 = vpop.f32.mrf.mxu0  ;;  %7154 = vmatprep.subr.bf16.mxu0 %v13265_v40  ;;  %7194 = vmatpush1.bf16.msra.mxu1 %v13400_v42  ;;  %v3638_v39 = vpop.f32.mrf.mxu1  ;;  %v4220_v40 = vld [vmem:[%s19818_s3 + $0x840] sm:$0xff]  ;;  %v13361_v45 = vcombine.high %v4356_v47, %v4360_v54  ;;  %v13360_v49 = vcombine.low %v4356_v47, %v4360_v54 }
 0x24b   :  { %v3598_v62 = vadd.f32 %v3597_v23, %v3557_v51  ;;  %7195 = vmatprep.subr.bf16.mxu1 %v13393_v58  ;;  %v3637_v37 = vadd.f32 %v3636_v52, %v3596_v43  ;;  %v4224_v42 = vld [vmem:[%s19818_s3 + $0x860] sm:$0xff] }
 0x24c   :  { %v3599_v2 = vpop.f32.mrf.mxu0  ;;  %v3640_v4 = vpop.f32.mrf.mxu1  ;;  %v4352_v58 = vld [vmem:[%s19818_s3 + $0xc60] sm:$0xff]  ;;  %v13225_v63 = vcombine.high %v4220_v40, %v4224_v42 }
 0x24d   :  { %v3639_v3 = vadd.f32 %v3638_v39, %v3598_v62  ;;  %7155 = vmatpush1.bf16.msra.mxu0 %v13264_v53  ;;  %v16385_v50 = vadd.f32 %v3855_v38, %v3637_v37  ;;  %v4212_v51 = vld [vmem:[%s19818_s3 + $0x800] sm:$0xff]  ;;  %v13353_v53 = vcombine.high %v4348_v41, %v4352_v58  ;;  %v13352_v39 = vcombine.low %v4348_v41, %v4352_v58  ;;  %v16449_v38 = vld [vmem:[%s19818_s3 + $0x5c8] sm:$0xff] }
 0x24e   :  { %v3600_v20 = vpop.f32.mrf.mxu0  ;;  %7156 = vmatprep.subr.bf16.mxu0 %v13257_v55  ;;  %7196 = vmatpush1.bf16.msra.mxu1 %v13392_v56  ;;  %v3641_v8 = vpop.f32.mrf.mxu1  ;;  %v4216_v52 = vld [vmem:[%s19818_s3 + $0x820] sm:$0xff]  ;;  %v13224_v56 = vcombine.low %v4220_v40, %v4224_v42  ;;  %v13337_v4 = vcombine.high %v4332_v1, %v4336_v36  ;;  %v16454_v40 = vld [vmem:[%s19818_s3 + $0x5e8] sm:$0xff] }
 0x24f   :  { %v16340_v7 = vadd.f32 %v3859_v0, %v3639_v3  ;;  %7197 = vmatprep.subr.bf16.mxu1 %v13385_v60  ;;  %v4340_v23 = vld [vmem:[%s19818_s3 + $0xc00] sm:$0xff]  ;;  %v13217_v62 = vcombine.high %v4212_v51, %v4216_v52  ;;  %v3896_v0 = vmin.f32 %v16385_v50, 0.0  ;;  %v13216_v6 = vcombine.low %v4212_v51, %v4216_v52 }
 0x250   :  { %v4344_v55 = vld [vmem:[%s19818_s3 + $0xc20] sm:$0xff]  ;;  %v13146_v41 = vcombine.low %v16449_v38, %v16454_v40  ;;  %vm3888_vm5 = vcmp.gt.f32.partialorder %v16385_v50, 0.0 }
 0x251   :  { %v3897_v14 = vmin.f32 %v16340_v7, 0.0  ;;  %7157 = vmatpush1.bf16.msra.mxu0 %v13256_v5  ;;  %v13345_v60 = vcombine.high %v4340_v23, %v4344_v55  ;;  %v4460_v2 = vld [vmem:[%s19818_s3 + $0xfc0] sm:$0xff]  ;;  %v13344_v5 = vcombine.low %v4340_v23, %v4344_v55  ;;  %v3908_v20 = vmul.f32 1.442695, %v3896_v0 }
 0x252   :  { %7158 = vmatprep.subr.bf16.mxu0 %v13249_v29  ;;  %7198 = vmatpush1.bf16.msra.mxu1 %v13384_v33  ;;  %v4324_v33 = vld [vmem:[%s19818_s3 + $0xb80] sm:$0xff]  ;;  %v13465_v9 = vcombine.high %v4460_v2, %v4464_v16  ;;  %vm3889_vm4 = vcmp.gt.f32.partialorder %v16340_v7, 0.0 }
 0x253   :  { %v3910_v21 = vmul.f32 1.442695, %v3897_v14  ;;  %7199 = vmatprep.subr.bf16.mxu1 %v13377_v11  ;;  %v4328_v8 = vld [vmem:[%s19818_s3 + $0xba0] sm:$0xff] }
 0x254   :  { %v4456_v11 = vld [vmem:[%s19818_s3 + $0xfa0] sm:$0xff]  ;;  %v13329_v14 = vcombine.high %v4324_v33, %v4328_v8 }
 0x255   :  { %14282 = vpow2.f32 %v3910_v21  ;;  %7159 = vmatpush1.bf16.msra.mxu0 %v13248_v15  ;;  %v13464_v15 = vcombine.low %v4460_v2, %v4464_v16  ;;  %v4320_v43 = vld [vmem:[%s19818_s3 + $0xb60] sm:$0xff]  ;;  %v13457_v21 = vcombine.high %v4452_v10, %v4456_v11 }
 0x256   :  { %7160 = vmatprep.subr.bf16.mxu0 %v13241_v31  ;;  %7200 = vmatpush1.bf16.msra.mxu1 %v13376_v18  ;;  %14284 = vpow2.f32 %v3908_v20  ;;  %v4316_v18 = vld [vmem:[%s19818_s3 + $0xb40] sm:$0xff] }
 0x257   :  { %7201 = vmatprep.subr.bf16.mxu1 %v13369_v26  ;;  %v4444_v25 = vld [vmem:[%s19818_s3 + $0xf40] sm:$0xff]  ;;  %v13321_v54 = vcombine.high %v4316_v18, %v4320_v43  ;;  %v13320_v58 = vcombine.low %v4316_v18, %v4320_v43 }
 0x258   :  { %v4448_v26 = vld [vmem:[%s19818_s3 + $0xf60] sm:$0xff] }
 0x259   :  { %7161 = vmatpush1.bf16.msra.mxu0 %v13240_v27  ;;  %v4308_v27 = vld [vmem:[%s19818_s3 + $0xb00] sm:$0xff]  ;;  %v13449_v37 = vcombine.high %v4444_v25, %v4448_v26 }
 0x25a   :  { %7162 = vmatprep.subr.bf16.mxu0 %v13233_v30  ;;  %7202 = vmatpush1.bf16.msra.mxu1 %v13368_v32  ;;  %v13456_v30 = vcombine.low %v4452_v10, %v4456_v11  ;;  %v4312_v32 = vld [vmem:[%s19818_s3 + $0xb20] sm:$0xff] }
 0x25b   :  { %7203 = vmatprep.subr.bf16.mxu1 %v13361_v45  ;;  %v4436_v42 = vld [vmem:[%s19818_s3 + $0xf00] sm:$0xff]  ;;  %v13312_v55 = vcombine.low %v4308_v27, %v4312_v32 }
 0x25c   :  { %v4440_v45 = vld [vmem:[%s19818_s3 + $0xf20] sm:$0xff] }
 0x25d   :  { %7163 = vmatpush1.bf16.msra.mxu0 %v13232_v46  ;;  %v13313_v46 = vcombine.high %v4308_v27, %v4312_v32  ;;  %v4304_v51 = vld [vmem:[%s19818_s3 + $0xae0] sm:$0xff]  ;;  %v13441_v52 = vcombine.high %v4436_v42, %v4440_v45 }
 0x25e   :  { %7164 = vmatprep.subr.bf16.mxu0 %v13225_v63  ;;  %7204 = vmatpush1.bf16.msra.mxu1 %v13360_v49  ;;  %v13448_v63 = vcombine.low %v4444_v25, %v4448_v26  ;;  %v4300_v49 = vld [vmem:[%s19818_s3 + $0xac0] sm:$0xff]  ;;  %v4013_v26 = vld [vmem:[%s19818_s3 + $0x1c8] sm:$0xff] }
 0x25f   :  { %7205 = vmatprep.subr.bf16.mxu1 %v13353_v53  ;;  %v4428_v53 = vld [vmem:[%s19818_s3 + $0xec0] sm:$0xff]  ;;  %v13304_v16 = vcombine.low %v4300_v49, %v4304_v51 }
 0x260   :  { %v4432_v23 = vld [vmem:[%s19818_s3 + $0xee0] sm:$0xff] }
 0x261   :  { %7165 = vmatpush1.bf16.msra.mxu0 %v13224_v56  ;;  %v13305_v56 = vcombine.high %v4300_v49, %v4304_v51  ;;  %v4296_v0 = vld [vmem:[%s19818_s3 + $0xaa0] sm:$0xff]  ;;  %v13433_v1 = vcombine.high %v4428_v53, %v4432_v23  ;;  %v3997_v49 = vld [vmem:[%s19818_s3 + $0x148] sm:$0xff] }
 0x262   :  { %v14283_v3 = vpop.eup %14282  ;;  %7166 = vmatprep.subr.bf16.mxu0 %v13217_v62  ;;  %7206 = vmatpush1.bf16.msra.mxu1 %v13352_v39  ;;  %v13440_v62 = vcombine.low %v4436_v42, %v4440_v45  ;;  %v4292_v39 = vld [vmem:[%s19818_s3 + $0xa80] sm:$0xff]  ;;  %v4009_v42 = vld [vmem:[%s19818_s3 + $0x1a8] sm:$0xff]  ;;  %v13147_v45 = vcombine.high %v16449_v38, %v16454_v40 }
 0x263   :  { %v12957_v29 = vadd.f32 -1.0, %v14283_v3  ;;  %7207 = vmatprep.subr.bf16.mxu1 %v13345_v60  ;;  %v14285_v36 = vpop.eup %14284  ;;  %v4420_v60 = vld [vmem:[%s19818_s3 + $0xe80] sm:$0xff]  ;;  %v13432_v3 = vcombine.low %v4428_v53, %v4432_v23  ;;  %v4001_v51 = vld [vmem:[%s19818_s3 + $0x168] sm:$0xff] }
 0x264   :  { %v4424_v2 = vld [vmem:[%s19818_s3 + $0xea0] sm:$0xff]  ;;  %v4117_v38 = vld [vmem:[%s19818_s3 + $0x508] sm:$0xff] }
 0x265   :  { %v3929_v12 = vmul.f32 1.6732632, %v12957_v29  ;;  %7167 = vmatpush1.bf16.msra.mxu0 %v13216_v6  ;;  %v13297_v6 = vcombine.high %v4292_v39, %v4296_v0  ;;  %v4288_v20 = vld [vmem:[%s19818_s3 + $0xa60] sm:$0xff]  ;;  %v13425_v29 = vcombine.high %v4420_v60, %v4424_v2  ;;  %v13424_v11 = vcombine.low %v4420_v60, %v4424_v2  ;;  %v4121_v40 = vld [vmem:[%s19818_s3 + $0x528] sm:$0xff] }
 0x266   :  { %7168 = vmatprep.subr.bf16.mxu0 %v13337_v4  ;;  %7208 = vmatpush1.bf16.msra.mxu1 %v13344_v5  ;;  %v12956_v4 = vadd.f32 -1.0, %v14285_v36  ;;  %v4284_v5 = vld [vmem:[%s19818_s3 + $0xa40] sm:$0xff]  ;;  %v13002_v2 = vcombine.low %v3997_v49, %v4001_v51 }
 0x267   :  { %v3937_v31 = vsel %vm3889_vm4, %v16340_v7, %v3929_v12  ;;  %7209 = vmatprep.subr.bf16.mxu1 %v13465_v9  ;;  %v13328_v7 = vcombine.low %v4324_v33, %v4328_v8  ;;  %v4412_v33 = vld [vmem:[%s19818_s3 + $0xe40] sm:$0xff]  ;;  %v13296_v9 = vcombine.low %v4292_v39, %v4296_v0  ;;  %v13289_v10 = vcombine.high %v4284_v5, %v4288_v20  ;;  %v3989_v0 = vld [vmem:[%s19818_s3 + $0x108] sm:$0xff] }
 0x268   :  { %v3945_v22 = vmul.f32 1.050701, %v3937_v31  ;;  %v4416_v8 = vld [vmem:[%s19818_s3 + $0xe60] sm:$0xff]  ;;  %v3928_v12 = vmul.f32 1.6732632, %v12956_v4  ;;  %v13288_v43 = vcombine.low %v4284_v5, %v4288_v20  ;;  %v3981_v4 = vld [vmem:[%s19818_s3 + $0xc8] sm:$0xff] }
 0x269   :  { %7169 = vmatpush2.bf16.msra.mxu0 %v13336_v28  ;;  %v4276_v28 = vld [vmem:[%s19818_s3 + $0xa00] sm:$0xff]  ;;  %v3985_v5 = vld [vmem:[%s19818_s3 + $0xe8] sm:$0xff] }
 0x26a   :  { %7170 = vmatprep.subr.bf16.mxu0 %v13329_v14  ;;  %v16438_v47 = vpack.c.bf16 %v3945_v22, %v3945_v22  ;;  %7210 = vmatpush2.bf16.msra.mxu1 %v13464_v15  ;;  %v4280_v14 = vld [vmem:[%s19818_s3 + $0xa20] sm:$0xff]  ;;  %v13417_v15 = vcombine.high %v4412_v33, %v4416_v8  ;;  %v13416_v22 = vcombine.low %v4412_v33, %v4416_v8  ;;  %v3973_v33 = vld [vmem:[%s19818_s3 + $0x88] sm:$0xff] }
 0x26b   :  { %7211 = vmatprep.subr.bf16.mxu1 %v13457_v21  ;;  %v4404_v31 = vld [vmem:[%s19818_s3 + $0xe00] sm:$0xff]  ;;  %v13281_v21 = vcombine.high %v4276_v28, %v4280_v14  ;;  %v3936_v25 = vsel %vm3888_vm5, %v16385_v50, %v3928_v12  ;;  %v13280_v27 = vcombine.low %v4276_v28, %v4280_v14  ;;  %v4005_v50 = vld [vmem:[%s19818_s3 + $0x188] sm:$0xff] }
 0x26c   :  { %7184 = vmatprep.mubr.bf16.mxu0 %v16438_v47  ;;  %v4408_v18 = vld [vmem:[%s19818_s3 + $0xe20] sm:$0xff]  ;;  %v13010_v23 = vcombine.low %v4005_v50, %v4009_v42  ;;  %v3977_v8 = vld [vmem:[%s19818_s3 + $0xa8] sm:$0xff] }
 0x26d   :  { %7171 = vmatpush2.bf16.msra.mxu0 %v13328_v7  ;;  %v4017_v7 = vld [vmem:[%s19818_s3 + $0x1e8] sm:$0xff]  ;;  %v12978_v28 = vcombine.low %v3973_v33, %v3977_v8 }
 0x26e   :  { %7172 = vmatprep.subr.bf16.mxu0 %v13321_v54  ;;  %7212 = vmatpush2.bf16.msra.mxu1 %v13456_v30  ;;  %v13409_v54 = vcombine.high %v4404_v31, %v4408_v18  ;;  %v3944_v30 = vmul.f32 1.050701, %v3936_v25  ;;  %v13019_v32 = vcombine.high %v4013_v26, %v4017_v7  ;;  %v3969_v12 = vld [vmem:[%s19818_s3 + $0x68] sm:$0xff] }
 0x26f   :  { %7213 = vmatprep.subr.bf16.mxu1 %v13449_v37  ;;  %v13408_v37 = vcombine.low %v4404_v31, %v4408_v18  ;;  %v3961_v31 = vld [vmem:[%s19818_s3 + $0x28] sm:$0xff] }
 0x271   :  { %7173 = vmatpush2.bf16.msra.mxu0 %v13320_v58  ;;  %v13018_v58 = vcombine.low %v4013_v26, %v4017_v7  ;;  %v4069_v7 = vld [vmem:[%s19818_s3 + $0x388] sm:$0xff] }
 0x272   :  { %7174 = vmatprep.subr.bf16.mxu0 %v13313_v46  ;;  %7214 = vmatpush2.bf16.msra.mxu1 %v13448_v63  ;;  %v16529_v46 = vpack.c.bf16 %v3944_v30, %v3944_v30  ;;  %v13011_v63 = vcombine.high %v4005_v50, %v4009_v42 }
 0x273   :  { %7215 = vmatprep.subr.bf16.mxu1 %v13441_v52 }
 0x275   :  { %7175 = vmatpush2.bf16.msra.mxu0 %v13312_v55 }
 0x276   :  { %7176 = vmatprep.subr.bf16.mxu0 %v13305_v56  ;;  %7216 = vmatpush2.bf16.msra.mxu1 %v13440_v62  ;;  %v13003_v62 = vcombine.high %v3997_v49, %v4001_v51  ;;  %v4045_v51 = vld [vmem:[%s19818_s3 + $0x2c8] sm:$0xff] }
 0x277   :  { %7217 = vmatprep.subr.bf16.mxu1 %v13433_v1  ;;  %v3993_v1 = vld [vmem:[%s19818_s3 + $0x128] sm:$0xff] }
 0x278   :  { %v12994_v20 = vcombine.low %v3989_v0, %v3993_v1 }
 0x279   :  { %7177 = vmatpush2.bf16.msra.mxu0 %v13304_v16 }
 0x27a   :  { %7178 = vmatprep.subr.bf16.mxu0 %v13297_v6  ;;  %7218 = vmatpush2.bf16.msra.mxu1 %v13432_v3  ;;  %v12995_v6 = vcombine.high %v3989_v0, %v3993_v1  ;;  %v4041_v0 = vld [vmem:[%s19818_s3 + $0x2a8] sm:$0xff] }
 0x27b   :  { %7219 = vmatprep.subr.bf16.mxu1 %v13425_v29  ;;  %v12987_v29 = vcombine.high %v3981_v4, %v3985_v5 }
 0x27d   :  { %7179 = vmatpush2.bf16.msra.mxu0 %v13296_v9  ;;  %v12986_v9 = vcombine.low %v3981_v4, %v3985_v5  ;;  %v4025_v4 = vld [vmem:[%s19818_s3 + $0x228] sm:$0xff] }
 0x27e   :  { %7180 = vmatprep.subr.bf16.mxu0 %v13289_v10  ;;  %7220 = vmatpush2.bf16.msra.mxu1 %v13424_v11  ;;  %v12979_v10 = vcombine.high %v3973_v33, %v3977_v8  ;;  %v3965_v11 = vld [vmem:[%s19818_s3 + $0x48] sm:$0xff] }
 0x27f   :  { %7221 = vmatprep.subr.bf16.mxu1 %v13417_v15  ;;  %v12971_v14 = vcombine.high %v3965_v11, %v3969_v12  ;;  %v3957_v15 = vld [vmem:[%s19818_s3 + $0x8] sm:$0xff]  ;;  %v12970_v18 = vcombine.low %v3965_v11, %v3969_v12  ;;  %v16636_v12 = vsub.s32 6, %v15890_v24 }
 0x280   :  { %v12962_v25 = vcombine.low %v3957_v15, %v3961_v31  ;;  %v4273_v33 = vld [vmem:[%s19818_s3 + $0x9e8] sm:$0xff] }
 0x281   :  { %7181 = vmatpush2.bf16.msra.mxu0 %v13288_v43  ;;  %v12963_v43 = vcombine.high %v3957_v15, %v3961_v31  ;;  %v4265_v11 = vld [vmem:[%s19818_s3 + $0x9a8] sm:$0xff]  ;;  %v16639_v15 = vsub.s32 7, %v15890_v24 }
 0x282   :  { %7182 = vmatprep.subr.bf16.mxu0 %v13281_v21  ;;  %7222 = vmatpush2.bf16.msra.mxu1 %v13416_v22  ;;  %v4077_v21 = vld [vmem:[%s19818_s3 + $0x3c8] sm:$0xff] }
 0x283   :  { %7223 = vmatprep.subr.bf16.mxu1 %v13409_v54  ;;  %v4081_v22 = vld [vmem:[%s19818_s3 + $0x3e8] sm:$0xff] }
 0x284   :  { %v13083_v26 = vcombine.high %v4077_v21, %v4081_v22  ;;  %v4073_v54 = vld [vmem:[%s19818_s3 + $0x3a8] sm:$0xff] }
 0x285   :  { %7183 = vmatpush2.bf16.msra.mxu0 %v13280_v27  ;;  %v13082_v27 = vcombine.low %v4077_v21, %v4081_v22  ;;  %v13075_v30 = vcombine.high %v4069_v7, %v4073_v54  ;;  %v13074_v50 = vcombine.low %v4069_v7, %v4073_v54  ;;  %v4253_v31 = vld [vmem:[%s19818_s3 + $0x948] sm:$0xff]  ;;  %v14328_v21 = vld [vmem:[%s19817_s2] sm:$0xff] }
 0x286   :  { %7234 = vmatprep.subr.bf16.mxu0 %v13019_v32  ;;  %7224 = vmatpush2.bf16.msra.mxu1 %v13408_v37  ;;  %v4061_v32 = vld [vmem:[%s19818_s3 + $0x348] sm:$0xff]  ;;  %v3863_v22 = vrot.slane %v14328_v21, %v16636_v12 }
 0x287   :  { %7275 = vmatprep.subr.bf16.mxu1 %v13147_v45  ;;  %v4065_v37 = vld [vmem:[%s19818_s3 + $0x368] sm:$0xff] }
 0x288   :  { %v3677_v52 = vpop.f32.mrf.mxu0  ;;  %7185 = vmatmul.mubr.bf16.vlgmr.msra.gmra.mxu0 %v16529_v46  ;;  %v3718_v53 = vpop.f32.mrf.mxu1  ;;  %v13067_v42 = vcombine.high %v4061_v32, %v4065_v37  ;;  %v4053_v45 = vld [vmem:[%s19818_s3 + $0x308] sm:$0xff] }
 0x289   :  { %7235 = vmatpush1.bf16.msra.mxu0 %v13018_v58  ;;  %7266 = vmatprep.mubr.bf16.mxu0 %v16082_v48  ;;  %v16539_v55 = vadd.f32 %v3718_v53, %v3677_v52  ;;  %v4057_v58 = vld [vmem:[%s19818_s3 + $0x328] sm:$0xff] }
 0x28a   :  { %v16541_v56 = vpop.f32.mrf.mxu0  ;;  %7236 = vmatprep.subr.bf16.mxu0 %v13011_v63  ;;  %v16543_v39 = vpop.f32.mrf.mxu1  ;;  %v13066_v63 = vcombine.low %v4061_v32, %v4065_v37  ;;  %v13059_v49 = vcombine.high %v4053_v45, %v4057_v58  ;;  %v4049_v52 = vld [vmem:[%s19818_s3 + $0x2e8] sm:$0xff]  ;;  %v13058_v53 = vcombine.low %v4053_v45, %v4057_v58 }
 0x28b   :  { %v13050_v1 = vcombine.low %v4045_v51, %v4049_v52  ;;  %v3721_v24 = vadd.f32 %v16543_v39, %v16541_v56 }
 0x28c   :  { %v3681_v36 = vpop.f32.mrf.mxu0  ;;  %v3722_v60 = vpop.f32.mrf.mxu1 }
 0x28d   :  { %7237 = vmatpush1.bf16.msra.mxu0 %v13010_v23  ;;  %v13051_v23 = vcombine.high %v4045_v51, %v4049_v52  ;;  %v4029_v60 = vld [vmem:[%s19818_s3 + $0x248] sm:$0xff] }
 0x28e   :  { %v3682_v16 = vpop.f32.mrf.mxu0  ;;  %7238 = vmatprep.subr.bf16.mxu0 %v13003_v62  ;;  %v3723_v3 = vpop.f32.mrf.mxu1  ;;  %v4037_v62 = vld [vmem:[%s19818_s3 + $0x288] sm:$0xff] }
 0x28f   :  { %v13043_v36 = vcombine.high %v4037_v62, %v4041_v0  ;;  %v13042_v16 = vcombine.low %v4037_v62, %v4041_v0  ;;  %v4021_v3 = vld [vmem:[%s19818_s3 + $0x208] sm:$0xff] }
 0x290   :  { %v13026_v8 = vcombine.low %v4021_v3, %v4025_v4  ;;  %v4237_v62 = vld [vmem:[%s19818_s3 + $0x8c8] sm:$0xff] }
 0x291   :  { %7239 = vmatpush1.bf16.msra.mxu0 %v13002_v2  ;;  %v4033_v2 = vld [vmem:[%s19818_s3 + $0x268] sm:$0xff] }
 0x292   :  { %7240 = vmatprep.subr.bf16.mxu0 %v12995_v6  ;;  %v13035_v6 = vcombine.high %v4029_v60, %v4033_v2  ;;  %v13034_v5 = vcombine.low %v4029_v60, %v4033_v2  ;;  %v4241_v0 = vld [vmem:[%s19818_s3 + $0x8e8] sm:$0xff] }
 0x293   :  { %v13243_v2 = vcombine.high %v4237_v62, %v4241_v0 }
 0x295   :  { %7241 = vmatpush1.bf16.msra.mxu0 %v12994_v20  ;;  %v13027_v20 = vcombine.high %v4021_v3, %v4025_v4  ;;  %v4233_v3 = vld [vmem:[%s19818_s3 + $0x8a8] sm:$0xff]  ;;  %v13242_v4 = vcombine.low %v4237_v62, %v4241_v0 }
 0x296   :  { %7242 = vmatprep.subr.bf16.mxu0 %v12987_v29  ;;  %v4269_v29 = vld [vmem:[%s19818_s3 + $0x9c8] sm:$0xff] }
 0x297   :  { %v4313_v62 = vld [vmem:[%s19818_s3 + $0xb28] sm:$0xff] }
 0x298   :  { %v4125_v0 = vld [vmem:[%s19818_s3 + $0x548] sm:$0xff] }
 0x299   :  { %7243 = vmatpush1.bf16.msra.mxu0 %v12986_v9  ;;  %v13275_v9 = vcombine.high %v4269_v29, %v4273_v33 }
 0x29a   :  { %7244 = vmatprep.subr.bf16.mxu0 %v12979_v10  ;;  %v4261_v10 = vld [vmem:[%s19818_s3 + $0x988] sm:$0xff] }
 0x29b   :  { %v13266_v7 = vcombine.low %v4261_v10, %v4265_v11 }
 0x29d   :  { %7245 = vmatpush1.bf16.msra.mxu0 %v12978_v28  ;;  %v13274_v28 = vcombine.low %v4269_v29, %v4273_v33  ;;  %v4225_v29 = vld [vmem:[%s19818_s3 + $0x868] sm:$0xff] }
 0x29e   :  { %7246 = vmatprep.subr.bf16.mxu0 %v12971_v14  ;;  %v13267_v14 = vcombine.high %v4261_v10, %v4265_v11  ;;  %v4217_v10 = vld [vmem:[%s19818_s3 + $0x828] sm:$0xff] }
 0x2a1   :  { %7247 = vmatpush1.bf16.msra.mxu0 %v12970_v18  ;;  %v4257_v18 = vld [vmem:[%s19818_s3 + $0x968] sm:$0xff] }
 0x2a2   :  { %7248 = vmatprep.subr.bf16.mxu0 %v12963_v43 }
 0x2a5   :  { %7249 = vmatpush1.bf16.msra.mxu0 %v12962_v25 }
 0x2a6   :  { %7250 = vmatprep.subr.bf16.mxu0 %v13083_v26 }
 0x2a9   :  { %7251 = vmatpush2.bf16.msra.mxu0 %v13082_v27  ;;  %v13259_v27 = vcombine.high %v4253_v31, %v4257_v18 }
 0x2aa   :  { %7252 = vmatprep.subr.bf16.mxu0 %v13075_v30 }
 0x2ad   :  { %7253 = vmatpush2.bf16.msra.mxu0 %v13074_v50  ;;  %v3867_v50 = vrot.slane %v14328_v21, %v16639_v15 }
 0x2ae   :  { %7254 = vmatprep.subr.bf16.mxu0 %v13067_v42  ;;  %v4245_v42 = vld [vmem:[%s19818_s3 + $0x908] sm:$0xff] }
 0x2b1   :  { %7255 = vmatpush2.bf16.msra.mxu0 %v13066_v63  ;;  %v13258_v63 = vcombine.low %v4253_v31, %v4257_v18  ;;  %v4337_v31 = vld [vmem:[%s19818_s3 + $0xbe8] sm:$0xff] }
 0x2b2   :  { %7256 = vmatprep.subr.bf16.mxu0 %v13059_v49 }
 0x2b5   :  { %7257 = vmatpush2.bf16.msra.mxu0 %v13058_v53 }
 0x2b6   :  { %7258 = vmatprep.subr.bf16.mxu0 %v13051_v23 }
 0x2b9   :  { %7259 = vmatpush2.bf16.msra.mxu0 %v13050_v1 }
 0x2ba   :  { %7260 = vmatprep.subr.bf16.mxu0 %v13043_v36 }
 0x2bd   :  { %7261 = vmatpush2.bf16.msra.mxu0 %v13042_v16 }
 0x2be   :  { %7262 = vmatprep.subr.bf16.mxu0 %v13035_v6  ;;  %v4229_v6 = vld [vmem:[%s19818_s3 + $0x888] sm:$0xff] }
 0x2bf   :  { %v13234_v33 = vcombine.low %v4229_v6, %v4233_v3 }
 0x2c1   :  { %7263 = vmatpush2.bf16.msra.mxu0 %v13034_v5  ;;  %v13235_v5 = vcombine.high %v4229_v6, %v4233_v3  ;;  %v4301_v6 = vld [vmem:[%s19818_s3 + $0xac8] sm:$0xff] }
 0x2c2   :  { %7264 = vmatprep.subr.bf16.mxu0 %v13027_v20  ;;  %v4221_v20 = vld [vmem:[%s19818_s3 + $0x848] sm:$0xff] }
 0x2c3   :  { %v13226_v11 = vcombine.low %v4221_v20, %v4225_v29  ;;  %v4305_v3 = vld [vmem:[%s19818_s3 + $0xae8] sm:$0xff] }
 0x2c5   :  { %7265 = vmatpush2.bf16.msra.mxu0 %v13026_v8  ;;  %v13227_v8 = vcombine.high %v4221_v20, %v4225_v29  ;;  %v13123_v20 = vcombine.high %v4117_v38, %v4121_v40  ;;  %v4293_v29 = vld [vmem:[%s19818_s3 + $0xa88] sm:$0xff] }
 0x2c6   :  { %7316 = vmatprep.subr.bf16.mxu0 %v13275_v9  ;;  %v4213_v9 = vld [vmem:[%s19818_s3 + $0x808] sm:$0xff] }
 0x2c7   :  { %v13218_v21 = vcombine.low %v4213_v9, %v4217_v10 }
 0x2c8   :  { %v3759_v43 = vpop.f32.mrf.mxu0  ;;  %7267 = vmatmul.mubr.bf16.vlgmr.msra.gmra.mxu0 %v16303_v57  ;;  %v3800_v26 = vpop.f32.mrf.mxu1 }
 0x2c9   :  { %v3760_v25 = vadd.f32 %v3759_v43, %v16539_v55  ;;  %7317 = vmatpush1.bf16.msra.mxu0 %v13274_v28  ;;  %7348 = vmatprep.mubr.bf16.mxu0 %v16438_v47  ;;  %v4249_v55 = vld [vmem:[%s19818_s3 + $0x928] sm:$0xff]  ;;  %v13219_v28 = vcombine.high %v4213_v9, %v4217_v10  ;;  %v13306_v10 = vcombine.low %v4301_v6, %v4305_v3 }
 0x2ca   :  { %v3761_v54 = vpop.f32.mrf.mxu0  ;;  %7318 = vmatprep.subr.bf16.mxu0 %v13267_v14  ;;  %v3802_v37 = vpop.f32.mrf.mxu1  ;;  %v13251_v51 = vcombine.high %v4245_v42, %v4249_v55  ;;  %v13250_v60 = vcombine.low %v4245_v42, %v4249_v55  ;;  %v4333_v14 = vld [vmem:[%s19818_s3 + $0xbc8] sm:$0xff] }
 0x2cb   :  { %v3801_v30 = vadd.f32 %v3800_v26, %v3760_v25  ;;  %v3762_v32 = vadd.f32 %v3761_v54, %v3721_v24  ;;  %v13339_v24 = vcombine.high %v4333_v14, %v4337_v31  ;;  %v4329_v54 = vld [vmem:[%s19818_s3 + $0xba8] sm:$0xff] }
 0x2cc   :  { %v3763_v56 = vpop.f32.mrf.mxu0  ;;  %v3804_v58 = vpop.f32.mrf.mxu1  ;;  %v4133_v55 = vld [vmem:[%s19818_s3 + $0x588] sm:$0xff] }
 0x2cd   :  { %v3882_v39 = vadd.f32 %v3863_v22, %v3801_v30  ;;  %v3803_v45 = vadd.f32 %v3802_v37, %v3762_v32  ;;  %7319 = vmatpush1.bf16.msra.mxu0 %v13266_v7  ;;  %v4325_v7 = vld [vmem:[%s19818_s3 + $0xb88] sm:$0xff]  ;;  %v13338_v32 = vcombine.low %v4333_v14, %v4337_v31 }
 0x2ce   :  { %v3764_v49 = vpop.f32.mrf.mxu0  ;;  %7320 = vmatprep.subr.bf16.mxu0 %v13259_v27  ;;  %v3805_v23 = vpop.f32.mrf.mxu1  ;;  %v13331_v37 = vcombine.high %v4325_v7, %v4329_v54  ;;  %v4321_v58 = vld [vmem:[%s19818_s3 + $0xb68] sm:$0xff] }
 0x2cf   :  { %v3898_v52 = vmin.f32 %v3882_v39, 0.0  ;;  %v3883_v53 = vadd.f32 %v3867_v50, %v3803_v45  ;;  %vm3890_vm6 = vcmp.gt.f32.partialorder %v3882_v39, 0.0  ;;  %v4137_v45 = vld [vmem:[%s19818_s3 + $0x5a8] sm:$0xff] }
 0x2d0   :  { %v4309_v23 = vld [vmem:[%s19818_s3 + $0xb08] sm:$0xff] }
 0x2d1   :  { %v3912_v1 = vmul.f32 1.442695, %v3898_v52  ;;  %v3899_v36 = vmin.f32 %v3883_v53, 0.0  ;;  %7321 = vmatpush1.bf16.msra.mxu0 %v13258_v63  ;;  %vm3891_vm7 = vcmp.gt.f32.partialorder %v3883_v53, 0.0  ;;  %v13330_v63 = vcombine.low %v4325_v7, %v4329_v54  ;;  %v4113_v9 = vld [vmem:[%s19818_s3 + $0x4e8] sm:$0xff] }
 0x2d2   :  { %7322 = vmatprep.subr.bf16.mxu0 %v13251_v51  ;;  %v13139_v52 = vcombine.high %v4133_v55, %v4137_v45  ;;  %v4285_v31 = vld [vmem:[%s19818_s3 + $0xa48] sm:$0xff] }
 0x2d3   :  { %14286 = vpow2.f32 %v3912_v1  ;;  %v3914_v16 = vmul.f32 1.442695, %v3899_v36  ;;  %v4129_v1 = vld [vmem:[%s19818_s3 + $0x568] sm:$0xff] }
 0x2d4   :  { %v4277_v7 = vld [vmem:[%s19818_s3 + $0xa08] sm:$0xff] }
 0x2d5   :  { %14288 = vpow2.f32 %v3914_v16  ;;  %7323 = vmatpush1.bf16.msra.mxu0 %v13250_v60  ;;  %v13138_v60 = vcombine.low %v4133_v55, %v4137_v45  ;;  %v13131_v16 = vcombine.high %v4125_v0, %v4129_v1  ;;  %v4281_v54 = vld [vmem:[%s19818_s3 + $0xa28] sm:$0xff]  ;;  %v4014_v55 = vld [vmem:[%s19818_s3 + $0x1d0] sm:$0xff] }
 0x2d6   :  { %7324 = vmatprep.subr.bf16.mxu0 %v13243_v2  ;;  %v13315_v2 = vcombine.high %v4309_v23, %v4313_v62  ;;  %v4085_v45 = vld [vmem:[%s19818_s3 + $0x408] sm:$0xff] }
 0x2d9   :  { %7325 = vmatpush1.bf16.msra.mxu0 %v13242_v4  ;;  %v13130_v4 = vcombine.low %v4125_v0, %v4129_v1  ;;  %v4010_v0 = vld [vmem:[%s19818_s3 + $0x1b0] sm:$0xff]  ;;  %v4205_v1 = vld [vmem:[%s19818_s3 + $0x7c8] sm:$0xff] }
 0x2da   :  { %7326 = vmatprep.subr.bf16.mxu0 %v13235_v5  ;;  %v13307_v5 = vcombine.high %v4301_v6, %v4305_v3 }
 0x2dd   :  { %7327 = vmatpush1.bf16.msra.mxu0 %v13234_v33  ;;  %v4297_v33 = vld [vmem:[%s19818_s3 + $0xaa8] sm:$0xff] }
 0x2de   :  { %7328 = vmatprep.subr.bf16.mxu0 %v13227_v8  ;;  %v4109_v8 = vld [vmem:[%s19818_s3 + $0x4c8] sm:$0xff] }
 0x2df   :  { %v13115_v14 = vcombine.high %v4109_v8, %v4113_v9 }
 0x2e0   :  { %v14287_v18 = vpop.eup %14286 }
 0x2e1   :  { %v12958_v43 = vadd.f32 -1.0, %v14287_v18  ;;  %7329 = vmatpush1.bf16.msra.mxu0 %v13226_v11  ;;  %v13122_v11 = vcombine.low %v4117_v38, %v4121_v40  ;;  %v4289_v18 = vld [vmem:[%s19818_s3 + $0xa68] sm:$0xff]  ;;  %v3998_v40 = vld [vmem:[%s19818_s3 + $0x150] sm:$0xff] }
 0x2e2   :  { %v14289_v22 = vpop.eup %14288  ;;  %7330 = vmatprep.subr.bf16.mxu0 %v13219_v28  ;;  %v13299_v28 = vcombine.high %v4293_v29, %v4297_v33 }
 0x2e3   :  { %v3930_v25 = vmul.f32 1.6732632, %v12958_v43  ;;  %v12959_v26 = vadd.f32 -1.0, %v14289_v22  ;;  %v4101_v43 = vld [vmem:[%s19818_s3 + $0x488] sm:$0xff]  ;;  %v13298_v22 = vcombine.low %v4293_v29, %v4297_v33 }
 0x2e5   :  { %v3938_v27 = vsel %vm3890_vm6, %v3882_v39, %v3930_v25  ;;  %v3931_v30 = vmul.f32 1.6732632, %v12959_v26  ;;  %7331 = vmatpush1.bf16.msra.mxu0 %v13218_v21  ;;  %v4317_v39 = vld [vmem:[%s19818_s3 + $0xb48] sm:$0xff]  ;;  %v13291_v25 = vcombine.high %v4285_v31, %v4289_v18 }
 0x2e6   :  { %7332 = vmatprep.subr.bf16.mxu0 %v13339_v24  ;;  %v3946_v50 = vmul.f32 1.050701, %v3938_v27  ;;  %v13322_v36 = vcombine.low %v4317_v39, %v4321_v58  ;;  %v4105_v21 = vld [vmem:[%s19818_s3 + $0x4a8] sm:$0xff]  ;;  %v13114_v24 = vcombine.low %v4109_v8, %v4113_v9 }
 0x2e7   :  { %v3939_v42 = vsel %vm3891_vm7, %v3883_v53, %v3931_v30  ;;  %v13323_v53 = vcombine.high %v4317_v39, %v4321_v58  ;;  %v13107_v26 = vcombine.high %v4101_v43, %v4105_v21  ;;  %v4093_v27 = vld [vmem:[%s19818_s3 + $0x448] sm:$0xff]  ;;  %v13282_v58 = vcombine.low %v4277_v7, %v4281_v54 }
 0x2e8   :  { %v3947_v56 = vmul.f32 1.050701, %v3939_v42  ;;  %v16713_v51 = vpack.c.bf16 %v3946_v50, %v3946_v50  ;;  %v4097_v30 = vld [vmem:[%s19818_s3 + $0x468] sm:$0xff]  ;;  %v13283_v50 = vcombine.high %v4277_v7, %v4281_v54 }
 0x2e9   :  { %7333 = vmatpush2.bf16.msra.mxu0 %v13338_v32  ;;  %v13290_v32 = vcombine.low %v4285_v31, %v4289_v18  ;;  %v13099_v42 = vcombine.high %v4093_v27, %v4097_v30  ;;  %v4089_v39 = vld [vmem:[%s19818_s3 + $0x428] sm:$0xff] }
 0x2ea   :  { %v16711_v49 = vpack.c.bf16 %v3947_v56, %v3947_v56  ;;  %7334 = vmatprep.subr.bf16.mxu0 %v13331_v37  ;;  %v13106_v37 = vcombine.low %v4101_v43, %v4105_v21  ;;  %v4018_v56 = vld [vmem:[%s19818_s3 + $0x1f0] sm:$0xff] }
 0x2eb   :  { %v3990_v43 = vld [vmem:[%s19818_s3 + $0x110] sm:$0xff] }
 0x2ec   :  { %7225 = vmatprep.mubr.bf16.mxu1 %v16711_v49  ;;  %v3994_v21 = vld [vmem:[%s19818_s3 + $0x130] sm:$0xff] }
 0x2ed   :  { %7226 = vmatmul.mubr.bf16.vlgmr.msra.gmra.mxu1 %v16713_v51  ;;  %7335 = vmatpush2.bf16.msra.mxu0 %v13330_v63  ;;  %v13098_v63 = vcombine.low %v4093_v27, %v4097_v30 }
 0x2ee   :  { %7276 = vmatpush1.bf16.msra.mxu1 %v13146_v41  ;;  %7307 = vmatprep.mubr.bf16.mxu1 %v16091_v59  ;;  %v13314_v41 = vcombine.low %v4309_v23, %v4313_v62  ;;  %v13091_v23 = vcombine.high %v4085_v45, %v4089_v39  ;;  %v4006_v62 = vld [vmem:[%s19818_s3 + $0x190] sm:$0xff] }
 0x2ef   :  { %7277 = vmatprep.subr.bf16.mxu1 %v13139_v52  ;;  %7336 = vmatprep.subr.bf16.mxu0 %v13323_v53  ;;  %v4468_v52 = vld [vmem:[%s19819_s4] sm:$0xff]  ;;  %v13021_v53 = vcombine.high %v4014_v55, %v4018_v56  ;;  %v13013_v6 = vcombine.high %v4006_v62, %v4010_v0  ;;  %v13012_v8 = vcombine.low %v4006_v62, %v4010_v0  ;;  %v4173_v62 = vld [vmem:[%s19818_s3 + $0x6c8] sm:$0xff] }
 0x2f0   :  { %v4477_v3 = vrot.slane %v4468_v52, %v15905_v34  ;;  %v4177_v0 = vld [vmem:[%s19818_s3 + $0x6e8] sm:$0xff] }
 0x2f1   :  { %7337 = vmatpush2.bf16.msra.mxu0 %v13322_v36  ;;  %v4209_v36 = vld [vmem:[%s19818_s3 + $0x7e8] sm:$0xff] }
 0x2f2   :  { %7278 = vmatpush1.bf16.msra.mxu1 %v13138_v60  ;;  %7338 = vmatprep.subr.bf16.mxu0 %v13315_v2  ;;  %v4473_v60 = vrot.slane %v4468_v52, %v16126_v13  ;;  %v13020_v2 = vcombine.low %v4014_v55, %v4018_v56  ;;  %v13211_v38 = vcombine.high %v4205_v1, %v4209_v36  ;;  %v3986_v55 = vld [vmem:[%s19818_s3 + $0xf0] sm:$0xff]  ;;  %v4181_v56 = vld [vmem:[%s19818_s3 + $0x708] sm:$0xff] }
 0x2f3   :  { %7279 = vmatprep.subr.bf16.mxu1 %v13131_v16  ;;  %v13090_v16 = vcombine.low %v4085_v45, %v4089_v39  ;;  %v4185_v45 = vld [vmem:[%s19818_s3 + $0x728] sm:$0xff]  ;;  %v12996_v39 = vcombine.low %v3990_v43, %v3994_v21 }
 0x2f4   :  { %v13187_v52 = vcombine.high %v4181_v56, %v4185_v45 }
 0x2f5   :  { %7339 = vmatpush2.bf16.msra.mxu0 %v13314_v41  ;;  %v4002_v41 = vld [vmem:[%s19818_s3 + $0x170] sm:$0xff] }
 0x2f6   :  { %7280 = vmatpush1.bf16.msra.mxu1 %v13130_v4  ;;  %7340 = vmatprep.subr.bf16.mxu0 %v13307_v5  ;;  %v4197_v5 = vld [vmem:[%s19818_s3 + $0x788] sm:$0xff]  ;;  %v13004_v54 = vcombine.low %v3998_v40, %v4002_v41 }
 0x2f7   :  { %7281 = vmatprep.subr.bf16.mxu1 %v13123_v20  ;;  %v4201_v20 = vld [vmem:[%s19818_s3 + $0x7a8] sm:$0xff] }
 0x2f8   :  { %v13203_v18 = vcombine.high %v4197_v5, %v4201_v20  ;;  %v13202_v30 = vcombine.low %v4197_v5, %v4201_v20  ;;  %v3958_v20 = vld [vmem:[%s19818_s3 + $0x10] sm:$0xff] }
 0x2f9   :  { %7341 = vmatpush2.bf16.msra.mxu0 %v13306_v10  ;;  %v13210_v10 = vcombine.low %v4205_v1, %v4209_v36  ;;  %v13186_v36 = vcombine.low %v4181_v56, %v4185_v45  ;;  %v4389_v56 = vld [vmem:[%s19818_s3 + $0xd88] sm:$0xff] }
 0x2fa   :  { %7282 = vmatpush1.bf16.msra.mxu1 %v13122_v11  ;;  %7342 = vmatprep.subr.bf16.mxu0 %v13299_v28  ;;  %v13005_v11 = vcombine.high %v3998_v40, %v4002_v41  ;;  %v13178_v41 = vcombine.low %v4173_v62, %v4177_v0  ;;  %v4393_v45 = vld [vmem:[%s19818_s3 + $0xda8] sm:$0xff] }
 0x2fb   :  { %7283 = vmatprep.subr.bf16.mxu1 %v13115_v14 }
 0x2fd   :  { %7343 = vmatpush2.bf16.msra.mxu0 %v13298_v22 }
 0x2fe   :  { %7284 = vmatpush1.bf16.msra.mxu1 %v13114_v24  ;;  %7344 = vmatprep.subr.bf16.mxu0 %v13291_v25  ;;  %v4189_v24 = vld [vmem:[%s19818_s3 + $0x748] sm:$0xff] }
 0x2ff   :  { %7285 = vmatprep.subr.bf16.mxu1 %v13107_v26  ;;  %v4193_v25 = vld [vmem:[%s19818_s3 + $0x768] sm:$0xff] }
 0x301   :  { %7345 = vmatpush2.bf16.msra.mxu0 %v13290_v32  ;;  %v12997_v32 = vcombine.high %v3990_v43, %v3994_v21  ;;  %v4149_v43 = vld [vmem:[%s19818_s3 + $0x608] sm:$0xff] }
 0x302   :  { %7286 = vmatpush1.bf16.msra.mxu1 %v13106_v37  ;;  %7346 = vmatprep.subr.bf16.mxu0 %v13283_v50  ;;  %v13195_v50 = vcombine.high %v4189_v24, %v4193_v25  ;;  %v4153_v21 = vld [vmem:[%s19818_s3 + $0x628] sm:$0xff] }
 0x303   :  { %7287 = vmatprep.subr.bf16.mxu1 %v13099_v42  ;;  %v3982_v42 = vld [vmem:[%s19818_s3 + $0xd0] sm:$0xff] }
 0x304   :  { %v12988_v1 = vcombine.low %v3982_v42, %v3986_v55 }
 0x305   :  { %7347 = vmatpush2.bf16.msra.mxu0 %v13282_v58  ;;  %v13194_v58 = vcombine.low %v4189_v24, %v4193_v25 }
 0x306   :  { %7288 = vmatpush1.bf16.msra.mxu1 %v13098_v63  ;;  %7398 = vmatprep.subr.bf16.mxu0 %v13021_v53  ;;  %v12989_v63 = vcombine.high %v3982_v42, %v3986_v55  ;;  %v3974_v53 = vld [vmem:[%s19818_s3 + $0x90] sm:$0xff] }
 0x307   :  { %7289 = vmatprep.subr.bf16.mxu1 %v13091_v23  ;;  %v3978_v23 = vld [vmem:[%s19818_s3 + $0xb0] sm:$0xff] }
 0x308   :  { %v7104_v4 = vpop.f32.mrf.mxu0  ;;  %7349 = vmatmul.mubr.bf16.vlgmr.msra.gmra.mxu0 %v16529_v46  ;;  %v12980_v40 = vcombine.low %v3974_v53, %v3978_v23 }
 0x309   :  { %v7105_v29 = vadd.f32 %v7104_v4, %v4473_v60  ;;  %v7145_v33 = vpop.f32.mrf.mxu1  ;;  %7399 = vmatpush1.bf16.msra.mxu0 %v13020_v2  ;;  %7430 = vmatprep.mubr.bf16.mxu0 %v16082_v48  ;;  %v12981_v60 = vcombine.high %v3974_v53, %v3978_v23  ;;  %v13179_v2 = vcombine.high %v4173_v62, %v4177_v0  ;;  %v4054_v62 = vld [vmem:[%s19818_s3 + $0x310] sm:$0xff] }
 0x30a   :  { %7290 = vmatpush1.bf16.msra.mxu1 %v13090_v16  ;;  %v7106_v9 = vpop.f32.mrf.mxu0  ;;  %7400 = vmatprep.subr.bf16.mxu0 %v13013_v6  ;;  %v3966_v16 = vld [vmem:[%s19818_s3 + $0x50] sm:$0xff]  ;;  %v13395_v53 = vcombine.high %v4389_v56, %v4393_v45 }
 0x30b   :  { %v16824_v28 = vadd.f32 %v7145_v33, %v7105_v29  ;;  %v7107_v14 = vadd.f32 %v7106_v9, %v4477_v3  ;;  %v7147_v31 = vpop.f32.mrf.mxu1  ;;  %7291 = vmatprep.subr.bf16.mxu1 %v13211_v38  ;;  %v3970_v6 = vld [vmem:[%s19818_s3 + $0x70] sm:$0xff]  ;;  %v4165_v3 = vld [vmem:[%s19818_s3 + $0x688] sm:$0xff] }
 0x30c   :  { %v7108_v22 = vpop.f32.mrf.mxu0  ;;  %v4169_v38 = vld [vmem:[%s19818_s3 + $0x6a8] sm:$0xff]  ;;  %v12973_v4 = vcombine.high %v3966_v16, %v3970_v6  ;;  %v3962_v29 = vld [vmem:[%s19818_s3 + $0x30] sm:$0xff]  ;;  %v12972_v9 = vcombine.low %v3966_v16, %v3970_v6 }
 0x30d   :  { %v16838_v26 = vadd.f32 %v7147_v31, %v7107_v14  ;;  %v7149_v7 = vpop.f32.mrf.mxu1  ;;  %7401 = vmatpush1.bf16.msra.mxu0 %v13012_v8  ;;  %v13171_v5 = vcombine.high %v4165_v3, %v4169_v38  ;;  %v4157_v33 = vld [vmem:[%s19818_s3 + $0x648] sm:$0xff]  ;;  %v4078_v31 = vld [vmem:[%s19818_s3 + $0x3d0] sm:$0xff]  ;;  %v12964_v22 = vcombine.low %v3958_v20, %v3962_v29 }
 0x30e   :  { %7292 = vmatpush2.bf16.msra.mxu1 %v13210_v10  ;;  %v7109_v27 = vpop.f32.mrf.mxu0  ;;  %7402 = vmatprep.subr.bf16.mxu0 %v13005_v11  ;;  %v4161_v8 = vld [vmem:[%s19818_s3 + $0x668] sm:$0xff]  ;;  %v13170_v10 = vcombine.low %v4165_v3, %v4169_v38  ;;  %v12965_v11 = vcombine.high %v3958_v20, %v3962_v29  ;;  %v13155_v7 = vcombine.high %v4149_v43, %v4153_v21  ;;  %v4058_v0 = vld [vmem:[%s19818_s3 + $0x330] sm:$0xff] }
 0x30f   :  { %v7150_v37 = vpop.f32.mrf.mxu1  ;;  %7293 = vmatprep.subr.bf16.mxu1 %v13203_v18  ;;  %v13163_v14 = vcombine.high %v4157_v33, %v4161_v8  ;;  %v4082_v18 = vld [vmem:[%s19818_s3 + $0x3f0] sm:$0xff]  ;;  %v13162_v24 = vcombine.low %v4157_v33, %v4161_v8  ;;  %v13061_v16 = vcombine.high %v4054_v62, %v4058_v0 }
 0x310   :  { %v13085_v25 = vcombine.high %v4078_v31, %v4082_v18  ;;  %v4074_v27 = vld [vmem:[%s19818_s3 + $0x3b0] sm:$0xff]  ;;  %v13084_v37 = vcombine.low %v4078_v31, %v4082_v18 }
 0x311   :  { %7403 = vmatpush1.bf16.msra.mxu0 %v13004_v54  ;;  %v4070_v54 = vld [vmem:[%s19818_s3 + $0x390] sm:$0xff] }
 0x312   :  { %7294 = vmatpush2.bf16.msra.mxu1 %v13202_v30  ;;  %7404 = vmatprep.subr.bf16.mxu0 %v12997_v32  ;;  %v4397_v30 = vld [vmem:[%s19818_s3 + $0xdc8] sm:$0xff]  ;;  %v13077_v42 = vcombine.high %v4070_v54, %v4074_v27  ;;  %v4046_v3 = vld [vmem:[%s19818_s3 + $0x2d0] sm:$0xff] }
 0x313   :  { %7295 = vmatprep.subr.bf16.mxu1 %v13195_v50  ;;  %v4401_v32 = vld [vmem:[%s19818_s3 + $0xde8] sm:$0xff]  ;;  %v13154_v50 = vcombine.low %v4149_v43, %v4153_v21  ;;  %v4050_v38 = vld [vmem:[%s19818_s3 + $0x2f0] sm:$0xff] }
 0x314   :  { %v13403_v55 = vcombine.high %v4397_v30, %v4401_v32  ;;  %v13053_v20 = vcombine.high %v4046_v3, %v4050_v38  ;;  %v4038_v33 = vld [vmem:[%s19818_s3 + $0x290] sm:$0xff] }
 0x315   :  { %7405 = vmatpush1.bf16.msra.mxu0 %v12996_v39  ;;  %v4062_v39 = vld [vmem:[%s19818_s3 + $0x350] sm:$0xff] }
 0x316   :  { %7296 = vmatpush2.bf16.msra.mxu1 %v13194_v58  ;;  %7406 = vmatprep.subr.bf16.mxu0 %v12989_v63  ;;  %v4066_v58 = vld [vmem:[%s19818_s3 + $0x370] sm:$0xff]  ;;  %v13076_v63 = vcombine.low %v4070_v54, %v4074_v27 }
 0x317   :  { %7297 = vmatprep.subr.bf16.mxu1 %v13187_v52  ;;  %v13402_v52 = vcombine.low %v4397_v30, %v4401_v32  ;;  %v13069_v23 = vcombine.high %v4062_v39, %v4066_v58  ;;  %v4042_v8 = vld [vmem:[%s19818_s3 + $0x2b0] sm:$0xff] }
 0x318   :  { %v13045_v31 = vcombine.high %v4038_v33, %v4042_v8  ;;  %v4030_v43 = vld [vmem:[%s19818_s3 + $0x250] sm:$0xff] }
 0x319   :  { %7407 = vmatpush1.bf16.msra.mxu0 %v12988_v1  ;;  %v4381_v1 = vld [vmem:[%s19818_s3 + $0xd48] sm:$0xff]  ;;  %v4034_v21 = vld [vmem:[%s19818_s3 + $0x270] sm:$0xff] }
 0x31a   :  { %7298 = vmatpush2.bf16.msra.mxu1 %v13186_v36  ;;  %7408 = vmatprep.subr.bf16.mxu0 %v12981_v60  ;;  %v4385_v36 = vld [vmem:[%s19818_s3 + $0xd68] sm:$0xff]  ;;  %v13068_v60 = vcombine.low %v4062_v39, %v4066_v58  ;;  %v13037_v54 = vcombine.high %v4030_v43, %v4034_v21  ;;  %v4022_v30 = vld [vmem:[%s19818_s3 + $0x210] sm:$0xff] }
 0x31b   :  { %7299 = vmatprep.subr.bf16.mxu1 %v13179_v2  ;;  %v13394_v2 = vcombine.low %v4389_v56, %v4393_v45  ;;  %v13387_v6 = vcombine.high %v4381_v1, %v4385_v36  ;;  %v4026_v32 = vld [vmem:[%s19818_s3 + $0x230] sm:$0xff] }
 0x31c   :  { %v13029_v56 = vcombine.high %v4022_v30, %v4026_v32  ;;  %v4270_v39 = vld [vmem:[%s19818_s3 + $0x9d0] sm:$0xff] }
 0x31d   :  { %7409 = vmatpush1.bf16.msra.mxu0 %v12980_v40  ;;  %v4373_v40 = vld [vmem:[%s19818_s3 + $0xd08] sm:$0xff]  ;;  %v4274_v58 = vld [vmem:[%s19818_s3 + $0x9f0] sm:$0xff] }
 0x31e   :  { %7300 = vmatpush2.bf16.msra.mxu1 %v13178_v41  ;;  %7410 = vmatprep.subr.bf16.mxu0 %v12973_v4  ;;  %v4377_v41 = vld [vmem:[%s19818_s3 + $0xd28] sm:$0xff]  ;;  %v13060_v4 = vcombine.low %v4054_v62, %v4058_v0  ;;  %v13277_v62 = vcombine.high %v4270_v39, %v4274_v58 }
 0x31f   :  { %7301 = vmatprep.subr.bf16.mxu1 %v13171_v5  ;;  %v13386_v5 = vcombine.low %v4381_v1, %v4385_v36  ;;  %v13379_v29 = vcombine.high %v4373_v40, %v4377_v41  ;;  %v4262_v1 = vld [vmem:[%s19818_s3 + $0x990] sm:$0xff] }
 0x320   :  { %v4266_v36 = vld [vmem:[%s19818_s3 + $0x9b0] sm:$0xff] }
 0x321   :  { %7411 = vmatpush1.bf16.msra.mxu0 %v12972_v9  ;;  %v4365_v9 = vld [vmem:[%s19818_s3 + $0xcc8] sm:$0xff] }
 0x322   :  { %7302 = vmatpush2.bf16.msra.mxu1 %v13170_v10  ;;  %7412 = vmatprep.subr.bf16.mxu0 %v12965_v11  ;;  %v4369_v10 = vld [vmem:[%s19818_s3 + $0xce8] sm:$0xff]  ;;  %v13052_v11 = vcombine.low %v4046_v3, %v4050_v38  ;;  %v13269_v3 = vcombine.high %v4262_v1, %v4266_v36 }
 0x323   :  { %7303 = vmatprep.subr.bf16.mxu1 %v13163_v14  ;;  %v13378_v14 = vcombine.low %v4373_v40, %v4377_v41  ;;  %v13371_v18 = vcombine.high %v4365_v9, %v4369_v10  ;;  %v4254_v40 = vld [vmem:[%s19818_s3 + $0x950] sm:$0xff] }
 0x324   :  { %v4258_v41 = vld [vmem:[%s19818_s3 + $0x970] sm:$0xff] }
 0x325   :  { %7413 = vmatpush1.bf16.msra.mxu0 %v12964_v22  ;;  %v4357_v22 = vld [vmem:[%s19818_s3 + $0xc88] sm:$0xff] }
 0x326   :  { %7304 = vmatpush2.bf16.msra.mxu1 %v13162_v24  ;;  %7414 = vmatprep.subr.bf16.mxu0 %v13085_v25  ;;  %v4361_v24 = vld [vmem:[%s19818_s3 + $0xca8] sm:$0xff]  ;;  %v13044_v25 = vcombine.low %v4038_v33, %v4042_v8  ;;  %v13268_v33 = vcombine.low %v4262_v1, %v4266_v36 }
 0x327   :  { %7305 = vmatprep.subr.bf16.mxu1 %v13155_v7  ;;  %v13370_v7 = vcombine.low %v4365_v9, %v4369_v10  ;;  %v13363_v27 = vcombine.high %v4357_v22, %v4361_v24  ;;  %v13261_v10 = vcombine.high %v4254_v40, %v4258_v41  ;;  %v4421_v1 = vld [vmem:[%s19818_s3 + $0xe88] sm:$0xff] }
 0x328   :  { %v4425_v36 = vld [vmem:[%s19818_s3 + $0xea8] sm:$0xff] }
 0x329   :  { %7415 = vmatpush2.bf16.msra.mxu0 %v13084_v37  ;;  %v4349_v37 = vld [vmem:[%s19818_s3 + $0xc48] sm:$0xff] }
 0x32a   :  { %7306 = vmatpush2.bf16.msra.mxu1 %v13154_v50  ;;  %7416 = vmatprep.subr.bf16.mxu0 %v13077_v42  ;;  %v4353_v50 = vld [vmem:[%s19818_s3 + $0xc68] sm:$0xff]  ;;  %v13036_v42 = vcombine.low %v4030_v43, %v4034_v21  ;;  %v13260_v21 = vcombine.low %v4254_v40, %v4258_v41 }
 0x32b   :  { %7357 = vmatprep.subr.bf16.mxu1 %v13403_v55  ;;  %v13362_v55 = vcombine.low %v4357_v22, %v4361_v24  ;;  %v13355_v45 = vcombine.high %v4349_v37, %v4353_v50  ;;  %v4445_v43 = vld [vmem:[%s19818_s3 + $0xf48] sm:$0xff] }
 0x32c   :  { %v4413_v40 = vld [vmem:[%s19818_s3 + $0xe48] sm:$0xff] }
 0x32d   :  { %7308 = vmatmul.mubr.bf16.vlgmr.msra.gmra.mxu1 %v16305_v61  ;;  %7417 = vmatpush2.bf16.msra.mxu0 %v13076_v63  ;;  %v4341_v63 = vld [vmem:[%s19818_s3 + $0xc08] sm:$0xff] }
 0x32e   :  { %7358 = vmatpush1.bf16.msra.mxu1 %v13402_v52  ;;  %7389 = vmatprep.mubr.bf16.mxu1 %v16711_v49  ;;  %v4345_v52 = vld [vmem:[%s19818_s3 + $0xc28] sm:$0xff] }
 0x32f   :  { %7359 = vmatprep.subr.bf16.mxu1 %v13395_v53  ;;  %7418 = vmatprep.subr.bf16.mxu0 %v13069_v23  ;;  %v13028_v53 = vcombine.low %v4022_v30, %v4026_v32  ;;  %v13354_v23 = vcombine.low %v4349_v37, %v4353_v50  ;;  %v13347_v0 = vcombine.high %v4341_v63, %v4345_v52  ;;  %v4437_v30 = vld [vmem:[%s19818_s3 + $0xf08] sm:$0xff] }
 0x330   :  { %v4441_v32 = vld [vmem:[%s19818_s3 + $0xf28] sm:$0xff] }
 0x331   :  { %7419 = vmatpush2.bf16.msra.mxu0 %v13068_v60  ;;  %v4461_v60 = vld [vmem:[%s19818_s3 + $0xfc8] sm:$0xff] }
 0x332   :  { %7360 = vmatpush1.bf16.msra.mxu1 %v13394_v2  ;;  %7420 = vmatprep.subr.bf16.mxu0 %v13061_v16  ;;  %v4465_v2 = vld [vmem:[%s19818_s3 + $0xfe8] sm:$0xff]  ;;  %v13276_v16 = vcombine.low %v4270_v39, %v4274_v58 }
 0x333   :  { %7361 = vmatprep.subr.bf16.mxu1 %v13387_v6  ;;  %v13346_v6 = vcombine.low %v4341_v63, %v4345_v52  ;;  %v13467_v38 = vcombine.high %v4461_v60, %v4465_v2  ;;  %v13466_v9 = vcombine.low %v4461_v60, %v4465_v2  ;;  %v4429_v39 = vld [vmem:[%s19818_s3 + $0xec8] sm:$0xff]  ;;  %v13442_v52 = vcombine.low %v4437_v30, %v4441_v32 }
 0x334   :  { %v4433_v58 = vld [vmem:[%s19818_s3 + $0xee8] sm:$0xff] }
 0x335   :  { %7421 = vmatpush2.bf16.msra.mxu0 %v13060_v4  ;;  %v13434_v2 = vcombine.low %v4429_v39, %v4433_v58  ;;  %v4417_v41 = vld [vmem:[%s19818_s3 + $0xe68] sm:$0xff] }
 0x336   :  { %7362 = vmatpush1.bf16.msra.mxu1 %v13386_v5  ;;  %7422 = vmatprep.subr.bf16.mxu0 %v13053_v20  ;;  %v4453_v5 = vld [vmem:[%s19818_s3 + $0xf88] sm:$0xff] }
 0x337   :  { %7363 = vmatprep.subr.bf16.mxu1 %v13379_v29  ;;  %v4457_v20 = vld [vmem:[%s19818_s3 + $0xfa8] sm:$0xff] }
 0x338   :  { %v13458_v24 = vcombine.low %v4453_v5, %v4457_v20 }
 0x339   :  { %7423 = vmatpush2.bf16.msra.mxu0 %v13052_v11 }
 0x33a   :  { %7364 = vmatpush1.bf16.msra.mxu1 %v13378_v14  ;;  %7424 = vmatprep.subr.bf16.mxu0 %v13045_v31  ;;  %v13459_v14 = vcombine.high %v4453_v5, %v4457_v20  ;;  %v4246_v31 = vld [vmem:[%s19818_s3 + $0x910] sm:$0xff]  ;;  %v13426_v5 = vcombine.low %v4421_v1, %v4425_v36 }
 0x33b   :  { %7365 = vmatprep.subr.bf16.mxu1 %v13371_v18 }
 0x33d   :  { %7425 = vmatpush2.bf16.msra.mxu0 %v13044_v25 }
 0x33e   :  { %7366 = vmatpush1.bf16.msra.mxu1 %v13370_v7  ;;  %7426 = vmatprep.subr.bf16.mxu0 %v13037_v54  ;;  %v4238_v54 = vld [vmem:[%s19818_s3 + $0x8d0] sm:$0xff] }
 0x33f   :  { %7367 = vmatprep.subr.bf16.mxu1 %v13363_v27  ;;  %v4242_v27 = vld [vmem:[%s19818_s3 + $0x8f0] sm:$0xff] }
 0x340   :  { %v13244_v63 = vcombine.low %v4238_v54, %v4242_v27 }
 0x341   :  { %7427 = vmatpush2.bf16.msra.mxu0 %v13036_v42  ;;  %v13245_v42 = vcombine.high %v4238_v54, %v4242_v27 }
 0x342   :  { %7368 = vmatpush1.bf16.msra.mxu1 %v13362_v55  ;;  %7428 = vmatprep.subr.bf16.mxu0 %v13029_v56  ;;  %v13443_v55 = vcombine.high %v4437_v30, %v4441_v32  ;;  %v4230_v56 = vld [vmem:[%s19818_s3 + $0x890] sm:$0xff] }
 0x343   :  { %7369 = vmatprep.subr.bf16.mxu1 %v13355_v45  ;;  %v4234_v45 = vld [vmem:[%s19818_s3 + $0x8b0] sm:$0xff] }
 0x344   :  { %v13236_v60 = vcombine.low %v4230_v56, %v4234_v45  ;;  %v4134_v30 = vld [vmem:[%s19818_s3 + $0x590] sm:$0xff] }
 0x345   :  { %7429 = vmatpush2.bf16.msra.mxu0 %v13028_v53  ;;  %v13237_v53 = vcombine.high %v4230_v56, %v4234_v45  ;;  %v4138_v32 = vld [vmem:[%s19818_s3 + $0x5b0] sm:$0xff] }
 0x346   :  { %7370 = vmatpush1.bf16.msra.mxu1 %v13354_v23  ;;  %7480 = vmatprep.subr.bf16.mxu0 %v13277_v62  ;;  %v13435_v23 = vcombine.high %v4429_v39, %v4433_v58  ;;  %v4222_v62 = vld [vmem:[%s19818_s3 + $0x850] sm:$0xff]  ;;  %v13141_v56 = vcombine.high %v4134_v30, %v4138_v32 }
 0x347   :  { %7371 = vmatprep.subr.bf16.mxu1 %v13347_v0  ;;  %v4226_v0 = vld [vmem:[%s19818_s3 + $0x870] sm:$0xff] }
 0x348   :  { %v7186_v4 = vpop.f32.mrf.mxu0  ;;  %7431 = vmatmul.mubr.bf16.vlgmr.msra.gmra.mxu0 %v16303_v57  ;;  %v4310_v39 = vld [vmem:[%s19818_s3 + $0xb10] sm:$0xff] }
 0x349   :  { %v17024_v29 = vadd.f32 %v7186_v4, %v16824_v28  ;;  %7481 = vmatpush1.bf16.msra.mxu0 %v13276_v16  ;;  %7512 = vmatprep.mubr.bf16.mxu0 %v16438_v47  ;;  %v4250_v28 = vld [vmem:[%s19818_s3 + $0x930] sm:$0xff]  ;;  %v13229_v16 = vcombine.high %v4222_v62, %v4226_v0  ;;  %v13228_v4 = vcombine.low %v4222_v62, %v4226_v0 }
 0x34a   :  { %7372 = vmatpush1.bf16.msra.mxu1 %v13346_v6  ;;  %v7188_v8 = vpop.f32.mrf.mxu0  ;;  %7482 = vmatprep.subr.bf16.mxu0 %v13269_v3  ;;  %v13253_v25 = vcombine.high %v4246_v31, %v4250_v28  ;;  %v13252_v37 = vcombine.low %v4246_v31, %v4250_v28  ;;  %v13427_v6 = vcombine.high %v4421_v1, %v4425_v36  ;;  %v4214_v3 = vld [vmem:[%s19818_s3 + $0x810] sm:$0xff] }
 0x34b   :  { %v17028_v11 = vadd.f32 %v7188_v8, %v16838_v26  ;;  %7373 = vmatprep.subr.bf16.mxu1 %v13467_v38  ;;  %v4449_v26 = vld [vmem:[%s19818_s3 + $0xf68] sm:$0xff]  ;;  %v4218_v38 = vld [vmem:[%s19818_s3 + $0x830] sm:$0xff]  ;;  %v13418_v28 = vcombine.low %v4413_v40, %v4417_v41 }
 0x34c   :  { %v7190_v18 = vpop.f32.mrf.mxu0  ;;  %v13451_v7 = vcombine.high %v4445_v43, %v4449_v26  ;;  %v13450_v50 = vcombine.low %v4445_v43, %v4449_v26  ;;  %v13221_v20 = vcombine.high %v4214_v3, %v4218_v38  ;;  %v4334_v8 = vld [vmem:[%s19818_s3 + $0xbd0] sm:$0xff]  ;;  %v13220_v31 = vcombine.low %v4214_v3, %v4218_v38 }
 0x34d   :  { %7483 = vmatpush1.bf16.msra.mxu0 %v13268_v33  ;;  %v13419_v33 = vcombine.high %v4413_v40, %v4417_v41  ;;  %v4326_v26 = vld [vmem:[%s19818_s3 + $0xb90] sm:$0xff] }
 0x34e   :  { %7374 = vmatpush2.bf16.msra.mxu1 %v13466_v9  ;;  %v7191_v22 = vpop.f32.mrf.mxu0  ;;  %7484 = vmatprep.subr.bf16.mxu0 %v13261_v10  ;;  %v4338_v9 = vld [vmem:[%s19818_s3 + $0xbf0] sm:$0xff]  ;;  %v4405_v10 = vld [vmem:[%s19818_s3 + $0xe08] sm:$0xff] }
 0x34f   :  { %7375 = vmatprep.subr.bf16.mxu1 %v13459_v14  ;;  %v4409_v14 = vld [vmem:[%s19818_s3 + $0xe28] sm:$0xff]  ;;  %v13341_v18 = vcombine.high %v4334_v8, %v4338_v9  ;;  %v4142_v22 = vld [vmem:[%s19818_s3 + $0x5d0] sm:$0xff] }
 0x350   :  { %v13411_v43 = vcombine.high %v4405_v10, %v4409_v14  ;;  %v4314_v58 = vld [vmem:[%s19818_s3 + $0xb30] sm:$0xff] }
 0x351   :  { %7485 = vmatpush1.bf16.msra.mxu0 %v13260_v21  ;;  %v4330_v21 = vld [vmem:[%s19818_s3 + $0xbb0] sm:$0xff]  ;;  %v13317_v62 = vcombine.high %v4310_v39, %v4314_v58 }
 0x352   :  { %7376 = vmatpush2.bf16.msra.mxu1 %v13458_v24  ;;  %7486 = vmatprep.subr.bf16.mxu0 %v13253_v25  ;;  %v4146_v24 = vld [vmem:[%s19818_s3 + $0x5f0] sm:$0xff]  ;;  %v13340_v25 = vcombine.low %v4334_v8, %v4338_v9  ;;  %v13333_v54 = vcombine.high %v4326_v26, %v4330_v21 }
 0x353   :  { %7377 = vmatprep.subr.bf16.mxu1 %v13451_v7  ;;  %v13410_v7 = vcombine.low %v4405_v10, %v4409_v14  ;;  %v13149_v27 = vcombine.high %v4142_v22, %v4146_v24  ;;  %v4302_v1 = vld [vmem:[%s19818_s3 + $0xad0] sm:$0xff] }
 0x354   :  { %v4306_v36 = vld [vmem:[%s19818_s3 + $0xaf0] sm:$0xff] }
 0x355   :  { %7487 = vmatpush1.bf16.msra.mxu0 %v13252_v37  ;;  %v4318_v37 = vld [vmem:[%s19818_s3 + $0xb50] sm:$0xff]  ;;  %v13309_v3 = vcombine.high %v4302_v1, %v4306_v36 }
 0x356   :  { %7378 = vmatpush2.bf16.msra.mxu1 %v13450_v50  ;;  %7488 = vmatprep.subr.bf16.mxu0 %v13245_v42  ;;  %v4322_v50 = vld [vmem:[%s19818_s3 + $0xb70] sm:$0xff]  ;;  %v13332_v42 = vcombine.low %v4326_v26, %v4330_v21 }
 0x357   :  { %7379 = vmatprep.subr.bf16.mxu1 %v13443_v55  ;;  %v13148_v55 = vcombine.low %v4142_v22, %v4146_v24  ;;  %v13325_v45 = vcombine.high %v4318_v37, %v4322_v50  ;;  %v4294_v40 = vld [vmem:[%s19818_s3 + $0xa90] sm:$0xff] }
 0x358   :  { %v4298_v41 = vld [vmem:[%s19818_s3 + $0xab0] sm:$0xff] }
 0x359   :  { %7489 = vmatpush1.bf16.msra.mxu0 %v13244_v63  ;;  %v4126_v63 = vld [vmem:[%s19818_s3 + $0x550] sm:$0xff]  ;;  %v13301_v8 = vcombine.high %v4294_v40, %v4298_v41 }
 0x35a   :  { %7380 = vmatpush2.bf16.msra.mxu1 %v13442_v52  ;;  %7490 = vmatprep.subr.bf16.mxu0 %v13237_v53  ;;  %v4130_v52 = vld [vmem:[%s19818_s3 + $0x570] sm:$0xff]  ;;  %v13324_v53 = vcombine.low %v4318_v37, %v4322_v50  ;;  %v4015_v37 = vld [vmem:[%s19818_s3 + $0x1d8] sm:$0xff] }
 0x35b   :  { %7381 = vmatprep.subr.bf16.mxu1 %v13435_v23  ;;  %v13140_v23 = vcombine.low %v4134_v30, %v4138_v32  ;;  %v13133_v0 = vcombine.high %v4126_v63, %v4130_v52  ;;  %v4286_v10 = vld [vmem:[%s19818_s3 + $0xa50] sm:$0xff]  ;;  %v4019_v50 = vld [vmem:[%s19818_s3 + $0x1f8] sm:$0xff] }
 0x35c   :  { %v4290_v14 = vld [vmem:[%s19818_s3 + $0xa70] sm:$0xff] }
 0x35d   :  { %7491 = vmatpush1.bf16.msra.mxu0 %v13236_v60  ;;  %v4118_v60 = vld [vmem:[%s19818_s3 + $0x510] sm:$0xff]  ;;  %v13293_v26 = vcombine.high %v4286_v10, %v4290_v14 }
 0x35e   :  { %7382 = vmatpush2.bf16.msra.mxu1 %v13434_v2  ;;  %7492 = vmatprep.subr.bf16.mxu0 %v13229_v16  ;;  %v4122_v2 = vld [vmem:[%s19818_s3 + $0x530] sm:$0xff]  ;;  %v13316_v16 = vcombine.low %v4310_v39, %v4314_v58  ;;  %v13023_v39 = vcombine.high %v4015_v37, %v4019_v50 }
 0x35f   :  { %7383 = vmatprep.subr.bf16.mxu1 %v13427_v6  ;;  %v13132_v6 = vcombine.low %v4126_v63, %v4130_v52  ;;  %v13125_v38 = vcombine.high %v4118_v60, %v4122_v2  ;;  %v4278_v22 = vld [vmem:[%s19818_s3 + $0xa10] sm:$0xff]  ;;  %v4007_v63 = vld [vmem:[%s19818_s3 + $0x198] sm:$0xff] }
 0x360   :  { %v4282_v24 = vld [vmem:[%s19818_s3 + $0xa30] sm:$0xff]  ;;  %v4011_v52 = vld [vmem:[%s19818_s3 + $0x1b8] sm:$0xff] }
 0x361   :  { %7493 = vmatpush1.bf16.msra.mxu0 %v13228_v4  ;;  %v4110_v4 = vld [vmem:[%s19818_s3 + $0x4d0] sm:$0xff]  ;;  %v13285_v30 = vcombine.high %v4278_v22, %v4282_v24 }
 0x362   :  { %7384 = vmatpush2.bf16.msra.mxu1 %v13426_v5  ;;  %7494 = vmatprep.subr.bf16.mxu0 %v13221_v20  ;;  %v4114_v5 = vld [vmem:[%s19818_s3 + $0x4f0] sm:$0xff]  ;;  %v13308_v20 = vcombine.low %v4302_v1, %v4306_v36  ;;  %v13015_v1 = vcombine.high %v4007_v63, %v4011_v52 }
 0x363   :  { %7385 = vmatprep.subr.bf16.mxu1 %v13419_v33  ;;  %v13124_v33 = vcombine.low %v4118_v60, %v4122_v2  ;;  %v13117_v9 = vcombine.high %v4110_v4, %v4114_v5  ;;  %v3999_v60 = vld [vmem:[%s19818_s3 + $0x158] sm:$0xff] }
 0x364   :  { %v4003_v2 = vld [vmem:[%s19818_s3 + $0x178] sm:$0xff] }
 0x365   :  { %7495 = vmatpush1.bf16.msra.mxu0 %v13220_v31  ;;  %v4102_v31 = vld [vmem:[%s19818_s3 + $0x490] sm:$0xff] }
 0x366   :  { %7386 = vmatpush2.bf16.msra.mxu1 %v13418_v28  ;;  %7496 = vmatprep.subr.bf16.mxu0 %v13341_v18  ;;  %v4106_v28 = vld [vmem:[%s19818_s3 + $0x4b0] sm:$0xff]  ;;  %v13300_v18 = vcombine.low %v4294_v40, %v4298_v41 }
 0x367   :  { %7387 = vmatprep.subr.bf16.mxu1 %v13411_v43  ;;  %v13116_v43 = vcombine.low %v4110_v4, %v4114_v5  ;;  %v13109_v21 = vcombine.high %v4102_v31, %v4106_v28  ;;  %v13007_v4 = vcombine.high %v3999_v60, %v4003_v2 }
 0x369   :  { %7497 = vmatpush2.bf16.msra.mxu0 %v13340_v25  ;;  %v4094_v25 = vld [vmem:[%s19818_s3 + $0x450] sm:$0xff] }
 0x36a   :  { %7388 = vmatpush2.bf16.msra.mxu1 %v13410_v7  ;;  %7498 = vmatprep.subr.bf16.mxu0 %v13333_v54  ;;  %v4098_v7 = vld [vmem:[%s19818_s3 + $0x470] sm:$0xff]  ;;  %v13292_v54 = vcombine.low %v4286_v10, %v4290_v14  ;;  %v13006_v10 = vcombine.low %v3999_v60, %v4003_v2 }
 0x36b   :  { %7439 = vmatprep.subr.bf16.mxu1 %v13149_v27  ;;  %v13108_v27 = vcombine.low %v4102_v31, %v4106_v28  ;;  %v13101_v32 = vcombine.high %v4094_v25, %v4098_v7  ;;  %v4162_v60 = vld [vmem:[%s19818_s3 + $0x670] sm:$0xff] }
 0x36d   :  { %7390 = vmatmul.mubr.bf16.vlgmr.msra.gmra.mxu1 %v16713_v51  ;;  %7499 = vmatpush2.bf16.msra.mxu0 %v13332_v42  ;;  %v4086_v42 = vld [vmem:[%s19818_s3 + $0x410] sm:$0xff] }
 0x36e   :  { %7440 = vmatpush1.bf16.msra.mxu1 %v13148_v55  ;;  %7471 = vmatprep.mubr.bf16.mxu1 %v16091_v59  ;;  %v4090_v55 = vld [vmem:[%s19818_s3 + $0x430] sm:$0xff] }
 0x36f   :  { %7441 = vmatprep.subr.bf16.mxu1 %v13141_v56  ;;  %7500 = vmatprep.subr.bf16.mxu0 %v13325_v45  ;;  %v13284_v56 = vcombine.low %v4278_v22, %v4282_v24  ;;  %v13100_v45 = vcombine.low %v4094_v25, %v4098_v7  ;;  %v13093_v58 = vcombine.high %v4086_v42, %v4090_v55  ;;  %v4186_v22 = vld [vmem:[%s19818_s3 + $0x730] sm:$0xff] }
 0x371   :  { %7501 = vmatpush2.bf16.msra.mxu0 %v13324_v53  ;;  %v4206_v53 = vld [vmem:[%s19818_s3 + $0x7d0] sm:$0xff] }
 0x372   :  { %7442 = vmatpush1.bf16.msra.mxu1 %v13140_v23  ;;  %7502 = vmatprep.subr.bf16.mxu0 %v13317_v62  ;;  %v4210_v23 = vld [vmem:[%s19818_s3 + $0x7f0] sm:$0xff]  ;;  %v13022_v62 = vcombine.low %v4015_v37, %v4019_v50 }
 0x373   :  { %7443 = vmatprep.subr.bf16.mxu1 %v13133_v0  ;;  %v13092_v0 = vcombine.low %v4086_v42, %v4090_v55  ;;  %v13213_v36 = vcombine.high %v4206_v53, %v4210_v23  ;;  %v13212_v41 = vcombine.low %v4206_v53, %v4210_v23  ;;  %v4178_v37 = vld [vmem:[%s19818_s3 + $0x6f0] sm:$0xff] }
 0x375   :  { %7503 = vmatpush2.bf16.msra.mxu0 %v13316_v16 }
 0x376   :  { %7444 = vmatpush1.bf16.msra.mxu1 %v13132_v6  ;;  %7504 = vmatprep.subr.bf16.mxu0 %v13309_v3  ;;  %v4198_v6 = vld [vmem:[%s19818_s3 + $0x790] sm:$0xff] }
 0x377   :  { %7445 = vmatprep.subr.bf16.mxu1 %v13125_v38  ;;  %v4202_v3 = vld [vmem:[%s19818_s3 + $0x7b0] sm:$0xff]  ;;  %v13014_v38 = vcombine.low %v4007_v63, %v4011_v52 }
 0x378   :  { %v13205_v5 = vcombine.high %v4198_v6, %v4202_v3  ;;  %v13204_v31 = vcombine.low %v4198_v6, %v4202_v3  ;;  %v4170_v63 = vld [vmem:[%s19818_s3 + $0x6b0] sm:$0xff] }
 0x379   :  { %7505 = vmatpush2.bf16.msra.mxu0 %v13308_v20  ;;  %v3991_v20 = vld [vmem:[%s19818_s3 + $0x118] sm:$0xff] }
 0x37a   :  { %7446 = vmatpush1.bf16.msra.mxu1 %v13124_v33  ;;  %7506 = vmatprep.subr.bf16.mxu0 %v13301_v8  ;;  %v3995_v33 = vld [vmem:[%s19818_s3 + $0x138] sm:$0xff] }
 0x37b   :  { %7447 = vmatprep.subr.bf16.mxu1 %v13117_v9  ;;  %v4194_v9 = vld [vmem:[%s19818_s3 + $0x770] sm:$0xff]  ;;  %v12999_v28 = vcombine.high %v3991_v20, %v3995_v33  ;;  %v12998_v24 = vcombine.low %v3991_v20, %v3995_v33 }
 0x37c   :  { %v4154_v20 = vld [vmem:[%s19818_s3 + $0x630] sm:$0xff] }
 0x37d   :  { %7507 = vmatpush2.bf16.msra.mxu0 %v13300_v18 }
 0x37e   :  { %7448 = vmatpush1.bf16.msra.mxu1 %v13116_v43  ;;  %7508 = vmatprep.subr.bf16.mxu0 %v13293_v26  ;;  %v3983_v43 = vld [vmem:[%s19818_s3 + $0xd8] sm:$0xff] }
 0x37f   :  { %7449 = vmatprep.subr.bf16.mxu1 %v13109_v21  ;;  %v3987_v26 = vld [vmem:[%s19818_s3 + $0xf8] sm:$0xff]  ;;  %v4182_v21 = vld [vmem:[%s19818_s3 + $0x710] sm:$0xff] }
 0x380   :  { %v12991_v7 = vcombine.high %v3983_v43, %v3987_v26  ;;  %v12990_v50 = vcombine.low %v3983_v43, %v3987_v26  ;;  %v13188_v42 = vcombine.low %v4182_v21, %v4186_v22 }
 0x381   :  { %7509 = vmatpush2.bf16.msra.mxu0 %v13292_v54  ;;  %v13189_v54 = vcombine.high %v4182_v21, %v4186_v22  ;;  %v4390_v22 = vld [vmem:[%s19818_s3 + $0xd90] sm:$0xff] }
 0x382   :  { %7450 = vmatpush1.bf16.msra.mxu1 %v13108_v27  ;;  %7510 = vmatprep.subr.bf16.mxu0 %v13285_v30  ;;  %v3975_v27 = vld [vmem:[%s19818_s3 + $0x98] sm:$0xff] }
 0x383   :  { %7451 = vmatprep.subr.bf16.mxu1 %v13101_v32  ;;  %v3979_v30 = vld [vmem:[%s19818_s3 + $0xb8] sm:$0xff]  ;;  %v4174_v32 = vld [vmem:[%s19818_s3 + $0x6d0] sm:$0xff] }
 0x384   :  { %v12983_v55 = vcombine.high %v3975_v27, %v3979_v30  ;;  %v12982_v52 = vcombine.low %v3975_v27, %v3979_v30  ;;  %v13180_v53 = vcombine.low %v4174_v32, %v4178_v37 }
 0x385   :  { %7511 = vmatpush2.bf16.msra.mxu0 %v13284_v56  ;;  %v13181_v56 = vcombine.high %v4174_v32, %v4178_v37  ;;  %v4055_v37 = vld [vmem:[%s19818_s3 + $0x318] sm:$0xff] }
 0x386   :  { %7452 = vmatpush1.bf16.msra.mxu1 %v13100_v45  ;;  %7562 = vmatprep.subr.bf16.mxu0 %v13023_v39  ;;  %v3967_v45 = vld [vmem:[%s19818_s3 + $0x58] sm:$0xff] }
 0x387   :  { %7453 = vmatprep.subr.bf16.mxu1 %v13093_v58  ;;  %v3971_v39 = vld [vmem:[%s19818_s3 + $0x78] sm:$0xff]  ;;  %v4166_v58 = vld [vmem:[%s19818_s3 + $0x690] sm:$0xff] }
 0x388   :  { %v17218_v16 = vpop.f32.mrf.mxu0  ;;  %7513 = vmatmul.mubr.bf16.vlgmr.msra.gmra.mxu0 %v16529_v46  ;;  %v12975_v23 = vcombine.high %v3967_v45, %v3971_v39  ;;  %v12974_v2 = vcombine.low %v3967_v45, %v3971_v39  ;;  %v13172_v6 = vcombine.low %v4166_v58, %v4170_v63 }
 0x389   :  { %7563 = vmatpush1.bf16.msra.mxu0 %v13022_v62  ;;  %7594 = vmatprep.mubr.bf16.mxu0 %v16082_v48  ;;  %v4190_v48 = vld [vmem:[%s19818_s3 + $0x750] sm:$0xff]  ;;  %v13173_v62 = vcombine.high %v4166_v58, %v4170_v63 }
 0x38a   :  { %7454 = vmatpush1.bf16.msra.mxu1 %v13092_v0  ;;  %v17228_v40 = vpop.f32.mrf.mxu0  ;;  %7564 = vmatprep.subr.bf16.mxu0 %v13015_v1  ;;  %v13197_v18 = vcombine.high %v4190_v48, %v4194_v9  ;;  %v13196_v25 = vcombine.low %v4190_v48, %v4194_v9  ;;  %v3959_v0 = vld [vmem:[%s19818_s3 + $0x18] sm:$0xff] }
 0x38b   :  { %7455 = vmatprep.subr.bf16.mxu1 %v13213_v36  ;;  %v3963_v1 = vld [vmem:[%s19818_s3 + $0x38] sm:$0xff]  ;;  %v4158_v36 = vld [vmem:[%s19818_s3 + $0x650] sm:$0xff] }
 0x38c   :  { %v7272_v8 = vpop.f32.mrf.mxu0  ;;  %v12967_v3 = vcombine.high %v3959_v0, %v3963_v1  ;;  %v12966_v33 = vcombine.low %v3959_v0, %v3963_v1  ;;  %v4378_v0 = vld [vmem:[%s19818_s3 + $0xd30] sm:$0xff] }
 0x38d   :  { %7565 = vmatpush1.bf16.msra.mxu0 %v13014_v38  ;;  %v13165_v38 = vcombine.high %v4158_v36, %v4162_v60  ;;  %v13164_v8 = vcombine.low %v4158_v36, %v4162_v60 }
 0x38e   :  { %7456 = vmatpush2.bf16.msra.mxu1 %v13212_v41  ;;  %v7273_v14 = vpop.f32.mrf.mxu0  ;;  %7566 = vmatprep.subr.bf16.mxu0 %v13007_v4  ;;  %v4079_v41 = vld [vmem:[%s19818_s3 + $0x3d8] sm:$0xff] }
 0x38f   :  { %7457 = vmatprep.subr.bf16.mxu1 %v13205_v5  ;;  %v4083_v4 = vld [vmem:[%s19818_s3 + $0x3f8] sm:$0xff]  ;;  %v4150_v5 = vld [vmem:[%s19818_s3 + $0x610] sm:$0xff] }
 0x390   :  { %v13087_v48 = vcombine.high %v4079_v41, %v4083_v4  ;;  %v13157_v9 = vcombine.high %v4150_v5, %v4154_v20  ;;  %v4075_v14 = vld [vmem:[%s19818_s3 + $0x3b8] sm:$0xff]  ;;  %v13156_v43 = vcombine.low %v4150_v5, %v4154_v20  ;;  %v4370_v5 = vld [vmem:[%s19818_s3 + $0xcf0] sm:$0xff] }
 0x391   :  { %7567 = vmatpush1.bf16.msra.mxu0 %v13006_v10  ;;  %v4071_v10 = vld [vmem:[%s19818_s3 + $0x398] sm:$0xff] }
 0x392   :  { %7458 = vmatpush2.bf16.msra.mxu1 %v13204_v31  ;;  %7568 = vmatprep.subr.bf16.mxu0 %v12999_v28  ;;  %v4398_v31 = vld [vmem:[%s19818_s3 + $0xdd0] sm:$0xff]  ;;  %v13079_v26 = vcombine.high %v4071_v10, %v4075_v14 }
 0x393   :  { %7459 = vmatprep.subr.bf16.mxu1 %v13197_v18  ;;  %v4402_v28 = vld [vmem:[%s19818_s3 + $0xdf0] sm:$0xff]  ;;  %v13086_v18 = vcombine.low %v4079_v41, %v4083_v4  ;;  %v4043_v41 = vld [vmem:[%s19818_s3 + $0x2b8] sm:$0xff] }
 0x394   :  { %v13405_v21 = vcombine.high %v4398_v31, %v4402_v28  ;;  %v13404_v27 = vcombine.low %v4398_v31, %v4402_v28  ;;  %v4366_v4 = vld [vmem:[%s19818_s3 + $0xcd0] sm:$0xff] }
 0x395   :  { %7569 = vmatpush1.bf16.msra.mxu0 %v12998_v24  ;;  %v4394_v24 = vld [vmem:[%s19818_s3 + $0xdb0] sm:$0xff] }
 0x396   :  { %7460 = vmatpush2.bf16.msra.mxu1 %v13196_v25  ;;  %7570 = vmatprep.subr.bf16.mxu0 %v12991_v7  ;;  %v4063_v25 = vld [vmem:[%s19818_s3 + $0x358] sm:$0xff]  ;;  %v13397_v30 = vcombine.high %v4390_v22, %v4394_v24  ;;  %v13396_v58 = vcombine.low %v4390_v22, %v4394_v24  ;;  %v4362_v31 = vld [vmem:[%s19818_s3 + $0xcb0] sm:$0xff] }
 0x397   :  { %7461 = vmatprep.subr.bf16.mxu1 %v13189_v54  ;;  %v4067_v7 = vld [vmem:[%s19818_s3 + $0x378] sm:$0xff]  ;;  %v13078_v54 = vcombine.low %v4071_v10, %v4075_v14  ;;  %v4358_v14 = vld [vmem:[%s19818_s3 + $0xc90] sm:$0xff] }
 0x398   :  { %v13071_v32 = vcombine.high %v4063_v25, %v4067_v7  ;;  %v13070_v45 = vcombine.low %v4063_v25, %v4067_v7  ;;  %v4035_v10 = vld [vmem:[%s19818_s3 + $0x278] sm:$0xff]  ;;  %v4350_v24 = vld [vmem:[%s19818_s3 + $0xc50] sm:$0xff] }
 0x399   :  { %7571 = vmatpush1.bf16.msra.mxu0 %v12990_v50  ;;  %v4059_v50 = vld [vmem:[%s19818_s3 + $0x338] sm:$0xff]  ;;  %v4354_v25 = vld [vmem:[%s19818_s3 + $0xc70] sm:$0xff] }
 0x39a   :  { %7462 = vmatpush2.bf16.msra.mxu1 %v13188_v42  ;;  %7572 = vmatprep.subr.bf16.mxu0 %v12983_v55  ;;  %v4382_v42 = vld [vmem:[%s19818_s3 + $0xd50] sm:$0xff]  ;;  %v13063_v63 = vcombine.high %v4055_v37, %v4059_v50  ;;  %v13062_v36 = vcombine.low %v4055_v37, %v4059_v50  ;;  %v4027_v22 = vld [vmem:[%s19818_s3 + $0x238] sm:$0xff] }
 0x39b   :  { %7463 = vmatprep.subr.bf16.mxu1 %v13181_v56  ;;  %v4386_v55 = vld [vmem:[%s19818_s3 + $0xd70] sm:$0xff]  ;;  %v4275_v37 = vld [vmem:[%s19818_s3 + $0x9f8] sm:$0xff] }
 0x39c   :  { %v13388_v60 = vcombine.low %v4382_v42, %v4386_v55  ;;  %v4342_v50 = vld [vmem:[%s19818_s3 + $0xc10] sm:$0xff] }
 0x39d   :  { %7573 = vmatpush1.bf16.msra.mxu0 %v12982_v52 }
 0x39e   :  { %7464 = vmatpush2.bf16.msra.mxu1 %v13180_v53  ;;  %7574 = vmatprep.subr.bf16.mxu0 %v12975_v23  ;;  %v13389_v53 = vcombine.high %v4382_v42, %v4386_v55  ;;  %v4047_v23 = vld [vmem:[%s19818_s3 + $0x2d8] sm:$0xff]  ;;  %v4346_v42 = vld [vmem:[%s19818_s3 + $0xc30] sm:$0xff] }
 0x39f   :  { %7465 = vmatprep.subr.bf16.mxu1 %v13173_v62  ;;  %v4051_v62 = vld [vmem:[%s19818_s3 + $0x2f8] sm:$0xff] }
 0x3a0   :  { %v13054_v20 = vcombine.low %v4047_v23, %v4051_v62 }
 0x3a1   :  { %7575 = vmatpush1.bf16.msra.mxu0 %v12974_v2  ;;  %v13055_v2 = vcombine.high %v4047_v23, %v4051_v62  ;;  %v4462_v23 = vld [vmem:[%s19818_s3 + $0xfd0] sm:$0xff] }
 0x3a2   :  { %7466 = vmatpush2.bf16.msra.mxu1 %v13172_v6  ;;  %7576 = vmatprep.subr.bf16.mxu0 %v12967_v3  ;;  %v4466_v62 = vld [vmem:[%s19818_s3 + $0xff0] sm:$0xff] }
 0x3a3   :  { %7467 = vmatprep.subr.bf16.mxu1 %v13165_v38  ;;  %v4039_v38 = vld [vmem:[%s19818_s3 + $0x298] sm:$0xff] }
 0x3a4   :  { %v13046_v28 = vcombine.low %v4039_v38, %v4043_v41 }
 0x3a5   :  { %7577 = vmatpush1.bf16.msra.mxu0 %v12966_v33 }
 0x3a6   :  { %7468 = vmatpush2.bf16.msra.mxu1 %v13164_v8  ;;  %7578 = vmatprep.subr.bf16.mxu0 %v13087_v48  ;;  %v13047_v8 = vcombine.high %v4039_v38, %v4043_v41  ;;  %v13373_v48 = vcombine.high %v4366_v4, %v4370_v5  ;;  %v4458_v38 = vld [vmem:[%s19818_s3 + $0xfb0] sm:$0xff] }
 0x3a7   :  { %7469 = vmatprep.subr.bf16.mxu1 %v13157_v9  ;;  %v4031_v9 = vld [vmem:[%s19818_s3 + $0x258] sm:$0xff] }
 0x3a8   :  { %v13038_v7 = vcombine.low %v4031_v9, %v4035_v10 }
 0x3a9   :  { %7579 = vmatpush2.bf16.msra.mxu0 %v13086_v18  ;;  %v13372_v18 = vcombine.low %v4366_v4, %v4370_v5  ;;  %v13468_v5 = vcombine.low %v4462_v23, %v4466_v62 }
 0x3aa   :  { %7470 = vmatpush2.bf16.msra.mxu1 %v13156_v43  ;;  %7580 = vmatprep.subr.bf16.mxu0 %v13079_v26  ;;  %v13039_v43 = vcombine.high %v4031_v9, %v4035_v10  ;;  %v13365_v26 = vcombine.high %v4358_v14, %v4362_v31  ;;  %v4450_v9 = vld [vmem:[%s19818_s3 + $0xf70] sm:$0xff] }
 0x3ab   :  { %7521 = vmatprep.subr.bf16.mxu1 %v13405_v21  ;;  %v4023_v21 = vld [vmem:[%s19818_s3 + $0x218] sm:$0xff] }
 0x3ac   :  { %v13030_v55 = vcombine.low %v4023_v21, %v4027_v22 }
 0x3ad   :  { %7472 = vmatmul.mubr.bf16.vlgmr.msra.gmra.mxu1 %v16305_v61  ;;  %v7227_v56 = vpop.f32.mrf.mxu1  ;;  %7581 = vmatpush2.bf16.msra.mxu0 %v13078_v54  ;;  %v13364_v54 = vcombine.low %v4358_v14, %v4362_v31 }
 0x3ae   :  { %v17340_v39 = vadd.f32 %v7227_v56, %v17024_v29  ;;  %7522 = vmatpush1.bf16.msra.mxu1 %v13404_v27  ;;  %7553 = vmatprep.mubr.bf16.mxu1 %v16711_v49  ;;  %v4374_v29 = vld [vmem:[%s19818_s3 + $0xd10] sm:$0xff]  ;;  %v13031_v27 = vcombine.high %v4023_v21, %v4027_v22  ;;  %v13356_v56 = vcombine.low %v4350_v24, %v4354_v25 }
 0x3af   :  { %v17343_v52 = vpop.f32.mrf.mxu1  ;;  %7523 = vmatprep.subr.bf16.mxu1 %v13397_v30  ;;  %7582 = vmatprep.subr.bf16.mxu0 %v13071_v32  ;;  %v13381_v3 = vcombine.high %v4374_v29, %v4378_v0  ;;  %v13380_v33 = vcombine.low %v4374_v29, %v4378_v0  ;;  %v13357_v30 = vcombine.high %v4350_v24, %v4354_v25  ;;  %v4271_v32 = vld [vmem:[%s19818_s3 + $0x9d8] sm:$0xff]  ;;  %v4438_v21 = vld [vmem:[%s19818_s3 + $0xf10] sm:$0xff] }
 0x3b0   :  { %v13278_v29 = vcombine.low %v4271_v32, %v4275_v37  ;;  %v13348_v0 = vcombine.low %v4342_v50, %v4346_v42  ;;  %v4442_v22 = vld [vmem:[%s19818_s3 + $0xf30] sm:$0xff]  ;;  %vm7726_vm9 = vcmp.gt.f32.partialorder %v17340_v39, 0.0 }
 0x3b1   :  { %v7231_v1 = vpop.f32.mrf.mxu1  ;;  %7583 = vmatpush2.bf16.msra.mxu0 %v13070_v45  ;;  %v13279_v45 = vcombine.high %v4271_v32, %v4275_v37  ;;  %v4430_v32 = vld [vmem:[%s19818_s3 + $0xed0] sm:$0xff] }
 0x3b2   :  { %7524 = vmatpush1.bf16.msra.mxu1 %v13396_v58  ;;  %7584 = vmatprep.subr.bf16.mxu0 %v13063_v63  ;;  %v13349_v58 = vcombine.high %v4342_v50, %v4346_v42  ;;  %v4263_v63 = vld [vmem:[%s19818_s3 + $0x998] sm:$0xff]  ;;  %v4434_v37 = vld [vmem:[%s19818_s3 + $0xef0] sm:$0xff]  ;;  %v13444_v42 = vcombine.low %v4438_v21, %v4442_v22 }
 0x3b3   :  { %v7232_v6 = vpop.f32.mrf.mxu1  ;;  %7525 = vmatprep.subr.bf16.mxu1 %v13389_v53  ;;  %v4267_v53 = vld [vmem:[%s19818_s3 + $0x9b8] sm:$0xff] }
 0x3b4   :  { %v13271_v1 = vcombine.high %v4263_v63, %v4267_v53  ;;  %v13270_v41 = vcombine.low %v4263_v63, %v4267_v53  ;;  %v4422_v63 = vld [vmem:[%s19818_s3 + $0xe90] sm:$0xff] }
 0x3b5   :  { %7585 = vmatpush2.bf16.msra.mxu0 %v13062_v36  ;;  %v13469_v36 = vcombine.high %v4462_v23, %v4466_v62  ;;  %v4426_v53 = vld [vmem:[%s19818_s3 + $0xeb0] sm:$0xff]  ;;  %v13436_v62 = vcombine.low %v4430_v32, %v4434_v37 }
 0x3b6   :  { %7526 = vmatpush1.bf16.msra.mxu1 %v13388_v60  ;;  %7586 = vmatprep.subr.bf16.mxu0 %v13055_v2  ;;  %v4255_v60 = vld [vmem:[%s19818_s3 + $0x958] sm:$0xff] }
 0x3b7   :  { %7527 = vmatprep.subr.bf16.mxu1 %v13381_v3  ;;  %v4259_v2 = vld [vmem:[%s19818_s3 + $0x978] sm:$0xff]  ;;  %v4454_v3 = vld [vmem:[%s19818_s3 + $0xf90] sm:$0xff] }
 0x3b8   :  { %v13262_v10 = vcombine.low %v4255_v60, %v4259_v2  ;;  %v13460_v31 = vcombine.low %v4454_v3, %v4458_v38 }
 0x3b9   :  { %7587 = vmatpush2.bf16.msra.mxu0 %v13054_v20  ;;  %v13263_v20 = vcombine.high %v4255_v60, %v4259_v2  ;;  %v17491_v60 = vadd.f32 %v17343_v52, %v17028_v11  ;;  %v4414_v2 = vld [vmem:[%s19818_s3 + $0xe50] sm:$0xff]  ;;  %v4335_v11 = vld [vmem:[%s19818_s3 + $0xbd8] sm:$0xff] }
 0x3ba   :  { %7528 = vmatpush1.bf16.msra.mxu1 %v13380_v33  ;;  %7588 = vmatprep.subr.bf16.mxu0 %v13047_v8  ;;  %v4247_v33 = vld [vmem:[%s19818_s3 + $0x918] sm:$0xff] }
 0x3bb   :  { %7529 = vmatprep.subr.bf16.mxu1 %v13373_v48  ;;  %v4251_v8 = vld [vmem:[%s19818_s3 + $0x938] sm:$0xff]  ;;  %vm7727_vm8 = vcmp.gt.f32.partialorder %v17491_v60, 0.0 }
 0x3bc   :  { %v13254_v24 = vcombine.low %v4247_v33, %v4251_v8  ;;  %v4339_v52 = vld [vmem:[%s19818_s3 + $0xbf8] sm:$0xff] }
 0x3bd   :  { %7589 = vmatpush2.bf16.msra.mxu0 %v13046_v28  ;;  %v13255_v28 = vcombine.high %v4247_v33, %v4251_v8  ;;  %v4406_v33 = vld [vmem:[%s19818_s3 + $0xe10] sm:$0xff] }
 0x3be   :  { %7530 = vmatpush1.bf16.msra.mxu1 %v13372_v18  ;;  %7590 = vmatprep.subr.bf16.mxu0 %v13039_v43  ;;  %v4239_v43 = vld [vmem:[%s19818_s3 + $0x8d8] sm:$0xff]  ;;  %v4410_v8 = vld [vmem:[%s19818_s3 + $0xe30] sm:$0xff] }
 0x3bf   :  { %7531 = vmatprep.subr.bf16.mxu1 %v13365_v26  ;;  %v4243_v26 = vld [vmem:[%s19818_s3 + $0x8f8] sm:$0xff] }
 0x3c0   :  { %v13246_v50 = vcombine.low %v4239_v43, %v4243_v26 }
 0x3c1   :  { %7591 = vmatpush2.bf16.msra.mxu0 %v13038_v7  ;;  %v13247_v7 = vcombine.high %v4239_v43, %v4243_v26  ;;  %v4147_v43 = vld [vmem:[%s19818_s3 + $0x5f8] sm:$0xff]  ;;  %v13342_v26 = vcombine.low %v4335_v11, %v4339_v52 }
 0x3c2   :  { %7532 = vmatpush1.bf16.msra.mxu1 %v13364_v54  ;;  %7592 = vmatprep.subr.bf16.mxu0 %v13031_v27  ;;  %v13445_v54 = vcombine.high %v4438_v21, %v4442_v22  ;;  %v4231_v27 = vld [vmem:[%s19818_s3 + $0x898] sm:$0xff]  ;;  %v13412_v21 = vcombine.low %v4406_v33, %v4410_v8 }
 0x3c3   :  { %7533 = vmatprep.subr.bf16.mxu1 %v13357_v30  ;;  %v4235_v30 = vld [vmem:[%s19818_s3 + $0x8b8] sm:$0xff] }
 0x3c4   :  { %v13238_v23 = vcombine.low %v4231_v27, %v4235_v30 }
 0x3c5   :  { %7593 = vmatpush2.bf16.msra.mxu0 %v13030_v55  ;;  %v13239_v55 = vcombine.high %v4231_v27, %v4235_v30  ;;  %v4139_v27 = vld [vmem:[%s19818_s3 + $0x5b8] sm:$0xff] }
 0x3c6   :  { %7534 = vmatpush1.bf16.msra.mxu1 %v13356_v56  ;;  %7644 = vmatprep.subr.bf16.mxu0 %v13279_v45  ;;  %v13437_v56 = vcombine.high %v4430_v32, %v4434_v37  ;;  %v4223_v45 = vld [vmem:[%s19818_s3 + $0x858] sm:$0xff] }
 0x3c7   :  { %7535 = vmatprep.subr.bf16.mxu1 %v13349_v58  ;;  %v4227_v58 = vld [vmem:[%s19818_s3 + $0x878] sm:$0xff] }
 0x3c8   :  { %v17423_v6 = vpop.f32.mrf.mxu0  ;;  %7595 = vmatmul.mubr.bf16.vlgmr.msra.gmra.mxu0 %v16303_v57  ;;  %v13461_v57 = vcombine.high %v4454_v3, %v4458_v38  ;;  %v4418_v3 = vld [vmem:[%s19818_s3 + $0xe70] sm:$0xff]  ;;  %v13230_v38 = vcombine.low %v4223_v45, %v4227_v58  ;;  %v4319_v30 = vld [vmem:[%s19818_s3 + $0xb58] sm:$0xff] }
 0x3c9   :  { %7645 = vmatpush1.bf16.msra.mxu0 %v13278_v29  ;;  %7676 = vmatprep.mubr.bf16.mxu0 %v16438_v47  ;;  %v4446_v47 = vld [vmem:[%s19818_s3 + $0xf50] sm:$0xff]  ;;  %v13231_v29 = vcombine.high %v4223_v45, %v4227_v58  ;;  %v4323_v32 = vld [vmem:[%s19818_s3 + $0xb78] sm:$0xff] }
 0x3ca   :  { %7536 = vmatpush1.bf16.msra.mxu1 %v13348_v0  ;;  %v17433_v4 = vpop.f32.mrf.mxu0  ;;  %7646 = vmatprep.subr.bf16.mxu0 %v13271_v1  ;;  %v13453_v18 = vcombine.high %v4446_v47, %v4450_v9  ;;  %v13452_v25 = vcombine.low %v4446_v47, %v4450_v9  ;;  %v13429_v0 = vcombine.high %v4422_v63, %v4426_v53  ;;  %v4215_v1 = vld [vmem:[%s19818_s3 + $0x818] sm:$0xff] }
 0x3cb   :  { %7537 = vmatprep.subr.bf16.mxu1 %v13469_v36  ;;  %v4219_v36 = vld [vmem:[%s19818_s3 + $0x838] sm:$0xff]  ;;  %v13420_v47 = vcombine.low %v4414_v2, %v4418_v3  ;;  %v13343_v9 = vcombine.high %v4335_v11, %v4339_v52 }
 0x3cc   :  { %v7354_v48 = vpop.f32.mrf.mxu0  ;;  %v4311_v45 = vld [vmem:[%s19818_s3 + $0xb18] sm:$0xff] }
 0x3cd   :  { %7647 = vmatpush1.bf16.msra.mxu0 %v13270_v41  ;;  %v13428_v41 = vcombine.low %v4422_v63, %v4426_v53  ;;  %v13222_v48 = vcombine.low %v4215_v1, %v4219_v36  ;;  %v4315_v58 = vld [vmem:[%s19818_s3 + $0xb38] sm:$0xff] }
 0x3ce   :  { %7538 = vmatpush2.bf16.msra.mxu1 %v13468_v5  ;;  %v7355_v14 = vpop.f32.mrf.mxu0  ;;  %7648 = vmatprep.subr.bf16.mxu0 %v13263_v20  ;;  %v13223_v5 = vcombine.high %v4215_v1, %v4219_v36  ;;  %v13421_v20 = vcombine.high %v4414_v2, %v4418_v3  ;;  %v4127_v53 = vld [vmem:[%s19818_s3 + $0x558] sm:$0xff]  ;;  %v13318_v52 = vcombine.low %v4311_v45, %v4315_v58 }
 0x3cf   :  { %7539 = vmatprep.subr.bf16.mxu1 %v13461_v57  ;;  %v7735_v57 = vmin.f32 %v17491_v60, 0.0  ;;  %v4327_v14 = vld [vmem:[%s19818_s3 + $0xb98] sm:$0xff] }
 0x3d1   :  { %7649 = vmatpush1.bf16.msra.mxu0 %v13262_v10  ;;  %v13413_v10 = vcombine.high %v4406_v33, %v4410_v8 }
 0x3d2   :  { %7540 = vmatpush2.bf16.msra.mxu1 %v13460_v31  ;;  %7650 = vmatprep.subr.bf16.mxu0 %v13255_v28  ;;  %v4331_v31 = vld [vmem:[%s19818_s3 + $0xbb8] sm:$0xff]  ;;  %v7744_v28 = vmul.f32 1.442695, %v7735_v57 }
 0x3d3   :  { %7541 = vmatprep.subr.bf16.mxu1 %v13453_v18  ;;  %v4143_v18 = vld [vmem:[%s19818_s3 + $0x5d8] sm:$0xff]  ;;  %v13335_v22 = vcombine.high %v4327_v14, %v4331_v31  ;;  %v13334_v37 = vcombine.low %v4327_v14, %v4331_v31 }
 0x3d4   :  { %14290 = vpow2.f32 %v7744_v28 }
 0x3d5   :  { %7651 = vmatpush1.bf16.msra.mxu0 %v13254_v24  ;;  %v13151_v24 = vcombine.high %v4143_v18, %v4147_v43 }
 0x3d6   :  { %7542 = vmatpush2.bf16.msra.mxu1 %v13452_v25  ;;  %7652 = vmatprep.subr.bf16.mxu0 %v13247_v7  ;;  %v4135_v25 = vld [vmem:[%s19818_s3 + $0x598] sm:$0xff]  ;;  %v17530_v7 = vld [vmem:[%s19819_s4] sm:$0xff] }
 0x3d7   :  { %7543 = vmatprep.subr.bf16.mxu1 %v13445_v54  ;;  %v4481_v54 = vrot.slane %v17530_v7, %v16135_v17 }
 0x3d9   :  { %7653 = vmatpush1.bf16.msra.mxu0 %v13246_v50  ;;  %v4485_v50 = vrot.slane %v17530_v7, %v15908_v35  ;;  %v7269_v63 = vadd.f32 %v17218_v16, %v4481_v54  ;;  %v13319_v16 = vcombine.high %v4311_v45, %v4315_v58 }
 0x3da   :  { %7544 = vmatpush2.bf16.msra.mxu1 %v13444_v42  ;;  %7654 = vmatprep.subr.bf16.mxu0 %v13239_v55  ;;  %v13150_v42 = vcombine.low %v4143_v18, %v4147_v43  ;;  %v13143_v55 = vcombine.high %v4135_v25, %v4139_v27 }
 0x3db   :  { %7545 = vmatprep.subr.bf16.mxu1 %v13437_v56  ;;  %v13327_v56 = vcombine.high %v4319_v30, %v4323_v32  ;;  %v7271_v1 = vadd.f32 %v17228_v40, %v4485_v50  ;;  %v4119_v40 = vld [vmem:[%s19818_s3 + $0x518] sm:$0xff] }
 0x3dc   :  { %v4283_v50 = vld [vmem:[%s19818_s3 + $0xa38] sm:$0xff] }
 0x3dd   :  { %7655 = vmatpush1.bf16.msra.mxu0 %v13238_v23  ;;  %v4131_v23 = vld [vmem:[%s19818_s3 + $0x578] sm:$0xff] }
 0x3de   :  { %7546 = vmatpush2.bf16.msra.mxu1 %v13436_v62  ;;  %7656 = vmatprep.subr.bf16.mxu0 %v13231_v29  ;;  %v13142_v29 = vcombine.low %v4135_v25, %v4139_v27  ;;  %v13135_v3 = vcombine.high %v4127_v53, %v4131_v23  ;;  %v13134_v57 = vcombine.low %v4127_v53, %v4131_v23  ;;  %v4107_v25 = vld [vmem:[%s19818_s3 + $0x4b8] sm:$0xff]  ;;  %v7854_v23 = vld [vmem:[%s19820_s5 + $0x1c0] sm:$0xff] }
 0x3df   :  { %7547 = vmatprep.subr.bf16.mxu1 %v13429_v0  ;;  %v13326_v0 = vcombine.low %v4319_v30, %v4323_v32 }
 0x3e1   :  { %7657 = vmatpush1.bf16.msra.mxu0 %v13230_v38  ;;  %v4303_v38 = vld [vmem:[%s19818_s3 + $0xad8] sm:$0xff]  ;;  %v14291_v14 = vpop.eup %14290 }
 0x3e2   :  { %7548 = vmatpush2.bf16.msra.mxu1 %v13428_v41  ;;  %7658 = vmatprep.subr.bf16.mxu0 %v13223_v5  ;;  %v4307_v41 = vld [vmem:[%s19818_s3 + $0xaf8] sm:$0xff] }
 0x3e3   :  { %7549 = vmatprep.subr.bf16.mxu1 %v13421_v20  ;;  %v13311_v33 = vcombine.high %v4303_v38, %v4307_v41  ;;  %v13310_v31 = vcombine.low %v4303_v38, %v4307_v41  ;;  %v7850_v41 = vld [vmem:[%s19820_s5 + $0x1a0] sm:$0xff] }
 0x3e5   :  { %7659 = vmatpush1.bf16.msra.mxu0 %v13222_v48 }
 0x3e6   :  { %7550 = vmatpush2.bf16.msra.mxu1 %v13420_v47  ;;  %7660 = vmatprep.subr.bf16.mxu0 %v13343_v9  ;;  %v4295_v9 = vld [vmem:[%s19818_s3 + $0xa98] sm:$0xff] }
 0x3e7   :  { %7551 = vmatprep.subr.bf16.mxu1 %v13413_v10  ;;  %v4111_v10 = vld [vmem:[%s19818_s3 + $0x4d8] sm:$0xff] }
 0x3e9   :  { %7661 = vmatpush2.bf16.msra.mxu0 %v13342_v26  ;;  %v4287_v26 = vld [vmem:[%s19818_s3 + $0xa58] sm:$0xff] }
 0x3ea   :  { %7552 = vmatpush2.bf16.msra.mxu1 %v13412_v21  ;;  %7662 = vmatprep.subr.bf16.mxu0 %v13335_v22  ;;  %v4291_v21 = vld [vmem:[%s19818_s3 + $0xa78] sm:$0xff]  ;;  %v13473_v22 = vadd.f32 -1.0, %v14291_v14 }
 0x3eb   :  { %7603 = vmatprep.subr.bf16.mxu1 %v13151_v24  ;;  %v4103_v24 = vld [vmem:[%s19818_s3 + $0x498] sm:$0xff]  ;;  %v13295_v30 = vcombine.high %v4287_v26, %v4291_v21  ;;  %v13294_v45 = vcombine.low %v4287_v26, %v4291_v21 }
 0x3ec   :  { %v13111_v32 = vcombine.high %v4103_v24, %v4107_v25  ;;  %v13110_v58 = vcombine.low %v4103_v24, %v4107_v25  ;;  %v4191_v21 = vld [vmem:[%s19818_s3 + $0x758] sm:$0xff] }
 0x3ed   :  { %v7309_v62 = vpop.f32.mrf.mxu1  ;;  %7554 = vmatmul.mubr.bf16.vlgmr.msra.gmra.mxu1 %v16713_v51  ;;  %7663 = vmatpush2.bf16.msra.mxu0 %v13334_v37  ;;  %v4279_v37 = vld [vmem:[%s19818_s3 + $0xa18] sm:$0xff] }
 0x3ee   :  { %v7310_v36 = vadd.f32 %v7309_v62, %v7269_v63  ;;  %7604 = vmatpush1.bf16.msra.mxu1 %v13150_v42  ;;  %7635 = vmatprep.mubr.bf16.mxu1 %v16091_v59  ;;  %v4123_v59 = vld [vmem:[%s19818_s3 + $0x538] sm:$0xff]  ;;  %v7767_v42 = vmul.f32 1.6732632, %v13473_v22  ;;  %v13287_v63 = vcombine.high %v4279_v37, %v4283_v50  ;;  %v7858_v62 = vld [vmem:[%s19820_s5 + $0x1e0] sm:$0xff] }
 0x3ef   :  { %v7311_v2 = vpop.f32.mrf.mxu1  ;;  %7605 = vmatprep.subr.bf16.mxu1 %v13143_v55  ;;  %7664 = vmatprep.subr.bf16.mxu0 %v13327_v56  ;;  %v13127_v47 = vcombine.high %v4119_v40, %v4123_v59  ;;  %v13126_v28 = vcombine.low %v4119_v40, %v4123_v59  ;;  %v4095_v55 = vld [vmem:[%s19818_s3 + $0x458] sm:$0xff]  ;;  %v13536_v59 = vcombine.low %v7854_v23, %v7858_v62 }
 0x3f0   :  { %v7312_v5 = vadd.f32 %v7311_v2, %v7271_v1  ;;  %v17574_v20 = vadd.f32 %v17423_v6, %v7310_v36  ;;  %v4299_v6 = vld [vmem:[%s19818_s3 + $0xab8] sm:$0xff]  ;;  %v13286_v36 = vcombine.low %v4279_v37, %v4283_v50  ;;  %v13537_v2 = vcombine.high %v7854_v23, %v7858_v62  ;;  %v7826_v37 = vld [vmem:[%s19820_s5 + $0xe0] sm:$0xff] }
 0x3f1   :  { %v7313_v11 = vpop.f32.mrf.mxu1  ;;  %7665 = vmatpush2.bf16.msra.mxu0 %v13326_v0  ;;  %v13303_v18 = vcombine.high %v4295_v9, %v4299_v6  ;;  %v13302_v54 = vcombine.low %v4295_v9, %v4299_v6  ;;  %v4099_v56 = vld [vmem:[%s19818_s3 + $0x478] sm:$0xff] }
 0x3f2   :  { %7606 = vmatpush1.bf16.msra.mxu1 %v13142_v29  ;;  %7666 = vmatprep.subr.bf16.mxu0 %v13319_v16  ;;  %v17577_v8 = vadd.f32 %v17433_v4, %v7312_v5  ;;  %v4115_v4 = vld [vmem:[%s19818_s3 + $0x4f8] sm:$0xff]  ;;  %v13103_v53 = vcombine.high %v4095_v55, %v4099_v56  ;;  %v7775_v29 = vsel %vm7727_vm8, %v17491_v60, %v7767_v42  ;;  %v7846_v60 = vld [vmem:[%s19820_s5 + $0x180] sm:$0xff]  ;;  %vm14333_vm8 = vmmov 0  }
 0x3f3   :  { %v7314_v48 = vpop.f32.mrf.mxu1  ;;  %7607 = vmatprep.subr.bf16.mxu1 %v13135_v3  ;;  %v13119_v43 = vcombine.high %v4111_v10, %v4115_v4  ;;  %v13118_v27 = vcombine.low %v4111_v10, %v4115_v4  ;;  %v4087_v0 = vld [vmem:[%s19818_s3 + $0x418] sm:$0xff]  ;;  %v13102_v16 = vcombine.low %v4095_v55, %v4099_v56  ;;  %v7783_v3 = vmul.f32 1.050701, %v7775_v29 }
 0x3f4   :  { %v4091_v1 = vld [vmem:[%s19818_s3 + $0x438] sm:$0xff]  ;;  %v7838_v48 = vld [vmem:[%s19820_s5 + $0x140] sm:$0xff]  ;;  %v13528_v4 = vcombine.low %v7846_v60, %v7850_v41 }
 0x3f5   :  { %7667 = vmatpush2.bf16.msra.mxu0 %v13318_v52  ;;  %v13095_v38 = vcombine.high %v4087_v0, %v4091_v1  ;;  %v4207_v5 = vld [vmem:[%s19818_s3 + $0x7d8] sm:$0xff]  ;;  %v13094_v11 = vcombine.low %v4087_v0, %v4091_v1  ;;  %v13529_v52 = vcombine.high %v7846_v60, %v7850_v41 }
 0x3f6   :  { %7608 = vmatpush1.bf16.msra.mxu1 %v13134_v57  ;;  %7668 = vmatprep.subr.bf16.mxu0 %v13311_v33  ;;  %v4211_v40 = vld [vmem:[%s19818_s3 + $0x7f8] sm:$0xff]  ;;  %v17641_v57 = vpack.c.bf16 %v7783_v3, %v7783_v3 }
 0x3f7   :  { %7609 = vmatprep.subr.bf16.mxu1 %v13127_v47  ;;  %v13215_v33 = vcombine.high %v4207_v5, %v4211_v40  ;;  %v7842_v47 = vld [vmem:[%s19820_s5 + $0x160] sm:$0xff]  ;;  %v4199_v6 = vld [vmem:[%s19818_s3 + $0x798] sm:$0xff] }
 0x3f8   :  { %v4203_v10 = vld [vmem:[%s19818_s3 + $0x7b8] sm:$0xff]  ;;  %v13520_v24 = vcombine.low %v7838_v48, %v7842_v47 }
 0x3f9   :  { %7669 = vmatpush2.bf16.msra.mxu0 %v13310_v31  ;;  %v13214_v31 = vcombine.low %v4207_v5, %v4211_v40  ;;  %v4195_v22 = vld [vmem:[%s19818_s3 + $0x778] sm:$0xff] }
 0x3fa   :  { %7610 = vmatpush1.bf16.msra.mxu1 %v13126_v28  ;;  %7670 = vmatprep.subr.bf16.mxu0 %v13303_v18  ;;  %v13521_v28 = vcombine.high %v7838_v48, %v7842_v47  ;;  %v7830_v18 = vld [vmem:[%s19820_s5 + $0x100] sm:$0xff]  ;;  %v4183_v50 = vld [vmem:[%s19818_s3 + $0x718] sm:$0xff]  ;;  %v13198_v56 = vcombine.low %v4191_v21, %v4195_v22 }
 0x3fb   :  { %7611 = vmatprep.subr.bf16.mxu1 %v13119_v43  ;;  %v7834_v43 = vld [vmem:[%s19820_s5 + $0x120] sm:$0xff]  ;;  %v4187_v42 = vld [vmem:[%s19818_s3 + $0x738] sm:$0xff] }
 0x3fc   :  { %v13512_v55 = vcombine.low %v7830_v18, %v7834_v43  ;;  %v4175_v23 = vld [vmem:[%s19818_s3 + $0x6d8] sm:$0xff]  ;;  %v13190_v0 = vcombine.low %v4183_v50, %v4187_v42 }
 0x3fd   :  { %7671 = vmatpush2.bf16.msra.mxu0 %v13302_v54  ;;  %v13206_v54 = vcombine.low %v4199_v6, %v4203_v10  ;;  %v4179_v62 = vld [vmem:[%s19818_s3 + $0x6f8] sm:$0xff] }
 0x3fe   :  { %7612 = vmatpush1.bf16.msra.mxu1 %v13118_v27  ;;  %7672 = vmatprep.subr.bf16.mxu0 %v13295_v30  ;;  %v13513_v27 = vcombine.high %v7830_v18, %v7834_v43  ;;  %v13199_v30 = vcombine.high %v4191_v21, %v4195_v22  ;;  %v4167_v3 = vld [vmem:[%s19818_s3 + $0x698] sm:$0xff]  ;;  %v13182_v41 = vcombine.low %v4175_v23, %v4179_v62 }
 0x3ff   :  { %7613 = vmatprep.subr.bf16.mxu1 %v13111_v32  ;;  %v7822_v32 = vld [vmem:[%s19820_s5 + $0xc0] sm:$0xff]  ;;  %v4155_v18 = vld [vmem:[%s19818_s3 + $0x638] sm:$0xff] }
 0x400   :  { %v13504_v29 = vcombine.low %v7822_v32, %v7826_v37 }
 0x401   :  { %7673 = vmatpush2.bf16.msra.mxu0 %v13294_v45  ;;  %v13505_v45 = vcombine.high %v7822_v32, %v7826_v37 }
 0x402   :  { %7614 = vmatpush1.bf16.msra.mxu1 %v13110_v58  ;;  %7674 = vmatprep.subr.bf16.mxu0 %v13287_v63  ;;  %v13191_v58 = vcombine.high %v4183_v50, %v4187_v42  ;;  %v7814_v63 = vld [vmem:[%s19820_s5 + $0x80] sm:$0xff] }
 0x403   :  { %7615 = vmatprep.subr.bf16.mxu1 %v13103_v53  ;;  %v7818_v53 = vld [vmem:[%s19820_s5 + $0xa0] sm:$0xff] }
 0x404   :  { %v13497_v1 = vcombine.high %v7814_v63, %v7818_v53  ;;  %v13496_v60 = vcombine.low %v7814_v63, %v7818_v53 }
 0x405   :  { %7675 = vmatpush2.bf16.msra.mxu0 %v13286_v36  ;;  %v13183_v36 = vcombine.high %v4175_v23, %v4179_v62 }
 0x406   :  { %7616 = vmatpush1.bf16.msra.mxu1 %v13102_v16  ;;  %10912 = vmatprep.subr.bf16.mxu0 %v13537_v2  ;;  %v7806_v16 = vld [vmem:[%s19820_s5 + $0x40] sm:$0xff] }
 0x407   :  { %7617 = vmatprep.subr.bf16.mxu1 %v13095_v38  ;;  %v7810_v2 = vld [vmem:[%s19820_s5 + $0x60] sm:$0xff]  ;;  %v4171_v38 = vld [vmem:[%s19818_s3 + $0x6b8] sm:$0xff] }
 0x408   :  { %v17649_v9 = vpop.f32.mrf.mxu0  ;;  %7677 = vmatmul.mubr.bf16.vlgmr.msra.gmra.mxu0 %v16529_v46  ;;  %v13207_v46 = vcombine.high %v4199_v6, %v4203_v10  ;;  %v13489_v5 = vcombine.high %v7806_v16, %v7810_v2  ;;  %v13175_v40 = vcombine.high %v4167_v3, %v4171_v38  ;;  %v13488_v48 = vcombine.low %v7806_v16, %v7810_v2 }
 0x409   :  { %10913 = vmatpush1.bf16.msra.mxu0 %v13536_v59  ;;  %10944 = vmatprep.mubr.bf16.mxu0 %v17641_v57  ;;  %v7798_v59 = vld [vmem:[%s19820_s5] sm:$0xff]  ;;  %v13174_v47 = vcombine.low %v4167_v3, %v4171_v38  ;;  %v7734_v10 = vmin.f32 %v17340_v39, 0.0 }
 0x40a   :  { %7618 = vmatpush1.bf16.msra.mxu1 %v13094_v11  ;;  %v17659_v14 = vpop.f32.mrf.mxu0  ;;  %10914 = vmatprep.subr.bf16.mxu0 %v13529_v52  ;;  %v7802_v11 = vld [vmem:[%s19820_s5 + $0x20] sm:$0xff]  ;;  %v4159_v52 = vld [vmem:[%s19818_s3 + $0x658] sm:$0xff] }
 0x40b   :  { %7619 = vmatprep.subr.bf16.mxu1 %v13215_v33  ;;  %v4163_v33 = vld [vmem:[%s19818_s3 + $0x678] sm:$0xff]  ;;  %v13481_v6 = vcombine.high %v7798_v59, %v7802_v11  ;;  %v13480_v43 = vcombine.low %v7798_v59, %v7802_v11  ;;  %v7742_v22 = vmul.f32 1.442695, %v7734_v10  ;;  %v7882_v10 = vld [vmem:[%s19820_s5 + $0x2a0] sm:$0xff] }
 0x40c   :  { %v7436_v26 = vpop.f32.mrf.mxu0 }
 0x40d   :  { %10915 = vmatpush1.bf16.msra.mxu0 %v13528_v4  ;;  %v13167_v4 = vcombine.high %v4159_v52, %v4163_v33  ;;  %v13166_v26 = vcombine.low %v4159_v52, %v4163_v33  ;;  %14292 = vpow2.f32 %v7742_v22  ;;  %v7870_v22 = vld [vmem:[%s19820_s5 + $0x240] sm:$0xff] }
 0x40e   :  { %7620 = vmatpush2.bf16.msra.mxu1 %v13214_v31  ;;  %v7437_v25 = vpop.f32.mrf.mxu0  ;;  %10916 = vmatprep.subr.bf16.mxu0 %v13521_v28  ;;  %v7918_v31 = vld [vmem:[%s19820_s5 + $0x3c0] sm:$0xff] }
 0x40f   :  { %7621 = vmatprep.subr.bf16.mxu1 %v13207_v46  ;;  %v7922_v28 = vld [vmem:[%s19820_s5 + $0x3e0] sm:$0xff]  ;;  %v4151_v46 = vld [vmem:[%s19818_s3 + $0x618] sm:$0xff] }
 0x410   :  { %v13601_v21 = vcombine.high %v7918_v31, %v7922_v28  ;;  %v7910_v25 = vld [vmem:[%s19820_s5 + $0x380] sm:$0xff]  ;;  %v13600_v32 = vcombine.low %v7918_v31, %v7922_v28  ;;  %v13158_v37 = vcombine.low %v4151_v46, %v4155_v18  ;;  %v4367_v31 = vld [vmem:[%s19818_s3 + $0xcd8] sm:$0xff] }
 0x411   :  { %10917 = vmatpush1.bf16.msra.mxu0 %v13520_v24  ;;  %v13159_v24 = vcombine.high %v4151_v46, %v4155_v18  ;;  %v4371_v28 = vld [vmem:[%s19818_s3 + $0xcf8] sm:$0xff] }
 0x412   :  { %7622 = vmatpush2.bf16.msra.mxu1 %v13206_v54  ;;  %10918 = vmatprep.subr.bf16.mxu0 %v13513_v27  ;;  %v7914_v54 = vld [vmem:[%s19820_s5 + $0x3a0] sm:$0xff]  ;;  %v4399_v27 = vld [vmem:[%s19818_s3 + $0xdd8] sm:$0xff] }
 0x413   :  { %7623 = vmatprep.subr.bf16.mxu1 %v13199_v30  ;;  %v4403_v30 = vld [vmem:[%s19818_s3 + $0xdf8] sm:$0xff]  ;;  %v13593_v50 = vcombine.high %v7910_v25, %v7914_v54  ;;  %v13592_v63 = vcombine.low %v7910_v25, %v7914_v54 }
 0x414   :  { %v13407_v42 = vcombine.high %v4399_v27, %v4403_v30  ;;  %v13406_v53 = vcombine.low %v4399_v27, %v4403_v30  ;;  %v4359_v25 = vld [vmem:[%s19818_s3 + $0xc98] sm:$0xff]  ;;  %v13374_v30 = vcombine.low %v4367_v31, %v4371_v28 }
 0x415   :  { %10919 = vmatpush1.bf16.msra.mxu0 %v13512_v55  ;;  %v4391_v55 = vld [vmem:[%s19818_s3 + $0xd98] sm:$0xff] }
 0x416   :  { %7624 = vmatpush2.bf16.msra.mxu1 %v13198_v56  ;;  %10920 = vmatprep.subr.bf16.mxu0 %v13505_v45  ;;  %v4395_v56 = vld [vmem:[%s19818_s3 + $0xdb8] sm:$0xff]  ;;  %v7902_v45 = vld [vmem:[%s19820_s5 + $0x340] sm:$0xff] }
 0x417   :  { %7625 = vmatprep.subr.bf16.mxu1 %v13191_v58  ;;  %v7906_v58 = vld [vmem:[%s19820_s5 + $0x360] sm:$0xff]  ;;  %v13399_v23 = vcombine.high %v4391_v55, %v4395_v56  ;;  %v13398_v38 = vcombine.low %v4391_v55, %v4395_v56  ;;  %v4363_v54 = vld [vmem:[%s19818_s3 + $0xcb8] sm:$0xff] }
 0x418   :  { %v13585_v62 = vcombine.high %v7902_v45, %v7906_v58  ;;  %v13584_v2 = vcombine.low %v7902_v45, %v7906_v58  ;;  %v7866_v55 = vld [vmem:[%s19820_s5 + $0x220] sm:$0xff]  ;;  %v4351_v56 = vld [vmem:[%s19818_s3 + $0xc58] sm:$0xff] }
 0x419   :  { %10921 = vmatpush1.bf16.msra.mxu0 %v13504_v29  ;;  %v7894_v29 = vld [vmem:[%s19820_s5 + $0x300] sm:$0xff]  ;;  %v4355_v45 = vld [vmem:[%s19818_s3 + $0xc78] sm:$0xff] }
 0x41a   :  { %7626 = vmatpush2.bf16.msra.mxu1 %v13190_v0  ;;  %10922 = vmatprep.subr.bf16.mxu0 %v13497_v1  ;;  %v7898_v0 = vld [vmem:[%s19820_s5 + $0x320] sm:$0xff]  ;;  %v4383_v1 = vld [vmem:[%s19818_s3 + $0xd58] sm:$0xff] }
 0x41b   :  { %7627 = vmatprep.subr.bf16.mxu1 %v13183_v36  ;;  %v4387_v36 = vld [vmem:[%s19818_s3 + $0xd78] sm:$0xff]  ;;  %v13576_v11 = vcombine.low %v7894_v29, %v7898_v0 }
 0x41c   :  { %v13390_v52 = vcombine.low %v4383_v1, %v4387_v36 }
 0x41d   :  { %10923 = vmatpush1.bf16.msra.mxu0 %v13496_v60  ;;  %v13577_v60 = vcombine.high %v7894_v29, %v7898_v0  ;;  %v8110_v29 = vld [vmem:[%s19820_s5 + $0x9c0] sm:$0xff] }
 0x41e   :  { %7628 = vmatpush2.bf16.msra.mxu1 %v13182_v41  ;;  %10924 = vmatprep.subr.bf16.mxu0 %v13489_v5  ;;  %v13391_v5 = vcombine.high %v4383_v1, %v4387_v36  ;;  %v8114_v0 = vld [vmem:[%s19820_s5 + $0x9e0] sm:$0xff]  ;;  %v4343_v1 = vld [vmem:[%s19818_s3 + $0xc18] sm:$0xff] }
 0x41f   :  { %7629 = vmatprep.subr.bf16.mxu1 %v13175_v40  ;;  %v7886_v40 = vld [vmem:[%s19820_s5 + $0x2c0] sm:$0xff]  ;;  %v4347_v36 = vld [vmem:[%s19818_s3 + $0xc38] sm:$0xff] }
 0x421   :  { %10925 = vmatpush1.bf16.msra.mxu0 %v13488_v48 }
 0x422   :  { %7630 = vmatpush2.bf16.msra.mxu1 %v13174_v47  ;;  %10926 = vmatprep.subr.bf16.mxu0 %v13481_v6  ;;  %v7878_v6 = vld [vmem:[%s19820_s5 + $0x280] sm:$0xff] }
 0x423   :  { %7631 = vmatprep.subr.bf16.mxu1 %v13167_v4  ;;  %v14293_v4 = vpop.eup %14292  ;;  %v13560_v27 = vcombine.low %v7878_v6, %v7882_v10 }
 0x425   :  { %10927 = vmatpush1.bf16.msra.mxu0 %v13480_v43  ;;  %v13561_v43 = vcombine.high %v7878_v6, %v7882_v10  ;;  %v4455_v10 = vld [vmem:[%s19818_s3 + $0xf98] sm:$0xff] }
 0x426   :  { %7632 = vmatpush2.bf16.msra.mxu1 %v13166_v26  ;;  %10928 = vmatprep.subr.bf16.mxu0 %v13601_v21  ;;  %v13472_v26 = vadd.f32 -1.0, %v14293_v4  ;;  %v13375_v21 = vcombine.high %v4367_v31, %v4371_v28  ;;  %v4459_v4 = vld [vmem:[%s19818_s3 + $0xfb8] sm:$0xff] }
 0x427   :  { %7633 = vmatprep.subr.bf16.mxu1 %v13159_v24  ;;  %v7874_v24 = vld [vmem:[%s19820_s5 + $0x260] sm:$0xff] }
 0x428   :  { %v13552_v58 = vcombine.low %v7870_v22, %v7874_v24 }
 0x429   :  { %10929 = vmatpush2.bf16.msra.mxu0 %v13600_v32  ;;  %v13553_v32 = vcombine.high %v7870_v22, %v7874_v24  ;;  %v8090_v22 = vld [vmem:[%s19820_s5 + $0x920] sm:$0xff]  ;;  %v17884_v24 = vld [vmem:[%s19820_s5 + $0x1c8] sm:$0xff] }
 0x42a   :  { %7634 = vmatpush2.bf16.msra.mxu1 %v13158_v37  ;;  %10930 = vmatprep.subr.bf16.mxu0 %v13593_v50  ;;  %v7766_v37 = vmul.f32 1.6732632, %v13472_v26  ;;  %v13367_v50 = vcombine.high %v4359_v25, %v4363_v54  ;;  %v8086_v26 = vld [vmem:[%s19820_s5 + $0x900] sm:$0xff] }
 0x42b   :  { %7685 = vmatprep.subr.bf16.mxu1 %v13407_v42  ;;  %v7862_v42 = vld [vmem:[%s19820_s5 + $0x200] sm:$0xff] }
 0x42d   :  { %v7391_v16 = vpop.f32.mrf.mxu1  ;;  %7636 = vmatmul.mubr.bf16.vlgmr.msra.gmra.mxu1 %v16305_v61  ;;  %10931 = vmatpush2.bf16.msra.mxu0 %v13592_v63  ;;  %v7890_v61 = vld [vmem:[%s19820_s5 + $0x2e0] sm:$0xff]  ;;  %v13366_v63 = vcombine.low %v4359_v25, %v4363_v54  ;;  %v17889_v25 = vld [vmem:[%s19820_s5 + $0x1e8] sm:$0xff] }
 0x42e   :  { %v17772_v3 = vadd.f32 %v7391_v16, %v17574_v20  ;;  %7686 = vmatpush1.bf16.msra.mxu1 %v13406_v53  ;;  %7717 = vmatprep.mubr.bf16.mxu1 %v16711_v49  ;;  %v4375_v20 = vld [vmem:[%s19818_s3 + $0xd18] sm:$0xff]  ;;  %v13569_v33 = vcombine.high %v7886_v40, %v7890_v61  ;;  %v13568_v46 = vcombine.low %v7886_v40, %v7890_v61  ;;  %v8102_v40 = vld [vmem:[%s19820_s5 + $0x980] sm:$0xff] }
 0x42f   :  { %v17775_v41 = vpop.f32.mrf.mxu1  ;;  %7687 = vmatprep.subr.bf16.mxu1 %v13399_v23  ;;  %10932 = vmatprep.subr.bf16.mxu0 %v13585_v62  ;;  %v4379_v49 = vld [vmem:[%s19818_s3 + $0xd38] sm:$0xff]  ;;  %v13545_v53 = vcombine.high %v7862_v42, %v7866_v55  ;;  %v7774_v23 = vsel %vm7726_vm9, %v17340_v39, %v7766_v37  ;;  %v13359_v62 = vcombine.high %v4351_v56, %v4355_v45  ;;  %v8106_v61 = vld [vmem:[%s19820_s5 + $0x9a0] sm:$0xff] }
 0x430   :  { %v13383_v47 = vcombine.high %v4375_v20, %v4379_v49  ;;  %v13382_v18 = vcombine.low %v4375_v20, %v4379_v49  ;;  %v17841_v39 = vadd.f32 %v17775_v41, %v17577_v8  ;;  %v13544_v16 = vcombine.low %v7862_v42, %v7866_v55  ;;  %v4463_v8 = vld [vmem:[%s19818_s3 + $0xfd8] sm:$0xff] }
 0x431   :  { %v7395_v59 = vpop.f32.mrf.mxu1  ;;  %10933 = vmatpush2.bf16.msra.mxu0 %v13584_v2  ;;  %v7782_v2 = vmul.f32 1.050701, %v7774_v23  ;;  %v4467_v41 = vld [vmem:[%s19818_s3 + $0xff8] sm:$0xff]  ;;  %v13792_v49 = vcombine.low %v8110_v29, %v8114_v0  ;;  %v13784_v28 = vcombine.low %v8102_v40, %v8106_v61  ;;  %v13538_v37 = vcombine.low %v17884_v24, %v17889_v25 }
 0x432   :  { %7688 = vmatpush1.bf16.msra.mxu1 %v13398_v38  ;;  %10934 = vmatprep.subr.bf16.mxu0 %v13577_v60  ;;  %v13358_v38 = vcombine.low %v4351_v56, %v4355_v45  ;;  %v13793_v60 = vcombine.high %v8110_v29, %v8114_v0  ;;  %v7737_v20 = vmin.f32 %v17841_v39, 0.0  ;;  %v13462_v42 = vcombine.low %v4455_v10, %v4459_v4  ;;  %v8078_v45 = vld [vmem:[%s19820_s5 + $0x8c0] sm:$0xff] }
 0x433   :  { %v7396_v48 = vpop.f32.mrf.mxu1  ;;  %7689 = vmatprep.subr.bf16.mxu1 %v13391_v5  ;;  %v13351_v5 = vcombine.high %v4343_v1, %v4347_v36  ;;  %v17856_v59 = vpack.c.bf16 %v7782_v2, %v7782_v2  ;;  %v13769_v55 = vcombine.high %v8086_v26, %v8090_v22  ;;  %v13768_v23 = vcombine.low %v8086_v26, %v8090_v22  ;;  %v4435_v2 = vld [vmem:[%s19818_s3 + $0xef8] sm:$0xff]  ;;  %v8174_v22 = vld [vmem:[%s19820_s5 + $0xbc0] sm:$0xff] }
 0x434   :  { %v8094_v48 = vld [vmem:[%s19820_s5 + $0x940] sm:$0xff]  ;;  %v7748_v31 = vmul.f32 1.442695, %v7737_v20  ;;  %v4427_v20 = vld [vmem:[%s19818_s3 + $0xeb8] sm:$0xff]  ;;  %vm7729_vm10 = vcmp.gt.f32.partialorder %v17841_v39, 0.0  ;;  %vm7728_vm11 = vcmp.gt.f32.partialorder %v17772_v3, 0.0 }
 0x435   :  { %10935 = vmatpush2.bf16.msra.mxu0 %v13576_v11  ;;  %v13350_v11 = vcombine.low %v4343_v1, %v4347_v36  ;;  %v8070_v1 = vld [vmem:[%s19820_s5 + $0x880] sm:$0xff] }
 0x436   :  { %7690 = vmatpush1.bf16.msra.mxu1 %v13390_v52  ;;  %10936 = vmatprep.subr.bf16.mxu0 %v13569_v33  ;;  %v13785_v52 = vcombine.high %v8102_v40, %v8106_v61  ;;  %v13471_v33 = vcombine.high %v4463_v8, %v4467_v41  ;;  %14294 = vpow2.f32 %v7748_v31  ;;  %v8074_v36 = vld [vmem:[%s19820_s5 + $0x8a0] sm:$0xff]  ;;  %v4419_v31 = vld [vmem:[%s19818_s3 + $0xe78] sm:$0xff] }
 0x437   :  { %7691 = vmatprep.subr.bf16.mxu1 %v13383_v47  ;;  %v8098_v47 = vld [vmem:[%s19820_s5 + $0x960] sm:$0xff] }
 0x438   :  { %v8062_v61 = vld [vmem:[%s19820_s5 + $0x840] sm:$0xff] }
 0x439   :  { %10937 = vmatpush2.bf16.msra.mxu0 %v13568_v46 }
 0x43a   :  { %7692 = vmatpush1.bf16.msra.mxu1 %v13382_v18  ;;  %10938 = vmatprep.subr.bf16.mxu0 %v13561_v43  ;;  %v13470_v18 = vcombine.low %v4463_v8, %v4467_v41  ;;  %v13777_v43 = vcombine.high %v8094_v48, %v8098_v47  ;;  %v8066_v8 = vld [vmem:[%s19820_s5 + $0x860] sm:$0xff]  ;;  %v4423_v41 = vld [vmem:[%s19818_s3 + $0xe98] sm:$0xff] }
 0x43b   :  { %7693 = vmatprep.subr.bf16.mxu1 %v13375_v21  ;;  %v13463_v21 = vcombine.high %v4455_v10, %v4459_v4  ;;  %v8058_v10 = vld [vmem:[%s19820_s5 + $0x820] sm:$0xff]  ;;  %v4415_v4 = vld [vmem:[%s19818_s3 + $0xe58] sm:$0xff] }
 0x43d   :  { %10939 = vmatpush2.bf16.msra.mxu0 %v13560_v27  ;;  %v4447_v27 = vld [vmem:[%s19818_s3 + $0xf58] sm:$0xff] }
 0x43e   :  { %7694 = vmatpush1.bf16.msra.mxu1 %v13374_v30  ;;  %10940 = vmatprep.subr.bf16.mxu0 %v13553_v32  ;;  %v4451_v30 = vld [vmem:[%s19818_s3 + $0xf78] sm:$0xff]  ;;  %v13776_v32 = vcombine.low %v8094_v48, %v8098_v47  ;;  %v13431_v48 = vcombine.high %v4423_v41, %v4427_v20  ;;  %v8054_v47 = vld [vmem:[%s19820_s5 + $0x800] sm:$0xff] }
 0x43f   :  { %7695 = vmatprep.subr.bf16.mxu1 %v13367_v50  ;;  %v13455_v56 = vcombine.high %v4447_v27, %v4451_v30  ;;  %v13737_v26 = vcombine.high %v8054_v47, %v8058_v10 }
 0x441   :  { %10941 = vmatpush2.bf16.msra.mxu0 %v13552_v58  ;;  %v8082_v58 = vld [vmem:[%s19820_s5 + $0x8e0] sm:$0xff] }
 0x442   :  { %7696 = vmatpush1.bf16.msra.mxu1 %v13366_v63  ;;  %10942 = vmatprep.subr.bf16.mxu0 %v13545_v53  ;;  %v4439_v63 = vld [vmem:[%s19818_s3 + $0xf18] sm:$0xff]  ;;  %v13761_v29 = vcombine.high %v8078_v45, %v8082_v58 }
 0x443   :  { %7697 = vmatprep.subr.bf16.mxu1 %v13359_v62  ;;  %v4443_v53 = vld [vmem:[%s19818_s3 + $0xf38] sm:$0xff]  ;;  %v13454_v62 = vcombine.low %v4447_v27, %v4451_v30 }
 0x444   :  { %v13447_v0 = vcombine.high %v4439_v63, %v4443_v53  ;;  %v4407_v27 = vld [vmem:[%s19818_s3 + $0xe18] sm:$0xff] }
 0x445   :  { %10943 = vmatpush2.bf16.msra.mxu0 %v13544_v16  ;;  %v4431_v16 = vld [vmem:[%s19818_s3 + $0xed8] sm:$0xff] }
 0x446   :  { %7698 = vmatpush1.bf16.msra.mxu1 %v13358_v38  ;;  %10994 = vmatprep.subr.bf16.mxu0 %v13793_v60  ;;  %v13760_v38 = vcombine.low %v8078_v45, %v8082_v58  ;;  %v13446_v60 = vcombine.low %v4439_v63, %v4443_v53  ;;  %v13439_v40 = vcombine.high %v4431_v16, %v4435_v2  ;;  %v4411_v30 = vld [vmem:[%s19818_s3 + $0xe38] sm:$0xff]  ;;  %v8166_v45 = vld [vmem:[%s19820_s5 + $0xb80] sm:$0xff] }
 0x447   :  { %7699 = vmatprep.subr.bf16.mxu1 %v13351_v5  ;;  %v13753_v5 = vcombine.high %v8070_v1, %v8074_v36  ;;  %v8170_v58 = vld [vmem:[%s19820_s5 + $0xba0] sm:$0xff] }
 0x448   :  { %v17864_v6 = vpop.f32.mrf.mxu0  ;;  %10945 = vmatmul.mubr.bf16.vlgmr.msra.gmra.mxu0 %v17856_v59  ;;  %v7982_v63 = vld [vmem:[%s19820_s5 + $0x5c0] sm:$0xff] }
 0x449   :  { %10995 = vmatpush1.bf16.msra.mxu0 %v13792_v49  ;;  %v13752_v49 = vcombine.low %v8070_v1, %v8074_v36  ;;  %v7986_v53 = vld [vmem:[%s19820_s5 + $0x5e0] sm:$0xff] }
 0x44a   :  { %7700 = vmatpush1.bf16.msra.mxu1 %v13350_v11  ;;  %v17873_v46 = vpop.f32.mrf.mxu0  ;;  %10996 = vmatprep.subr.bf16.mxu0 %v13785_v52  ;;  %v14295_v11 = vpop.eup %14294  ;;  %v13438_v52 = vcombine.low %v4431_v16, %v4435_v2  ;;  %v13665_v1 = vcombine.high %v7982_v63, %v7986_v53  ;;  %v7974_v36 = vld [vmem:[%s19820_s5 + $0x580] sm:$0xff]  ;;  %v4489_v16 = vrot.slane %v17530_v7, %v16357_v19 }
 0x44b   :  { %7701 = vmatprep.subr.bf16.mxu1 %v13471_v33  ;;  %v13745_v33 = vcombine.high %v8062_v61, %v8066_v8 }
 0x44c   :  { %v7518_v54 = vpop.f32.mrf.mxu0 }
 0x44d   :  { %10997 = vmatpush1.bf16.msra.mxu0 %v13784_v28  ;;  %v13475_v28 = vadd.f32 -1.0, %v14295_v11  ;;  %v8178_v54 = vld [vmem:[%s19820_s5 + $0xbe0] sm:$0xff]  ;;  %v7433_v11 = vadd.f32 %v17649_v9, %v4489_v16 }
 0x44e   :  { %7702 = vmatpush2.bf16.msra.mxu1 %v13470_v18  ;;  %v7519_v50 = vpop.f32.mrf.mxu0  ;;  %10998 = vmatprep.subr.bf16.mxu0 %v13777_v43  ;;  %v13744_v18 = vcombine.low %v8062_v61, %v8066_v8  ;;  %v13430_v43 = vcombine.low %v4423_v41, %v4427_v20  ;;  %v13664_v61 = vcombine.low %v7982_v63, %v7986_v53  ;;  %v8150_v20 = vld [vmem:[%s19820_s5 + $0xb00] sm:$0xff] }
 0x44f   :  { %7703 = vmatprep.subr.bf16.mxu1 %v13463_v21  ;;  %v13423_v21 = vcombine.high %v4415_v4, %v4419_v31  ;;  %v13736_v50 = vcombine.low %v8054_v47, %v8058_v10 }
 0x451   :  { %10999 = vmatpush1.bf16.msra.mxu0 %v13776_v32  ;;  %v7769_v32 = vmul.f32 1.6732632, %v13475_v28 }
 0x452   :  { %7704 = vmatpush2.bf16.msra.mxu1 %v13462_v42  ;;  %11000 = vmatprep.subr.bf16.mxu0 %v13769_v55  ;;  %v13422_v42 = vcombine.low %v4415_v4, %v4419_v31  ;;  %v13857_v55 = vcombine.high %v8174_v22, %v8178_v54 }
 0x453   :  { %7705 = vmatprep.subr.bf16.mxu1 %v13455_v56  ;;  %v13415_v56 = vcombine.high %v4407_v27, %v4411_v30 }
 0x455   :  { %11001 = vmatpush1.bf16.msra.mxu0 %v13768_v23  ;;  %v7777_v23 = vsel %vm7729_vm10, %v17841_v39, %v7769_v32  ;;  %v7978_v39 = vld [vmem:[%s19820_s5 + $0x5a0] sm:$0xff]  ;;  %vm12426_vm10 = vcmask 7168  }
 0x456   :  { %7706 = vmatpush2.bf16.msra.mxu1 %v13454_v62  ;;  %11002 = vmatprep.subr.bf16.mxu0 %v13761_v29  ;;  %v13856_v62 = vcombine.low %v8174_v22, %v8178_v54  ;;  %v13414_v29 = vcombine.low %v4407_v27, %v4411_v30  ;;  %v7785_v2 = vmul.f32 1.050701, %v7777_v23  ;;  %v13657_v8 = vcombine.high %v7974_v36, %v7978_v39 }
 0x457   :  { %7707 = vmatprep.subr.bf16.mxu1 %v13447_v0  ;;  %v13849_v0 = vcombine.high %v8166_v45, %v8170_v58  ;;  %v13656_v47 = vcombine.low %v7974_v36, %v7978_v39 }
 0x459   :  { %11003 = vmatpush1.bf16.msra.mxu0 %v13760_v38  ;;  %v8158_v38 = vld [vmem:[%s19820_s5 + $0xb40] sm:$0xff] }
 0x45a   :  { %7708 = vmatpush2.bf16.msra.mxu1 %v13446_v60  ;;  %11004 = vmatprep.subr.bf16.mxu0 %v13753_v5  ;;  %v8162_v60 = vld [vmem:[%s19820_s5 + $0xb60] sm:$0xff]  ;;  %v13848_v5 = vcombine.low %v8166_v45, %v8170_v58 }
 0x45b   :  { %7709 = vmatprep.subr.bf16.mxu1 %v13439_v40  ;;  %v4493_v40 = vrot.slane %v17530_v7, %v16308_v44  ;;  %v13841_v41 = vcombine.high %v8158_v38, %v8162_v60  ;;  %v7966_v7 = vld [vmem:[%s19820_s5 + $0x540] sm:$0xff]  ;;  %v13840_v10 = vcombine.low %v8158_v38, %v8162_v60 }
 0x45c   :  { %v7950_v45 = vld [vmem:[%s19820_s5 + $0x4c0] sm:$0xff] }
 0x45d   :  { %11005 = vmatpush1.bf16.msra.mxu0 %v13752_v49  ;;  %v8154_v49 = vld [vmem:[%s19820_s5 + $0xb20] sm:$0xff]  ;;  %v7435_v4 = vadd.f32 %v17659_v14, %v4493_v40 }
 0x45e   :  { %7710 = vmatpush2.bf16.msra.mxu1 %v13438_v52  ;;  %11006 = vmatprep.subr.bf16.mxu0 %v13745_v33  ;;  %v17996_v52 = vpack.c.bf16 %v7785_v2, %v7785_v2  ;;  %v7970_v33 = vld [vmem:[%s19820_s5 + $0x560] sm:$0xff]  ;;  %v13833_v9 = vcombine.high %v8150_v20, %v8154_v49  ;;  %v13832_v27 = vcombine.low %v8150_v20, %v8154_v49 }
 0x45f   :  { %7711 = vmatprep.subr.bf16.mxu1 %v13431_v48  ;;  %v7958_v14 = vld [vmem:[%s19820_s5 + $0x500] sm:$0xff]  ;;  %v13648_v30 = vcombine.low %v7966_v7, %v7970_v33 }
 0x460   :  { %v8118_v38 = vld [vmem:[%s19820_s5 + $0xa00] sm:$0xff] }
 0x461   :  { %11007 = vmatpush1.bf16.msra.mxu0 %v13744_v18  ;;  %v13649_v18 = vcombine.high %v7966_v7, %v7970_v33  ;;  %v8122_v60 = vld [vmem:[%s19820_s5 + $0xa20] sm:$0xff] }
 0x462   :  { %7712 = vmatpush2.bf16.msra.mxu1 %v13430_v43  ;;  %11008 = vmatprep.subr.bf16.mxu0 %v13737_v26  ;;  %v8142_v43 = vld [vmem:[%s19820_s5 + $0xac0] sm:$0xff]  ;;  %v13800_v7 = vcombine.low %v8118_v38, %v8122_v60 }
 0x463   :  { %7713 = vmatprep.subr.bf16.mxu1 %v13423_v21  ;;  %v7962_v21 = vld [vmem:[%s19820_s5 + $0x520] sm:$0xff] }
 0x464   :  { %v13640_v63 = vcombine.low %v7958_v14, %v7962_v21  ;;  %v7938_v40 = vld [vmem:[%s19820_s5 + $0x460] sm:$0xff] }
 0x465   :  { %11009 = vmatpush1.bf16.msra.mxu0 %v13736_v50  ;;  %v7926_v49 = vld [vmem:[%s19820_s5 + $0x400] sm:$0xff] }
 0x466   :  { %7714 = vmatpush2.bf16.msra.mxu1 %v13422_v42  ;;  %11010 = vmatprep.subr.bf16.mxu0 %v13857_v55  ;;  %v13641_v55 = vcombine.high %v7958_v14, %v7962_v21 }
 0x467   :  { %7715 = vmatprep.subr.bf16.mxu1 %v13415_v56  ;;  %v8134_v56 = vld [vmem:[%s19820_s5 + $0xa80] sm:$0xff] }
 0x469   :  { %11011 = vmatpush2.bf16.msra.mxu0 %v13856_v62  ;;  %v8126_v62 = vld [vmem:[%s19820_s5 + $0xa40] sm:$0xff] }
 0x46a   :  { %7716 = vmatpush2.bf16.msra.mxu1 %v13414_v29  ;;  %11012 = vmatprep.subr.bf16.mxu0 %v13849_v0  ;;  %v8130_v29 = vld [vmem:[%s19820_s5 + $0xa60] sm:$0xff] }
 0x46b   :  { %10953 = vmatprep.subr.bf16.mxu1 %v13665_v1  ;;  %v7942_v0 = vld [vmem:[%s19820_s5 + $0x480] sm:$0xff]  ;;  %v13809_v2 = vcombine.high %v8126_v62, %v8130_v29 }
 0x46c   :  { %v7946_v1 = vld [vmem:[%s19820_s5 + $0x4a0] sm:$0xff] }
 0x46d   :  { %v7473_v48 = vpop.f32.mrf.mxu1  ;;  %7718 = vmatmul.mubr.bf16.vlgmr.msra.gmra.mxu1 %v16713_v51  ;;  %11013 = vmatpush2.bf16.msra.mxu0 %v13848_v5  ;;  %v8146_v51 = vld [vmem:[%s19820_s5 + $0xae0] sm:$0xff]  ;;  %v13625_v39 = vcombine.high %v7942_v0, %v7946_v1 }
 0x46e   :  { %v7474_v31 = vadd.f32 %v7473_v48, %v7433_v11  ;;  %10954 = vmatpush1.bf16.msra.mxu1 %v13664_v61  ;;  %10985 = vmatprep.mubr.bf16.mxu1 %v17996_v52  ;;  %v13825_v50 = vcombine.high %v8142_v43, %v8146_v51  ;;  %v13824_v58 = vcombine.low %v8142_v43, %v8146_v51  ;;  %v7934_v5 = vld [vmem:[%s19820_s5 + $0x440] sm:$0xff] }
 0x46f   :  { %v7475_v28 = vpop.f32.mrf.mxu1  ;;  %10955 = vmatprep.subr.bf16.mxu1 %v13657_v8  ;;  %11014 = vmatprep.subr.bf16.mxu0 %v13841_v41  ;;  %v13808_v61 = vcombine.low %v8126_v62, %v8130_v29  ;;  %v13624_v8 = vcombine.low %v7942_v0, %v7946_v1  ;;  %v13801_v41 = vcombine.high %v8118_v38, %v8122_v60  ;;  %v7930_v11 = vld [vmem:[%s19820_s5 + $0x420] sm:$0xff] }
 0x470   :  { %v7476_v26 = vadd.f32 %v7475_v28, %v7435_v4  ;;  %v18020_v22 = vadd.f32 %v17864_v6, %v7474_v31  ;;  %v8138_v6 = vld [vmem:[%s19820_s5 + $0xaa0] sm:$0xff]  ;;  %v13617_v20 = vcombine.high %v7934_v5, %v7938_v40  ;;  %v13616_v33 = vcombine.low %v7934_v5, %v7938_v40 }
 0x471   :  { %v7477_v54 = vpop.f32.mrf.mxu1  ;;  %11015 = vmatpush2.bf16.msra.mxu0 %v13840_v10  ;;  %v13817_v53 = vcombine.high %v8134_v56, %v8138_v6  ;;  %v13816_v36 = vcombine.low %v8134_v56, %v8138_v6  ;;  %v13539_v48 = vcombine.high %v17884_v24, %v17889_v25  ;;  %v7736_v10 = vmin.f32 %v17772_v3, 0.0  ;;  %v8046_v4 = vld [vmem:[%s19820_s5 + $0x7c0] sm:$0xff]  ;;  %v7831_v24 = vld [vmem:[%s19820_s5 + $0x108] sm:$0xff] }
 0x472   :  { %10956 = vmatpush1.bf16.msra.mxu1 %v13656_v47  ;;  %v18023_v32 = vadd.f32 %v17873_v46, %v7476_v26  ;;  %11016 = vmatprep.subr.bf16.mxu0 %v13833_v9  ;;  %v7954_v46 = vld [vmem:[%s19820_s5 + $0x4e0] sm:$0xff]  ;;  %v13609_v47 = vcombine.high %v7926_v49, %v7930_v11  ;;  %v13608_v9 = vcombine.low %v7926_v49, %v7930_v11  ;;  %v7835_v25 = vld [vmem:[%s19820_s5 + $0x128] sm:$0xff] }
 0x473   :  { %v7478_v42 = vpop.f32.mrf.mxu1  ;;  %10957 = vmatprep.subr.bf16.mxu1 %v13649_v18  ;;  %v13633_v23 = vcombine.high %v7950_v45, %v7954_v46  ;;  %v13632_v16 = vcombine.low %v7950_v45, %v7954_v46  ;;  %v8050_v31 = vld [vmem:[%s19820_s5 + $0x7e0] sm:$0xff]  ;;  %v7746_v18 = vmul.f32 1.442695, %v7736_v10 }
 0x474   :  { %v13729_v28 = vcombine.high %v8046_v4, %v8050_v31  ;;  %v8038_v51 = vld [vmem:[%s19820_s5 + $0x780] sm:$0xff]  ;;  %v13728_v21 = vcombine.low %v8046_v4, %v8050_v31 }
 0x475   :  { %11017 = vmatpush2.bf16.msra.mxu0 %v13832_v27  ;;  %v8042_v26 = vld [vmem:[%s19820_s5 + $0x7a0] sm:$0xff]  ;;  %14296 = vpow2.f32 %v7746_v18 }
 0x476   :  { %10958 = vmatpush1.bf16.msra.mxu1 %v13648_v30  ;;  %11018 = vmatprep.subr.bf16.mxu0 %v13825_v50  ;;  %v13721_v54 = vcombine.high %v8038_v51, %v8042_v26  ;;  %v8030_v30 = vld [vmem:[%s19820_s5 + $0x740] sm:$0xff] }
 0x477   :  { %10959 = vmatprep.subr.bf16.mxu1 %v13641_v55  ;;  %v8034_v50 = vld [vmem:[%s19820_s5 + $0x760] sm:$0xff]  ;;  %v13720_v55 = vcombine.low %v8038_v51, %v8042_v26 }
 0x478   :  { %v13713_v56 = vcombine.high %v8030_v30, %v8034_v50  ;;  %v8022_v6 = vld [vmem:[%s19820_s5 + $0x700] sm:$0xff]  ;;  %v13712_v46 = vcombine.low %v8030_v30, %v8034_v50 }
 0x479   :  { %11019 = vmatpush2.bf16.msra.mxu0 %v13824_v58  ;;  %v8026_v45 = vld [vmem:[%s19820_s5 + $0x720] sm:$0xff] }
 0x47a   :  { %10960 = vmatpush1.bf16.msra.mxu1 %v13640_v63  ;;  %11020 = vmatprep.subr.bf16.mxu0 %v13817_v53  ;;  %v13705_v58 = vcombine.high %v8022_v6, %v8026_v45  ;;  %v8014_v63 = vld [vmem:[%s19820_s5 + $0x6c0] sm:$0xff] }
 0x47b   :  { %10961 = vmatprep.subr.bf16.mxu1 %v13633_v23  ;;  %v8018_v53 = vld [vmem:[%s19820_s5 + $0x6e0] sm:$0xff]  ;;  %v13704_v23 = vcombine.low %v8022_v6, %v8026_v45 }
 0x47c   :  { %v13697_v62 = vcombine.high %v8014_v63, %v8018_v53  ;;  %v8006_v29 = vld [vmem:[%s19820_s5 + $0x680] sm:$0xff] }
 0x47d   :  { %11021 = vmatpush2.bf16.msra.mxu0 %v13816_v36  ;;  %v8010_v0 = vld [vmem:[%s19820_s5 + $0x6a0] sm:$0xff]  ;;  %v13696_v36 = vcombine.low %v8014_v63, %v8018_v53 }
 0x47e   :  { %10962 = vmatpush1.bf16.msra.mxu1 %v13632_v16  ;;  %11022 = vmatprep.subr.bf16.mxu0 %v13809_v2  ;;  %v13689_v16 = vcombine.high %v8006_v29, %v8010_v0  ;;  %v8002_v38 = vld [vmem:[%s19820_s5 + $0x660] sm:$0xff]  ;;  %v13688_v60 = vcombine.low %v8006_v29, %v8010_v0 }
 0x47f   :  { %10963 = vmatprep.subr.bf16.mxu1 %v13625_v39  ;;  %v7998_v39 = vld [vmem:[%s19820_s5 + $0x640] sm:$0xff] }
 0x480   :  { %v13681_v5 = vcombine.high %v7998_v39, %v8002_v38  ;;  %v8238_v11 = vld [vmem:[%s19820_s5 + $0xdc0] sm:$0xff] }
 0x481   :  { %11023 = vmatpush2.bf16.msra.mxu0 %v13808_v61  ;;  %v7990_v61 = vld [vmem:[%s19820_s5 + $0x600] sm:$0xff] }
 0x482   :  { %10964 = vmatpush1.bf16.msra.mxu1 %v13624_v8  ;;  %11024 = vmatprep.subr.bf16.mxu0 %v13801_v41  ;;  %v14297_v1 = vpop.eup %14296  ;;  %v7994_v8 = vld [vmem:[%s19820_s5 + $0x620] sm:$0xff]  ;;  %v13680_v41 = vcombine.low %v7998_v39, %v8002_v38 }
 0x483   :  { %10965 = vmatprep.subr.bf16.mxu1 %v13617_v20  ;;  %v13474_v2 = vadd.f32 -1.0, %v14297_v1  ;;  %v13673_v20 = vcombine.high %v7990_v61, %v7994_v8  ;;  %v8230_v10 = vld [vmem:[%s19820_s5 + $0xd80] sm:$0xff] }
 0x484   :  { %v8226_v18 = vld [vmem:[%s19820_s5 + $0xd60] sm:$0xff] }
 0x485   :  { %11025 = vmatpush2.bf16.msra.mxu0 %v13800_v7  ;;  %v7768_v40 = vmul.f32 1.6732632, %v13474_v2  ;;  %v8242_v7 = vld [vmem:[%s19820_s5 + $0xde0] sm:$0xff] }
 0x486   :  { %10966 = vmatpush1.bf16.msra.mxu1 %v13616_v33  ;;  %11076 = vmatprep.subr.bf16.mxu0 %v13539_v48  ;;  %v13672_v33 = vcombine.low %v7990_v61, %v7994_v8  ;;  %v13920_v4 = vcombine.low %v8238_v11, %v8242_v7  ;;  %v8210_v53 = vld [vmem:[%s19820_s5 + $0xce0] sm:$0xff] }
 0x487   :  { %10967 = vmatprep.subr.bf16.mxu1 %v13609_v47  ;;  %v7776_v49 = vsel %vm7728_vm11, %v17772_v3, %v7768_v40  ;;  %v13921_v47 = vcombine.high %v8238_v11, %v8242_v7  ;;  %v8234_v3 = vld [vmem:[%s19820_s5 + $0xda0] sm:$0xff] }
 0x488   :  { %v18076_v43 = vpop.f32.mrf.mxu0  ;;  %v7784_v48 = vmul.f32 1.050701, %v7776_v49  ;;  %v8198_v29 = vld [vmem:[%s19820_s5 + $0xc80] sm:$0xff] }
 0x489   :  { %v8202_v0 = vld [vmem:[%s19820_s5 + $0xca0] sm:$0xff] }
 0x48a   :  { %10968 = vmatpush1.bf16.msra.mxu1 %v13608_v9  ;;  %v18084_v14 = vpop.f32.mrf.mxu0  ;;  %v18136_v31 = vpack.c.bf16 %v7784_v48, %v7784_v48  ;;  %v13913_v9 = vcombine.high %v8230_v10, %v8234_v3  ;;  %v8194_v2 = vld [vmem:[%s19820_s5 + $0xc60] sm:$0xff]  ;;  %v13880_v39 = vcombine.low %v8198_v29, %v8202_v0 }
 0x48b   :  { %10969 = vmatprep.subr.bf16.mxu1 %v13729_v28  ;;  %v8222_v28 = vld [vmem:[%s19820_s5 + $0xd40] sm:$0xff] }
 0x48c   :  { %v7600_v27 = vpop.f32.mrf.mxu0  ;;  %v8302_v7 = vld [vmem:[%s19820_s5 + $0xfc0] sm:$0xff] }
 0x48d   :  { %v13905_v27 = vcombine.high %v8222_v28, %v8226_v18 }
 0x48e   :  { %10970 = vmatpush2.bf16.msra.mxu1 %v13728_v21  ;;  %v7601_v42 = vpop.f32.mrf.mxu0  ;;  %v13912_v21 = vcombine.low %v8230_v10, %v8234_v3 }
 0x48f   :  { %10971 = vmatprep.subr.bf16.mxu1 %v13721_v54  ;;  %v8214_v42 = vld [vmem:[%s19820_s5 + $0xd00] sm:$0xff] }
 0x492   :  { %10972 = vmatpush2.bf16.msra.mxu1 %v13720_v55  ;;  %v8218_v55 = vld [vmem:[%s19820_s5 + $0xd20] sm:$0xff] }
 0x493   :  { %10973 = vmatprep.subr.bf16.mxu1 %v13713_v56 }
 0x496   :  { %10974 = vmatpush2.bf16.msra.mxu1 %v13712_v46 }
 0x497   :  { %10975 = vmatprep.subr.bf16.mxu1 %v13705_v58  ;;  %v13897_v58 = vcombine.high %v8214_v42, %v8218_v55 }
 0x49a   :  { %10976 = vmatpush2.bf16.msra.mxu1 %v13704_v23  ;;  %v13896_v23 = vcombine.low %v8214_v42, %v8218_v55  ;;  %v18204_v42 = vld [vmem:[%s19820_s5 + $0x5c8] sm:$0xff] }
 0x49b   :  { %10977 = vmatprep.subr.bf16.mxu1 %v13697_v62  ;;  %v18209_v55 = vld [vmem:[%s19820_s5 + $0x5e8] sm:$0xff] }
 0x49e   :  { %10978 = vmatpush2.bf16.msra.mxu1 %v13696_v36  ;;  %v13881_v36 = vcombine.high %v8198_v29, %v8202_v0 }
 0x49f   :  { %10979 = vmatprep.subr.bf16.mxu1 %v13689_v16  ;;  %v8190_v16 = vld [vmem:[%s19820_s5 + $0xc40] sm:$0xff] }
 0x4a0   :  { %v13873_v38 = vcombine.high %v8190_v16, %v8194_v2  ;;  %v13872_v8 = vcombine.low %v8190_v16, %v8194_v2  ;;  %v8282_v16 = vld [vmem:[%s19820_s5 + $0xf20] sm:$0xff] }
 0x4a2   :  { %10980 = vmatpush2.bf16.msra.mxu1 %v13688_v60  ;;  %v8182_v60 = vld [vmem:[%s19820_s5 + $0xc00] sm:$0xff] }
 0x4a3   :  { %10981 = vmatprep.subr.bf16.mxu1 %v13681_v5  ;;  %v8186_v5 = vld [vmem:[%s19820_s5 + $0xc20] sm:$0xff] }
 0x4a4   :  { %v13864_v10 = vcombine.low %v8182_v60, %v8186_v5 }
 0x4a6   :  { %10982 = vmatpush2.bf16.msra.mxu1 %v13680_v41 }
 0x4a7   :  { %10983 = vmatprep.subr.bf16.mxu1 %v13673_v20  ;;  %v13865_v20 = vcombine.high %v8182_v60, %v8186_v5  ;;  %v8270_v60 = vld [vmem:[%s19820_s5 + $0xec0] sm:$0xff] }
 0x4a8   :  { %v8274_v5 = vld [vmem:[%s19820_s5 + $0xee0] sm:$0xff] }
 0x4aa   :  { %10984 = vmatpush2.bf16.msra.mxu1 %v13672_v33  ;;  %v8306_v33 = vld [vmem:[%s19820_s5 + $0xfe0] sm:$0xff] }
 0x4ab   :  { %11035 = vmatprep.subr.bf16.mxu1 %v13921_v47  ;;  %v13985_v3 = vcombine.high %v8302_v7, %v8306_v33 }
 0x4ad   :  { %v7555_v51 = vpop.f32.mrf.mxu1  ;;  %10986 = vmatmul.mubr.bf16.vlgmr.msra.gmra.mxu1 %v18136_v31 }
 0x4ae   :  { %v7556_v26 = vadd.f32 %v7555_v51, %v18020_v22  ;;  %11036 = vmatpush1.bf16.msra.mxu1 %v13920_v4  ;;  %v13904_v22 = vcombine.low %v8222_v28, %v8226_v18  ;;  %v7847_v18 = vld [vmem:[%s19820_s5 + $0x188] sm:$0xff] }
 0x4af   :  { %v7557_v54 = vpop.f32.mrf.mxu1  ;;  %11037 = vmatprep.subr.bf16.mxu1 %v13913_v9 }
 0x4b0   :  { %v7738_v30 = vmin.f32 %v7556_v26, 0.0  ;;  %v7558_v50 = vadd.f32 %v7557_v54, %v18023_v32  ;;  %v8206_v32 = vld [vmem:[%s19820_s5 + $0xcc0] sm:$0xff]  ;;  %vm7730_vm12 = vcmp.gt.f32.partialorder %v7556_v26, 0.0 }
 0x4b1   :  { %v7559_v56 = vpop.f32.mrf.mxu1  ;;  %v13889_v62 = vcombine.high %v8206_v32, %v8210_v53  ;;  %v13888_v1 = vcombine.low %v8206_v32, %v8210_v53  ;;  %v8298_v54 = vld [vmem:[%s19820_s5 + $0xfa0] sm:$0xff]  ;;  %v7843_v32 = vld [vmem:[%s19820_s5 + $0x168] sm:$0xff]  ;;  %v13666_v53 = vcombine.low %v18204_v42, %v18209_v55 }
 0x4b2   :  { %v7750_v6 = vmul.f32 1.442695, %v7738_v30  ;;  %v7739_v45 = vmin.f32 %v7558_v50, 0.0  ;;  %11038 = vmatpush1.bf16.msra.mxu1 %v13912_v21  ;;  %vm7731_vm13 = vcmp.gt.f32.partialorder %v7558_v50, 0.0  ;;  %v7851_v21 = vld [vmem:[%s19820_s5 + $0x1a8] sm:$0xff]  ;;  %v13984_v30 = vcombine.low %v8302_v7, %v8306_v33  ;;  %v8266_v7 = vld [vmem:[%s19820_s5 + $0xea0] sm:$0xff] }
 0x4b3   :  { %v7560_v46 = vpop.f32.mrf.mxu1  ;;  %11039 = vmatprep.subr.bf16.mxu1 %v13905_v27  ;;  %v13530_v29 = vcombine.low %v7847_v18, %v7851_v21  ;;  %v7815_v33 = vld [vmem:[%s19820_s5 + $0x88] sm:$0xff] }
 0x4b4   :  { %14298 = vpow2.f32 %v7750_v6  ;;  %v7752_v63 = vmul.f32 1.442695, %v7739_v45  ;;  %v13531_v45 = vcombine.high %v7847_v18, %v7851_v21  ;;  %v8286_v46 = vld [vmem:[%s19820_s5 + $0xf40] sm:$0xff]  ;;  %v7811_v21 = vld [vmem:[%s19820_s5 + $0x68] sm:$0xff] }
 0x4b5   :  { %v8258_v18 = vld [vmem:[%s19820_s5 + $0xe60] sm:$0xff] }
 0x4b6   :  { %14300 = vpow2.f32 %v7752_v63  ;;  %11040 = vmatpush1.bf16.msra.mxu1 %v13904_v22  ;;  %v7839_v63 = vld [vmem:[%s19820_s5 + $0x148] sm:$0xff] }
 0x4b7   :  { %11041 = vmatprep.subr.bf16.mxu1 %v13897_v58  ;;  %v8290_v58 = vld [vmem:[%s19820_s5 + $0xf60] sm:$0xff]  ;;  %v13522_v2 = vcombine.low %v7839_v63, %v7843_v32 }
 0x4b8   :  { %v13969_v0 = vcombine.high %v8286_v46, %v8290_v58 }
 0x4ba   :  { %11042 = vmatpush1.bf16.msra.mxu1 %v13896_v23 }
 0x4bb   :  { %11043 = vmatprep.subr.bf16.mxu1 %v13889_v62 }
 0x4be   :  { %11044 = vmatpush1.bf16.msra.mxu1 %v13888_v1  ;;  %v13523_v1 = vcombine.high %v7839_v63, %v7843_v32 }
 0x4bf   :  { %11045 = vmatprep.subr.bf16.mxu1 %v13881_v36  ;;  %v8278_v36 = vld [vmem:[%s19820_s5 + $0xf00] sm:$0xff] }
 0x4c1   :  { %v14299_v40 = vpop.eup %14298 }
 0x4c2   :  { %v13476_v61 = vadd.f32 -1.0, %v14299_v40  ;;  %11046 = vmatpush1.bf16.msra.mxu1 %v13880_v39  ;;  %v13961_v39 = vcombine.high %v8278_v36, %v8282_v16  ;;  %v7823_v40 = vld [vmem:[%s19820_s5 + $0xc8] sm:$0xff] }
 0x4c3   :  { %v14301_v41 = vpop.eup %14300  ;;  %11047 = vmatprep.subr.bf16.mxu1 %v13873_v38  ;;  %v13515_v38 = vcombine.high %v7831_v24, %v7835_v25 }
 0x4c4   :  { %v7770_v49 = vmul.f32 1.6732632, %v13476_v61  ;;  %v13477_v11 = vadd.f32 -1.0, %v14301_v41  ;;  %v7827_v61 = vld [vmem:[%s19820_s5 + $0xe8] sm:$0xff]  ;;  %v13514_v41 = vcombine.low %v7831_v24, %v7835_v25  ;;  %v14330_v24 = vld [vmem:[%s19819_s4] sm:$0xff] }
 0x4c5   :  { %v4497_v25 = vrot.slane %v14330_v24, %v16636_v12 }
 0x4c6   :  { %v7778_v48 = vsel %vm7730_vm12, %v7556_v26, %v7770_v49  ;;  %v7771_v47 = vmul.f32 1.6732632, %v13477_v11  ;;  %11048 = vmatpush1.bf16.msra.mxu1 %v13872_v8  ;;  %v8294_v26 = vld [vmem:[%s19820_s5 + $0xf80] sm:$0xff]  ;;  %v13960_v8 = vcombine.low %v8278_v36, %v8282_v16  ;;  %v13507_v49 = vcombine.high %v7823_v40, %v7827_v61 }
 0x4c7   :  { %11049 = vmatprep.subr.bf16.mxu1 %v13865_v20  ;;  %v7786_v4 = vmul.f32 1.050701, %v7778_v48  ;;  %v13977_v22 = vcombine.high %v8294_v26, %v8298_v54  ;;  %v13976_v62 = vcombine.low %v8294_v26, %v8298_v54  ;;  %v13953_v20 = vcombine.high %v8270_v60, %v8274_v5  ;;  %v8262_v11 = vld [vmem:[%s19820_s5 + $0xe80] sm:$0xff]  ;;  %v7819_v48 = vld [vmem:[%s19820_s5 + $0xa8] sm:$0xff] }
 0x4c8   :  { %v7779_v9 = vsel %vm7731_vm13, %v7558_v50, %v7771_v47  ;;  %v18183_v28 = vpop.f32.mrf.mxu0  ;;  %v13952_v47 = vcombine.low %v8270_v60, %v8274_v5  ;;  %v13944_v26 = vcombine.low %v8262_v11, %v8266_v7  ;;  %v13498_v54 = vcombine.low %v7815_v33, %v7819_v48 }
 0x4c9   :  { %v7787_v51 = vmul.f32 1.050701, %v7779_v9  ;;  %v18211_v56 = vpack.c.bf16 %v7786_v4, %v7786_v4  ;;  %v13499_v4 = vcombine.high %v7815_v33, %v7819_v48  ;;  %v8254_v9 = vld [vmem:[%s19820_s5 + $0xe40] sm:$0xff]  ;;  %v13667_v16 = vcombine.high %v18204_v42, %v18209_v55  ;;  %v7963_v42 = vld [vmem:[%s19820_s5 + $0x528] sm:$0xff]  ;;  %v7832_v55 = vld [vmem:[%s19820_s5 + $0x110] sm:$0xff] }
 0x4ca   :  { %v18197_v27 = vpop.f32.mrf.mxu0  ;;  %11050 = vmatpush1.bf16.msra.mxu1 %v13864_v10  ;;  %v13506_v10 = vcombine.low %v7823_v40, %v7827_v61  ;;  %v13936_v63 = vcombine.low %v8254_v9, %v8258_v18  ;;  %v7597_v5 = vadd.f32 %v18076_v43, %v4497_v25  ;;  %v8107_v25 = vld [vmem:[%s19820_s5 + $0x9a8] sm:$0xff] }
 0x4cb   :  { %v18199_v50 = vpack.c.bf16 %v7787_v51, %v7787_v51  ;;  %11051 = vmatprep.subr.bf16.mxu1 %v13985_v3  ;;  %v13945_v3 = vcombine.high %v8262_v11, %v8266_v7  ;;  %v7807_v51 = vld [vmem:[%s19820_s5 + $0x48] sm:$0xff] }
 0x4cc   :  { %v7682_v6 = vpop.f32.mrf.mxu0  ;;  %v13490_v32 = vcombine.low %v7807_v51, %v7811_v21 }
 0x4cd   :  { %11026 = vmatprep.mubr.bf16.mxu0 %v18199_v50  ;;  %v13491_v6 = vcombine.high %v7807_v51, %v7811_v21  ;;  %v7891_v51 = vld [vmem:[%s19820_s5 + $0x2e8] sm:$0xff] }
 0x4ce   :  { %11027 = vmatmul.mubr.bf16.vlgmr.msra.gmra.mxu0 %v18211_v56  ;;  %v7683_v23 = vpop.f32.mrf.mxu0  ;;  %11052 = vmatpush2.bf16.msra.mxu1 %v13984_v30  ;;  %v13937_v30 = vcombine.high %v8254_v9, %v8258_v18 }
 0x4cf   :  { %11077 = vmatpush1.bf16.msra.mxu0 %v13538_v37  ;;  %11108 = vmatprep.mubr.bf16.mxu0 %v17641_v57  ;;  %v13968_v37 = vcombine.low %v8286_v46, %v8290_v58  ;;  %v7799_v46 = vld [vmem:[%s19820_s5 + $0x8] sm:$0xff] }
 0x4d0   :  { %11078 = vmatprep.subr.bf16.mxu0 %v13531_v45  ;;  %11053 = vmatprep.subr.bf16.mxu1 %v13977_v22  ;;  %v8246_v45 = vld [vmem:[%s19820_s5 + $0xe00] sm:$0xff]  ;;  %v7803_v58 = vld [vmem:[%s19820_s5 + $0x28] sm:$0xff] }
 0x4d1   :  { %v8250_v22 = vld [vmem:[%s19820_s5 + $0xe20] sm:$0xff]  ;;  %v13482_v36 = vcombine.low %v7799_v46, %v7803_v58 }
 0x4d2   :  { %11054 = vmatpush2.bf16.msra.mxu1 %v13976_v62  ;;  %v13929_v23 = vcombine.high %v8246_v45, %v8250_v22  ;;  %v13483_v62 = vcombine.high %v7799_v46, %v7803_v58 }
 0x4d3   :  { %11079 = vmatpush1.bf16.msra.mxu0 %v13530_v29  ;;  %11055 = vmatprep.subr.bf16.mxu1 %v13969_v0  ;;  %v7919_v29 = vld [vmem:[%s19820_s5 + $0x3c8] sm:$0xff] }
 0x4d4   :  { %11080 = vmatprep.subr.bf16.mxu0 %v13523_v1  ;;  %v7923_v0 = vld [vmem:[%s19820_s5 + $0x3e8] sm:$0xff]  ;;  %v13928_v1 = vcombine.low %v8246_v45, %v8250_v22 }
 0x4d5   :  { %v13602_v60 = vcombine.low %v7919_v29, %v7923_v0  ;;  %v7871_v45 = vld [vmem:[%s19820_s5 + $0x248] sm:$0xff] }
 0x4d6   :  { %11056 = vmatpush2.bf16.msra.mxu1 %v13968_v37  ;;  %v13603_v37 = vcombine.high %v7919_v29, %v7923_v0  ;;  %v7875_v22 = vld [vmem:[%s19820_s5 + $0x268] sm:$0xff] }
 0x4d7   :  { %11081 = vmatpush1.bf16.msra.mxu0 %v13522_v2  ;;  %11057 = vmatprep.subr.bf16.mxu1 %v13961_v39  ;;  %v7911_v2 = vld [vmem:[%s19820_s5 + $0x388] sm:$0xff]  ;;  %v13555_v58 = vcombine.high %v7871_v45, %v7875_v22 }
 0x4d8   :  { %11082 = vmatprep.subr.bf16.mxu0 %v13515_v38  ;;  %v7915_v39 = vld [vmem:[%s19820_s5 + $0x3a8] sm:$0xff]  ;;  %v4501_v38 = vrot.slane %v14330_v24, %v16639_v15 }
 0x4d9   :  { %v13595_v40 = vcombine.high %v7911_v2, %v7915_v39  ;;  %v13594_v7 = vcombine.low %v7911_v2, %v7915_v39  ;;  %v8111_v29 = vld [vmem:[%s19820_s5 + $0x9c8] sm:$0xff] }
 0x4da   :  { %11058 = vmatpush2.bf16.msra.mxu1 %v13960_v8  ;;  %v7903_v8 = vld [vmem:[%s19820_s5 + $0x348] sm:$0xff] }
 0x4db   :  { %11083 = vmatpush1.bf16.msra.mxu0 %v13514_v41  ;;  %11059 = vmatprep.subr.bf16.mxu1 %v13953_v20  ;;  %v7907_v41 = vld [vmem:[%s19820_s5 + $0x368] sm:$0xff]  ;;  %v7599_v20 = vadd.f32 %v18084_v14, %v4501_v38 }
 0x4dc   :  { %11084 = vmatprep.subr.bf16.mxu0 %v13507_v49  ;;  %v13587_v43 = vcombine.high %v7903_v8, %v7907_v41  ;;  %v13586_v9 = vcombine.low %v7903_v8, %v7907_v41  ;;  %v8115_v0 = vld [vmem:[%s19820_s5 + $0x9e8] sm:$0xff] }
 0x4dd   :  { %v8103_v24 = vld [vmem:[%s19820_s5 + $0x988] sm:$0xff]  ;;  %v13794_v2 = vcombine.low %v8111_v29, %v8115_v0 }
 0x4de   :  { %11060 = vmatpush2.bf16.msra.mxu1 %v13952_v47  ;;  %v13787_v38 = vcombine.high %v8103_v24, %v8107_v25  ;;  %v8087_v41 = vld [vmem:[%s19820_s5 + $0x908] sm:$0xff] }
 0x4df   :  { %11085 = vmatpush1.bf16.msra.mxu0 %v13506_v10  ;;  %11061 = vmatprep.subr.bf16.mxu1 %v13945_v3  ;;  %v7895_v10 = vld [vmem:[%s19820_s5 + $0x308] sm:$0xff] }
 0x4e0   :  { %11086 = vmatprep.subr.bf16.mxu0 %v13499_v4  ;;  %v7899_v3 = vld [vmem:[%s19820_s5 + $0x328] sm:$0xff] }
 0x4e1   :  { %v13579_v18 = vcombine.high %v7895_v10, %v7899_v3  ;;  %v13578_v21 = vcombine.low %v7895_v10, %v7899_v3  ;;  %v8071_v10 = vld [vmem:[%s19820_s5 + $0x888] sm:$0xff] }
 0x4e2   :  { %11062 = vmatpush2.bf16.msra.mxu1 %v13944_v26  ;;  %v8075_v3 = vld [vmem:[%s19820_s5 + $0x8a8] sm:$0xff] }
 0x4e3   :  { %11087 = vmatpush1.bf16.msra.mxu0 %v13498_v54  ;;  %11063 = vmatprep.subr.bf16.mxu1 %v13937_v30  ;;  %v7883_v54 = vld [vmem:[%s19820_s5 + $0x2a8] sm:$0xff] }
 0x4e4   :  { %11088 = vmatprep.subr.bf16.mxu0 %v13491_v6 }
 0x4e6   :  { %11064 = vmatpush2.bf16.msra.mxu1 %v13936_v63  ;;  %v7863_v63 = vld [vmem:[%s19820_s5 + $0x208] sm:$0xff] }
 0x4e7   :  { %11089 = vmatpush1.bf16.msra.mxu0 %v13490_v32  ;;  %11065 = vmatprep.subr.bf16.mxu1 %v13929_v23  ;;  %v7867_v32 = vld [vmem:[%s19820_s5 + $0x228] sm:$0xff]  ;;  %v13554_v23 = vcombine.low %v7871_v45, %v7875_v22 }
 0x4e8   :  { %11090 = vmatprep.subr.bf16.mxu0 %v13483_v62  ;;  %v13547_v62 = vcombine.high %v7863_v63, %v7867_v32  ;;  %v8179_v45 = vld [vmem:[%s19820_s5 + $0xbe8] sm:$0xff] }
 0x4ea   :  { %11066 = vmatpush2.bf16.msra.mxu1 %v13928_v1  ;;  %v13546_v1 = vcombine.low %v7863_v63, %v7867_v32  ;;  %v8171_v63 = vld [vmem:[%s19820_s5 + $0xba8] sm:$0xff] }
 0x4eb   :  { %11091 = vmatpush1.bf16.msra.mxu0 %v13482_v36  ;;  %11117 = vmatprep.subr.bf16.mxu1 %v13667_v16  ;;  %v13795_v16 = vcombine.high %v8111_v29, %v8115_v0  ;;  %v8159_v29 = vld [vmem:[%s19820_s5 + $0xb48] sm:$0xff] }
 0x4ec   :  { %11092 = vmatprep.subr.bf16.mxu0 %v13603_v37  ;;  %v8163_v0 = vld [vmem:[%s19820_s5 + $0xb68] sm:$0xff] }
 0x4ed   :  { %v7637_v61 = vpop.f32.mrf.mxu1 }
 0x4ee   :  { %v7638_v49 = vadd.f32 %v7637_v61, %v7597_v5  ;;  %v8099_v5 = vld [vmem:[%s19820_s5 + $0x968] sm:$0xff]  ;;  %v13786_v61 = vcombine.low %v8103_v24, %v8107_v25 }
 0x4ef   :  { %11093 = vmatpush2.bf16.msra.mxu0 %v13602_v60  ;;  %v7639_v11 = vpop.f32.mrf.mxu1  ;;  %v8095_v60 = vld [vmem:[%s19820_s5 + $0x948] sm:$0xff] }
 0x4f0   :  { %v7640_v33 = vadd.f32 %v7639_v11, %v7599_v20  ;;  %11094 = vmatprep.subr.bf16.mxu0 %v13595_v40  ;;  %v18321_v48 = vadd.f32 %v18183_v28, %v7638_v49  ;;  %v7887_v28 = vld [vmem:[%s19820_s5 + $0x2c8] sm:$0xff]  ;;  %v13779_v8 = vcombine.high %v8095_v60, %v8099_v5  ;;  %v13778_v49 = vcombine.low %v8095_v60, %v8099_v5 }
 0x4f1   :  { %v7641_v47 = vpop.f32.mrf.mxu1  ;;  %v13571_v26 = vcombine.high %v7887_v28, %v7891_v51  ;;  %v13570_v30 = vcombine.low %v7887_v28, %v7891_v51  ;;  %v8091_v20 = vld [vmem:[%s19820_s5 + $0x928] sm:$0xff]  ;;  %v13754_v51 = vcombine.low %v8071_v10, %v8075_v3 }
 0x4f2   :  { %v18330_v14 = vadd.f32 %v18197_v27, %v7640_v33  ;;  %v7879_v27 = vld [vmem:[%s19820_s5 + $0x288] sm:$0xff]  ;;  %v13771_v11 = vcombine.high %v8087_v41, %v8091_v20 }
 0x4f3   :  { %11095 = vmatpush2.bf16.msra.mxu0 %v13594_v7  ;;  %v7642_v4 = vpop.f32.mrf.mxu1  ;;  %v13563_v6 = vcombine.high %v7879_v27, %v7883_v54  ;;  %v13562_v46 = vcombine.low %v7879_v27, %v7883_v54  ;;  %v8079_v7 = vld [vmem:[%s19820_s5 + $0x8c8] sm:$0xff] }
 0x4f4   :  { %11096 = vmatprep.subr.bf16.mxu0 %v13587_v43  ;;  %v8083_v33 = vld [vmem:[%s19820_s5 + $0x8e8] sm:$0xff]  ;;  %v13770_v43 = vcombine.low %v8087_v41, %v8091_v20 }
 0x4f5   :  { %v13763_v47 = vcombine.high %v8079_v7, %v8083_v33  ;;  %v13762_v4 = vcombine.low %v8079_v7, %v8083_v33  ;;  %v8067_v28 = vld [vmem:[%s19820_s5 + $0x868] sm:$0xff] }
 0x4f6   :  { %v8059_v27 = vld [vmem:[%s19820_s5 + $0x828] sm:$0xff] }
 0x4f7   :  { %11097 = vmatpush2.bf16.msra.mxu0 %v13586_v9  ;;  %v13755_v9 = vcombine.high %v8071_v10, %v8075_v3  ;;  %v8151_v60 = vld [vmem:[%s19820_s5 + $0xb08] sm:$0xff] }
 0x4f8   :  { %11098 = vmatprep.subr.bf16.mxu0 %v13579_v18  ;;  %v8063_v18 = vld [vmem:[%s19820_s5 + $0x848] sm:$0xff] }
 0x4f9   :  { %v13746_v54 = vcombine.low %v8063_v18, %v8067_v28  ;;  %v8155_v5 = vld [vmem:[%s19820_s5 + $0xb28] sm:$0xff] }
 0x4fa   :  { %v8143_v20 = vld [vmem:[%s19820_s5 + $0xac8] sm:$0xff] }
 0x4fb   :  { %11099 = vmatpush2.bf16.msra.mxu0 %v13578_v21  ;;  %v13747_v21 = vcombine.high %v8063_v18, %v8067_v28  ;;  %v8135_v33 = vld [vmem:[%s19820_s5 + $0xa88] sm:$0xff] }
 0x4fc   :  { %11100 = vmatprep.subr.bf16.mxu0 %v13571_v26  ;;  %v8055_v26 = vld [vmem:[%s19820_s5 + $0x808] sm:$0xff] }
 0x4fd   :  { %v13738_v22 = vcombine.low %v8055_v26, %v8059_v27  ;;  %v8127_v3 = vld [vmem:[%s19820_s5 + $0xa48] sm:$0xff] }
 0x4ff   :  { %11101 = vmatpush2.bf16.msra.mxu0 %v13570_v30  ;;  %v13739_v30 = vcombine.high %v8055_v26, %v8059_v27 }
 0x500   :  { %11102 = vmatprep.subr.bf16.mxu0 %v13563_v6  ;;  %v8175_v6 = vld [vmem:[%s19820_s5 + $0xbc8] sm:$0xff] }
 0x501   :  { %v13858_v32 = vcombine.low %v8175_v6, %v8179_v45 }
 0x503   :  { %11103 = vmatpush2.bf16.msra.mxu0 %v13562_v46  ;;  %v13859_v46 = vcombine.high %v8175_v6, %v8179_v45 }
 0x504   :  { %11104 = vmatprep.subr.bf16.mxu0 %v13555_v58  ;;  %v8167_v58 = vld [vmem:[%s19820_s5 + $0xb88] sm:$0xff] }
 0x505   :  { %v13850_v24 = vcombine.low %v8167_v58, %v8171_v63 }
 0x507   :  { %11105 = vmatpush2.bf16.msra.mxu0 %v13554_v23  ;;  %v13851_v23 = vcombine.high %v8167_v58, %v8171_v63 }
 0x508   :  { %v18362_v36 = vpop.f32.mrf.mxu0  ;;  %11106 = vmatprep.subr.bf16.mxu0 %v13547_v62 }
 0x50a   :  { %v18370_v37 = vpop.f32.mrf.mxu0 }
 0x50b   :  { %11107 = vmatpush2.bf16.msra.mxu0 %v13546_v1 }
 0x50c   :  { %v10950_v39 = vpop.f32.mrf.mxu0  ;;  %11158 = vmatprep.subr.bf16.mxu0 %v13795_v16 }
 0x50d   :  { %v13843_v39 = vcombine.high %v8159_v29, %v8163_v0 }
 0x50e   :  { %11109 = vmatmul.mubr.bf16.vlgmr.msra.gmra.mxu0 %v17856_v59  ;;  %v10951_v40 = vpop.f32.mrf.mxu0 }
 0x50f   :  { %11159 = vmatpush1.bf16.msra.mxu0 %v13794_v2  ;;  %11190 = vmatprep.mubr.bf16.mxu0 %v18199_v50 }
 0x510   :  { %11160 = vmatprep.subr.bf16.mxu0 %v13787_v38 }
 0x513   :  { %11161 = vmatpush1.bf16.msra.mxu0 %v13786_v61 }
 0x514   :  { %11162 = vmatprep.subr.bf16.mxu0 %v13779_v8  ;;  %v13842_v8 = vcombine.low %v8159_v29, %v8163_v0 }
 0x517   :  { %11163 = vmatpush1.bf16.msra.mxu0 %v13778_v49  ;;  %v8147_v49 = vld [vmem:[%s19820_s5 + $0xae8] sm:$0xff] }
 0x518   :  { %11164 = vmatprep.subr.bf16.mxu0 %v13771_v11  ;;  %v13834_v11 = vcombine.low %v8151_v60, %v8155_v5  ;;  %v13827_v7 = vcombine.high %v8143_v20, %v8147_v49 }
 0x51b   :  { %11165 = vmatpush1.bf16.msra.mxu0 %v13770_v43  ;;  %v8139_v43 = vld [vmem:[%s19820_s5 + $0xaa8] sm:$0xff] }
 0x51c   :  { %11166 = vmatprep.subr.bf16.mxu0 %v13763_v47  ;;  %v13826_v47 = vcombine.low %v8143_v20, %v8147_v49  ;;  %v13819_v10 = vcombine.high %v8135_v33, %v8139_v43 }
 0x51f   :  { %11167 = vmatpush1.bf16.msra.mxu0 %v13762_v4  ;;  %v8131_v4 = vld [vmem:[%s19820_s5 + $0xa68] sm:$0xff] }
 0x520   :  { %11168 = vmatprep.subr.bf16.mxu0 %v13755_v9  ;;  %v13818_v9 = vcombine.low %v8135_v33, %v8139_v43  ;;  %v13811_v18 = vcombine.high %v8127_v3, %v8131_v4 }
 0x523   :  { %11169 = vmatpush1.bf16.msra.mxu0 %v13754_v51  ;;  %v8119_v51 = vld [vmem:[%s19820_s5 + $0xa08] sm:$0xff] }
 0x524   :  { %11170 = vmatprep.subr.bf16.mxu0 %v13747_v21  ;;  %v8123_v21 = vld [vmem:[%s19820_s5 + $0xa28] sm:$0xff] }
 0x525   :  { %v13803_v45 = vcombine.high %v8119_v51, %v8123_v21 }
 0x527   :  { %11171 = vmatpush1.bf16.msra.mxu0 %v13746_v54  ;;  %v13810_v54 = vcombine.low %v8127_v3, %v8131_v4  ;;  %v7955_v3 = vld [vmem:[%s19820_s5 + $0x4e8] sm:$0xff]  ;;  %v7824_v4 = vld [vmem:[%s19820_s5 + $0xd0] sm:$0xff] }
 0x528   :  { %11172 = vmatprep.subr.bf16.mxu0 %v13739_v30 }
 0x52b   :  { %11173 = vmatpush1.bf16.msra.mxu0 %v13738_v22  ;;  %v7856_v22 = vld [vmem:[%s19820_s5 + $0x1d0] sm:$0xff] }
 0x52c   :  { %11174 = vmatprep.subr.bf16.mxu0 %v13859_v46  ;;  %v7860_v46 = vld [vmem:[%s19820_s5 + $0x1f0] sm:$0xff] }
 0x52d   :  { %v7719_v62 = vpop.f32.mrf.mxu1  ;;  %v13541_v29 = vcombine.high %v7856_v22, %v7860_v46 }
 0x52e   :  { %v7720_v1 = vadd.f32 %v7719_v62, %v18321_v48 }
 0x52f   :  { %11175 = vmatpush2.bf16.msra.mxu0 %v13858_v32  ;;  %v7721_v16 = vpop.f32.mrf.mxu1  ;;  %v13802_v32 = vcombine.low %v8119_v51, %v8123_v21 }
 0x530   :  { %v7740_v25 = vmin.f32 %v7720_v1, 0.0  ;;  %v7722_v2 = vadd.f32 %v7721_v16, %v18330_v14  ;;  %11176 = vmatprep.subr.bf16.mxu0 %v13851_v23  ;;  %v13835_v14 = vcombine.high %v8151_v60, %v8155_v5  ;;  %vm7732_vm14 = vcmp.gt.f32.partialorder %v7720_v1, 0.0  ;;  %v7975_v16 = vld [vmem:[%s19820_s5 + $0x588] sm:$0xff] }
 0x531   :  { %v7723_v38 = vpop.f32.mrf.mxu1  ;;  %v7967_v60 = vld [vmem:[%s19820_s5 + $0x548] sm:$0xff] }
 0x532   :  { %v7754_v40 = vmul.f32 1.442695, %v7740_v25  ;;  %v7741_v61 = vmin.f32 %v7722_v2, 0.0  ;;  %vm7733_vm15 = vcmp.gt.f32.partialorder %v7722_v2, 0.0  ;;  %v7852_v25 = vld [vmem:[%s19820_s5 + $0x1b0] sm:$0xff] }
 0x533   :  { %11177 = vmatpush2.bf16.msra.mxu0 %v13850_v24  ;;  %v7724_v48 = vpop.f32.mrf.mxu1  ;;  %v7979_v24 = vld [vmem:[%s19820_s5 + $0x5a8] sm:$0xff] }
 0x534   :  { %14302 = vpow2.f32 %v7754_v40  ;;  %v7756_v41 = vmul.f32 1.442695, %v7741_v61  ;;  %11178 = vmatprep.subr.bf16.mxu0 %v13843_v39  ;;  %v13540_v39 = vcombine.low %v7856_v22, %v7860_v46  ;;  %v13659_v5 = vcombine.high %v7975_v16, %v7979_v24  ;;  %v7971_v61 = vld [vmem:[%s19820_s5 + $0x568] sm:$0xff]  ;;  %v7840_v48 = vld [vmem:[%s19820_s5 + $0x150] sm:$0xff] }
 0x535   :  { %v13651_v20 = vcombine.high %v7967_v60, %v7971_v61 }
 0x536   :  { %14304 = vpow2.f32 %v7756_v41  ;;  %v13658_v41 = vcombine.low %v7975_v16, %v7979_v24  ;;  %v7927_v24 = vld [vmem:[%s19820_s5 + $0x408] sm:$0xff] }
 0x537   :  { %11179 = vmatpush2.bf16.msra.mxu0 %v13842_v8  ;;  %v7844_v8 = vld [vmem:[%s19820_s5 + $0x170] sm:$0xff] }
 0x538   :  { %11180 = vmatprep.subr.bf16.mxu0 %v13835_v14  ;;  %v13525_v49 = vcombine.high %v7840_v48, %v7844_v8  ;;  %v13524_v33 = vcombine.low %v7840_v48, %v7844_v8  ;;  %v8047_v8 = vld [vmem:[%s19820_s5 + $0x7c8] sm:$0xff] }
 0x53b   :  { %11181 = vmatpush2.bf16.msra.mxu0 %v13834_v11  ;;  %v7959_v11 = vld [vmem:[%s19820_s5 + $0x508] sm:$0xff] }
 0x53c   :  { %11182 = vmatprep.subr.bf16.mxu0 %v13827_v7  ;;  %v13650_v7 = vcombine.low %v7967_v60, %v7971_v61  ;;  %v13643_v43 = vcombine.high %v7959_v11, %v7963_v42 }
 0x53f   :  { %11183 = vmatpush2.bf16.msra.mxu0 %v13826_v47 }
 0x540   :  { %11184 = vmatprep.subr.bf16.mxu0 %v13819_v10  ;;  %v7951_v10 = vld [vmem:[%s19820_s5 + $0x4c8] sm:$0xff] }
 0x541   :  { %v14303_v28 = vpop.eup %14302  ;;  %v13635_v51 = vcombine.high %v7951_v10, %v7955_v3 }
 0x542   :  { %v13478_v26 = vadd.f32 -1.0, %v14303_v28 }
 0x543   :  { %v14305_v27 = vpop.eup %14304  ;;  %11185 = vmatpush2.bf16.msra.mxu0 %v13818_v9  ;;  %v7828_v9 = vld [vmem:[%s19820_s5 + $0xf0] sm:$0xff] }
 0x544   :  { %v7772_v30 = vmul.f32 1.6732632, %v13478_v26  ;;  %v13479_v6 = vadd.f32 -1.0, %v14305_v27  ;;  %11186 = vmatprep.subr.bf16.mxu0 %v13811_v18  ;;  %v13642_v18 = vcombine.low %v7959_v11, %v7963_v42  ;;  %v13509_v21 = vcombine.high %v7824_v4, %v7828_v9  ;;  %v7943_v26 = vld [vmem:[%s19820_s5 + $0x488] sm:$0xff] }
 0x545   :  { %v7947_v27 = vld [vmem:[%s19820_s5 + $0x4a8] sm:$0xff] }
 0x546   :  { %v7780_v58 = vsel %vm7732_vm14, %v7720_v1, %v7772_v30  ;;  %v7773_v63 = vmul.f32 1.6732632, %v13479_v6  ;;  %v7848_v1 = vld [vmem:[%s19820_s5 + $0x190] sm:$0xff]  ;;  %v13634_v6 = vcombine.low %v7951_v10, %v7955_v3  ;;  %v13627_v22 = vcombine.high %v7943_v26, %v7947_v27 }
 0x547   :  { %11187 = vmatpush2.bf16.msra.mxu0 %v13810_v54  ;;  %v7788_v23 = vmul.f32 1.050701, %v7780_v58  ;;  %v13533_v40 = vcombine.high %v7848_v1, %v7852_v25  ;;  %v13532_v14 = vcombine.low %v7848_v1, %v7852_v25  ;;  %v7816_v54 = vld [vmem:[%s19820_s5 + $0x90] sm:$0xff]  ;;  %v7935_v58 = vld [vmem:[%s19820_s5 + $0x448] sm:$0xff] }
 0x548   :  { %v7781_v62 = vsel %vm7733_vm15, %v7722_v2, %v7773_v63  ;;  %11188 = vmatprep.subr.bf16.mxu0 %v13803_v45  ;;  %v7820_v30 = vld [vmem:[%s19820_s5 + $0xb0] sm:$0xff]  ;;  %v13508_v45 = vcombine.low %v7824_v4, %v7828_v9  ;;  %v7939_v63 = vld [vmem:[%s19820_s5 + $0x468] sm:$0xff] }
 0x549   :  { %v7789_v0 = vmul.f32 1.050701, %v7781_v62  ;;  %v18480_v38 = vpack.c.bf16 %v7788_v23, %v7788_v23  ;;  %v13501_v46 = vcombine.high %v7816_v54, %v7820_v30  ;;  %v7812_v23 = vld [vmem:[%s19820_s5 + $0x70] sm:$0xff]  ;;  %v13626_v62 = vcombine.low %v7943_v26, %v7947_v27  ;;  %v7931_v1 = vld [vmem:[%s19820_s5 + $0x428] sm:$0xff] }
 0x54a   :  { %v7800_v25 = vld [vmem:[%s19820_s5 + $0x10] sm:$0xff]  ;;  %v13618_v60 = vcombine.low %v7935_v58, %v7939_v63  ;;  %v13611_v61 = vcombine.high %v7927_v24, %v7931_v1 }
 0x54b   :  { %v18478_v2 = vpack.c.bf16 %v7789_v0, %v7789_v0  ;;  %11189 = vmatpush2.bf16.msra.mxu0 %v13802_v32  ;;  %v7808_v32 = vld [vmem:[%s19820_s5 + $0x50] sm:$0xff]  ;;  %v13619_v0 = vcombine.high %v7935_v58, %v7939_v63  ;;  %v8023_v58 = vld [vmem:[%s19820_s5 + $0x708] sm:$0xff] }
 0x54c   :  { %11240 = vmatprep.subr.bf16.mxu0 %v13541_v29  ;;  %v13500_v29 = vcombine.low %v7816_v54, %v7820_v30  ;;  %v13493_v16 = vcombine.high %v7808_v32, %v7812_v23 }
 0x54d   :  { %11067 = vmatprep.mubr.bf16.mxu1 %v18478_v2 }
 0x54e   :  { %11191 = vmatmul.mubr.bf16.vlgmr.msra.gmra.mxu0 %v18211_v56  ;;  %11068 = vmatmul.mubr.bf16.vlgmr.msra.gmra.mxu1 %v18480_v38 }
 0x54f   :  { %11118 = vmatpush1.bf16.msra.mxu1 %v13666_v53  ;;  %11241 = vmatpush1.bf16.msra.mxu0 %v13540_v39  ;;  %v7836_v53 = vld [vmem:[%s19820_s5 + $0x130] sm:$0xff] }
 0x550   :  { %11272 = vmatprep.mubr.bf16.mxu0 %v17641_v57  ;;  %11149 = vmatprep.mubr.bf16.mxu1 %v17996_v52  ;;  %v13517_v47 = vcombine.high %v7832_v55, %v7836_v53  ;;  %v13516_v28 = vcombine.low %v7832_v55, %v7836_v53  ;;  %v7804_v39 = vld [vmem:[%s19820_s5 + $0x30] sm:$0xff] }
 0x551   :  { %11119 = vmatprep.subr.bf16.mxu1 %v13659_v5  ;;  %11242 = vmatprep.subr.bf16.mxu0 %v13533_v40  ;;  %v13492_v5 = vcombine.low %v7808_v32, %v7812_v23  ;;  %v8310_v40 = vld [vmem:[%s19821_s6] sm:$0xff]  ;;  %v13485_v48 = vcombine.high %v7800_v25, %v7804_v39  ;;  %v13484_v11 = vcombine.low %v7800_v25, %v7804_v39  ;;  %v7896_v32 = vld [vmem:[%s19820_s5 + $0x310] sm:$0xff]  ;;  %v8019_v25 = vld [vmem:[%s19820_s5 + $0x6e8] sm:$0xff] }
 0x552   :  { %v8315_v42 = vrot.slane %v8310_v40, %v16126_v13  ;;  %v7916_v13 = vld [vmem:[%s19820_s5 + $0x3b0] sm:$0xff] }
 0x553   :  { %11120 = vmatpush1.bf16.msra.mxu1 %v13658_v41  ;;  %11243 = vmatpush1.bf16.msra.mxu0 %v13532_v14  ;;  %v8051_v41 = vld [vmem:[%s19820_s5 + $0x7e8] sm:$0xff]  ;;  %v7920_v14 = vld [vmem:[%s19820_s5 + $0x3d0] sm:$0xff] }
 0x554   :  { %11121 = vmatprep.subr.bf16.mxu1 %v13651_v20  ;;  %11244 = vmatprep.subr.bf16.mxu0 %v13525_v49  ;;  %v7924_v20 = vld [vmem:[%s19820_s5 + $0x3f0] sm:$0xff]  ;;  %v13610_v49 = vcombine.low %v7927_v24, %v7931_v1  ;;  %v13731_v55 = vcombine.high %v8047_v8, %v8051_v41  ;;  %v13730_v10 = vcombine.low %v8047_v8, %v8051_v41  ;;  %v8015_v1 = vld [vmem:[%s19820_s5 + $0x6c8] sm:$0xff] }
 0x555   :  { %v13605_v53 = vcombine.high %v7920_v14, %v7924_v20  ;;  %v13604_v3 = vcombine.low %v7920_v14, %v7924_v20  ;;  %v10947_v4 = vadd.f32 %v18362_v36, %v8315_v42  ;;  %v7908_v36 = vld [vmem:[%s19820_s5 + $0x370] sm:$0xff]  ;;  %v8007_v8 = vld [vmem:[%s19820_s5 + $0x688] sm:$0xff] }
 0x556   :  { %v7900_v23 = vld [vmem:[%s19820_s5 + $0x330] sm:$0xff]  ;;  %v8011_v41 = vld [vmem:[%s19820_s5 + $0x6a8] sm:$0xff] }
 0x557   :  { %11122 = vmatpush1.bf16.msra.mxu1 %v13650_v7  ;;  %11245 = vmatpush1.bf16.msra.mxu0 %v13524_v33  ;;  %v8039_v7 = vld [vmem:[%s19820_s5 + $0x788] sm:$0xff]  ;;  %v13581_v24 = vcombine.high %v7896_v32, %v7900_v23  ;;  %v7888_v39 = vld [vmem:[%s19820_s5 + $0x2d0] sm:$0xff]  ;;  %v13691_v42 = vcombine.high %v8007_v8, %v8011_v41 }
 0x558   :  { %11123 = vmatprep.subr.bf16.mxu1 %v13643_v43  ;;  %11246 = vmatprep.subr.bf16.mxu0 %v13517_v47  ;;  %v8043_v33 = vld [vmem:[%s19820_s5 + $0x7a8] sm:$0xff]  ;;  %v7912_v43 = vld [vmem:[%s19820_s5 + $0x390] sm:$0xff]  ;;  %v8319_v47 = vrot.slane %v8310_v40, %v15905_v34  ;;  %v13580_v40 = vcombine.low %v7896_v32, %v7900_v23 }
 0x559   :  { %v13723_v9 = vcombine.high %v8039_v7, %v8043_v33  ;;  %v7904_v34 = vld [vmem:[%s19820_s5 + $0x350] sm:$0xff]  ;;  %v13722_v30 = vcombine.low %v8039_v7, %v8043_v33  ;;  %v8003_v7 = vld [vmem:[%s19820_s5 + $0x668] sm:$0xff] }
 0x55a   :  { %v10949_v26 = vadd.f32 %v18370_v37, %v8319_v47  ;;  %v8027_v37 = vld [vmem:[%s19820_s5 + $0x728] sm:$0xff]  ;;  %v7880_v14 = vld [vmem:[%s19820_s5 + $0x290] sm:$0xff] }
 0x55b   :  { %11124 = vmatpush1.bf16.msra.mxu1 %v13642_v18  ;;  %11247 = vmatpush1.bf16.msra.mxu0 %v13516_v28  ;;  %v13597_v18 = vcombine.high %v7912_v43, %v7916_v13  ;;  %v8031_v28 = vld [vmem:[%s19820_s5 + $0x748] sm:$0xff]  ;;  %v7884_v20 = vld [vmem:[%s19820_s5 + $0x2b0] sm:$0xff] }
 0x55c   :  { %11125 = vmatprep.subr.bf16.mxu1 %v13635_v51  ;;  %11248 = vmatprep.subr.bf16.mxu0 %v13509_v21  ;;  %v8035_v21 = vld [vmem:[%s19820_s5 + $0x768] sm:$0xff]  ;;  %v7872_v33 = vld [vmem:[%s19820_s5 + $0x250] sm:$0xff]  ;;  %v13564_v47 = vcombine.low %v7880_v14, %v7884_v20 }
 0x55d   :  { %v8235_v32 = vld [vmem:[%s19820_s5 + $0xda8] sm:$0xff]  ;;  %v8104_v23 = vld [vmem:[%s19820_s5 + $0x990] sm:$0xff] }
 0x55f   :  { %11126 = vmatpush1.bf16.msra.mxu1 %v13634_v6  ;;  %11249 = vmatpush1.bf16.msra.mxu0 %v13508_v45  ;;  %v13596_v6 = vcombine.low %v7912_v43, %v7916_v13  ;;  %v7876_v43 = vld [vmem:[%s19820_s5 + $0x270] sm:$0xff]  ;;  %v13690_v13 = vcombine.low %v8007_v8, %v8011_v41 }
 0x560   :  { %11127 = vmatprep.subr.bf16.mxu1 %v13627_v22  ;;  %11250 = vmatprep.subr.bf16.mxu0 %v13501_v46  ;;  %v13715_v22 = vcombine.high %v8031_v28, %v8035_v21  ;;  %v13589_v46 = vcombine.high %v7904_v34, %v7908_v36 }
 0x563   :  { %11128 = vmatpush1.bf16.msra.mxu1 %v13626_v62  ;;  %11251 = vmatpush1.bf16.msra.mxu0 %v13500_v29  ;;  %v13714_v29 = vcombine.low %v8031_v28, %v8035_v21  ;;  %v7868_v28 = vld [vmem:[%s19820_s5 + $0x230] sm:$0xff]  ;;  %v13556_v21 = vcombine.low %v7872_v33, %v7876_v43 }
 0x564   :  { %11129 = vmatprep.subr.bf16.mxu1 %v13619_v0  ;;  %11252 = vmatprep.subr.bf16.mxu0 %v13493_v16  ;;  %v13588_v0 = vcombine.low %v7904_v34, %v7908_v36  ;;  %v13707_v16 = vcombine.high %v8023_v58, %v8027_v37 }
 0x567   :  { %11130 = vmatpush1.bf16.msra.mxu1 %v13618_v60  ;;  %11253 = vmatpush1.bf16.msra.mxu0 %v13492_v5  ;;  %v7892_v60 = vld [vmem:[%s19820_s5 + $0x2f0] sm:$0xff]  ;;  %v13706_v5 = vcombine.low %v8023_v58, %v8027_v37  ;;  %v8231_v37 = vld [vmem:[%s19820_s5 + $0xd88] sm:$0xff] }
 0x568   :  { %11131 = vmatprep.subr.bf16.mxu1 %v13611_v61  ;;  %11254 = vmatprep.subr.bf16.mxu0 %v13485_v48  ;;  %v13699_v61 = vcombine.high %v8015_v1, %v8019_v25  ;;  %v13573_v48 = vcombine.high %v7888_v39, %v7892_v60 }
 0x56b   :  { %11132 = vmatpush1.bf16.msra.mxu1 %v13610_v49  ;;  %11255 = vmatpush1.bf16.msra.mxu0 %v13484_v11  ;;  %v13698_v49 = vcombine.low %v8015_v1, %v8019_v25  ;;  %v13572_v11 = vcombine.low %v7888_v39, %v7892_v60  ;;  %v8223_v1 = vld [vmem:[%s19820_s5 + $0xd48] sm:$0xff]  ;;  %v8096_v60 = vld [vmem:[%s19820_s5 + $0x950] sm:$0xff] }
 0x56c   :  { %11133 = vmatprep.subr.bf16.mxu1 %v13731_v55  ;;  %11256 = vmatprep.subr.bf16.mxu0 %v13605_v53  ;;  %v13565_v55 = vcombine.high %v7880_v14, %v7884_v20  ;;  %v7999_v53 = vld [vmem:[%s19820_s5 + $0x648] sm:$0xff] }
 0x56d   :  { %v10987_v51 = vpop.f32.mrf.mxu1  ;;  %v8227_v25 = vld [vmem:[%s19820_s5 + $0xd68] sm:$0xff] }
 0x56e   :  { %v18605_v27 = vadd.f32 %v10987_v51, %v10947_v4  ;;  %v7991_v4 = vld [vmem:[%s19820_s5 + $0x608] sm:$0xff]  ;;  %v13682_v51 = vcombine.low %v7999_v53, %v8003_v7  ;;  %v13907_v41 = vcombine.high %v8223_v1, %v8227_v25 }
 0x56f   :  { %11134 = vmatpush2.bf16.msra.mxu1 %v13730_v10  ;;  %11257 = vmatpush2.bf16.msra.mxu0 %v13604_v3  ;;  %v10989_v54 = vpop.f32.mrf.mxu1  ;;  %v13683_v10 = vcombine.high %v7999_v53, %v8003_v7  ;;  %v13557_v3 = vcombine.high %v7872_v33, %v7876_v43 }
 0x570   :  { %v18607_v45 = vadd.f32 %v10989_v54, %v10949_v26  ;;  %11135 = vmatprep.subr.bf16.mxu1 %v13723_v9  ;;  %11258 = vmatprep.subr.bf16.mxu0 %v13597_v18  ;;  %v7995_v9 = vld [vmem:[%s19820_s5 + $0x628] sm:$0xff]  ;;  %v7864_v18 = vld [vmem:[%s19820_s5 + $0x210] sm:$0xff] }
 0x571   :  { %v10991_v63 = vpop.f32.mrf.mxu1  ;;  %v13675_v34 = vcombine.high %v7991_v4, %v7995_v9  ;;  %v13549_v36 = vcombine.high %v7864_v18, %v7868_v28  ;;  %v8239_v26 = vld [vmem:[%s19820_s5 + $0xdc8] sm:$0xff] }
 0x572   :  { %v8243_v54 = vld [vmem:[%s19820_s5 + $0xde8] sm:$0xff] }
 0x573   :  { %11136 = vmatpush2.bf16.msra.mxu1 %v13722_v30  ;;  %11259 = vmatpush2.bf16.msra.mxu0 %v13596_v6  ;;  %v10992_v62 = vpop.f32.mrf.mxu1  ;;  %v8112_v30 = vld [vmem:[%s19820_s5 + $0x9d0] sm:$0xff]  ;;  %v13923_v58 = vcombine.high %v8239_v26, %v8243_v54 }
 0x574   :  { %11137 = vmatprep.subr.bf16.mxu1 %v13715_v22  ;;  %11260 = vmatprep.subr.bf16.mxu0 %v13589_v46  ;;  %v8116_v6 = vld [vmem:[%s19820_s5 + $0x9f0] sm:$0xff]  ;;  %v13674_v22 = vcombine.low %v7991_v4, %v7995_v9  ;;  %v13548_v46 = vcombine.low %v7864_v18, %v7868_v28 }
 0x575   :  { %v13797_v63 = vcombine.high %v8112_v30, %v8116_v6  ;;  %v8108_v62 = vld [vmem:[%s19820_s5 + $0x9b0] sm:$0xff] }
 0x576   :  { %v13788_v8 = vcombine.low %v8104_v23, %v8108_v62 }
 0x577   :  { %11138 = vmatpush2.bf16.msra.mxu1 %v13714_v29  ;;  %11261 = vmatpush2.bf16.msra.mxu0 %v13588_v0  ;;  %v13922_v29 = vcombine.low %v8239_v26, %v8243_v54  ;;  %v13796_v0 = vcombine.low %v8112_v30, %v8116_v6 }
 0x578   :  { %11139 = vmatprep.subr.bf16.mxu1 %v13707_v16  ;;  %11262 = vmatprep.subr.bf16.mxu0 %v13581_v24  ;;  %v13915_v16 = vcombine.high %v8231_v37, %v8235_v32  ;;  %v13789_v24 = vcombine.high %v8104_v23, %v8108_v62 }
 0x57b   :  { %11140 = vmatpush2.bf16.msra.mxu1 %v13706_v5  ;;  %11263 = vmatpush2.bf16.msra.mxu0 %v13580_v40  ;;  %v8100_v5 = vld [vmem:[%s19820_s5 + $0x970] sm:$0xff] }
 0x57c   :  { %11141 = vmatprep.subr.bf16.mxu1 %v13699_v61  ;;  %11264 = vmatprep.subr.bf16.mxu0 %v13573_v48  ;;  %v13914_v61 = vcombine.low %v8231_v37, %v8235_v32  ;;  %v13781_v20 = vcombine.high %v8096_v60, %v8100_v5  ;;  %v13780_v7 = vcombine.low %v8096_v60, %v8100_v5  ;;  %v8303_v5 = vld [vmem:[%s19820_s5 + $0xfc8] sm:$0xff] }
 0x57f   :  { %11142 = vmatpush2.bf16.msra.mxu1 %v13698_v49  ;;  %11265 = vmatpush2.bf16.msra.mxu0 %v13572_v11  ;;  %v8219_v49 = vld [vmem:[%s19820_s5 + $0xd28] sm:$0xff] }
 0x580   :  { %11143 = vmatprep.subr.bf16.mxu1 %v13691_v42  ;;  %11266 = vmatprep.subr.bf16.mxu0 %v13565_v55  ;;  %v8088_v42 = vld [vmem:[%s19820_s5 + $0x910] sm:$0xff]  ;;  %v13906_v55 = vcombine.low %v8223_v1, %v8227_v25 }
 0x583   :  { %11144 = vmatpush2.bf16.msra.mxu1 %v13690_v13  ;;  %11267 = vmatpush2.bf16.msra.mxu0 %v13564_v47  ;;  %v8207_v13 = vld [vmem:[%s19820_s5 + $0xcc8] sm:$0xff] }
 0x584   :  { %11145 = vmatprep.subr.bf16.mxu1 %v13683_v10  ;;  %11268 = vmatprep.subr.bf16.mxu0 %v13557_v3  ;;  %v8211_v47 = vld [vmem:[%s19820_s5 + $0xce8] sm:$0xff]  ;;  %v8080_v10 = vld [vmem:[%s19820_s5 + $0x8d0] sm:$0xff] }
 0x585   :  { %v8084_v3 = vld [vmem:[%s19820_s5 + $0x8f0] sm:$0xff]  ;;  %v13891_v18 = vcombine.high %v8207_v13, %v8211_v47  ;;  %v13890_v26 = vcombine.low %v8207_v13, %v8211_v47  ;;  %v8287_v13 = vld [vmem:[%s19820_s5 + $0xf48] sm:$0xff] }
 0x586   :  { %v13765_v28 = vcombine.high %v8080_v10, %v8084_v3  ;;  %v13764_v54 = vcombine.low %v8080_v10, %v8084_v3  ;;  %v8291_v47 = vld [vmem:[%s19820_s5 + $0xf68] sm:$0xff]  ;;  %v8160_v10 = vld [vmem:[%s19820_s5 + $0xb50] sm:$0xff] }
 0x587   :  { %11146 = vmatpush2.bf16.msra.mxu1 %v13682_v51  ;;  %11269 = vmatpush2.bf16.msra.mxu0 %v13556_v21  ;;  %v8199_v51 = vld [vmem:[%s19820_s5 + $0xc88] sm:$0xff]  ;;  %v8164_v3 = vld [vmem:[%s19820_s5 + $0xb70] sm:$0xff] }
 0x588   :  { %11147 = vmatprep.subr.bf16.mxu1 %v13675_v34  ;;  %11270 = vmatprep.subr.bf16.mxu0 %v13549_v36  ;;  %v8203_v21 = vld [vmem:[%s19820_s5 + $0xca8] sm:$0xff]  ;;  %v8072_v34 = vld [vmem:[%s19820_s5 + $0x890] sm:$0xff] }
 0x589   :  { %v8076_v36 = vld [vmem:[%s19820_s5 + $0x8b0] sm:$0xff]  ;;  %v13883_v30 = vcombine.high %v8199_v51, %v8203_v21  ;;  %v13882_v37 = vcombine.low %v8199_v51, %v8203_v21  ;;  %v8279_v51 = vld [vmem:[%s19820_s5 + $0xf08] sm:$0xff] }
 0x58a   :  { %v13757_v6 = vcombine.high %v8072_v34, %v8076_v36  ;;  %v13756_v32 = vcombine.low %v8072_v34, %v8076_v36  ;;  %v8283_v21 = vld [vmem:[%s19820_s5 + $0xf28] sm:$0xff]  ;;  %v8152_v34 = vld [vmem:[%s19820_s5 + $0xb10] sm:$0xff] }
 0x58b   :  { %11148 = vmatpush2.bf16.msra.mxu1 %v13674_v22  ;;  %11271 = vmatpush2.bf16.msra.mxu0 %v13548_v46  ;;  %v8191_v22 = vld [vmem:[%s19820_s5 + $0xc48] sm:$0xff]  ;;  %v8156_v36 = vld [vmem:[%s19820_s5 + $0xb30] sm:$0xff] }
 0x58c   :  { %11199 = vmatprep.subr.bf16.mxu1 %v13923_v58  ;;  %11322 = vmatprep.subr.bf16.mxu0 %v13797_v63  ;;  %v8195_v46 = vld [vmem:[%s19820_s5 + $0xc68] sm:$0xff]  ;;  %v8064_v58 = vld [vmem:[%s19820_s5 + $0x850] sm:$0xff] }
 0x58d   :  { %v8068_v63 = vld [vmem:[%s19820_s5 + $0x870] sm:$0xff]  ;;  %v13875_v23 = vcombine.high %v8191_v22, %v8195_v46  ;;  %v13874_v1 = vcombine.low %v8191_v22, %v8195_v46  ;;  %v8271_v22 = vld [vmem:[%s19820_s5 + $0xec8] sm:$0xff] }
 0x58e   :  { %11150 = vmatmul.mubr.bf16.vlgmr.msra.gmra.mxu1 %v18136_v31  ;;  %11273 = vmatmul.mubr.bf16.vlgmr.msra.gmra.mxu0 %v17856_v59  ;;  %v11028_v39 = vpop.f32.mrf.mxu0  ;;  %v13749_v62 = vcombine.high %v8064_v58, %v8068_v63  ;;  %v13748_v25 = vcombine.low %v8064_v58, %v8068_v63  ;;  %v8275_v46 = vld [vmem:[%s19820_s5 + $0xee8] sm:$0xff]  ;;  %v8144_v58 = vld [vmem:[%s19820_s5 + $0xad0] sm:$0xff] }
 0x58f   :  { %v18708_v40 = vadd.f32 %v11028_v39, %v18605_v27  ;;  %11200 = vmatpush1.bf16.msra.mxu1 %v13922_v29  ;;  %11231 = vmatprep.mubr.bf16.mxu1 %v18478_v2  ;;  %v8215_v27 = vld [vmem:[%s19820_s5 + $0xd08] sm:$0xff]  ;;  %v8148_v63 = vld [vmem:[%s19820_s5 + $0xaf0] sm:$0xff] }
 0x590   :  { %11323 = vmatpush1.bf16.msra.mxu0 %v13796_v0  ;;  %11354 = vmatprep.mubr.bf16.mxu0 %v18199_v50  ;;  %v11030_v48 = vpop.f32.mrf.mxu0  ;;  %v13899_v33 = vcombine.high %v8215_v27, %v8219_v49  ;;  %v13898_v4 = vcombine.low %v8215_v27, %v8219_v49  ;;  %v8183_v29 = vld [vmem:[%s19820_s5 + $0xc08] sm:$0xff] }
 0x591   :  { %v18713_v14 = vadd.f32 %v11030_v48, %v18607_v45  ;;  %11201 = vmatprep.subr.bf16.mxu1 %v13915_v16  ;;  %11324 = vmatprep.subr.bf16.mxu0 %v13789_v24  ;;  %v8092_v45 = vld [vmem:[%s19820_s5 + $0x930] sm:$0xff]  ;;  %v8187_v0 = vld [vmem:[%s19820_s5 + $0xc28] sm:$0xff] }
 0x592   :  { %v11032_v11 = vpop.f32.mrf.mxu0  ;;  %v13773_v43 = vcombine.high %v8088_v42, %v8092_v45  ;;  %v13772_v9 = vcombine.low %v8088_v42, %v8092_v45  ;;  %v8056_v16 = vld [vmem:[%s19820_s5 + $0x810] sm:$0xff]  ;;  %v13867_v39 = vcombine.high %v8183_v29, %v8187_v0  ;;  %v8299_v42 = vld [vmem:[%s19820_s5 + $0xfa8] sm:$0xff] }
 0x593   :  { %11202 = vmatpush1.bf16.msra.mxu1 %v13914_v61  ;;  %v8060_v24 = vld [vmem:[%s19820_s5 + $0x830] sm:$0xff]  ;;  %v8307_v61 = vld [vmem:[%s19820_s5 + $0xfe8] sm:$0xff] }
 0x594   :  { %11325 = vmatpush1.bf16.msra.mxu0 %v13788_v8  ;;  %v11033_v53 = vpop.f32.mrf.mxu0  ;;  %11203 = vmatprep.subr.bf16.mxu1 %v13907_v41  ;;  %v13741_v60 = vcombine.high %v8056_v16, %v8060_v24  ;;  %v8176_v48 = vld [vmem:[%s19820_s5 + $0xbd0] sm:$0xff]  ;;  %v13866_v41 = vcombine.low %v8183_v29, %v8187_v0  ;;  %v13987_v27 = vcombine.high %v8303_v5, %v8307_v61  ;;  %v8295_v11 = vld [vmem:[%s19820_s5 + $0xf88] sm:$0xff] }
 0x595   :  { %11326 = vmatprep.subr.bf16.mxu0 %v13781_v20  ;;  %v8180_v8 = vld [vmem:[%s19820_s5 + $0xbf0] sm:$0xff]  ;;  %v13740_v20 = vcombine.low %v8056_v16, %v8060_v24  ;;  %v13986_v53 = vcombine.low %v8303_v5, %v8307_v61  ;;  %v8263_v29 = vld [vmem:[%s19820_s5 + $0xe88] sm:$0xff] }
 0x596   :  { %v13861_v49 = vcombine.high %v8176_v48, %v8180_v8  ;;  %v8168_v45 = vld [vmem:[%s19820_s5 + $0xb90] sm:$0xff]  ;;  %v8267_v0 = vld [vmem:[%s19820_s5 + $0xea8] sm:$0xff] }
 0x597   :  { %11204 = vmatpush1.bf16.msra.mxu1 %v13906_v55  ;;  %v8172_v55 = vld [vmem:[%s19820_s5 + $0xbb0] sm:$0xff]  ;;  %v8255_v5 = vld [vmem:[%s19820_s5 + $0xe48] sm:$0xff] }
 0x598   :  { %11327 = vmatpush1.bf16.msra.mxu0 %v13780_v7  ;;  %11205 = vmatprep.subr.bf16.mxu1 %v13899_v33  ;;  %v13860_v7 = vcombine.low %v8176_v48, %v8180_v8  ;;  %v13979_v33 = vcombine.high %v8295_v11, %v8299_v42  ;;  %v8136_v16 = vld [vmem:[%s19820_s5 + $0xa90] sm:$0xff]  ;;  %v8259_v61 = vld [vmem:[%s19820_s5 + $0xe68] sm:$0xff] }
 0x599   :  { %11328 = vmatprep.subr.bf16.mxu0 %v13773_v43  ;;  %v13853_v43 = vcombine.high %v8168_v45, %v8172_v55  ;;  %v8140_v24 = vld [vmem:[%s19820_s5 + $0xab0] sm:$0xff] }
 0x59a   :  { %v8128_v48 = vld [vmem:[%s19820_s5 + $0xa50] sm:$0xff] }
 0x59b   :  { %11206 = vmatpush1.bf16.msra.mxu1 %v13898_v4  ;;  %v13978_v4 = vcombine.low %v8295_v11, %v8299_v42  ;;  %v8132_v8 = vld [vmem:[%s19820_s5 + $0xa70] sm:$0xff]  ;;  %v8247_v11 = vld [vmem:[%s19820_s5 + $0xe08] sm:$0xff] }
 0x59c   :  { %11329 = vmatpush1.bf16.msra.mxu0 %v13772_v9  ;;  %11207 = vmatprep.subr.bf16.mxu1 %v13891_v18  ;;  %v13852_v9 = vcombine.low %v8168_v45, %v8172_v55  ;;  %v13971_v18 = vcombine.high %v8287_v13, %v8291_v47  ;;  %v8251_v42 = vld [vmem:[%s19820_s5 + $0xe28] sm:$0xff]  ;;  %v8120_v45 = vld [vmem:[%s19820_s5 + $0xa10] sm:$0xff] }
 0x59d   :  { %11330 = vmatprep.subr.bf16.mxu0 %v13765_v28  ;;  %v13845_v28 = vcombine.high %v8160_v10, %v8164_v3  ;;  %v8124_v55 = vld [vmem:[%s19820_s5 + $0xa30] sm:$0xff] }
 0x59f   :  { %11208 = vmatpush1.bf16.msra.mxu1 %v13890_v26  ;;  %v13970_v26 = vcombine.low %v8287_v13, %v8291_v47  ;;  %v7984_v13 = vld [vmem:[%s19820_s5 + $0x5d0] sm:$0xff] }
 0x5a0   :  { %11331 = vmatpush1.bf16.msra.mxu0 %v13764_v54  ;;  %11209 = vmatprep.subr.bf16.mxu1 %v13883_v30  ;;  %v13844_v54 = vcombine.low %v8160_v10, %v8164_v3  ;;  %v13963_v30 = vcombine.high %v8279_v51, %v8283_v21  ;;  %v7988_v47 = vld [vmem:[%s19820_s5 + $0x5f0] sm:$0xff]  ;;  %v7857_v10 = vld [vmem:[%s19820_s5 + $0x1d8] sm:$0xff] }
 0x5a1   :  { %11332 = vmatprep.subr.bf16.mxu0 %v13757_v6  ;;  %v13837_v6 = vcombine.high %v8152_v34, %v8156_v36  ;;  %v7861_v3 = vld [vmem:[%s19820_s5 + $0x1f8] sm:$0xff] }
 0x5a3   :  { %11210 = vmatpush1.bf16.msra.mxu1 %v13882_v37  ;;  %v13962_v37 = vcombine.low %v8279_v51, %v8283_v21  ;;  %v7976_v51 = vld [vmem:[%s19820_s5 + $0x590] sm:$0xff] }
 0x5a4   :  { %11333 = vmatpush1.bf16.msra.mxu0 %v13756_v32  ;;  %11211 = vmatprep.subr.bf16.mxu1 %v13875_v23  ;;  %v13836_v32 = vcombine.low %v8152_v34, %v8156_v36  ;;  %v13955_v23 = vcombine.high %v8271_v22, %v8275_v46  ;;  %v7980_v21 = vld [vmem:[%s19820_s5 + $0x5b0] sm:$0xff]  ;;  %v13668_v34 = vcombine.low %v7984_v13, %v7988_v47  ;;  %v7849_v36 = vld [vmem:[%s19820_s5 + $0x198] sm:$0xff] }
 0x5a5   :  { %11334 = vmatprep.subr.bf16.mxu0 %v13749_v62  ;;  %v13829_v62 = vcombine.high %v8144_v58, %v8148_v63 }
 0x5a7   :  { %11212 = vmatpush1.bf16.msra.mxu1 %v13874_v1  ;;  %v13954_v1 = vcombine.low %v8271_v22, %v8275_v46  ;;  %v7972_v22 = vld [vmem:[%s19820_s5 + $0x570] sm:$0xff]  ;;  %v7841_v46 = vld [vmem:[%s19820_s5 + $0x158] sm:$0xff] }
 0x5a8   :  { %11335 = vmatpush1.bf16.msra.mxu0 %v13748_v25  ;;  %11213 = vmatprep.subr.bf16.mxu1 %v13867_v39  ;;  %v13828_v25 = vcombine.low %v8144_v58, %v8148_v63  ;;  %v13947_v39 = vcombine.high %v8263_v29, %v8267_v0 }
 0x5a9   :  { %11336 = vmatprep.subr.bf16.mxu0 %v13741_v60  ;;  %v13821_v60 = vcombine.high %v8136_v16, %v8140_v24 }
 0x5ab   :  { %11214 = vmatpush1.bf16.msra.mxu1 %v13866_v41  ;;  %v13946_v41 = vcombine.low %v8263_v29, %v8267_v0 }
 0x5ac   :  { %11337 = vmatpush1.bf16.msra.mxu0 %v13740_v20  ;;  %11215 = vmatprep.subr.bf16.mxu1 %v13987_v27  ;;  %v13820_v20 = vcombine.low %v8136_v16, %v8140_v24  ;;  %v13939_v27 = vcombine.high %v8255_v5, %v8259_v61  ;;  %v7964_v24 = vld [vmem:[%s19820_s5 + $0x530] sm:$0xff] }
 0x5ad   :  { %11338 = vmatprep.subr.bf16.mxu0 %v13861_v49  ;;  %v13813_v49 = vcombine.high %v8128_v48, %v8132_v8 }
 0x5af   :  { %11216 = vmatpush2.bf16.msra.mxu1 %v13986_v53  ;;  %v13938_v53 = vcombine.low %v8255_v5, %v8259_v61 }
 0x5b0   :  { %11339 = vmatpush2.bf16.msra.mxu0 %v13860_v7  ;;  %11217 = vmatprep.subr.bf16.mxu1 %v13979_v33  ;;  %v13812_v7 = vcombine.low %v8128_v48, %v8132_v8  ;;  %v13931_v33 = vcombine.high %v8247_v11, %v8251_v42  ;;  %v7956_v8 = vld [vmem:[%s19820_s5 + $0x4f0] sm:$0xff] }
 0x5b1   :  { %11340 = vmatprep.subr.bf16.mxu0 %v13853_v43  ;;  %v13805_v43 = vcombine.high %v8120_v45, %v8124_v55 }
 0x5b3   :  { %11218 = vmatpush2.bf16.msra.mxu1 %v13978_v4  ;;  %v13930_v4 = vcombine.low %v8247_v11, %v8251_v42  ;;  %v7944_v11 = vld [vmem:[%s19820_s5 + $0x490] sm:$0xff] }
 0x5b4   :  { %11341 = vmatpush2.bf16.msra.mxu0 %v13852_v9  ;;  %11219 = vmatprep.subr.bf16.mxu1 %v13971_v18  ;;  %v13804_v9 = vcombine.low %v8120_v45, %v8124_v55  ;;  %v13669_v18 = vcombine.high %v7984_v13, %v7988_v47  ;;  %v7948_v55 = vld [vmem:[%s19820_s5 + $0x4b0] sm:$0xff] }
 0x5b5   :  { %11342 = vmatprep.subr.bf16.mxu0 %v13845_v28  ;;  %v13543_v28 = vcombine.high %v7857_v10, %v7861_v3  ;;  %v7936_v13 = vld [vmem:[%s19820_s5 + $0x450] sm:$0xff] }
 0x5b7   :  { %11220 = vmatpush2.bf16.msra.mxu1 %v13970_v26  ;;  %v7853_v26 = vld [vmem:[%s19820_s5 + $0x1b8] sm:$0xff] }
 0x5b8   :  { %11343 = vmatpush2.bf16.msra.mxu0 %v13844_v54  ;;  %11221 = vmatprep.subr.bf16.mxu1 %v13963_v30  ;;  %v13542_v54 = vcombine.low %v7857_v10, %v7861_v3  ;;  %v13661_v30 = vcombine.high %v7976_v51, %v7980_v21  ;;  %v13535_v63 = vcombine.high %v7849_v36, %v7853_v26  ;;  %v7940_v3 = vld [vmem:[%s19820_s5 + $0x470] sm:$0xff] }
 0x5b9   :  { %11344 = vmatprep.subr.bf16.mxu0 %v13837_v6  ;;  %v7968_v6 = vld [vmem:[%s19820_s5 + $0x550] sm:$0xff]  ;;  %v13534_v29 = vcombine.low %v7849_v36, %v7853_v26  ;;  %v13629_v10 = vcombine.high %v7944_v11, %v7948_v55  ;;  %v7801_v26 = vld [vmem:[%s19820_s5 + $0x18] sm:$0xff] }
 0x5ba   :  { %v13653_v0 = vcombine.high %v7968_v6, %v7972_v22  ;;  %v7932_v36 = vld [vmem:[%s19820_s5 + $0x430] sm:$0xff] }
 0x5bb   :  { %11222 = vmatpush2.bf16.msra.mxu1 %v13962_v37  ;;  %v7845_v37 = vld [vmem:[%s19820_s5 + $0x178] sm:$0xff] }
 0x5bc   :  { %11345 = vmatpush2.bf16.msra.mxu0 %v13836_v32  ;;  %11223 = vmatprep.subr.bf16.mxu1 %v13955_v23  ;;  %v13660_v32 = vcombine.low %v7976_v51, %v7980_v21  ;;  %v7960_v23 = vld [vmem:[%s19820_s5 + $0x510] sm:$0xff]  ;;  %v13527_v16 = vcombine.high %v7841_v46, %v7845_v37  ;;  %v13526_v61 = vcombine.low %v7841_v46, %v7845_v37 }
 0x5bd   :  { %11346 = vmatprep.subr.bf16.mxu0 %v13829_v62  ;;  %v13645_v48 = vcombine.high %v7960_v23, %v7964_v24  ;;  %v7928_v51 = vld [vmem:[%s19820_s5 + $0x410] sm:$0xff] }
 0x5be   :  { %v8052_v37 = vld [vmem:[%s19820_s5 + $0x7f0] sm:$0xff] }
 0x5bf   :  { %11224 = vmatpush2.bf16.msra.mxu1 %v13954_v1  ;;  %v7833_v1 = vld [vmem:[%s19820_s5 + $0x118] sm:$0xff] }
 0x5c0   :  { %11347 = vmatpush2.bf16.msra.mxu0 %v13828_v25  ;;  %11225 = vmatprep.subr.bf16.mxu1 %v13947_v39  ;;  %v7837_v39 = vld [vmem:[%s19820_s5 + $0x138] sm:$0xff] }
 0x5c1   :  { %11348 = vmatprep.subr.bf16.mxu0 %v13821_v60  ;;  %v13652_v60 = vcombine.low %v7968_v6, %v7972_v22  ;;  %v13518_v42 = vcombine.low %v7833_v1, %v7837_v39  ;;  %v13620_v6 = vcombine.low %v7936_v13, %v7940_v3  ;;  %v8048_v22 = vld [vmem:[%s19820_s5 + $0x7d0] sm:$0xff] }
 0x5c3   :  { %11226 = vmatpush2.bf16.msra.mxu1 %v13946_v41  ;;  %v7825_v41 = vld [vmem:[%s19820_s5 + $0xd8] sm:$0xff] }
 0x5c4   :  { %11349 = vmatpush2.bf16.msra.mxu0 %v13820_v20  ;;  %11227 = vmatprep.subr.bf16.mxu1 %v13939_v27  ;;  %v7829_v20 = vld [vmem:[%s19820_s5 + $0xf8] sm:$0xff]  ;;  %v13519_v27 = vcombine.high %v7833_v1, %v7837_v39  ;;  %v13733_v1 = vcombine.high %v8048_v22, %v8052_v37 }
 0x5c5   :  { %11350 = vmatprep.subr.bf16.mxu0 %v13813_v49  ;;  %v13644_v49 = vcombine.low %v7960_v23, %v7964_v24  ;;  %v13510_v47 = vcombine.low %v7825_v41, %v7829_v20  ;;  %v7925_v23 = vld [vmem:[%s19820_s5 + $0x3f8] sm:$0xff] }
 0x5c6   :  { %v7913_v39 = vld [vmem:[%s19820_s5 + $0x398] sm:$0xff] }
 0x5c7   :  { %11228 = vmatpush2.bf16.msra.mxu1 %v13938_v53  ;;  %v7817_v53 = vld [vmem:[%s19820_s5 + $0x98] sm:$0xff] }
 0x5c8   :  { %11351 = vmatpush2.bf16.msra.mxu0 %v13812_v7  ;;  %11229 = vmatprep.subr.bf16.mxu1 %v13931_v33  ;;  %v7821_v7 = vld [vmem:[%s19820_s5 + $0xb8] sm:$0xff]  ;;  %v13511_v33 = vcombine.high %v7825_v41, %v7829_v20 }
 0x5c9   :  { %11352 = vmatprep.subr.bf16.mxu0 %v13805_v43  ;;  %v13502_v21 = vcombine.low %v7817_v53, %v7821_v7  ;;  %v7905_v20 = vld [vmem:[%s19820_s5 + $0x358] sm:$0xff] }
 0x5cb   :  { %11230 = vmatpush2.bf16.msra.mxu1 %v13930_v4  ;;  %v7809_v4 = vld [vmem:[%s19820_s5 + $0x58] sm:$0xff] }
 0x5cc   :  { %11353 = vmatpush2.bf16.msra.mxu0 %v13804_v9  ;;  %11281 = vmatprep.subr.bf16.mxu1 %v13669_v18  ;;  %v7813_v9 = vld [vmem:[%s19820_s5 + $0x78] sm:$0xff]  ;;  %v13503_v18 = vcombine.high %v7817_v53, %v7821_v7 }
 0x5cd   :  { %11404 = vmatprep.subr.bf16.mxu0 %v13543_v28  ;;  %v13628_v28 = vcombine.low %v7944_v11, %v7948_v55  ;;  %v13494_v46 = vcombine.low %v7809_v4, %v7813_v9  ;;  %v7897_v7 = vld [vmem:[%s19820_s5 + $0x318] sm:$0xff] }
 0x5ce   :  { %v18904_v58 = vpop.f32.mrf.mxu0  ;;  %11232 = vmatmul.mubr.bf16.vlgmr.msra.gmra.mxu1 %v18480_v38 }
 0x5cf   :  { %11355 = vmatmul.mubr.bf16.vlgmr.msra.gmra.mxu0 %v18211_v56  ;;  %11282 = vmatpush1.bf16.msra.mxu1 %v13668_v34  ;;  %v13621_v34 = vcombine.high %v7936_v13, %v7940_v3 }
 0x5d0   :  { %11313 = vmatprep.mubr.bf16.mxu1 %v17996_v52  ;;  %11405 = vmatpush1.bf16.msra.mxu0 %v13542_v54  ;;  %v18915_v62 = vpop.f32.mrf.mxu0  ;;  %v7805_v54 = vld [vmem:[%s19820_s5 + $0x38] sm:$0xff] }
 0x5d1   :  { %11436 = vmatprep.mubr.bf16.mxu0 %v17641_v57  ;;  %11283 = vmatprep.subr.bf16.mxu1 %v13661_v30  ;;  %v7952_v57 = vld [vmem:[%s19820_s5 + $0x4d0] sm:$0xff]  ;;  %v13495_v30 = vcombine.high %v7809_v4, %v7813_v9  ;;  %v13486_v24 = vcombine.low %v7801_v26, %v7805_v54  ;;  %v7889_v9 = vld [vmem:[%s19820_s5 + $0x2d8] sm:$0xff] }
 0x5d2   :  { %v11114_v25 = vpop.f32.mrf.mxu0  ;;  %11406 = vmatprep.subr.bf16.mxu0 %v13535_v63  ;;  %v13637_v45 = vcombine.high %v7952_v57, %v7956_v8  ;;  %v13636_v43 = vcombine.low %v7952_v57, %v7956_v8  ;;  %v13613_v63 = vcombine.high %v7928_v51, %v7932_v36 }
 0x5d3   :  { %11284 = vmatpush1.bf16.msra.mxu1 %v13660_v32  ;;  %v7921_v32 = vld [vmem:[%s19820_s5 + $0x3d8] sm:$0xff]  ;;  %v8044_v25 = vld [vmem:[%s19820_s5 + $0x7b0] sm:$0xff] }
 0x5d4   :  { %11407 = vmatpush1.bf16.msra.mxu0 %v13534_v29  ;;  %v11115_v5 = vpop.f32.mrf.mxu0  ;;  %11285 = vmatprep.subr.bf16.mxu1 %v13653_v0  ;;  %v13487_v29 = vcombine.high %v7801_v26, %v7805_v54  ;;  %v13612_v0 = vcombine.low %v7928_v51, %v7932_v36  ;;  %v13607_v57 = vcombine.high %v7921_v32, %v7925_v23  ;;  %v7881_v54 = vld [vmem:[%s19820_s5 + $0x298] sm:$0xff] }
 0x5d5   :  { %11408 = vmatprep.subr.bf16.mxu0 %v13527_v16  ;;  %v8040_v16 = vld [vmem:[%s19820_s5 + $0x790] sm:$0xff]  ;;  %v13732_v5 = vcombine.low %v8048_v22, %v8052_v37  ;;  %v13606_v8 = vcombine.low %v7921_v32, %v7925_v23  ;;  %v7873_v23 = vld [vmem:[%s19820_s5 + $0x258] sm:$0xff] }
 0x5d6   :  { %v13725_v41 = vcombine.high %v8040_v16, %v8044_v25  ;;  %v13724_v11 = vcombine.low %v8040_v16, %v8044_v25 }
 0x5d7   :  { %11286 = vmatpush1.bf16.msra.mxu1 %v13652_v60  ;;  %v7917_v60 = vld [vmem:[%s19820_s5 + $0x3b8] sm:$0xff] }
 0x5d8   :  { %11409 = vmatpush1.bf16.msra.mxu0 %v13526_v61  ;;  %11287 = vmatprep.subr.bf16.mxu1 %v13645_v48  ;;  %v8032_v61 = vld [vmem:[%s19820_s5 + $0x750] sm:$0xff]  ;;  %v13598_v55 = vcombine.low %v7913_v39, %v7917_v60 }
 0x5d9   :  { %11410 = vmatprep.subr.bf16.mxu0 %v13519_v27  ;;  %v8036_v48 = vld [vmem:[%s19820_s5 + $0x770] sm:$0xff]  ;;  %v7909_v27 = vld [vmem:[%s19820_s5 + $0x378] sm:$0xff] }
 0x5da   :  { %v13717_v53 = vcombine.high %v8032_v61, %v8036_v48  ;;  %v13716_v13 = vcombine.low %v8032_v61, %v8036_v48  ;;  %v13590_v3 = vcombine.low %v7905_v20, %v7909_v27  ;;  %v8240_v48 = vld [vmem:[%s19820_s5 + $0xdd0] sm:$0xff] }
 0x5db   :  { %11288 = vmatpush1.bf16.msra.mxu1 %v13644_v49  ;;  %v13599_v49 = vcombine.high %v7913_v39, %v7917_v60  ;;  %v7865_v60 = vld [vmem:[%s19820_s5 + $0x218] sm:$0xff] }
 0x5dc   :  { %11411 = vmatpush1.bf16.msra.mxu0 %v13518_v42  ;;  %11289 = vmatprep.subr.bf16.mxu1 %v13637_v45  ;;  %v8024_v42 = vld [vmem:[%s19820_s5 + $0x710] sm:$0xff] }
 0x5dd   :  { %11412 = vmatprep.subr.bf16.mxu0 %v13511_v33  ;;  %v8028_v45 = vld [vmem:[%s19820_s5 + $0x730] sm:$0xff]  ;;  %v7901_v33 = vld [vmem:[%s19820_s5 + $0x338] sm:$0xff] }
 0x5de   :  { %v13709_v4 = vcombine.high %v8024_v42, %v8028_v45  ;;  %v13708_v51 = vcombine.low %v8024_v42, %v8028_v45  ;;  %v13582_v36 = vcombine.low %v7897_v7, %v7901_v33 }
 0x5df   :  { %11290 = vmatpush1.bf16.msra.mxu1 %v13636_v43  ;;  %v13591_v43 = vcombine.high %v7905_v20, %v7909_v27  ;;  %v8113_v27 = vld [vmem:[%s19820_s5 + $0x9d8] sm:$0xff] }
 0x5e0   :  { %11413 = vmatpush1.bf16.msra.mxu0 %v13510_v47  ;;  %11291 = vmatprep.subr.bf16.mxu1 %v13629_v10  ;;  %v8016_v47 = vld [vmem:[%s19820_s5 + $0x6d0] sm:$0xff] }
 0x5e1   :  { %11414 = vmatprep.subr.bf16.mxu0 %v13503_v18  ;;  %v8020_v10 = vld [vmem:[%s19820_s5 + $0x6f0] sm:$0xff]  ;;  %v7893_v18 = vld [vmem:[%s19820_s5 + $0x2f8] sm:$0xff] }
 0x5e2   :  { %v13701_v26 = vcombine.high %v8016_v47, %v8020_v10  ;;  %v13700_v22 = vcombine.low %v8016_v47, %v8020_v10  ;;  %v13574_v37 = vcombine.low %v7889_v9, %v7893_v18  ;;  %v8109_v47 = vld [vmem:[%s19820_s5 + $0x9b8] sm:$0xff] }
 0x5e3   :  { %11292 = vmatpush1.bf16.msra.mxu1 %v13628_v28  ;;  %v13583_v28 = vcombine.high %v7897_v7, %v7901_v33  ;;  %v8232_v7 = vld [vmem:[%s19820_s5 + $0xd90] sm:$0xff] }
 0x5e4   :  { %11415 = vmatpush1.bf16.msra.mxu0 %v13502_v21  ;;  %11293 = vmatprep.subr.bf16.mxu1 %v13621_v34  ;;  %v8008_v21 = vld [vmem:[%s19820_s5 + $0x690] sm:$0xff] }
 0x5e5   :  { %11416 = vmatprep.subr.bf16.mxu0 %v13495_v30  ;;  %v8012_v34 = vld [vmem:[%s19820_s5 + $0x6b0] sm:$0xff]  ;;  %v7885_v30 = vld [vmem:[%s19820_s5 + $0x2b8] sm:$0xff] }
 0x5e6   :  { %v13693_v32 = vcombine.high %v8008_v21, %v8012_v34  ;;  %v13692_v16 = vcombine.low %v8008_v21, %v8012_v34  ;;  %v13566_v25 = vcombine.low %v7881_v54, %v7885_v30  ;;  %v8236_v33 = vld [vmem:[%s19820_s5 + $0xdb0] sm:$0xff]  ;;  %v8097_v21 = vld [vmem:[%s19820_s5 + $0x958] sm:$0xff] }
 0x5e7   :  { %11294 = vmatpush1.bf16.msra.mxu1 %v13620_v6  ;;  %v13575_v6 = vcombine.high %v7889_v9, %v7893_v18  ;;  %v8228_v9 = vld [vmem:[%s19820_s5 + $0xd70] sm:$0xff]  ;;  %v8101_v34 = vld [vmem:[%s19820_s5 + $0x978] sm:$0xff] }
 0x5e8   :  { %11417 = vmatpush1.bf16.msra.mxu0 %v13494_v46  ;;  %11295 = vmatprep.subr.bf16.mxu1 %v13613_v63  ;;  %v8000_v46 = vld [vmem:[%s19820_s5 + $0x650] sm:$0xff] }
 0x5e9   :  { %11418 = vmatprep.subr.bf16.mxu0 %v13487_v29  ;;  %v8004_v63 = vld [vmem:[%s19820_s5 + $0x670] sm:$0xff]  ;;  %v7877_v29 = vld [vmem:[%s19820_s5 + $0x278] sm:$0xff] }
 0x5ea   :  { %v13685_v39 = vcombine.high %v8000_v46, %v8004_v63  ;;  %v13684_v61 = vcombine.low %v8000_v46, %v8004_v63  ;;  %v13783_v46 = vcombine.high %v8097_v21, %v8101_v34 }
 0x5eb   :  { %11296 = vmatpush1.bf16.msra.mxu1 %v13612_v0  ;;  %v13567_v0 = vcombine.high %v7881_v54, %v7885_v30 }
 0x5ec   :  { %11419 = vmatpush1.bf16.msra.mxu0 %v13486_v24  ;;  %11297 = vmatprep.subr.bf16.mxu1 %v13733_v1  ;;  %v7992_v24 = vld [vmem:[%s19820_s5 + $0x610] sm:$0xff] }
 0x5ed   :  { %11420 = vmatprep.subr.bf16.mxu0 %v13607_v57  ;;  %v7996_v1 = vld [vmem:[%s19820_s5 + $0x630] sm:$0xff]  ;;  %v7869_v57 = vld [vmem:[%s19820_s5 + $0x238] sm:$0xff] }
 0x5ee   :  { %v13677_v20 = vcombine.high %v7992_v24, %v7996_v1  ;;  %v13676_v42 = vcombine.low %v7992_v24, %v7996_v1  ;;  %v13550_v45 = vcombine.low %v7865_v60, %v7869_v57 }
 0x5ef   :  { %11298 = vmatpush2.bf16.msra.mxu1 %v13732_v5  ;;  %v13559_v5 = vcombine.high %v7873_v23, %v7877_v29 }
 0x5f0   :  { %11421 = vmatpush2.bf16.msra.mxu0 %v13606_v8  ;;  %11299 = vmatprep.subr.bf16.mxu1 %v13725_v41  ;;  %v8244_v8 = vld [vmem:[%s19820_s5 + $0xdf0] sm:$0xff]  ;;  %v13558_v41 = vcombine.low %v7873_v23, %v7877_v29 }
 0x5f1   :  { %11422 = vmatprep.subr.bf16.mxu0 %v13599_v49  ;;  %v8117_v49 = vld [vmem:[%s19820_s5 + $0x9f8] sm:$0xff] }
 0x5f2   :  { %v13798_v10 = vcombine.low %v8113_v27, %v8117_v49 }
 0x5f3   :  { %11300 = vmatpush2.bf16.msra.mxu1 %v13724_v11  ;;  %v13551_v11 = vcombine.high %v7865_v60, %v7869_v57  ;;  %v8081_v60 = vld [vmem:[%s19820_s5 + $0x8d8] sm:$0xff] }
 0x5f4   :  { %11423 = vmatpush2.bf16.msra.mxu0 %v13598_v55  ;;  %11301 = vmatprep.subr.bf16.mxu1 %v13717_v53  ;;  %v13925_v55 = vcombine.high %v8240_v48, %v8244_v8  ;;  %v13799_v53 = vcombine.high %v8113_v27, %v8117_v49  ;;  %v8085_v57 = vld [vmem:[%s19820_s5 + $0x8f8] sm:$0xff] }
 0x5f5   :  { %11424 = vmatprep.subr.bf16.mxu0 %v13591_v43  ;;  %v13924_v43 = vcombine.low %v8240_v48, %v8244_v8  ;;  %v13767_v8 = vcombine.high %v8081_v60, %v8085_v57  ;;  %v8073_v27 = vld [vmem:[%s19820_s5 + $0x898] sm:$0xff] }
 0x5f6   :  { %v8077_v49 = vld [vmem:[%s19820_s5 + $0x8b8] sm:$0xff] }
 0x5f7   :  { %11302 = vmatpush2.bf16.msra.mxu1 %v13716_v13  ;;  %v8105_v13 = vld [vmem:[%s19820_s5 + $0x998] sm:$0xff] }
 0x5f8   :  { %11425 = vmatpush2.bf16.msra.mxu0 %v13590_v3  ;;  %11303 = vmatprep.subr.bf16.mxu1 %v13709_v4  ;;  %v13917_v3 = vcombine.high %v8232_v7, %v8236_v33  ;;  %v8224_v4 = vld [vmem:[%s19820_s5 + $0xd50] sm:$0xff] }
 0x5f9   :  { %11426 = vmatprep.subr.bf16.mxu0 %v13583_v28  ;;  %v13908_v23 = vcombine.low %v8224_v4, %v8228_v9 }
 0x5fb   :  { %11304 = vmatpush2.bf16.msra.mxu1 %v13708_v51  ;;  %v13791_v51 = vcombine.high %v8105_v13, %v8109_v47 }
 0x5fc   :  { %11427 = vmatpush2.bf16.msra.mxu0 %v13582_v36  ;;  %11305 = vmatprep.subr.bf16.mxu1 %v13701_v26  ;;  %v13916_v26 = vcombine.low %v8232_v7, %v8236_v33  ;;  %v8196_v7 = vld [vmem:[%s19820_s5 + $0xc70] sm:$0xff]  ;;  %v8065_v33 = vld [vmem:[%s19820_s5 + $0x858] sm:$0xff] }
 0x5fd   :  { %11428 = vmatprep.subr.bf16.mxu0 %v13575_v6  ;;  %v13790_v6 = vcombine.low %v8105_v13, %v8109_v47  ;;  %v13758_v47 = vcombine.low %v8073_v27, %v8077_v49 }
 0x5ff   :  { %11306 = vmatpush2.bf16.msra.mxu1 %v13700_v22  ;;  %v13909_v22 = vcombine.high %v8224_v4, %v8228_v9  ;;  %v8184_v4 = vld [vmem:[%s19820_s5 + $0xc10] sm:$0xff] }
 0x600   :  { %11429 = vmatpush2.bf16.msra.mxu0 %v13574_v37  ;;  %11307 = vmatprep.subr.bf16.mxu1 %v13693_v32  ;;  %v8089_v32 = vld [vmem:[%s19820_s5 + $0x918] sm:$0xff]  ;;  %v8188_v9 = vld [vmem:[%s19820_s5 + $0xc30] sm:$0xff] }
 0x601   :  { %11430 = vmatprep.subr.bf16.mxu0 %v13567_v0 }
 0x603   :  { %11308 = vmatpush2.bf16.msra.mxu1 %v13692_v16  ;;  %v13782_v16 = vcombine.low %v8097_v21, %v8101_v34 }
 0x604   :  { %11431 = vmatpush2.bf16.msra.mxu0 %v13566_v25  ;;  %11309 = vmatprep.subr.bf16.mxu1 %v13685_v39  ;;  %v8208_v25 = vld [vmem:[%s19820_s5 + $0xcd0] sm:$0xff] }
 0x605   :  { %11432 = vmatprep.subr.bf16.mxu0 %v13559_v5  ;;  %v8212_v39 = vld [vmem:[%s19820_s5 + $0xcf0] sm:$0xff] }
 0x606   :  { %v13893_v48 = vcombine.high %v8208_v25, %v8212_v39 }
 0x607   :  { %11310 = vmatpush2.bf16.msra.mxu1 %v13684_v61 }
 0x608   :  { %11433 = vmatpush2.bf16.msra.mxu0 %v13558_v41  ;;  %11311 = vmatprep.subr.bf16.mxu1 %v13677_v20  ;;  %v8200_v41 = vld [vmem:[%s19820_s5 + $0xc90] sm:$0xff] }
 0x609   :  { %11434 = vmatprep.subr.bf16.mxu0 %v13551_v11  ;;  %v8204_v20 = vld [vmem:[%s19820_s5 + $0xcb0] sm:$0xff]  ;;  %v13892_v11 = vcombine.low %v8208_v25, %v8212_v39 }
 0x60a   :  { %v13884_v13 = vcombine.low %v8200_v41, %v8204_v20 }
 0x60b   :  { %11312 = vmatpush2.bf16.msra.mxu1 %v13676_v42  ;;  %v13766_v42 = vcombine.low %v8081_v60, %v8085_v57  ;;  %v8288_v57 = vld [vmem:[%s19820_s5 + $0xf50] sm:$0xff] }
 0x60c   :  { %11435 = vmatpush2.bf16.msra.mxu0 %v13550_v45  ;;  %11363 = vmatprep.subr.bf16.mxu1 %v13925_v55  ;;  %v13885_v45 = vcombine.high %v8200_v41, %v8204_v20  ;;  %v13759_v55 = vcombine.high %v8073_v27, %v8077_v49  ;;  %v8280_v49 = vld [vmem:[%s19820_s5 + $0xf10] sm:$0xff] }
 0x60d   :  { %11486 = vmatprep.subr.bf16.mxu0 %v13799_v53  ;;  %v8192_v53 = vld [vmem:[%s19820_s5 + $0xc50] sm:$0xff] }
 0x60e   :  { %v19101_v18 = vpop.f32.mrf.mxu0  ;;  %11314 = vmatmul.mubr.bf16.vlgmr.msra.gmra.mxu1 %v18136_v31  ;;  %v11069_v28 = vpop.f32.mrf.mxu1  ;;  %v13876_v21 = vcombine.low %v8192_v53, %v8196_v7 }
 0x60f   :  { %11437 = vmatmul.mubr.bf16.vlgmr.msra.gmra.mxu0 %v17856_v59  ;;  %v19112_v36 = vadd.f32 %v11069_v28, %v18708_v40  ;;  %11364 = vmatpush1.bf16.msra.mxu1 %v13924_v43  ;;  %v8216_v59 = vld [vmem:[%s19820_s5 + $0xd10] sm:$0xff]  ;;  %v8069_v43 = vld [vmem:[%s19820_s5 + $0x878] sm:$0xff] }
 0x610   :  { %11395 = vmatprep.mubr.bf16.mxu1 %v18478_v2  ;;  %11487 = vmatpush1.bf16.msra.mxu0 %v13798_v10  ;;  %v19115_v54 = vpop.f32.mrf.mxu0  ;;  %v19117_v30 = vpop.f32.mrf.mxu1  ;;  %v8220_v40 = vld [vmem:[%s19820_s5 + $0xd30] sm:$0xff]  ;;  %v13877_v10 = vcombine.high %v8192_v53, %v8196_v7  ;;  %v8057_v28 = vld [vmem:[%s19820_s5 + $0x818] sm:$0xff] }
 0x611   :  { %11518 = vmatprep.mubr.bf16.mxu0 %v18199_v50  ;;  %11365 = vmatprep.subr.bf16.mxu1 %v13917_v3  ;;  %v8093_v50 = vld [vmem:[%s19820_s5 + $0x938] sm:$0xff]  ;;  %v13901_v24 = vcombine.high %v8216_v59, %v8220_v40  ;;  %v13900_v5 = vcombine.low %v8216_v59, %v8220_v40  ;;  %v13751_v3 = vcombine.high %v8065_v33, %v8069_v43  ;;  %v8308_v59 = vld [vmem:[%s19820_s5 + $0xff0] sm:$0xff]  ;;  %vm11568_vm1 = vcmp.gt.f32.partialorder %v19112_v36, 0.0 }
 0x612   :  { %v11196_v63 = vpop.f32.mrf.mxu0  ;;  %11488 = vmatprep.subr.bf16.mxu0 %v13791_v51  ;;  %v11073_v37 = vpop.f32.mrf.mxu1  ;;  %v13775_v1 = vcombine.high %v8089_v32, %v8093_v50  ;;  %v13774_v61 = vcombine.low %v8089_v32, %v8093_v50  ;;  %v8061_v51 = vld [vmem:[%s19820_s5 + $0x838] sm:$0xff]  ;;  %v19182_v34 = vadd.f32 %v19117_v30, %v18713_v14  ;;  %v13868_v30 = vcombine.low %v8184_v4, %v8188_v9 }
 0x613   :  { %11366 = vmatpush1.bf16.msra.mxu1 %v13916_v26  ;;  %v13750_v26 = vcombine.low %v8065_v33, %v8069_v43  ;;  %v8177_v40 = vld [vmem:[%s19820_s5 + $0xbd8] sm:$0xff]  ;;  %v13742_v37 = vcombine.low %v8057_v28, %v8061_v51  ;;  %v8272_v43 = vld [vmem:[%s19820_s5 + $0xed0] sm:$0xff] }
 0x614   :  { %11489 = vmatpush1.bf16.msra.mxu0 %v13790_v6  ;;  %v11197_v29 = vpop.f32.mrf.mxu0  ;;  %v11074_v0 = vpop.f32.mrf.mxu1  ;;  %11367 = vmatprep.subr.bf16.mxu1 %v13909_v22  ;;  %v13869_v6 = vcombine.high %v8184_v4, %v8188_v9  ;;  %v13743_v22 = vcombine.high %v8057_v28, %v8061_v51  ;;  %v8181_v14 = vld [vmem:[%s19820_s5 + $0xbf8] sm:$0xff]  ;;  %v11577_v63 = vmin.f32 %v19182_v34, 0.0  ;;  %v8264_v51 = vld [vmem:[%s19820_s5 + $0xe90] sm:$0xff]  ;;  %vm11569_vm0 = vcmp.gt.f32.partialorder %v19182_v34, 0.0 }
 0x615   :  { %11490 = vmatprep.subr.bf16.mxu0 %v13783_v46  ;;  %v8304_v46 = vld [vmem:[%s19820_s5 + $0xfd0] sm:$0xff]  ;;  %v13863_v50 = vcombine.high %v8177_v40, %v8181_v14  ;;  %v8169_v0 = vld [vmem:[%s19820_s5 + $0xb98] sm:$0xff]  ;;  %v13862_v25 = vcombine.low %v8177_v40, %v8181_v14 }
 0x616   :  { %v13989_v32 = vcombine.high %v8304_v46, %v8308_v59  ;;  %v8300_v29 = vld [vmem:[%s19820_s5 + $0xfb0] sm:$0xff] }
 0x617   :  { %11368 = vmatpush1.bf16.msra.mxu1 %v13908_v23  ;;  %v8296_v23 = vld [vmem:[%s19820_s5 + $0xf90] sm:$0xff] }
 0x618   :  { %11491 = vmatpush1.bf16.msra.mxu0 %v13782_v16  ;;  %11369 = vmatprep.subr.bf16.mxu1 %v13901_v24  ;;  %v8173_v16 = vld [vmem:[%s19820_s5 + $0xbb8] sm:$0xff]  ;;  %v13988_v24 = vcombine.low %v8304_v46, %v8308_v59  ;;  %v13981_v39 = vcombine.high %v8296_v23, %v8300_v29 }
 0x619   :  { %11492 = vmatprep.subr.bf16.mxu0 %v13775_v1  ;;  %v11586_v1 = vmul.f32 1.442695, %v11577_v63  ;;  %v13855_v60 = vcombine.high %v8169_v0, %v8173_v16  ;;  %v13854_v41 = vcombine.low %v8169_v0, %v8173_v16  ;;  %v8260_v63 = vld [vmem:[%s19820_s5 + $0xe70] sm:$0xff] }
 0x61b   :  { %11370 = vmatpush1.bf16.msra.mxu1 %v13900_v5  ;;  %v8292_v5 = vld [vmem:[%s19820_s5 + $0xf70] sm:$0xff]  ;;  %14306 = vpow2.f32 %v11586_v1 }
 0x61c   :  { %11493 = vmatpush1.bf16.msra.mxu0 %v13774_v61  ;;  %11371 = vmatprep.subr.bf16.mxu1 %v13893_v48  ;;  %v8161_v61 = vld [vmem:[%s19820_s5 + $0xb58] sm:$0xff]  ;;  %v13973_v20 = vcombine.high %v8288_v57, %v8292_v5  ;;  %v8252_v1 = vld [vmem:[%s19820_s5 + $0xe30] sm:$0xff] }
 0x61d   :  { %11494 = vmatprep.subr.bf16.mxu0 %v13767_v8  ;;  %v8165_v48 = vld [vmem:[%s19820_s5 + $0xb78] sm:$0xff]  ;;  %v13980_v8 = vcombine.low %v8296_v23, %v8300_v29 }
 0x61e   :  { %v13847_v27 = vcombine.high %v8161_v61, %v8165_v48  ;;  %v13846_v53 = vcombine.low %v8161_v61, %v8165_v48 }
 0x61f   :  { %11372 = vmatpush1.bf16.msra.mxu1 %v13892_v11  ;;  %v8284_v11 = vld [vmem:[%s19820_s5 + $0xf30] sm:$0xff] }
 0x620   :  { %11495 = vmatpush1.bf16.msra.mxu0 %v13766_v42  ;;  %11373 = vmatprep.subr.bf16.mxu1 %v13885_v45  ;;  %v8153_v42 = vld [vmem:[%s19820_s5 + $0xb18] sm:$0xff]  ;;  %v13965_v7 = vcombine.high %v8280_v49, %v8284_v11 }
 0x621   :  { %11496 = vmatprep.subr.bf16.mxu0 %v13759_v55  ;;  %v8157_v45 = vld [vmem:[%s19820_s5 + $0xb38] sm:$0xff]  ;;  %v13972_v55 = vcombine.low %v8288_v57, %v8292_v5 }
 0x622   :  { %v13839_v33 = vcombine.high %v8153_v42, %v8157_v45  ;;  %v13838_v4 = vcombine.low %v8153_v42, %v8157_v45  ;;  %v19293_v45 = vld [vmem:[%s19821_s6] sm:$0xff] }
 0x623   :  { %11374 = vmatpush1.bf16.msra.mxu1 %v13884_v13  ;;  %v8276_v13 = vld [vmem:[%s19820_s5 + $0xef0] sm:$0xff] }
 0x624   :  { %11497 = vmatpush1.bf16.msra.mxu0 %v13758_v47  ;;  %11375 = vmatprep.subr.bf16.mxu1 %v13877_v10  ;;  %v8145_v47 = vld [vmem:[%s19820_s5 + $0xad8] sm:$0xff]  ;;  %v13957_v9 = vcombine.high %v8272_v43, %v8276_v13 }
 0x625   :  { %11498 = vmatprep.subr.bf16.mxu0 %v13751_v3  ;;  %v8149_v10 = vld [vmem:[%s19820_s5 + $0xaf8] sm:$0xff]  ;;  %v13964_v3 = vcombine.low %v8280_v49, %v8284_v11 }
 0x626   :  { %v13831_v28 = vcombine.high %v8145_v47, %v8149_v10  ;;  %v13830_v46 = vcombine.low %v8145_v47, %v8149_v10  ;;  %v14211_v47 = vld [vmem:[%s19822_s7 + $0x38] sm:$0xff]  }
 0x627   :  { %11376 = vmatpush1.bf16.msra.mxu1 %v13876_v21  ;;  %v8268_v21 = vld [vmem:[%s19820_s5 + $0xeb0] sm:$0xff] }
 0x628   :  { %11499 = vmatpush1.bf16.msra.mxu0 %v13750_v26  ;;  %11377 = vmatprep.subr.bf16.mxu1 %v13869_v6  ;;  %v8137_v26 = vld [vmem:[%s19820_s5 + $0xa98] sm:$0xff]  ;;  %v13949_v59 = vcombine.high %v8264_v51, %v8268_v21  ;;  %v14307_v40 = vpop.eup %14306 }
 0x629   :  { %11500 = vmatprep.subr.bf16.mxu0 %v13743_v22  ;;  %v8141_v6 = vld [vmem:[%s19820_s5 + $0xab8] sm:$0xff]  ;;  %v13956_v22 = vcombine.low %v8272_v43, %v8276_v13  ;;  %v13993_v23 = vadd.f32 -1.0, %v14307_v40 }
 0x62a   :  { %v13823_v14 = vcombine.high %v8137_v26, %v8141_v6  ;;  %v13822_v29 = vcombine.low %v8137_v26, %v8141_v6  ;;  %v7981_v43 = vld [vmem:[%s19820_s5 + $0x5b8] sm:$0xff] }
 0x62b   :  { %11378 = vmatpush1.bf16.msra.mxu1 %v13868_v30  ;;  %v8256_v30 = vld [vmem:[%s19820_s5 + $0xe50] sm:$0xff]  ;;  %v11609_v61 = vmul.f32 1.6732632, %v13993_v23  ;;  %v14215_v23 = vld [vmem:[%s19822_s7 + $0x28] sm:$0xff]  }
 0x62c   :  { %11501 = vmatpush1.bf16.msra.mxu0 %v13742_v37  ;;  %11379 = vmatprep.subr.bf16.mxu1 %v13989_v32  ;;  %v8129_v37 = vld [vmem:[%s19820_s5 + $0xa58] sm:$0xff]  ;;  %v13941_v0 = vcombine.high %v8256_v30, %v8260_v63 }
 0x62d   :  { %11502 = vmatprep.subr.bf16.mxu0 %v13863_v50  ;;  %v8133_v32 = vld [vmem:[%s19820_s5 + $0xa78] sm:$0xff]  ;;  %v13948_v50 = vcombine.low %v8264_v51, %v8268_v21  ;;  %v11617_v42 = vsel %vm11569_vm0, %v19182_v34, %v11609_v61 }
 0x62e   :  { %v13815_v16 = vcombine.high %v8129_v37, %v8133_v32  ;;  %v13814_v57 = vcombine.low %v8129_v37, %v8133_v32  ;;  %v7977_v34 = vld [vmem:[%s19820_s5 + $0x598] sm:$0xff] }
 0x62f   :  { %11380 = vmatpush2.bf16.msra.mxu1 %v13988_v24  ;;  %v8248_v24 = vld [vmem:[%s19820_s5 + $0xe10] sm:$0xff]  ;;  %v13663_v10 = vcombine.high %v7977_v34, %v7981_v43  ;;  %v13662_v6 = vcombine.low %v7977_v34, %v7981_v43  ;;  %v7933_v34 = vld [vmem:[%s19820_s5 + $0x438] sm:$0xff] }
 0x630   :  { %11503 = vmatpush2.bf16.msra.mxu0 %v13862_v25  ;;  %11381 = vmatprep.subr.bf16.mxu1 %v13981_v39  ;;  %v8121_v25 = vld [vmem:[%s19820_s5 + $0xa18] sm:$0xff]  ;;  %v13933_v5 = vcombine.high %v8248_v24, %v8252_v1 }
 0x631   :  { %11504 = vmatprep.subr.bf16.mxu0 %v13855_v60  ;;  %v8125_v39 = vld [vmem:[%s19820_s5 + $0xa38] sm:$0xff]  ;;  %v13940_v60 = vcombine.low %v8256_v30, %v8260_v63 }
 0x632   :  { %v13807_v48 = vcombine.high %v8121_v25, %v8125_v39  ;;  %v13806_v49 = vcombine.low %v8121_v25, %v8125_v39  ;;  %v14217_v25 = vld [vmem:[%s19822_s7 + $0x20] sm:$0xff]  }
 0x633   :  { %11382 = vmatpush2.bf16.msra.mxu1 %v13980_v8  ;;  %v7985_v8 = vld [vmem:[%s19820_s5 + $0x5d8] sm:$0xff] }
 0x634   :  { %11505 = vmatpush2.bf16.msra.mxu0 %v13854_v41  ;;  %11383 = vmatprep.subr.bf16.mxu1 %v13973_v20  ;;  %v7989_v41 = vld [vmem:[%s19820_s5 + $0x5f8] sm:$0xff]  ;;  %v11576_v20 = vmin.f32 %v19112_v36, 0.0 }
 0x635   :  { %11506 = vmatprep.subr.bf16.mxu0 %v13847_v27  ;;  %v13932_v27 = vcombine.low %v8248_v24, %v8252_v1  ;;  %v13671_v11 = vcombine.high %v7985_v8, %v7989_v41  ;;  %v13670_v13 = vcombine.low %v7985_v8, %v7989_v41  ;;  %v7957_v24 = vld [vmem:[%s19820_s5 + $0x4f8] sm:$0xff] }
 0x636   :  { %v14219_v8 = vld [vmem:[%s19822_s7 + $0x18] sm:$0xff]  }
 0x637   :  { %11384 = vmatpush2.bf16.msra.mxu1 %v13972_v55  ;;  %v8323_v55 = vrot.slane %v19293_v45, %v16135_v17  ;;  %v11625_v17 = vmul.f32 1.050701, %v11617_v42 }
 0x638   :  { %11507 = vmatpush2.bf16.msra.mxu0 %v13846_v53  ;;  %11385 = vmatprep.subr.bf16.mxu1 %v13965_v7  ;;  %v14210_v53 = vld [vmem:[%s19822_s7 + $0x78] sm:$0xff]   ;;  %v8327_v7 = vrot.slane %v19293_v45, %v15908_v35 }
 0x639   :  { %11508 = vmatprep.subr.bf16.mxu0 %v13839_v33  ;;  %v11584_v33 = vmul.f32 1.442695, %v11576_v20  ;;  %v11111_v35 = vadd.f32 %v18904_v58, %v8323_v55  ;;  %v14212_v58 = vld [vmem:[%s19822_s7 + $0x70] sm:$0xff]   ;;  %v11633_v26 = vpack.c.bf16 %v11625_v17, %v11625_v17  ;;  %v14223_v17 = vld [vmem:[%s19822_s7 + $0x8] sm:$0xff]  }
 0x63a   :  { %v14220_v20 = vld [vmem:[%s19822_s7 + $0x50] sm:$0xff]  }
 0x63b   :  { %11386 = vmatpush2.bf16.msra.mxu1 %v13964_v3  ;;  %v7969_v3 = vld [vmem:[%s19820_s5 + $0x558] sm:$0xff]  ;;  %14308 = vpow2.f32 %v11584_v33  ;;  %v14221_v55 = vld [vmem:[%s19822_s7 + $0x10] sm:$0xff]  }
 0x63c   :  { %11509 = vmatpush2.bf16.msra.mxu0 %v13838_v4  ;;  %11387 = vmatprep.subr.bf16.mxu1 %v13957_v9  ;;  %v7973_v4 = vld [vmem:[%s19820_s5 + $0x578] sm:$0xff]  ;;  %v11113_v9 = vadd.f32 %v18915_v62, %v8327_v7  ;;  %v14222_v7 = vld [vmem:[%s19822_s7 + $0x48] sm:$0xff]  }
 0x63d   :  { %11510 = vmatprep.subr.bf16.mxu0 %v13831_v28  ;;  %v13654_v37 = vcombine.low %v7969_v3, %v7973_v4  ;;  %v7929_v33 = vld [vmem:[%s19820_s5 + $0x418] sm:$0xff] }
 0x63f   :  { %11388 = vmatpush2.bf16.msra.mxu1 %v13956_v22 }
 0x640   :  { %11511 = vmatpush2.bf16.msra.mxu0 %v13830_v46  ;;  %11389 = vmatprep.subr.bf16.mxu1 %v13949_v59  ;;  %v14213_v46 = vld [vmem:[%s19822_s7 + $0x30] sm:$0xff]   ;;  %v13655_v59 = vcombine.high %v7969_v3, %v7973_v4  ;;  %v8053_v3 = vld [vmem:[%s19820_s5 + $0x7f8] sm:$0xff] }
 0x641   :  { %11512 = vmatprep.subr.bf16.mxu0 %v13823_v14  ;;  %v7965_v14 = vld [vmem:[%s19820_s5 + $0x538] sm:$0xff] }
 0x643   :  { %11390 = vmatpush2.bf16.msra.mxu1 %v13948_v50 }
 0x644   :  { %11513 = vmatpush2.bf16.msra.mxu0 %v13822_v29  ;;  %11391 = vmatprep.subr.bf16.mxu1 %v13941_v0  ;;  %v14216_v0 = vld [vmem:[%s19822_s7 + $0x60] sm:$0xff]  }
 0x645   :  { %11514 = vmatprep.subr.bf16.mxu0 %v13815_v16  ;;  %v7953_v16 = vld [vmem:[%s19820_s5 + $0x4d8] sm:$0xff] }
 0x646   :  { %v13639_v39 = vcombine.high %v7953_v16, %v7957_v24 }
 0x647   :  { %11392 = vmatpush2.bf16.msra.mxu1 %v13940_v60  ;;  %v14218_v60 = vld [vmem:[%s19822_s7 + $0x58] sm:$0xff]  }
 0x648   :  { %11515 = vmatpush2.bf16.msra.mxu0 %v13814_v57  ;;  %11393 = vmatprep.subr.bf16.mxu1 %v13933_v5  ;;  %v7945_v57 = vld [vmem:[%s19820_s5 + $0x498] sm:$0xff]  ;;  %v14309_v61 = vpop.eup %14308 }
 0x649   :  { %11516 = vmatprep.subr.bf16.mxu0 %v13807_v48  ;;  %v7949_v5 = vld [vmem:[%s19820_s5 + $0x4b8] sm:$0xff]  ;;  %v13638_v48 = vcombine.low %v7953_v16, %v7957_v24 }
 0x64a   :  { %v13631_v41 = vcombine.high %v7945_v57, %v7949_v5  ;;  %v13630_v42 = vcombine.low %v7945_v57, %v7949_v5  ;;  %v8009_v24 = vld [vmem:[%s19820_s5 + $0x698] sm:$0xff] }
 0x64b   :  { %11394 = vmatpush2.bf16.msra.mxu1 %v13932_v27  ;;  %v7937_v27 = vld [vmem:[%s19820_s5 + $0x458] sm:$0xff] }
 0x64c   :  { %11517 = vmatpush2.bf16.msra.mxu0 %v13806_v49  ;;  %11445 = vmatprep.subr.bf16.mxu1 %v13671_v11  ;;  %v7941_v49 = vld [vmem:[%s19820_s5 + $0x478] sm:$0xff]  ;;  %v13992_v11 = vadd.f32 -1.0, %v14309_v61 }
 0x64d   :  { %14068 = vmatprep.subr.bf16.mxu0 %v14210_v53  ;;  %v13623_v53 = vcombine.high %v7937_v27, %v7941_v49  ;;  %v8005_v57 = vld [vmem:[%s19820_s5 + $0x678] sm:$0xff] }
 0x64e   :  { %v11151_v28 = vpop.f32.mrf.mxu1  ;;  %v19319_v51 = vpop.f32.mrf.mxu0  ;;  %11396 = vmatmul.mubr.bf16.vlgmr.msra.gmra.mxu1 %v18480_v38  ;;  %v11608_v43 = vmul.f32 1.6732632, %v13992_v11 }
 0x64f   :  { %v19325_v21 = vadd.f32 %v11151_v28, %v11111_v35  ;;  %11519 = vmatmul.mubr.bf16.vlgmr.msra.gmra.mxu0 %v18211_v56  ;;  %11446 = vmatpush1.bf16.msra.mxu1 %v13670_v13  ;;  %v14214_v56 = vld [vmem:[%s19822_s7 + $0x68] sm:$0xff]   ;;  %v13622_v13 = vcombine.low %v7937_v27, %v7941_v49  ;;  %v14224_v35 = vld [vmem:[%s19822_s7 + $0x40] sm:$0xff]   ;;  %v8241_v27 = vld [vmem:[%s19820_s5 + $0xdd8] sm:$0xff] }
 0x650   :  { %11477 = vmatprep.mubr.bf16.mxu1 %v17996_v52  ;;  %14069 = vmatpush3.bf16.msra.mxu0 %v14211_v47  ;;  %v11153_v62 = vpop.f32.mrf.mxu1  ;;  %v19329_v22 = vpop.f32.mrf.mxu0  ;;  %v7961_v52 = vld [vmem:[%s19820_s5 + $0x518] sm:$0xff]  ;;  %v13615_v47 = vcombine.high %v7929_v33, %v7933_v34  ;;  %v11616_v4 = vsel %vm11568_vm1, %v19112_v36, %v11608_v43  ;;  %v14225_v28 = vld [vmem:[%s19822_s7] sm:$0xff]  }
 0x651   :  { %12191 = vmatprep.mubr.bf16.mxu0 %v11633_v26  ;;  %v19334_v40 = vadd.f32 %v11153_v62, %v11113_v9  ;;  %11447 = vmatprep.subr.bf16.mxu1 %v13663_v10  ;;  %v13647_v29 = vcombine.high %v7961_v52, %v7965_v14  ;;  %v13646_v1 = vcombine.low %v7961_v52, %v7965_v14  ;;  %v8049_v10 = vld [vmem:[%s19820_s5 + $0x7d8] sm:$0xff]  ;;  %v11624_v26 = vmul.f32 1.050701, %v11616_v4 }
 0x652   :  { %v11155_v30 = vpop.f32.mrf.mxu1  ;;  %v11278_v63 = vpop.f32.mrf.mxu0  ;;  %14070 = vmatprep.subr.bf16.mxu0 %v14212_v58  ;;  %v13614_v9 = vcombine.low %v7929_v33, %v7933_v34  ;;  %v13735_v58 = vcombine.high %v8049_v10, %v8053_v3  ;;  %v8045_v62 = vld [vmem:[%s19820_s5 + $0x7b8] sm:$0xff]  ;;  %v13734_v36 = vcombine.low %v8049_v10, %v8053_v3  ;;  %v11193_v34 = vadd.f32 %v19101_v18, %v19325_v21 }
 0x653   :  { %11448 = vmatpush1.bf16.msra.mxu1 %v13662_v6  ;;  %v8041_v6 = vld [vmem:[%s19820_s5 + $0x798] sm:$0xff] }
 0x654   :  { %14071 = vmatpush3.bf16.msra.mxu0 %v14213_v46  ;;  %v11156_v32 = vpop.f32.mrf.mxu1  ;;  %v11279_v50 = vpop.f32.mrf.mxu0  ;;  %11449 = vmatprep.subr.bf16.mxu1 %v13655_v59  ;;  %v13727_v46 = vcombine.high %v8041_v6, %v8045_v62  ;;  %v11632_v59 = vpack.c.bf16 %v11624_v26, %v11624_v26  ;;  %v8037_v52 = vld [vmem:[%s19820_s5 + $0x778] sm:$0xff]  ;;  %v13726_v14 = vcombine.low %v8041_v6, %v8045_v62  ;;  %v14244_v6 = vld [vmem:[%s19822_s7 + $0x170] sm:$0xff]  }
 0x655   :  { %14072 = vmatprep.subr.bf16.mxu0 %v14214_v56  ;;  %v8033_v56 = vld [vmem:[%s19820_s5 + $0x758] sm:$0xff] }
 0x656   :  { %v13719_v30 = vcombine.high %v8033_v56, %v8037_v52  ;;  %v8025_v63 = vld [vmem:[%s19820_s5 + $0x718] sm:$0xff]  ;;  %v13718_v32 = vcombine.low %v8033_v56, %v8037_v52 }
 0x657   :  { %11450 = vmatpush1.bf16.msra.mxu1 %v13654_v37  ;;  %v8029_v37 = vld [vmem:[%s19820_s5 + $0x738] sm:$0xff] }
 0x658   :  { %14073 = vmatpush3.bf16.msra.mxu0 %v14215_v23  ;;  %11451 = vmatprep.subr.bf16.mxu1 %v13647_v29  ;;  %v13711_v50 = vcombine.high %v8025_v63, %v8029_v37  ;;  %v8017_v23 = vld [vmem:[%s19820_s5 + $0x6d8] sm:$0xff] }
 0x659   :  { %14074 = vmatprep.subr.bf16.mxu0 %v14216_v0  ;;  %v8021_v29 = vld [vmem:[%s19820_s5 + $0x6f8] sm:$0xff]  ;;  %v13710_v0 = vcombine.low %v8025_v63, %v8029_v37  ;;  %v14247_v37 = vld [vmem:[%s19822_s7 + $0x128] sm:$0xff]  }
 0x65a   :  { %v13703_v16 = vcombine.high %v8017_v23, %v8021_v29  ;;  %v8245_v49 = vld [vmem:[%s19820_s5 + $0xdf8] sm:$0xff] }
 0x65b   :  { %11452 = vmatpush1.bf16.msra.mxu1 %v13646_v1  ;;  %v8013_v1 = vld [vmem:[%s19820_s5 + $0x6b8] sm:$0xff] }
 0x65c   :  { %14075 = vmatpush3.bf16.msra.mxu0 %v14217_v25  ;;  %11453 = vmatprep.subr.bf16.mxu1 %v13639_v39  ;;  %v13702_v25 = vcombine.low %v8017_v23, %v8021_v29  ;;  %v13695_v39 = vcombine.high %v8009_v24, %v8013_v1  ;;  %v13694_v5 = vcombine.low %v8009_v24, %v8013_v1  ;;  %v8225_v43 = vld [vmem:[%s19820_s5 + $0xd58] sm:$0xff]  ;;  %v14248_v29 = vld [vmem:[%s19822_s7 + $0x160] sm:$0xff]  }
 0x65d   :  { %14076 = vmatprep.subr.bf16.mxu0 %v14218_v60  ;;  %v8001_v60 = vld [vmem:[%s19820_s5 + $0x658] sm:$0xff] }
 0x65e   :  { %v13687_v61 = vcombine.high %v8001_v60, %v8005_v57  ;;  %v14242_v18 = vld [vmem:[%s19822_s7 + $0x178] sm:$0xff]  }
 0x65f   :  { %11454 = vmatpush1.bf16.msra.mxu1 %v13638_v48  ;;  %v7993_v48 = vld [vmem:[%s19820_s5 + $0x618] sm:$0xff] }
 0x660   :  { %14077 = vmatpush3.bf16.msra.mxu0 %v14219_v8  ;;  %11455 = vmatprep.subr.bf16.mxu1 %v13631_v41  ;;  %v7997_v8 = vld [vmem:[%s19820_s5 + $0x638] sm:$0xff]  ;;  %v13686_v41 = vcombine.low %v8001_v60, %v8005_v57  ;;  %v11195_v60 = vadd.f32 %v19115_v54, %v19334_v40  ;;  %v14252_v40 = vld [vmem:[%s19822_s7 + $0x150] sm:$0xff]  }
 0x661   :  { %14078 = vmatprep.subr.bf16.mxu0 %v14220_v20  ;;  %v13679_v20 = vcombine.high %v7993_v48, %v7997_v8  ;;  %v13678_v11 = vcombine.low %v7993_v48, %v7997_v8  ;;  %v14243_v4 = vld [vmem:[%s19822_s7 + $0x138] sm:$0xff]  }
 0x662   :  { %v8209_v56 = vld [vmem:[%s19820_s5 + $0xcd8] sm:$0xff] }
 0x663   :  { %11456 = vmatpush1.bf16.msra.mxu1 %v13630_v42  ;;  %v13927_v42 = vcombine.high %v8241_v27, %v8245_v49  ;;  %v8213_v52 = vld [vmem:[%s19820_s5 + $0xcf8] sm:$0xff] }
 0x664   :  { %14079 = vmatpush3.bf16.msra.mxu0 %v14221_v55  ;;  %11457 = vmatprep.subr.bf16.mxu1 %v13623_v53  ;;  %v8233_v55 = vld [vmem:[%s19820_s5 + $0xd98] sm:$0xff]  ;;  %v13895_v63 = vcombine.high %v8209_v56, %v8213_v52  ;;  %v13894_v23 = vcombine.low %v8209_v56, %v8213_v52 }
 0x665   :  { %14080 = vmatprep.subr.bf16.mxu0 %v14222_v7  ;;  %v8237_v53 = vld [vmem:[%s19820_s5 + $0xdb8] sm:$0xff]  ;;  %v13926_v7 = vcombine.low %v8241_v27, %v8245_v49 }
 0x666   :  { %v13919_v33 = vcombine.high %v8233_v55, %v8237_v53  ;;  %v13918_v10 = vcombine.low %v8233_v55, %v8237_v53  ;;  %v8193_v24 = vld [vmem:[%s19820_s5 + $0xc58] sm:$0xff]  ;;  %v14254_v55 = vld [vmem:[%s19822_s7 + $0x148] sm:$0xff]  }
 0x667   :  { %11458 = vmatpush1.bf16.msra.mxu1 %v13622_v13  ;;  %v8229_v13 = vld [vmem:[%s19820_s5 + $0xd78] sm:$0xff] }
 0x668   :  { %14081 = vmatpush3.bf16.msra.mxu0 %v14223_v17  ;;  %11459 = vmatprep.subr.bf16.mxu1 %v13615_v47  ;;  %v13911_v3 = vcombine.high %v8225_v43, %v8229_v13  ;;  %v13910_v26 = vcombine.low %v8225_v43, %v8229_v13  ;;  %v8197_v1 = vld [vmem:[%s19820_s5 + $0xc78] sm:$0xff]  ;;  %v14256_v13 = vld [vmem:[%s19822_s7 + $0x140] sm:$0xff]  }
 0x669   :  { %14082 = vmatprep.subr.bf16.mxu0 %v14224_v35  ;;  %v13879_v57 = vcombine.high %v8193_v24, %v8197_v1  ;;  %v8189_v48 = vld [vmem:[%s19820_s5 + $0xc38] sm:$0xff]  ;;  %v13878_v54 = vcombine.low %v8193_v24, %v8197_v1 }
 0x66a   :  { %v8305_v27 = vld [vmem:[%s19820_s5 + $0xfd8] sm:$0xff] }
 0x66b   :  { %11460 = vmatpush1.bf16.msra.mxu1 %v13614_v9  ;;  %v8217_v9 = vld [vmem:[%s19820_s5 + $0xd18] sm:$0xff] }
 0x66c   :  { %14083 = vmatpush3.bf16.msra.mxu0 %v14225_v28  ;;  %11461 = vmatprep.subr.bf16.mxu1 %v13735_v58  ;;  %v8309_v49 = vld [vmem:[%s19820_s5 + $0xff8] sm:$0xff] }
 0x66d   :  { %14112 = vmatprep.subr.bf16.mxu0 %v14242_v18  ;;  %v13991_v53 = vcombine.high %v8305_v27, %v8309_v49  ;;  %v8269_v56 = vld [vmem:[%s19820_s5 + $0xeb8] sm:$0xff] }
 0x66f   :  { %12192 = vmatmul.mubr.bf16.vlgmr.msra.gmra.mxu0 %v11632_v59  ;;  %11462 = vmatpush2.bf16.msra.mxu1 %v13734_v36 }
 0x670   :  { %11463 = vmatprep.subr.bf16.mxu1 %v13727_v46  ;;  %14113 = vmatpush3.bf16.msra.mxu0 %v14243_v4  ;;  %v14245_v46 = vld [vmem:[%s19822_s7 + $0x130] sm:$0xff]  }
 0x671   :  { %14114 = vmatprep.subr.bf16.mxu0 %v14244_v6  ;;  %v8273_v6 = vld [vmem:[%s19820_s5 + $0xed8] sm:$0xff] }
 0x673   :  { %11464 = vmatpush2.bf16.msra.mxu1 %v13726_v14 }
 0x674   :  { %11465 = vmatprep.subr.bf16.mxu1 %v13719_v30  ;;  %14115 = vmatpush3.bf16.msra.mxu0 %v14245_v46  ;;  %v14246_v30 = vld [vmem:[%s19822_s7 + $0x168] sm:$0xff]  }
 0x675   :  { %14116 = vmatprep.subr.bf16.mxu0 %v14246_v30 }
 0x677   :  { %11466 = vmatpush2.bf16.msra.mxu1 %v13718_v32  ;;  %v8201_v32 = vld [vmem:[%s19820_s5 + $0xc98] sm:$0xff] }
 0x678   :  { %11467 = vmatprep.subr.bf16.mxu1 %v13711_v50  ;;  %v8205_v50 = vld [vmem:[%s19820_s5 + $0xcb8] sm:$0xff]  ;;  %14117 = vmatpush3.bf16.msra.mxu0 %v14247_v37 }
 0x679   :  { %14118 = vmatprep.subr.bf16.mxu0 %v14248_v29  ;;  %v8261_v37 = vld [vmem:[%s19820_s5 + $0xe78] sm:$0xff] }
 0x67a   :  { %v8249_v29 = vld [vmem:[%s19820_s5 + $0xe18] sm:$0xff] }
 0x67b   :  { %11468 = vmatpush2.bf16.msra.mxu1 %v13710_v0  ;;  %v13887_v0 = vcombine.high %v8201_v32, %v8205_v50 }
 0x67c   :  { %11469 = vmatprep.subr.bf16.mxu1 %v13703_v16  ;;  %v14249_v16 = vld [vmem:[%s19822_s7 + $0x120] sm:$0xff]  }
 0x67d   :  { %14119 = vmatpush3.bf16.msra.mxu0 %v14249_v16 }
 0x67f   :  { %11470 = vmatpush2.bf16.msra.mxu1 %v13702_v25  ;;  %v13886_v25 = vcombine.low %v8201_v32, %v8205_v50 }
 0x680   :  { %11471 = vmatprep.subr.bf16.mxu1 %v13695_v39  ;;  %v14250_v39 = vld [vmem:[%s19822_s7 + $0x158] sm:$0xff]  }
 0x681   :  { %14120 = vmatprep.subr.bf16.mxu0 %v14250_v39 }
 0x683   :  { %11472 = vmatpush2.bf16.msra.mxu1 %v13694_v5  ;;  %v14251_v5 = vld [vmem:[%s19822_s7 + $0x118] sm:$0xff]  }
 0x684   :  { %11473 = vmatprep.subr.bf16.mxu1 %v13687_v61  ;;  %v8185_v61 = vld [vmem:[%s19820_s5 + $0xc18] sm:$0xff]  ;;  %14121 = vmatpush3.bf16.msra.mxu0 %v14251_v5  ;;  %v8331_v5 = vrot.slane %v19293_v45, %v16357_v19 }
 0x685   :  { %14122 = vmatprep.subr.bf16.mxu0 %v14252_v40  ;;  %v14228_v40 = vld [vmem:[%s19822_s7 + $0xf0] sm:$0xff]  }
 0x687   :  { %11474 = vmatpush2.bf16.msra.mxu1 %v13686_v41  ;;  %v13871_v41 = vcombine.high %v8185_v61, %v8189_v48 }
 0x688   :  { %11475 = vmatprep.subr.bf16.mxu1 %v13679_v20  ;;  %v14253_v20 = vld [vmem:[%s19822_s7 + $0x110] sm:$0xff]  }
 0x689   :  { %14123 = vmatpush3.bf16.msra.mxu0 %v14253_v20 }
 0x68a   :  { %14124 = vmatprep.subr.bf16.mxu0 %v14254_v55 }
 0x68b   :  { %11476 = vmatpush2.bf16.msra.mxu1 %v13678_v11 }
 0x68c   :  { %11527 = vmatprep.subr.bf16.mxu1 %v13927_v42  ;;  %v13870_v42 = vcombine.low %v8185_v61, %v8189_v48 }
 0x68e   :  { %v11233_v17 = vpop.f32.mrf.mxu1  ;;  %11478 = vmatmul.mubr.bf16.vlgmr.msra.gmra.mxu1 %v18136_v31 }
 0x68f   :  { %v19473_v47 = vadd.f32 %v11233_v17, %v11193_v34  ;;  %v19475_v35 = vpop.f32.mrf.mxu0  ;;  %11528 = vmatpush1.bf16.msra.mxu1 %v13926_v7  ;;  %11559 = vmatprep.mubr.bf16.mxu1 %v18478_v2  ;;  %v8221_v2 = vld [vmem:[%s19820_s5 + $0xd38] sm:$0xff]  ;;  %v14255_v7 = vld [vmem:[%s19822_s7 + $0x108] sm:$0xff]   ;;  %v14257_v17 = vld [vmem:[%s19822_s7 + $0x100] sm:$0xff]  }
 0x690   :  { %v11235_v21 = vpop.f32.mrf.mxu1  ;;  %11529 = vmatprep.subr.bf16.mxu1 %v13919_v33  ;;  %v13903_v36 = vcombine.high %v8217_v9, %v8221_v2  ;;  %v13902_v14 = vcombine.low %v8217_v9, %v8221_v2  ;;  %v8297_v33 = vld [vmem:[%s19820_s5 + $0xf98] sm:$0xff]  ;;  %14125 = vmatpush3.bf16.msra.mxu0 %v14255_v7 }
 0x691   :  { %v19484_v31 = vpop.f32.mrf.mxu0  ;;  %v19542_v8 = vadd.f32 %v11235_v21, %v11195_v60  ;;  %v8301_v34 = vld [vmem:[%s19820_s5 + $0xfb8] sm:$0xff]  ;;  %14126 = vmatprep.subr.bf16.mxu0 %v14256_v13  ;;  %v14232_v13 = vld [vmem:[%s19822_s7 + $0xe0] sm:$0xff]   ;;  %vm11570_vm3 = vcmp.gt.f32.partialorder %v19473_v47, 0.0 }
 0x692   :  { %v11237_v28 = vpop.f32.mrf.mxu1  ;;  %v13983_v18 = vcombine.high %v8297_v33, %v8301_v34  ;;  %v8289_v21 = vld [vmem:[%s19820_s5 + $0xf58] sm:$0xff]  ;;  %v13982_v4 = vcombine.low %v8297_v33, %v8301_v34  ;;  %v14231_v33 = vld [vmem:[%s19822_s7 + $0xa8] sm:$0xff]  }
 0x693   :  { %v11360_v58 = vpop.f32.mrf.mxu0  ;;  %11530 = vmatpush1.bf16.msra.mxu1 %v13918_v10  ;;  %v11579_v11 = vmin.f32 %v19542_v8, 0.0  ;;  %v13990_v10 = vcombine.low %v8305_v27, %v8309_v49  ;;  %v8281_v2 = vld [vmem:[%s19820_s5 + $0xf18] sm:$0xff]  ;;  %vm11571_vm2 = vcmp.gt.f32.partialorder %v19542_v8, 0.0 }
 0x694   :  { %v11238_v62 = vpop.f32.mrf.mxu1  ;;  %11531 = vmatprep.subr.bf16.mxu1 %v13911_v3  ;;  %v8293_v3 = vld [vmem:[%s19820_s5 + $0xf78] sm:$0xff]  ;;  %14127 = vmatpush3.bf16.msra.mxu0 %v14257_v17 }
 0x695   :  { %v11361_v59 = vpop.f32.mrf.mxu0  ;;  %v11590_v43 = vmul.f32 1.442695, %v11579_v11  ;;  %v13975_v9 = vcombine.high %v8289_v21, %v8293_v3  ;;  %v8285_v28 = vld [vmem:[%s19820_s5 + $0xf38] sm:$0xff]  ;;  %v13974_v58 = vcombine.low %v8289_v21, %v8293_v3  ;;  %v14229_v11 = vld [vmem:[%s19822_s7 + $0xb0] sm:$0xff]  }
 0x696   :  { %v8277_v62 = vld [vmem:[%s19820_s5 + $0xef8] sm:$0xff]  ;;  %v14236_v21 = vld [vmem:[%s19822_s7 + $0xd0] sm:$0xff]  }
 0x697   :  { %11532 = vmatpush1.bf16.msra.mxu1 %v13910_v26  ;;  %14310 = vpow2.f32 %v11590_v43  ;;  %v13967_v26 = vcombine.high %v8281_v2, %v8285_v28  ;;  %v13959_v46 = vcombine.high %v8273_v6, %v8277_v62  ;;  %v8265_v59 = vld [vmem:[%s19820_s5 + $0xe98] sm:$0xff] }
 0x698   :  { %11533 = vmatprep.subr.bf16.mxu1 %v13903_v36  ;;  %v13966_v36 = vcombine.low %v8281_v2, %v8285_v28  ;;  %v13951_v30 = vcombine.high %v8265_v59, %v8269_v56  ;;  %v13950_v50 = vcombine.low %v8265_v59, %v8269_v56  ;;  %v14239_v28 = vld [vmem:[%s19822_s7 + $0x88] sm:$0xff]  }
 0x69b   :  { %11534 = vmatpush1.bf16.msra.mxu1 %v13902_v14  ;;  %v13958_v14 = vcombine.low %v8273_v6, %v8277_v62  ;;  %v14241_v6 = vld [vmem:[%s19822_s7 + $0x80] sm:$0xff]  }
 0x69c   :  { %11535 = vmatprep.subr.bf16.mxu1 %v13895_v63  ;;  %v8257_v63 = vld [vmem:[%s19820_s5 + $0xe58] sm:$0xff] }
 0x69d   :  { %v13942_v24 = vcombine.low %v8257_v63, %v8261_v37 }
 0x69f   :  { %11536 = vmatpush1.bf16.msra.mxu1 %v13894_v23  ;;  %v13943_v23 = vcombine.high %v8257_v63, %v8261_v37 }
 0x6a0   :  { %11537 = vmatprep.subr.bf16.mxu1 %v13887_v0  ;;  %v8253_v0 = vld [vmem:[%s19820_s5 + $0xe38] sm:$0xff] }
 0x6a1   :  { %v13935_v1 = vcombine.high %v8249_v29, %v8253_v0  ;;  %v13934_v60 = vcombine.low %v8249_v29, %v8253_v0  ;;  %v14260_v0 = vld [vmem:[%s19822_s7 + $0x1f0] sm:$0xff]  }
 0x6a3   :  { %11538 = vmatpush1.bf16.msra.mxu1 %v13886_v25  ;;  %v11578_v25 = vmin.f32 %v19473_v47, 0.0 }
 0x6a4   :  { %11539 = vmatprep.subr.bf16.mxu1 %v13879_v57  ;;  %v14311_v52 = vpop.eup %14310  ;;  %v14226_v57 = vld [vmem:[%s19822_s7 + $0xf8] sm:$0xff]  }
 0x6a5   :  { %v13995_v32 = vadd.f32 -1.0, %v14311_v52  ;;  %v11588_v61 = vmul.f32 1.442695, %v11578_v25  ;;  %v14258_v52 = vld [vmem:[%s19822_s7 + $0x1f8] sm:$0xff]  }
 0x6a7   :  { %11540 = vmatpush1.bf16.msra.mxu1 %v13878_v54  ;;  %v11611_v16 = vmul.f32 1.6732632, %v13995_v32  ;;  %v8335_v54 = vrot.slane %v19293_v45, %v16308_v44  ;;  %14312 = vpow2.f32 %v11588_v61  ;;  %v14266_v61 = vld [vmem:[%s19822_s7 + $0x1d8] sm:$0xff]  }
 0x6a8   :  { %11541 = vmatprep.subr.bf16.mxu1 %v13871_v41  ;;  %v11275_v41 = vadd.f32 %v19319_v51, %v8331_v5  ;;  %v14230_v51 = vld [vmem:[%s19822_s7 + $0xe8] sm:$0xff]   ;;  %v14265_v5 = vld [vmem:[%s19822_s7 + $0x1a0] sm:$0xff]  }
 0x6a9   :  { %v11619_v39 = vsel %vm11571_vm2, %v19542_v8, %v11611_v16  ;;  %v14227_v8 = vld [vmem:[%s19822_s7 + $0xb8] sm:$0xff]   ;;  %v11277_v27 = vadd.f32 %v19329_v22, %v8335_v54 }
 0x6aa   :  { %v11627_v48 = vmul.f32 1.050701, %v11619_v39  ;;  %v14262_v39 = vld [vmem:[%s19822_s7 + $0x1e8] sm:$0xff]  }
 0x6ab   :  { %11542 = vmatpush1.bf16.msra.mxu1 %v13870_v42 }
 0x6ac   :  { %11543 = vmatprep.subr.bf16.mxu1 %v13991_v53  ;;  %v11635_v20 = vpack.c.bf16 %v11627_v48, %v11627_v48  ;;  %v14267_v48 = vld [vmem:[%s19822_s7 + $0x198] sm:$0xff]  }
 0x6af   :  { %11544 = vmatpush2.bf16.msra.mxu1 %v13990_v10  ;;  %v14234_v10 = vld [vmem:[%s19822_s7 + $0xd8] sm:$0xff]  }
 0x6b0   :  { %11545 = vmatprep.subr.bf16.mxu1 %v13983_v18 }
 0x6b3   :  { %11546 = vmatpush2.bf16.msra.mxu1 %v13982_v4  ;;  %v14237_v4 = vld [vmem:[%s19822_s7 + $0x90] sm:$0xff]  }
 0x6b4   :  { %11547 = vmatprep.subr.bf16.mxu1 %v13975_v9  ;;  %v14313_v18 = vpop.eup %14312  ;;  %v14238_v9 = vld [vmem:[%s19822_s7 + $0xc8] sm:$0xff]  }
 0x6b5   :  { %v13994_v3 = vadd.f32 -1.0, %v14313_v18 }
 0x6b7   :  { %11548 = vmatpush2.bf16.msra.mxu1 %v13974_v58  ;;  %v11610_v2 = vmul.f32 1.6732632, %v13994_v3  ;;  %v14240_v58 = vld [vmem:[%s19822_s7 + $0xc0] sm:$0xff]  }
 0x6b8   :  { %11549 = vmatprep.subr.bf16.mxu1 %v13967_v26 }
 0x6b9   :  { %v11618_v26 = vsel %vm11570_vm3, %v19473_v47, %v11610_v2  ;;  %v14259_v47 = vld [vmem:[%s19822_s7 + $0x1b8] sm:$0xff]  }
 0x6ba   :  { %v11626_v62 = vmul.f32 1.050701, %v11618_v26 }
 0x6bb   :  { %11550 = vmatpush2.bf16.msra.mxu1 %v13966_v36 }
 0x6bc   :  { %11551 = vmatprep.subr.bf16.mxu1 %v13959_v46  ;;  %v11634_v36 = vpack.c.bf16 %v11626_v62, %v11626_v62 }
 0x6bf   :  { %11552 = vmatpush2.bf16.msra.mxu1 %v13958_v14 }
 0x6c0   :  { %11553 = vmatprep.subr.bf16.mxu1 %v13951_v30 }
 0x6c3   :  { %11554 = vmatpush2.bf16.msra.mxu1 %v13950_v50 }
 0x6c4   :  { %11555 = vmatprep.subr.bf16.mxu1 %v13943_v23 }
 0x6c7   :  { %11556 = vmatpush2.bf16.msra.mxu1 %v13942_v24  ;;  %v14261_v24 = vld [vmem:[%s19822_s7 + $0x1b0] sm:$0xff]  }
 0x6c8   :  { %11557 = vmatprep.subr.bf16.mxu1 %v13935_v1 }
 0x6cb   :  { %11558 = vmatpush2.bf16.msra.mxu1 %v13934_v60  ;;  %v14263_v60 = vld [vmem:[%s19822_s7 + $0x1a8] sm:$0xff]  }
 0x6cc   :  { %14090 = vmatprep.subr.bf16.mxu1 %v14226_v57  ;;  %v14264_v57 = vld [vmem:[%s19822_s7 + $0x1e0] sm:$0xff]  }
 0x6ce   :  { %v11315_v19 = vpop.f32.mrf.mxu1  ;;  %11560 = vmatmul.mubr.bf16.vlgmr.msra.gmra.mxu1 %v18480_v38 }
 0x6cf   :  { %v11316_v44 = vadd.f32 %v11315_v19, %v11275_v41  ;;  %v19630_v49 = vpop.f32.mrf.mxu0  ;;  %14091 = vmatpush3.bf16.msra.mxu1 %v14227_v8  ;;  %12231 = vmatprep.mubr.bf16.mxu1 %v11635_v20  ;;  %v14269_v20 = vld [vmem:[%s19822_s7 + $0x190] sm:$0xff]  }
 0x6d0   :  { %v11317_v42 = vpop.f32.mrf.mxu1  ;;  %14092 = vmatprep.subr.bf16.mxu1 %v14228_v40  ;;  %v14268_v40 = vld [vmem:[%s19822_s7 + $0x1d0] sm:$0xff]  }
 0x6d1   :  { %v11318_v55 = vadd.f32 %v11317_v42, %v11277_v27  ;;  %v19638_v53 = vpop.f32.mrf.mxu0  ;;  %v11357_v38 = vadd.f32 %v19475_v35, %v11316_v44  ;;  %v14233_v35 = vld [vmem:[%s19822_s7 + $0xa0] sm:$0xff]   ;;  %v14270_v42 = vld [vmem:[%s19822_s7 + $0x1c8] sm:$0xff]  }
 0x6d2   :  { %v11319_v22 = vpop.f32.mrf.mxu1 }
 0x6d3   :  { %v11442_v7 = vpop.f32.mrf.mxu0  ;;  %14093 = vmatpush3.bf16.msra.mxu1 %v14229_v11  ;;  %v11359_v34 = vadd.f32 %v19484_v31, %v11318_v55  ;;  %v14235_v31 = vld [vmem:[%s19822_s7 + $0x98] sm:$0xff]  }
 0x6d4   :  { %v11320_v43 = vpop.f32.mrf.mxu1  ;;  %14094 = vmatprep.subr.bf16.mxu1 %v14230_v51  ;;  %v14271_v51 = vld [vmem:[%s19822_s7 + $0x188] sm:$0xff]   ;;  %v14272_v7 = vld [vmem:[%s19822_s7 + $0x1c0] sm:$0xff]  }
 0x6d5   :  { %v11443_v17 = vpop.f32.mrf.mxu0 }
 0x6d7   :  { %14095 = vmatpush3.bf16.msra.mxu1 %v14231_v33  ;;  %v14273_v33 = vld [vmem:[%s19822_s7 + $0x180] sm:$0xff]  }
 0x6d8   :  { %14096 = vmatprep.subr.bf16.mxu1 %v14232_v13 }
 0x6db   :  { %14097 = vmatpush3.bf16.msra.mxu1 %v14233_v35 }
 0x6dc   :  { %14098 = vmatprep.subr.bf16.mxu1 %v14234_v10 }
 0x6df   :  { %14099 = vmatpush3.bf16.msra.mxu1 %v14235_v31  ;;  %v8339_v31 = vrot.slane %v19293_v45, %v16636_v12 }
 0x6e0   :  { %14100 = vmatprep.subr.bf16.mxu1 %v14236_v21  ;;  %v8343_v21 = vrot.slane %v19293_v45, %v16639_v15 }
 0x6e1   :  { %v11439_v3 = vadd.f32 %v19630_v49, %v8339_v31  ;;  %v12327_v31 = vld [vmem:[%s19824_s9] sm:$0xff] }
 0x6e3   :  { %14101 = vmatpush3.bf16.msra.mxu1 %v14237_v4 }
 0x6e4   :  { %14102 = vmatprep.subr.bf16.mxu1 %v14238_v9  ;;  %v11441_v9 = vadd.f32 %v19638_v53, %v8343_v21  ;;  %v18_v21 = vstv %s19825_s10 }
 0x6e5   :  { %19 = vst [vmem:[#allocation3] sm:$0x1] %v18_v21 }
 0x6e7   :  { %14103 = vmatpush3.bf16.msra.mxu1 %v14239_v28 }
 0x6e8   :  { %14104 = vmatprep.subr.bf16.mxu1 %v14240_v58 }
 0x6eb   :  { %14105 = vmatpush3.bf16.msra.mxu1 %v14241_v6 }
 0x6ec   :  { %14134 = vmatprep.subr.bf16.mxu1 %v14258_v52 }
 0x6ee   :  { %12232 = vmatmul.mubr.bf16.vlgmr.msra.gmra.mxu1 %v11634_v36 }
 0x6ef   :  { %14135 = vmatpush3.bf16.msra.mxu1 %v14259_v47 }
 0x6f0   :  { %14136 = vmatprep.subr.bf16.mxu1 %v14260_v0 }
 0x6f3   :  { %14137 = vmatpush3.bf16.msra.mxu1 %v14261_v24 }
 0x6f4   :  { %14138 = vmatprep.subr.bf16.mxu1 %v14262_v39 }
 0x6f7   :  { %14139 = vmatpush3.bf16.msra.mxu1 %v14263_v60 }
 0x6f8   :  { %14140 = vmatprep.subr.bf16.mxu1 %v14264_v57 }
 0x6fb   :  { %14141 = vmatpush3.bf16.msra.mxu1 %v14265_v5 }
 0x6fc   :  { %14142 = vmatprep.subr.bf16.mxu1 %v14266_v61 }
 0x6ff   :  { %14143 = vmatpush3.bf16.msra.mxu1 %v14267_v48 }
 0x700   :  { %14144 = vmatprep.subr.bf16.mxu1 %v14268_v40  ;;  %v14332_v40 = vmov 0.0  }
 0x701   :  { %14173 = vmatprep.subr.mxu0 %v14332_v40 }
 0x703   :  { %14145 = vmatpush3.bf16.msra.mxu1 %v14269_v20 }
 0x704   :  { %14146 = vmatprep.subr.bf16.mxu1 %v14270_v42 }
 0x707   :  { %14147 = vmatpush3.bf16.msra.mxu1 %v14271_v51  ;;  %v12340_v51 = vld [vmem:[%s19824_s9 + $0x68] sm:$0xff] }
 0x708   :  { %14148 = vmatprep.subr.bf16.mxu1 %v14272_v7  ;;  %v12336_v7 = vld [vmem:[%s19824_s9 + $0x48] sm:$0xff] }
 0x70b   :  { %14149 = vmatpush3.bf16.msra.mxu1 %v14273_v33  ;;  %v12335_v33 = vld [vmem:[%s19824_s9 + $0x40] sm:$0xff] }
 0x70e   :  { %v11397_v46 = vpop.f32.mrf.mxu1 }
 0x70f   :  { %v11398_v59 = vadd.f32 %v11397_v46, %v11357_v38  ;;  %v19677_v56 = vpop.f32.mrf.mxu0 }
 0x710   :  { %v11399_v14 = vpop.f32.mrf.mxu1 }
 0x711   :  { %v11580_v30 = vmin.f32 %v11398_v59, 0.0  ;;  %v11400_v63 = vadd.f32 %v11399_v14, %v11359_v34  ;;  %v19685_v37 = vpop.f32.mrf.mxu0  ;;  %vm11572_vm4 = vcmp.gt.f32.partialorder %v11398_v59, 0.0 }
 0x712   :  { %v11401_v32 = vpop.f32.mrf.mxu1 }
 0x713   :  { %v11592_v50 = vmul.f32 1.442695, %v11580_v30  ;;  %v11581_v23 = vmin.f32 %v11400_v63, 0.0  ;;  %v11524_v29 = vpop.f32.mrf.mxu0  ;;  %vm11573_vm5 = vcmp.gt.f32.partialorder %v11400_v63, 0.0 }
 0x714   :  { %v11402_v16 = vpop.f32.mrf.mxu1 }
 0x715   :  { %14314 = vpow2.f32 %v11592_v50  ;;  %v11594_v1 = vmul.f32 1.442695, %v11581_v23  ;;  %v11525_v25 = vpop.f32.mrf.mxu0 }
 0x716   :  { %v14000_v25 = vld [vmem:[%s19823_s8] ss:$0 sm:$0xff] }
 0x717   :  { %14316 = vpow2.f32 %v11594_v1 }
 0x722   :  { %v14315_v54 = vpop.eup %14314 }
 0x723   :  { %v13996_v8 = vadd.f32 -1.0, %v14315_v54 }
 0x724   :  { %v14317_v41 = vpop.eup %14316 }
 0x725   :  { %v11612_v19 = vmul.f32 1.6732632, %v13996_v8  ;;  %v13997_v27 = vadd.f32 -1.0, %v14317_v41  ;;  %v12342_v41 = vld [vmem:[%s19824_s9 + $0x78] sm:$0xff] }
 0x727   :  { %v11620_v44 = vsel %vm11572_vm4, %v11398_v59, %v11612_v19  ;;  %v11613_v11 = vmul.f32 1.6732632, %v13997_v27 }
 0x728   :  { %v11628_v55 = vmul.f32 1.050701, %v11620_v44  ;;  %v12341_v44 = vld [vmem:[%s19824_s9 + $0x70] sm:$0xff] }
 0x729   :  { %v11621_v38 = vsel %vm11573_vm5, %v11400_v63, %v11613_v11 }
 0x72a   :  { %v11629_v22 = vmul.f32 1.050701, %v11621_v38  ;;  %v11636_v43 = vpack.c.bf16 %v11628_v55, %v11628_v55  ;;  %v12339_v55 = vld [vmem:[%s19824_s9 + $0x60] sm:$0xff]  ;;  %v12338_v38 = vld [vmem:[%s19824_s9 + $0x58] sm:$0xff] }
 0x72c   :  { %v11637_v34 = vpack.c.bf16 %v11629_v22, %v11629_v22  ;;  %v12337_v22 = vld [vmem:[%s19824_s9 + $0x50] sm:$0xff] }
 0x72e   :  { %12271 = vmatprep.mubr.bf16.mxu0 %v11637_v34  ;;  %v12334_v34 = vld [vmem:[%s19824_s9 + $0x38] sm:$0xff] }
 0x72f   :  { %v14084_v13 = vpop.f32.mrf.mxu0  ;;  %12272 = vmatmul.mubr.bf16.vlgmr.msra.gmra.mxu0 %v11636_v43  ;;  %v12333_v43 = vld [vmem:[%s19824_s9 + $0x30] sm:$0xff] }
 0x730   :  { %14174 = vmatpush3.msra.mxu0 %v12342_v41  ;;  %14205 = vmatprep.mubr.msk.f32.mxu0 %vm14333_vm8, %v14332_v40 }
 0x731   :  { %v14085_v17 = vpop.f32.mrf.mxu0  ;;  %14175 = vmatprep.subr.mxu0 %v14332_v40 }
 0x732   :  { %v14086_v35 = vadd.f32 %v14085_v17, %v14084_v13  ;;  %14176 = vmatpush3.msra.mxu0 %v12341_v44  ;;  %v12332_v13 = vld [vmem:[%s19824_s9 + $0x28] sm:$0xff]  ;;  %v12331_v17 = vld [vmem:[%s19824_s9 + $0x20] sm:$0xff] }
 0x733   :  { %v14087_v10 = vpop.f32.mrf.mxu0  ;;  %14177 = vmatprep.subr.mxu0 %v14332_v40 }
 0x734   :  { %v12194_v57 = vadd.f32 %v14086_v35, %v14000_v25  ;;  %14178 = vmatpush3.msra.mxu0 %v12340_v51  ;;  %v12330_v35 = vld [vmem:[%s19824_s9 + $0x18] sm:$0xff]  ;;  %v12329_v10 = vld [vmem:[%s19824_s9 + $0x10] sm:$0xff] }
 0x735   :  { %v14088_v18 = vpop.f32.mrf.mxu0  ;;  %14179 = vmatprep.subr.mxu0 %v14332_v40 }
 0x736   :  { %14180 = vmatpush3.msra.mxu0 %v12339_v55  ;;  %v12328_v18 = vld [vmem:[%s19824_s9 + $0x8] sm:$0xff] }
 0x737   :  { %14181 = vmatprep.subr.mxu0 %v14332_v40 }
 0x738   :  { %14182 = vmatpush3.msra.mxu0 %v12338_v38 }
 0x739   :  { %14183 = vmatprep.subr.mxu0 %v14332_v40 }
 0x73a   :  { %14184 = vmatpush3.msra.mxu0 %v12337_v22 }
 0x73b   :  { %14185 = vmatprep.subr.mxu0 %v14332_v40 }
 0x73c   :  { %14186 = vmatpush3.msra.mxu0 %v12336_v7 }
 0x73d   :  { %14187 = vmatprep.subr.mxu0 %v14332_v40 }
 0x73e   :  { %14188 = vmatpush3.msra.mxu0 %v12335_v33 }
 0x73f   :  { %14189 = vmatprep.subr.mxu0 %v14332_v40 }
 0x740   :  { %14190 = vmatpush3.msra.mxu0 %v12334_v34 }
 0x741   :  { %14191 = vmatprep.subr.mxu0 %v14332_v40 }
 0x742   :  { %14192 = vmatpush3.msra.mxu0 %v12333_v43 }
 0x743   :  { %14193 = vmatprep.subr.mxu0 %v14332_v40 }
 0x744   :  { %14194 = vmatpush3.msra.mxu0 %v12332_v13 }
 0x745   :  { %14195 = vmatprep.subr.mxu0 %v14332_v40 }
 0x746   :  { %14196 = vmatpush3.msra.mxu0 %v12331_v17 }
 0x747   :  { %14197 = vmatprep.subr.mxu0 %v14332_v40 }
 0x748   :  { %14198 = vmatpush3.msra.mxu0 %v12330_v35 }
 0x749   :  { %14199 = vmatprep.subr.mxu0 %v14332_v40 }
 0x74a   :  { %14200 = vmatpush3.msra.mxu0 %v12329_v10 }
 0x74b   :  { %14201 = vmatprep.subr.mxu0 %v14332_v40 }
 0x74c   :  { %14202 = vmatpush3.msra.mxu0 %v12328_v18 }
 0x74d   :  { %14203 = vmatprep.subr.mxu0 %v14332_v40 }
 0x74e   :  { %v11479_v4 = vpop.f32.mrf.mxu1  ;;  %14204 = vmatpush3.msra.mxu0 %v12327_v31 }
 0x74f   :  { %v11480_v2 = vadd.f32 %v11479_v4, %v11439_v3 }
 0x750   :  { %v11481_v28 = vpop.f32.mrf.mxu1 }
 0x751   :  { %v11482_v58 = vadd.f32 %v11481_v28, %v11441_v9  ;;  %v11521_v26 = vadd.f32 %v19677_v56, %v11480_v2 }
 0x752   :  { %v11483_v6 = vpop.f32.mrf.mxu1 }
 0x753   :  { %v11523_v62 = vadd.f32 %v19685_v37, %v11482_v58 }
 0x754   :  { %v11484_v36 = vpop.f32.mrf.mxu1 }
 0x78e   :  { %v11561_v46 = vpop.f32.mrf.mxu1 }
 0x78f   :  { %v11562_v59 = vadd.f32 %v11561_v46, %v11521_v26 }
 0x790   :  { %v11563_v12 = vpop.f32.mrf.mxu1 }
 0x791   :  { %v11582_v52 = vmin.f32 %v11562_v59, 0.0  ;;  %v11564_v14 = vadd.f32 %v11563_v12, %v11523_v62  ;;  %vm11574_vm6 = vcmp.gt.f32.partialorder %v11562_v59, 0.0 }
 0x792   :  { %v11565_v15 = vpop.f32.mrf.mxu1 }
 0x793   :  { %v11596_v45 = vmul.f32 1.442695, %v11582_v52  ;;  %v11583_v49 = vmin.f32 %v11564_v14, 0.0  ;;  %vm11575_vm7 = vcmp.gt.f32.partialorder %v11564_v14, 0.0  ;;  %v14066_v52 = vld [vmem:[#allocation3] ss:$0 sm:$0xff] }
 0x794   :  { %v11566_v47 = vpop.f32.mrf.mxu1 }
 0x795   :  { %14318 = vpow2.f32 %v11596_v45  ;;  %v11598_v53 = vmul.f32 1.442695, %v11583_v49 }
 0x797   :  { %14320 = vpow2.f32 %v11598_v53 }
 0x7a2   :  { %v14319_v30 = vpop.eup %14318 }
 0x7a3   :  { %v13998_v63 = vadd.f32 -1.0, %v14319_v30 }
 0x7a4   :  { %v14321_v32 = vpop.eup %14320 }
 0x7a5   :  { %v11614_v56 = vmul.f32 1.6732632, %v13998_v63  ;;  %v13999_v50 = vadd.f32 -1.0, %v14321_v32 }
 0x7a7   :  { %v11622_v37 = vsel %vm11574_vm6, %v11562_v59, %v11614_v56  ;;  %v11615_v23 = vmul.f32 1.6732632, %v13999_v50 }
 0x7a8   :  { %v11630_v29 = vmul.f32 1.050701, %v11622_v37 }
 0x7a9   :  { %v11623_v0 = vsel %vm11575_vm7, %v11564_v14, %v11615_v23 }
 0x7aa   :  { %v11631_v16 = vmul.f32 1.050701, %v11623_v0  ;;  %v11638_v1 = vpack.c.bf16 %v11630_v29, %v11630_v29 }
 0x7ac   :  { %v11639_v24 = vpack.c.bf16 %v11631_v16, %v11631_v16 }
 0x7ae   :  { %v14106_v39 = vpop.f32.mrf.mxu1  ;;  %12311 = vmatprep.mubr.bf16.mxu1 %v11639_v24 }
 0x7af   :  { %12312 = vmatmul.mubr.bf16.vlgmr.msra.gmra.mxu1 %v11638_v1 }
 0x7b0   :  { %v14107_v60 = vpop.f32.mrf.mxu1 }
 0x7b1   :  { %v14108_v5 = vadd.f32 %v14107_v60, %v14106_v39 }
 0x7b2   :  { %v14109_v61 = vpop.f32.mrf.mxu1 }
 0x7b3   :  { %v12234_v48 = vadd.f32 %v14108_v5, %v12194_v57 }
 0x7b4   :  { %v14110_v54 = vpop.f32.mrf.mxu1 }
 0x7ef   :  { %v14128_v8 = vpop.f32.mrf.mxu0 }
 0x7f1   :  { %v14129_v20 = vpop.f32.mrf.mxu0 }
 0x7f2   :  { %v14130_v19 = vadd.f32 %v14129_v20, %v14128_v8 }
 0x7f3   :  { %v14131_v27 = vpop.f32.mrf.mxu0 }
 0x7f4   :  { %v12274_v11 = vadd.f32 %v14130_v19, %v12234_v48 }
 0x7f5   :  { %v14132_v42 = vpop.f32.mrf.mxu0 }
 0x86f   :  { %v14150_v3 = vpop.f32.mrf.mxu1 }
 0x871   :  { %v14151_v4 = vpop.f32.mrf.mxu1 }
 0x872   :  { %v14152_v9 = vadd.f32 %v14151_v4, %v14150_v3 }
 0x873   :  { %v14153_v2 = vpop.f32.mrf.mxu1 }
 0x874   :  { %v12314_v28 = vadd.f32 %v14152_v9, %v12274_v11 }
 0x875   :  { %v14154_v58 = vpop.f32.mrf.mxu1 }
 0x876   :  { %v12320_v26 = vmin.f32 %v12314_v28, 0.0  ;;  %vm12319_vm9 = vcmp.gt.f32.partialorder %v12314_v28, 0.0 }
 0x878   :  { %v12321_v6 = vmul.f32 1.442695, %v12320_v26 }
 0x87a   :  { %14322 = vpow2.f32 %v12321_v6 }
 0x887   :  { %v14323_v62 = vpop.eup %14322 }
 0x888   :  { %v14065_v36 = vadd.f32 -1.0, %v14323_v62 }
 0x88a   :  { %v12324_v46 = vmul.f32 1.6732632, %v14065_v36 }
 0x88c   :  { %v12325_v59 = vsel %vm12319_vm9, %v12314_v28, %v12324_v46 }
 0x88d   :  { %v12326_v12 = vmul.f32 1.050701, %v12325_v59 }
 0x88f   :  { %14206 = vmatmul.mubr.f32.vlgmr.msra.gmra.mxu0 %v12326_v12 }
 0x94f   :  { %v12416_v14 = vpop.f32.mrf.mxu0 }
 0x950   :  { %v12417_v15 = vadd.f32 %v14066_v52, %v12416_v14 }
 0x951   :  { %v14207_v45 = vpop.f32.mrf.mxu0 }
 0x952   :  { %v12420_v49 = vsub.f32 0.0, %v12417_v15 }
 0x954   :  { %v12421_v47 = vmul.f32 1.442695, %v12420_v49 }
 0x956   :  { %14324 = vpow2.f32 %v12421_v47 }
 0x963   :  { %v14325_v53 = vpop.eup %14324 }
 0x964   :  { %v12423_v30 = vadd.f32 1.0, %v14325_v53 }
 0x966   :  { %14326 = vrcp.f32 %v12423_v30 }
 0x973   :  { %v14327_v63 = vpop.eup %14326 }
 0x974   :  { %12427 = vst.msk [vmem:[%s19826_s11] sm:$0xff] %vm12426_vm10, %v14327_v63  ;;  %vm12428_vm11 = vcmp.ge.f32.partialorder %v14327_v63, 0.5 }
 0x975   :  { %v14067_v32 = vsel %vm12428_vm11, 1.0, %v14332_v40 }
 0x976   :  { %12431 = vst.msk [vmem:[%s19827_s12] sm:$0xff] %vm12426_vm10, %v14067_v32 }

</bundles_post_ra>
